<compile_context>
chip_gen: v7x
topology: tpu7x:2x2x1
jax: 0.10.0
libtpu: 0.0.40
codegen_flags: <defaults>
</compile_context>

<pallas_src>
import functools

import jax
import jax.numpy as jnp
from jax.experimental import pallas as pl
from jax.experimental.pallas import tpu as pltpu

NEG_SLOPE = 0.01            # nn.LeakyReLU() default negative_slope
LANE = 128
SUBLANE = 16                # bf16-safe row granularity (also fine for f32)
MXU_DTYPE = jnp.bfloat16    # MXU/DMA format; all elementwise math stays f32


def _ceil_to(x, m):
    return (x + m - 1) // m * m


def _pick_tm(M, max_tm=512):
    """Row-tile size.

    Small problems (M <= max_tm) use one grid step (per-step overhead
    dominates at these sizes).  Larger problems are split into near-equal
    tiles (multiples of 16 rows) so row padding stays small and >= 2 grid
    steps exist for megacore sharding.
    """
    Mp = _ceil_to(M, SUBLANE)
    if Mp <= max_tm:
        return Mp
    n_steps = pl.cdiv(Mp, max_tm)
    return _ceil_to(pl.cdiv(M, n_steps), SUBLANE)


# ----------------------------------------------------------------------------
# Pallas kernels
# ----------------------------------------------------------------------------
def _conv_pool_kernel(x_ref, w_ref, b_ref, o_ref):
    """Fused Conv3d-as-matmul + bias + LeakyReLU + MaxPool3d((3,1,1)).

    x_ref: (3, tm, K) bf16 — the three depth-phase patch tiles of one pool
    group.  The max over the three conv outputs is taken in-register, so the
    un-pooled activation never leaves VMEM.
    """
    w = w_ref[...]
    b = b_ref[...]

    def phase(p):
        acc = jnp.dot(x_ref[p], w, preferred_element_type=jnp.float32) + b
        return jnp.where(acc >= 0.0, acc, NEG_SLOPE * acc)

    out = jnp.maximum(jnp.maximum(phase(0), phase(1)), phase(2))
    o_ref[...] = out.astype(o_ref.dtype)


def _conv_kernel(x_ref, w_ref, b_ref, o_ref):
    """Conv3d-as-matmul + bias + LeakyReLU (no pooling; stage 4)."""
    acc = jnp.dot(x_ref[...], w_ref[...], preferred_element_type=jnp.float32)
    acc = acc + b_ref[...]
    o_ref[...] = jnp.where(acc >= 0.0, acc, NEG_SLOPE * acc).astype(o_ref.dtype)


def _asc_kernel(x_ref, o_ref):
    """Sum-to-one constraint along the last (lane) axis, in float32."""
    x = x_ref[...]
    s = jnp.sum(x, axis=-1, keepdims=True)
    s = jnp.where(s == 0.0, 1.0, s)      # padded (all-zero) rows: avoid 0/0
    o_ref[...] = x / s


# ----------------------------------------------------------------------------
# pallas_call wrappers
# ----------------------------------------------------------------------------
def _conv_matmul(x, weight2d, bias, *, pooled, out_dtype):
    """Run the (optionally pool-fused) conv matmul on the MXU.

    x: (3, M, K) when pooled else (M, K); weight2d: (K, Cout); bias: (Cout,).
    Returns (M, Cout) in `out_dtype`.
    """
    if pooled:
        _, M, K = x.shape
    else:
        M, K = x.shape
    Cout = weight2d.shape[1]
    Kp = _ceil_to(K, LANE)
    Cp = _ceil_to(Cout, LANE)
    tm = _pick_tm(M)
    Mp = _ceil_to(M, tm)

    wp = jnp.zeros((Kp, Cp), MXU_DTYPE).at[:K, :Cout].set(
        weight2d.astype(MXU_DTYPE))
    bp = jnp.zeros((1, Cp), jnp.float32).at[0, :Cout].set(bias)

    if pooled:
        xp = jnp.zeros((3, Mp, Kp), MXU_DTYPE).at[:, :M, :K].set(
            x.astype(MXU_DTYPE))
        in_specs = [
            pl.BlockSpec((3, tm, Kp), lambda i: (0, i, 0)),
            pl.BlockSpec((Kp, Cp), lambda i: (0, 0)),
            pl.BlockSpec((1, Cp), lambda i: (0, 0)),
        ]
        kernel = _conv_pool_kernel
    else:
        xp = jnp.zeros((Mp, Kp), MXU_DTYPE).at[:M, :K].set(
            x.astype(MXU_DTYPE))
        in_specs = [
            pl.BlockSpec((tm, Kp), lambda i: (i, 0)),
            pl.BlockSpec((Kp, Cp), lambda i: (0, 0)),
            pl.BlockSpec((1, Cp), lambda i: (0, 0)),
        ]
        kernel = _conv_kernel

    out = pl.pallas_call(
        kernel,
        out_shape=jax.ShapeDtypeStruct((Mp, Cp), out_dtype),
        grid_spec=pltpu.PrefetchScalarGridSpec(
            num_scalar_prefetch=0,
            grid=(Mp // tm,),
            in_specs=in_specs,
            out_specs=pl.BlockSpec((tm, Cp), lambda i: (i, 0)),
        ),
        compiler_params=pltpu.CompilerParams(
            dimension_semantics=("parallel",)),
    )(xp, wp, bp)
    return out[:M, :Cout]


def _im2col3d(x, kd, kh, kw):
    """x:(N,D,H,W,C) -> (N, Do, Ho, Wo, C*kd*kh*kw).

    Patch flattening order is (C_in, kd, kh, kw) to match PyTorch's
    Conv3d weight.reshape(C_out, -1) layout.  This runs as an XLA fusion
    between pallas_calls.
    """
    N, D, H, W, C = x.shape
    Do, Ho, Wo = D - kd + 1, H - kh + 1, W - kw + 1
    cols = []
    for dz in range(kd):
        for dy in range(kh):
            for dx in range(kw):
                cols.append(x[:, dz:dz + Do, dy:dy + Ho, dx:dx + Wo, :])
    p = jnp.stack(cols, axis=-1)                      # (N,Do,Ho,Wo,C,taps)
    return p.reshape(N, Do, Ho, Wo, C * kd * kh * kw), (Do, Ho, Wo)


def conv3d_leaky_pool(x, weight, bias, *, pool, out_dtype=jnp.float32):
    """Valid Conv3d + LeakyReLU (+ MaxPool3d((3,1,1)) fused when pool=True).

    x: (N, D, H, W, Cin); weight in PyTorch layout (Cout, Cin, kd, kh, kw);
    bias: (Cout,).  Returns channels-last (N, D', H', W', Cout) in out_dtype.
    """
    Cout, Cin, kd, kh, kw = weight.shape
    N = x.shape[0]
    p5, (Do, Ho, Wo) = _im2col3d(x, kd, kh, kw)
    K = Cin * kd * kh * kw
    w2 = weight.reshape(Cout, K).T                    # (K, Cout)

    if pool:
        Dp = Do // 3
        # Group conv-output depths into pool triples; phase axis leading so
        # the kernel sees one (3, tm, K) tile per pooled output row block.
        p5 = p5[:, :3 * Dp].reshape(N, Dp, 3, Ho, Wo, K)
        phases = jnp.transpose(p5, (2, 0, 1, 3, 4, 5)).reshape(3, -1, K)
        y = _conv_matmul(phases, w2, bias, pooled=True, out_dtype=out_dtype)
        return y.reshape(N, Dp, Ho, Wo, Cout)
    else:
        patches = p5.reshape(-1, K)
        y = _conv_matmul(patches, w2, bias, pooled=False, out_dtype=out_dtype)
        return y.reshape(N, Do, Ho, Wo, Cout)


def asc(x):
    """ASC sum-to-one constraint on rows of (R, E)."""
    R, E = x.shape
    Rp = _ceil_to(R, 8)
    Ep = _ceil_to(E, LANE)
    xp = jnp.zeros((Rp, Ep), jnp.float32).at[:R, :E].set(x)
    out = pl.pallas_call(
        _asc_kernel,
        out_shape=jax.ShapeDtypeStruct((Rp, Ep), jnp.float32),
    )(xp)
    return out[:R, :E]


# ----------------------------------------------------------------------------
# EncoderNet forward
# ----------------------------------------------------------------------------
def init_params(key, end_members=4):
    """Deterministic synthetic parameters with the PyTorch Conv3d shapes."""
    E = end_members
    specs = [
        (E * 4, 1,     7, 3, 3),   # encoder_stage1 conv
        (E * 4, E * 4, 7, 3, 3),   # encoder_stage2 conv
        (E * 2, E * 4, 7, 1, 1),   # encoder_stage3 conv
        (E,     E * 2, 5, 1, 1),   # encoder_stage4 conv
    ]
    params = []
    for (co, ci, kd, kh, kw) in specs:
        key, k_w, k_b = jax.random.split(key, 3)
        fan_in = ci * kd * kh * kw
        bound = 1.0 / (fan_in ** 0.5)
        w = jax.random.uniform(k_w, (co, ci, kd, kh, kw), jnp.float32,
                               -bound, bound)
        b = jax.random.uniform(k_b, (co,), jnp.float32, -bound, bound)
        params.append((w, b))
    return params


def encoder_net_forward(x_ncdhw, params, end_members=4):
    """x_ncdhw: (N, 1, D=num_bands, H, W), float32 — PyTorch NCDHW input."""
    x = jnp.transpose(x_ncdhw, (0, 2, 3, 4, 1))       # -> NDHWC
    (w1, b1), (w2, b2), (w3, b3), (w4, b4) = params

    # Stages 1-3: fused conv+lrelu+pool; intermediates kept in bf16 (they are
    # re-cast to bf16 at the next MXU matmul anyway, so rounding is identical
    # while HBM writeback / im2col gather traffic halves).
    y = conv3d_leaky_pool(x, w1, b1, pool=True, out_dtype=MXU_DTYPE)
    y = conv3d_leaky_pool(y, w2, b2, pool=True, out_dtype=MXU_DTYPE)
    y = conv3d_leaky_pool(y, w3, b3, pool=True, out_dtype=MXU_DTYPE)
    # Stage 4 feeds the ASC normalization: keep float32.
    y = conv3d_leaky_pool(y, w4, b4, pool=False, out_dtype=jnp.float32)

    # Reproduce PyTorch output4.view(-1, end_members) over NCDHW ordering.
    y_ncdhw = jnp.transpose(y, (0, 4, 1, 2, 3))       # (N, E, Do, Ho, Wo)
    rows = y_ncdhw.reshape(-1, end_members)
    return asc(rows)                                  # encoder_stage6


if __name__ == "__main__":
    key = jax.random.PRNGKey(0)
    kx, kp = jax.random.split(key)

    # num_bands=224 (module default); small spatial patch 7x7, batch 2.
    N, C, D, H, W = 2, 1, 224, 7, 7
    end_members = 4
    x = jax.random.uniform(kx, (N, C, D, H, W), jnp.float32)
    params = init_params(kp, end_members=end_members)

    fwd = jax.jit(functools.partial(encoder_net_forward,
                                    end_members=end_members))
    out = fwd(x, params)
    jax.block_until_ready(out)

    # Depth chain: 224->218->72->66->22->16->5->1; spatial 7->5->3->3->3.
    assert out.shape == (N * 1 * 3 * 3, end_members), out.shape
    assert out.dtype == jnp.float32
    print("KERNEL_OK")
</pallas_src>

<mosaic_0001>
module attributes {stable_mosaic.version = 11 : i64} {
  func.func @_conv_pool_kernel(%arg0: i32, %arg1: memref<3x464x128xbf16, #tpu.memory_space<vmem>>, %arg2: memref<128x128xbf16, #tpu.memory_space<vmem>>, %arg3: memref<1x128xf32, #tpu.memory_space<vmem>>, %arg4: memref<464x128xbf16, #tpu.memory_space<vmem>>) attributes {dimension_semantics = [#tpu.dimension_semantics<parallel>], iteration_bounds = array<i64: 8>, scalar_prefetch = 0 : i64, scratch_operands = 0 : i64, tpu.core_type = #tpu.core_type<tc>, window_params = [{transform_indices = @transform_0, window_bounds = array<i64: 3, 464, 128>}, {pipeline_mode = #tpu.pipeline_mode<synchronous>, transform_indices = @transform_1, window_bounds = array<i64: 128, 128>}, {pipeline_mode = #tpu.pipeline_mode<synchronous>, transform_indices = @transform_2, window_bounds = array<i64: 1, 128>}, {transform_indices = @transform_3, window_bounds = array<i64: 464, 128>}]} {
    %c0 = arith.constant 0 : index
    %c0_0 = arith.constant 0 : index
    %0 = vector.load %arg2[%c0, %c0_0] : memref<128x128xbf16, #tpu.memory_space<vmem>>, vector<128x128xbf16>
    %c0_1 = arith.constant 0 : index
    %c0_2 = arith.constant 0 : index
    %1 = vector.load %arg3[%c0_1, %c0_2] : memref<1x128xf32, #tpu.memory_space<vmem>>, vector<1x128xf32>
    %c0_3 = arith.constant 0 : index
    %c0_4 = arith.constant 0 : index
    %c0_5 = arith.constant 0 : index
    %2 = vector.load %arg1[%c0_3, %c0_4, %c0_5] : memref<3x464x128xbf16, #tpu.memory_space<vmem>>, vector<1x464x128xbf16>
    %3 = vector.shape_cast %2 : vector<1x464x128xbf16> to vector<464x128xbf16>
    %cst = arith.constant dense<0.000000e+00> : vector<464x128xf32>
    %4 = tpu.matmul %3, %0, %cst {dimension_numbers = #tpu.dot_dimension_numbers<[1], [0], [0], [1], [0, 0, 1, 1], [], []>} : vector<464x128xbf16>, vector<128x128xbf16>, vector<464x128xf32> -> vector<464x128xf32>
    %5 = vector.broadcast %1 : vector<1x128xf32> to vector<464x128xf32>
    %6 = arith.addf %4, %5 : vector<464x128xf32>
    %cst_6 = arith.constant 0.000000e+00 : f32
    %7 = vector.broadcast %cst_6 : f32 to vector<464x128xf32>
    %8 = arith.cmpf oge, %6, %7 : vector<464x128xf32>
    %cst_7 = arith.constant 0.00999999977 : f32
    %9 = vector.broadcast %cst_7 : f32 to vector<464x128xf32>
    %10 = arith.mulf %9, %6 : vector<464x128xf32>
    %11 = arith.select %8, %6, %10 : vector<464x128xi1>, vector<464x128xf32>
    %c1 = arith.constant 1 : index
    %c0_8 = arith.constant 0 : index
    %c0_9 = arith.constant 0 : index
    %12 = vector.load %arg1[%c1, %c0_8, %c0_9] : memref<3x464x128xbf16, #tpu.memory_space<vmem>>, vector<1x464x128xbf16>
    %13 = vector.shape_cast %12 : vector<1x464x128xbf16> to vector<464x128xbf16>
    %cst_10 = arith.constant dense<0.000000e+00> : vector<464x128xf32>
    %14 = tpu.matmul %13, %0, %cst_10 {dimension_numbers = #tpu.dot_dimension_numbers<[1], [0], [0], [1], [0, 0, 1, 1], [], []>} : vector<464x128xbf16>, vector<128x128xbf16>, vector<464x128xf32> -> vector<464x128xf32>
    %15 = vector.broadcast %1 : vector<1x128xf32> to vector<464x128xf32>
    %16 = arith.addf %14, %15 : vector<464x128xf32>
    %cst_11 = arith.constant 0.000000e+00 : f32
    %17 = vector.broadcast %cst_11 : f32 to vector<464x128xf32>
    %18 = arith.cmpf oge, %16, %17 : vector<464x128xf32>
    %cst_12 = arith.constant 0.00999999977 : f32
    %19 = vector.broadcast %cst_12 : f32 to vector<464x128xf32>
    %20 = arith.mulf %19, %16 : vector<464x128xf32>
    %21 = arith.select %18, %16, %20 : vector<464x128xi1>, vector<464x128xf32>
    %22 = arith.maximumf %11, %21 : vector<464x128xf32>
    %c2 = arith.constant 2 : index
    %c0_13 = arith.constant 0 : index
    %c0_14 = arith.constant 0 : index
    %23 = vector.load %arg1[%c2, %c0_13, %c0_14] : memref<3x464x128xbf16, #tpu.memory_space<vmem>>, vector<1x464x128xbf16>
    %24 = vector.shape_cast %23 : vector<1x464x128xbf16> to vector<464x128xbf16>
    %cst_15 = arith.constant dense<0.000000e+00> : vector<464x128xf32>
    %25 = tpu.matmul %24, %0, %cst_15 {dimension_numbers = #tpu.dot_dimension_numbers<[1], [0], [0], [1], [0, 0, 1, 1], [], []>} : vector<464x128xbf16>, vector<128x128xbf16>, vector<464x128xf32> -> vector<464x128xf32>
    %26 = vector.broadcast %1 : vector<1x128xf32> to vector<464x128xf32>
    %27 = arith.addf %25, %26 : vector<464x128xf32>
    %cst_16 = arith.constant 0.000000e+00 : f32
    %28 = vector.broadcast %cst_16 : f32 to vector<464x128xf32>
    %29 = arith.cmpf oge, %27, %28 : vector<464x128xf32>
    %cst_17 = arith.constant 0.00999999977 : f32
    %30 = vector.broadcast %cst_17 : f32 to vector<464x128xf32>
    %31 = arith.mulf %30, %27 : vector<464x128xf32>
    %32 = arith.select %29, %27, %31 : vector<464x128xi1>, vector<464x128xf32>
    %33 = arith.maximumf %22, %32 : vector<464x128xf32>
    %34 = arith.truncf %33 : vector<464x128xf32> to vector<464x128xbf16>
    %c0_18 = arith.constant 0 : index
    %c0_19 = arith.constant 0 : index
    %35 = vector.load %arg4[%c0_18, %c0_19] : memref<464x128xbf16, #tpu.memory_space<vmem>>, vector<464x128xbf16>
    tpu.vector_store %arg4[%c0_18, %c0_19], %34 {strides = array<i32>} : memref<464x128xbf16, #tpu.memory_space<vmem>>, vector<464x128xbf16>,
    return
  }
  func.func @transform_0(%arg0: i32) -> (i32, i32, i32) {
    %c0_i32 = arith.constant 0 : i32
    %c0_i32_0 = arith.constant 0 : i32
    %c0_i32_1 = arith.constant 0 : i32
    return %c0_i32, %arg0, %c0_i32_0 : i32, i32, i32
  }
  func.func @transform_1(%arg0: i32) -> (i32, i32) {
    %c0_i32 = arith.constant 0 : i32
    %c0_i32_0 = arith.constant 0 : i32
    %c0_i32_1 = arith.constant 0 : i32
    return %c0_i32, %c0_i32_0 : i32, i32
  }
  func.func @transform_2(%arg0: i32) -> (i32, i32) {
    %c0_i32 = arith.constant 0 : i32
    %c0_i32_0 = arith.constant 0 : i32
    %c0_i32_1 = arith.constant 0 : i32
    return %c0_i32, %c0_i32_0 : i32, i32
  }
  func.func @transform_3(%arg0: i32) -> (i32, i32) {
    %c0_i32 = arith.constant 0 : i32
    %c0_i32_0 = arith.constant 0 : i32
    return %arg0, %c0_i32 : i32, i32
  }
}

module attributes {stable_mosaic.version = 11 : i64} {
  func.func @_conv_pool_kernel(%arg0: i32, %arg1: memref<3x400x1024xbf16, #tpu.memory_space<vmem>>, %arg2: memref<1024x128xbf16, #tpu.memory_space<vmem>>, %arg3: memref<1x128xf32, #tpu.memory_space<vmem>>, %arg4: memref<400x128xbf16, #tpu.memory_space<vmem>>) attributes {dimension_semantics = [#tpu.dimension_semantics<parallel>], iteration_bounds = array<i64: 1>, scalar_prefetch = 0 : i64, scratch_operands = 0 : i64, tpu.core_type = #tpu.core_type<tc>, window_params = [{transform_indices = @transform_0, window_bounds = array<i64: 3, 400, 1024>}, {pipeline_mode = #tpu.pipeline_mode<synchronous>, transform_indices = @transform_1, window_bounds = array<i64: 1024, 128>}, {pipeline_mode = #tpu.pipeline_mode<synchronous>, transform_indices = @transform_2, window_bounds = array<i64: 1, 128>}, {transform_indices = @transform_3, window_bounds = array<i64: 400, 128>}]} {
    %c0 = arith.constant 0 : index
    %c0_0 = arith.constant 0 : index
    %0 = vector.load %arg2[%c0, %c0_0] : memref<1024x128xbf16, #tpu.memory_space<vmem>>, vector<1024x128xbf16>
    %c0_1 = arith.constant 0 : index
    %c0_2 = arith.constant 0 : index
    %1 = vector.load %arg3[%c0_1, %c0_2] : memref<1x128xf32, #tpu.memory_space<vmem>>, vector<1x128xf32>
    %c0_3 = arith.constant 0 : index
    %c0_4 = arith.constant 0 : index
    %c0_5 = arith.constant 0 : index
    %2 = vector.load %arg1[%c0_3, %c0_4, %c0_5] : memref<3x400x1024xbf16, #tpu.memory_space<vmem>>, vector<1x400x1024xbf16>
    %3 = vector.shape_cast %2 : vector<1x400x1024xbf16> to vector<400x1024xbf16>
    %cst = arith.constant dense<0.000000e+00> : vector<400x128xf32>
    %4 = tpu.matmul %3, %0, %cst {dimension_numbers = #tpu.dot_dimension_numbers<[1], [0], [0], [1], [0, 0, 1, 1], [], []>} : vector<400x1024xbf16>, vector<1024x128xbf16>, vector<400x128xf32> -> vector<400x128xf32>
    %5 = vector.broadcast %1 : vector<1x128xf32> to vector<400x128xf32>
    %6 = arith.addf %4, %5 : vector<400x128xf32>
    %cst_6 = arith.constant 0.000000e+00 : f32
    %7 = vector.broadcast %cst_6 : f32 to vector<400x128xf32>
    %8 = arith.cmpf oge, %6, %7 : vector<400x128xf32>
    %cst_7 = arith.constant 0.00999999977 : f32
    %9 = vector.broadcast %cst_7 : f32 to vector<400x128xf32>
    %10 = arith.mulf %9, %6 : vector<400x128xf32>
    %11 = arith.select %8, %6, %10 : vector<400x128xi1>, vector<400x128xf32>
    %c1 = arith.constant 1 : index
    %c0_8 = arith.constant 0 : index
    %c0_9 = arith.constant 0 : index
    %12 = vector.load %arg1[%c1, %c0_8, %c0_9] : memref<3x400x1024xbf16, #tpu.memory_space<vmem>>, vector<1x400x1024xbf16>
    %13 = vector.shape_cast %12 : vector<1x400x1024xbf16> to vector<400x1024xbf16>
    %cst_10 = arith.constant dense<0.000000e+00> : vector<400x128xf32>
    %14 = tpu.matmul %13, %0, %cst_10 {dimension_numbers = #tpu.dot_dimension_numbers<[1], [0], [0], [1], [0, 0, 1, 1], [], []>} : vector<400x1024xbf16>, vector<1024x128xbf16>, vector<400x128xf32> -> vector<400x128xf32>
    %15 = vector.broadcast %1 : vector<1x128xf32> to vector<400x128xf32>
    %16 = arith.addf %14, %15 : vector<400x128xf32>
    %cst_11 = arith.constant 0.000000e+00 : f32
    %17 = vector.broadcast %cst_11 : f32 to vector<400x128xf32>
    %18 = arith.cmpf oge, %16, %17 : vector<400x128xf32>
    %cst_12 = arith.constant 0.00999999977 : f32
    %19 = vector.broadcast %cst_12 : f32 to vector<400x128xf32>
    %20 = arith.mulf %19, %16 : vector<400x128xf32>
    %21 = arith.select %18, %16, %20 : vector<400x128xi1>, vector<400x128xf32>
    %22 = arith.maximumf %11, %21 : vector<400x128xf32>
    %c2 = arith.constant 2 : index
    %c0_13 = arith.constant 0 : index
    %c0_14 = arith.constant 0 : index
    %23 = vector.load %arg1[%c2, %c0_13, %c0_14] : memref<3x400x1024xbf16, #tpu.memory_space<vmem>>, vector<1x400x1024xbf16>
    %24 = vector.shape_cast %23 : vector<1x400x1024xbf16> to vector<400x1024xbf16>
    %cst_15 = arith.constant dense<0.000000e+00> : vector<400x128xf32>
    %25 = tpu.matmul %24, %0, %cst_15 {dimension_numbers = #tpu.dot_dimension_numbers<[1], [0], [0], [1], [0, 0, 1, 1], [], []>} : vector<400x1024xbf16>, vector<1024x128xbf16>, vector<400x128xf32> -> vector<400x128xf32>
    %26 = vector.broadcast %1 : vector<1x128xf32> to vector<400x128xf32>
    %27 = arith.addf %25, %26 : vector<400x128xf32>
    %cst_16 = arith.constant 0.000000e+00 : f32
    %28 = vector.broadcast %cst_16 : f32 to vector<400x128xf32>
    %29 = arith.cmpf oge, %27, %28 : vector<400x128xf32>
    %cst_17 = arith.constant 0.00999999977 : f32
    %30 = vector.broadcast %cst_17 : f32 to vector<400x128xf32>
    %31 = arith.mulf %30, %27 : vector<400x128xf32>
    %32 = arith.select %29, %27, %31 : vector<400x128xi1>, vector<400x128xf32>
    %33 = arith.maximumf %22, %32 : vector<400x128xf32>
    %34 = arith.truncf %33 : vector<400x128xf32> to vector<400x128xbf16>
    %c0_18 = arith.constant 0 : index
    %c0_19 = arith.constant 0 : index
    %35 = vector.load %arg4[%c0_18, %c0_19] : memref<400x128xbf16, #tpu.memory_space<vmem>>, vector<400x128xbf16>
    tpu.vector_store %arg4[%c0_18, %c0_19], %34 {strides = array<i32>} : memref<400x128xbf16, #tpu.memory_space<vmem>>, vector<400x128xbf16>,
    return
  }
  func.func @transform_0(%arg0: i32) -> (i32, i32, i32) {
    %c0_i32 = arith.constant 0 : i32
    %c0_i32_0 = arith.constant 0 : i32
    %c0_i32_1 = arith.constant 0 : i32
    return %c0_i32, %arg0, %c0_i32_0 : i32, i32, i32
  }
  func.func @transform_1(%arg0: i32) -> (i32, i32) {
    %c0_i32 = arith.constant 0 : i32
    %c0_i32_0 = arith.constant 0 : i32
    %c0_i32_1 = arith.constant 0 : i32
    return %c0_i32, %c0_i32_0 : i32, i32
  }
  func.func @transform_2(%arg0: i32) -> (i32, i32) {
    %c0_i32 = arith.constant 0 : i32
    %c0_i32_0 = arith.constant 0 : i32
    %c0_i32_1 = arith.constant 0 : i32
    return %c0_i32, %c0_i32_0 : i32, i32
  }
  func.func @transform_3(%arg0: i32) -> (i32, i32) {
    %c0_i32 = arith.constant 0 : i32
    %c0_i32_0 = arith.constant 0 : i32
    return %arg0, %c0_i32 : i32, i32
  }
}

module attributes {stable_mosaic.version = 11 : i64} {
  func.func @_conv_pool_kernel(%arg0: i32, %arg1: memref<3x96x128xbf16, #tpu.memory_space<vmem>>, %arg2: memref<128x128xbf16, #tpu.memory_space<vmem>>, %arg3: memref<1x128xf32, #tpu.memory_space<vmem>>, %arg4: memref<96x128xbf16, #tpu.memory_space<vmem>>) attributes {dimension_semantics = [#tpu.dimension_semantics<parallel>], iteration_bounds = array<i64: 1>, scalar_prefetch = 0 : i64, scratch_operands = 0 : i64, tpu.core_type = #tpu.core_type<tc>, window_params = [{transform_indices = @transform_0, window_bounds = array<i64: 3, 96, 128>}, {pipeline_mode = #tpu.pipeline_mode<synchronous>, transform_indices = @transform_1, window_bounds = array<i64: 128, 128>}, {pipeline_mode = #tpu.pipeline_mode<synchronous>, transform_indices = @transform_2, window_bounds = array<i64: 1, 128>}, {transform_indices = @transform_3, window_bounds = array<i64: 96, 128>}]} {
    %c0 = arith.constant 0 : index
    %c0_0 = arith.constant 0 : index
    %0 = vector.load %arg2[%c0, %c0_0] : memref<128x128xbf16, #tpu.memory_space<vmem>>, vector<128x128xbf16>
    %c0_1 = arith.constant 0 : index
    %c0_2 = arith.constant 0 : index
    %1 = vector.load %arg3[%c0_1, %c0_2] : memref<1x128xf32, #tpu.memory_space<vmem>>, vector<1x128xf32>
    %c0_3 = arith.constant 0 : index
    %c0_4 = arith.constant 0 : index
    %c0_5 = arith.constant 0 : index
    %2 = vector.load %arg1[%c0_3, %c0_4, %c0_5] : memref<3x96x128xbf16, #tpu.memory_space<vmem>>, vector<1x96x128xbf16>
    %3 = vector.shape_cast %2 : vector<1x96x128xbf16> to vector<96x128xbf16>
    %cst = arith.constant dense<0.000000e+00> : vector<96x128xf32>
    %4 = tpu.matmul %3, %0, %cst {dimension_numbers = #tpu.dot_dimension_numbers<[1], [0], [0], [1], [0, 0, 1, 1], [], []>} : vector<96x128xbf16>, vector<128x128xbf16>, vector<96x128xf32> -> vector<96x128xf32>
    %5 = vector.broadcast %1 : vector<1x128xf32> to vector<96x128xf32>
    %6 = arith.addf %4, %5 : vector<96x128xf32>
    %cst_6 = arith.constant 0.000000e+00 : f32
    %7 = vector.broadcast %cst_6 : f32 to vector<96x128xf32>
    %8 = arith.cmpf oge, %6, %7 : vector<96x128xf32>
    %cst_7 = arith.constant 0.00999999977 : f32
    %9 = vector.broadcast %cst_7 : f32 to vector<96x128xf32>
    %10 = arith.mulf %9, %6 : vector<96x128xf32>
    %11 = arith.select %8, %6, %10 : vector<96x128xi1>, vector<96x128xf32>
    %c1 = arith.constant 1 : index
    %c0_8 = arith.constant 0 : index
    %c0_9 = arith.constant 0 : index
    %12 = vector.load %arg1[%c1, %c0_8, %c0_9] : memref<3x96x128xbf16, #tpu.memory_space<vmem>>, vector<1x96x128xbf16>
    %13 = vector.shape_cast %12 : vector<1x96x128xbf16> to vector<96x128xbf16>
    %cst_10 = arith.constant dense<0.000000e+00> : vector<96x128xf32>
    %14 = tpu.matmul %13, %0, %cst_10 {dimension_numbers = #tpu.dot_dimension_numbers<[1], [0], [0], [1], [0, 0, 1, 1], [], []>} : vector<96x128xbf16>, vector<128x128xbf16>, vector<96x128xf32> -> vector<96x128xf32>
    %15 = vector.broadcast %1 : vector<1x128xf32> to vector<96x128xf32>
    %16 = arith.addf %14, %15 : vector<96x128xf32>
    %cst_11 = arith.constant 0.000000e+00 : f32
    %17 = vector.broadcast %cst_11 : f32 to vector<96x128xf32>
    %18 = arith.cmpf oge, %16, %17 : vector<96x128xf32>
    %cst_12 = arith.constant 0.00999999977 : f32
    %19 = vector.broadcast %cst_12 : f32 to vector<96x128xf32>
    %20 = arith.mulf %19, %16 : vector<96x128xf32>
    %21 = arith.select %18, %16, %20 : vector<96x128xi1>, vector<96x128xf32>
    %22 = arith.maximumf %11, %21 : vector<96x128xf32>
    %c2 = arith.constant 2 : index
    %c0_13 = arith.constant 0 : index
    %c0_14 = arith.constant 0 : index
    %23 = vector.load %arg1[%c2, %c0_13, %c0_14] : memref<3x96x128xbf16, #tpu.memory_space<vmem>>, vector<1x96x128xbf16>
    %24 = vector.shape_cast %23 : vector<1x96x128xbf16> to vector<96x128xbf16>
    %cst_15 = arith.constant dense<0.000000e+00> : vector<96x128xf32>
    %25 = tpu.matmul %24, %0, %cst_15 {dimension_numbers = #tpu.dot_dimension_numbers<[1], [0], [0], [1], [0, 0, 1, 1], [], []>} : vector<96x128xbf16>, vector<128x128xbf16>, vector<96x128xf32> -> vector<96x128xf32>
    %26 = vector.broadcast %1 : vector<1x128xf32> to vector<96x128xf32>
    %27 = arith.addf %25, %26 : vector<96x128xf32>
    %cst_16 = arith.constant 0.000000e+00 : f32
    %28 = vector.broadcast %cst_16 : f32 to vector<96x128xf32>
    %29 = arith.cmpf oge, %27, %28 : vector<96x128xf32>
    %cst_17 = arith.constant 0.00999999977 : f32
    %30 = vector.broadcast %cst_17 : f32 to vector<96x128xf32>
    %31 = arith.mulf %30, %27 : vector<96x128xf32>
    %32 = arith.select %29, %27, %31 : vector<96x128xi1>, vector<96x128xf32>
    %33 = arith.maximumf %22, %32 : vector<96x128xf32>
    %34 = arith.truncf %33 : vector<96x128xf32> to vector<96x128xbf16>
    %c0_18 = arith.constant 0 : index
    %c0_19 = arith.constant 0 : index
    %35 = vector.load %arg4[%c0_18, %c0_19] : memref<96x128xbf16, #tpu.memory_space<vmem>>, vector<96x128xbf16>
    tpu.vector_store %arg4[%c0_18, %c0_19], %34 {strides = array<i32>} : memref<96x128xbf16, #tpu.memory_space<vmem>>, vector<96x128xbf16>,
    return
  }
  func.func @transform_0(%arg0: i32) -> (i32, i32, i32) {
    %c0_i32 = arith.constant 0 : i32
    %c0_i32_0 = arith.constant 0 : i32
    %c0_i32_1 = arith.constant 0 : i32
    return %c0_i32, %arg0, %c0_i32_0 : i32, i32, i32
  }
  func.func @transform_1(%arg0: i32) -> (i32, i32) {
    %c0_i32 = arith.constant 0 : i32
    %c0_i32_0 = arith.constant 0 : i32
    %c0_i32_1 = arith.constant 0 : i32
    return %c0_i32, %c0_i32_0 : i32, i32
  }
  func.func @transform_2(%arg0: i32) -> (i32, i32) {
    %c0_i32 = arith.constant 0 : i32
    %c0_i32_0 = arith.constant 0 : i32
    %c0_i32_1 = arith.constant 0 : i32
    return %c0_i32, %c0_i32_0 : i32, i32
  }
  func.func @transform_3(%arg0: i32) -> (i32, i32) {
    %c0_i32 = arith.constant 0 : i32
    %c0_i32_0 = arith.constant 0 : i32
    return %arg0, %c0_i32 : i32, i32
  }
}

module attributes {stable_mosaic.version = 11 : i64} {
  func.func @_conv_kernel(%arg0: i32, %arg1: memref<32x128xbf16, #tpu.memory_space<vmem>>, %arg2: memref<128x128xbf16, #tpu.memory_space<vmem>>, %arg3: memref<1x128xf32, #tpu.memory_space<vmem>>, %arg4: memref<32x128xf32, #tpu.memory_space<vmem>>) attributes {dimension_semantics = [#tpu.dimension_semantics<parallel>], iteration_bounds = array<i64: 1>, scalar_prefetch = 0 : i64, scratch_operands = 0 : i64, tpu.core_type = #tpu.core_type<tc>, window_params = [{transform_indices = @transform_0, window_bounds = array<i64: 32, 128>}, {pipeline_mode = #tpu.pipeline_mode<synchronous>, transform_indices = @transform_1, window_bounds = array<i64: 128, 128>}, {pipeline_mode = #tpu.pipeline_mode<synchronous>, transform_indices = @transform_2, window_bounds = array<i64: 1, 128>}, {transform_indices = @transform_3, window_bounds = array<i64: 32, 128>}]} {
    %c0 = arith.constant 0 : index
    %c0_0 = arith.constant 0 : index
    %0 = vector.load %arg1[%c0, %c0_0] : memref<32x128xbf16, #tpu.memory_space<vmem>>, vector<32x128xbf16>
    %c0_1 = arith.constant 0 : index
    %c0_2 = arith.constant 0 : index
    %1 = vector.load %arg2[%c0_1, %c0_2] : memref<128x128xbf16, #tpu.memory_space<vmem>>, vector<128x128xbf16>
    %cst = arith.constant dense<0.000000e+00> : vector<32x128xf32>
    %2 = tpu.matmul %0, %1, %cst {dimension_numbers = #tpu.dot_dimension_numbers<[1], [0], [0], [1], [0, 0, 1, 1], [], []>} : vector<32x128xbf16>, vector<128x128xbf16>, vector<32x128xf32> -> vector<32x128xf32>
    %c0_3 = arith.constant 0 : index
    %c0_4 = arith.constant 0 : index
    %3 = vector.load %arg3[%c0_3, %c0_4] : memref<1x128xf32, #tpu.memory_space<vmem>>, vector<1x128xf32>
    %4 = vector.broadcast %3 : vector<1x128xf32> to vector<32x128xf32>
    %5 = arith.addf %2, %4 : vector<32x128xf32>
    %cst_5 = arith.constant 0.000000e+00 : f32
    %6 = vector.broadcast %cst_5 : f32 to vector<32x128xf32>
    %7 = arith.cmpf oge, %5, %6 : vector<32x128xf32>
    %cst_6 = arith.constant 0.00999999977 : f32
    %8 = vector.broadcast %cst_6 : f32 to vector<32x128xf32>
    %9 = arith.mulf %8, %5 : vector<32x128xf32>
    %10 = arith.select %7, %5, %9 : vector<32x128xi1>, vector<32x128xf32>
    %c0_7 = arith.constant 0 : index
    %c0_8 = arith.constant 0 : index
    %11 = vector.load %arg4[%c0_7, %c0_8] : memref<32x128xf32, #tpu.memory_space<vmem>>, vector<32x128xf32>
    tpu.vector_store %arg4[%c0_7, %c0_8], %10 {strides = array<i32>} : memref<32x128xf32, #tpu.memory_space<vmem>>, vector<32x128xf32>,
    return
  }
  func.func @transform_0(%arg0: i32) -> (i32, i32) {
    %c0_i32 = arith.constant 0 : i32
    %c0_i32_0 = arith.constant 0 : i32
    return %arg0, %c0_i32 : i32, i32
  }
  func.func @transform_1(%arg0: i32) -> (i32, i32) {
    %c0_i32 = arith.constant 0 : i32
    %c0_i32_0 = arith.constant 0 : i32
    %c0_i32_1 = arith.constant 0 : i32
    return %c0_i32, %c0_i32_0 : i32, i32
  }
  func.func @transform_2(%arg0: i32) -> (i32, i32) {
    %c0_i32 = arith.constant 0 : i32
    %c0_i32_0 = arith.constant 0 : i32
    %c0_i32_1 = arith.constant 0 : i32
    return %c0_i32, %c0_i32_0 : i32, i32
  }
  func.func @transform_3(%arg0: i32) -> (i32, i32) {
    %c0_i32 = arith.constant 0 : i32
    %c0_i32_0 = arith.constant 0 : i32
    return %arg0, %c0_i32 : i32, i32
  }
}

module attributes {stable_mosaic.version = 11 : i64} {
  func.func @_asc_kernel(%arg0: memref<24x128xf32, #tpu.memory_space<vmem>>, %arg1: memref<24x128xf32, #tpu.memory_space<vmem>>) attributes {dimension_semantics = [], scalar_prefetch = 0 : i64, scratch_operands = 0 : i64, tpu.core_type = #tpu.core_type<tc>} {
    %c0 = arith.constant 0 : index
    %c0_0 = arith.constant 0 : index
    %0 = vector.load %arg0[%c0, %c0_0] : memref<24x128xf32, #tpu.memory_space<vmem>>, vector<24x128xf32>
    %cst = arith.constant dense<0.000000e+00> : vector<24xf32>
    %1 = vector.multi_reduction <add>, %0, %cst [1] : vector<24x128xf32> to vector<24xf32>
    %2 = vector.shape_cast %1 : vector<24xf32> to vector<24x1xf32>
    %cst_1 = arith.constant 0.000000e+00 : f32
    %3 = vector.broadcast %cst_1 : f32 to vector<24x1xf32>
    %4 = arith.cmpf oeq, %2, %3 : vector<24x1xf32>
    %cst_2 = arith.constant 1.000000e+00 : f32
    %5 = vector.broadcast %cst_2 : f32 to vector<24x1xf32>
    %6 = arith.select %4, %5, %2 : vector<24x1xi1>, vector<24x1xf32>
    %7 = vector.broadcast %6 : vector<24x1xf32> to vector<24x128xf32>
    %8 = arith.divf %0, %7 : vector<24x128xf32>
    %c0_3 = arith.constant 0 : index
    %c0_4 = arith.constant 0 : index
    %9 = vector.load %arg1[%c0_3, %c0_4] : memref<24x128xf32, #tpu.memory_space<vmem>>, vector<24x128xf32>
    tpu.vector_store %arg1[%c0_3, %c0_4], %8 {strides = array<i32>} : memref<24x128xf32, #tpu.memory_space<vmem>>, vector<24x128xf32>,
    return
  }
}

</mosaic_0001>

<bundles_post_ra>
// kernel: encoder_net_forward.5
= control target key start
LH: loop header
LB: loop body
LE: loop exit
PB: predicated region body
PF: predicated region fallthrough
CT: control target
= control target key end

     0   :  { %s4667_s12 = smov 0   ;;  %s4669_s13 = smov 0   ;;  %s5656_s0 = inlined_call_operand.vmem [shape: bf16[3,3712,128], index: 0, kind: input, shape index: {}]   ;;  %s5657_s1 = inlined_call_operand.vmem [shape: bf16[128,128], index: 1, kind: input, shape index: {}]   ;;  %s5658_s2 = inlined_call_operand.vmem [shape: f32[1,128], index: 2, kind: input, shape index: {}]   ;;  %s5659_s3 = inlined_call_operand.vmem [shape: bf16[3712,128], index: 3, kind: output, shape index: {}]  }
   0x1   :  { %s4671_s14 = smov 0  }
   0x2 LB: > { %s3462_s15 = sadd.s32 4294967295, %s4643_s14   ;;  %s4684_s16 = sadd.s32 1, %s4643_s14   ;;  %s4643_s14 = sphi %s4671_s14, %s5695_s14   ;;  %s4639_s13 = sphi %s4669_s13, %s5694_s13   ;;  %s4635_s12 = sphi %s4667_s12, %s5693_s12  }
   0x3   : > { %s17_s17 = ssub.s32 %s4643_s14, %s4684_s16  ;;  %s20_s18 = sadd.s32 1, %s4639_s13 }
   0x4   : > { %p18_p0 = scmp.eq.s32.totalorder %s17_s17, 0  ;;  %p27_p1 = scmp.ne.s32.totalorder %s4639_s13, %s4635_s12 }
   0x5   : > { %p28_p2 = scmp.eq.s32.totalorder %s4643_s14, 0  ;;  %p3465_p4 = scmp.ge.s32.totalorder %s4643_s14, 8 }
   0x6   : > { %s4693_s19 = scalar_select %p18_p0, %s4639_s13, %s20_s18  }
   0x7   : > { %p29_p3 = por %p28_p2, %p27_p1  ;;  %127 = sbr.rel (%p3465_p4) target bundleno = 63 (0x3f), region = 24 }
   0xe   : > { %130 = sbr.rel (!%p29_p3) target bundleno = 63 (0x3f), region = 28  ;;  %s132_s20 = sand.u32 (%p29_p3), 1, %s4639_s13  }
   0xf   : > { %s3741_s21 = smul.u32 (%p29_p3), 232, %s4643_s14 }
  0x10   : > { %s4496_s22 = smul.u32 (%p29_p3), 696, %s132_s20 }
  0x11   : > { %s4701_s25 = scalar_lea.vmem (%p29_p3), %s5656_s0, %s3741_s21 }
  0x12   : > { %v153_v0 = vld [vmem:[%s4701_s25] sm:$0xff] (%p29_p3)   ;;  %v157_v1 = vld [vmem:[%s4701_s25 + $0x8] sm:$0xff] (%p29_p3)   ;;  %v161_v2 = vld [vmem:[%s4701_s25 + $0x10] sm:$0xff] (%p29_p3)   ;;  %s4706_s26 = scalar_lea.vmem (%p29_p3), [#allocation2], %s4496_s22 }
  0x13   : > { %154 = vst [vmem:[%s4706_s26] sm:$0xff] (%p29_p3), %v153_v0   ;;  %158 = vst [vmem:[%s4706_s26 + $0x8] sm:$0xff] (%p29_p3), %v157_v1   ;;  %v165_v3 = vld [vmem:[%s4701_s25 + $0x18] sm:$0xff] (%p29_p3)   ;;  %v169_v4 = vld [vmem:[%s4701_s25 + $0x20] sm:$0xff] (%p29_p3)  }
  0x14   : > { %162 = vst [vmem:[%s4706_s26 + $0x10] sm:$0xff] (%p29_p3), %v161_v2   ;;  %v173_v5 = vld [vmem:[%s4701_s25 + $0x28] sm:$0xff] (%p29_p3)   ;;  %166 = vst [vmem:[%s4706_s26 + $0x18] sm:$0xff] (%p29_p3), %v165_v3   ;;  %v177_v6 = vld [vmem:[%s4701_s25 + $0x30] sm:$0xff] (%p29_p3)  }
  0x15   : > { %170 = vst [vmem:[%s4706_s26 + $0x20] sm:$0xff] %v169_v4   ;;  %174 = vst [vmem:[%s4706_s26 + $0x28] sm:$0xff] %v173_v5   ;;  %v181_v7 = vld [vmem:[%s4701_s25 + $0x38] sm:$0xff]   ;;  %v185_v8 = vld [vmem:[%s4701_s25 + $0x40] sm:$0xff]  }
  0x16   : > { %178 = vst [vmem:[%s4706_s26 + $0x30] sm:$0xff] %v177_v6   ;;  %182 = vst [vmem:[%s4706_s26 + $0x38] sm:$0xff] %v181_v7   ;;  %v189_v9 = vld [vmem:[%s4701_s25 + $0x48] sm:$0xff]   ;;  %v193_v10 = vld [vmem:[%s4701_s25 + $0x50] sm:$0xff]  }
  0x17   : > { %186 = vst [vmem:[%s4706_s26 + $0x40] sm:$0xff] %v185_v8   ;;  %v197_v11 = vld [vmem:[%s4701_s25 + $0x58] sm:$0xff]   ;;  %190 = vst [vmem:[%s4706_s26 + $0x48] sm:$0xff] %v189_v9   ;;  %v201_v12 = vld [vmem:[%s4701_s25 + $0x60] sm:$0xff]  }
  0x18   : > { %194 = vst [vmem:[%s4706_s26 + $0x50] sm:$0xff] %v193_v10   ;;  %198 = vst [vmem:[%s4706_s26 + $0x58] sm:$0xff] %v197_v11   ;;  %v205_v13 = vld [vmem:[%s4701_s25 + $0x68] sm:$0xff]   ;;  %v209_v14 = vld [vmem:[%s4701_s25 + $0x70] sm:$0xff]  }
  0x19   : > { %202 = vst [vmem:[%s4706_s26 + $0x60] sm:$0xff] %v201_v12   ;;  %206 = vst [vmem:[%s4706_s26 + $0x68] sm:$0xff] %v205_v13   ;;  %v213_v15 = vld [vmem:[%s4701_s25 + $0x78] sm:$0xff]   ;;  %v217_v16 = vld [vmem:[%s4701_s25 + $0x80] sm:$0xff]  }
  0x1a   : > { %210 = vst [vmem:[%s4706_s26 + $0x70] sm:$0xff] %v209_v14   ;;  %v221_v17 = vld [vmem:[%s4701_s25 + $0x88] sm:$0xff]   ;;  %214 = vst [vmem:[%s4706_s26 + $0x78] sm:$0xff] %v213_v15   ;;  %v225_v18 = vld [vmem:[%s4701_s25 + $0x90] sm:$0xff]  }
  0x1b   : > { %218 = vst [vmem:[%s4706_s26 + $0x80] sm:$0xff] %v217_v16   ;;  %222 = vst [vmem:[%s4706_s26 + $0x88] sm:$0xff] %v221_v17   ;;  %v229_v19 = vld [vmem:[%s4701_s25 + $0x98] sm:$0xff]   ;;  %v233_v20 = vld [vmem:[%s4701_s25 + $0xa0] sm:$0xff]  }
  0x1c   : > { %226 = vst [vmem:[%s4706_s26 + $0x90] sm:$0xff] %v225_v18   ;;  %230 = vst [vmem:[%s4706_s26 + $0x98] sm:$0xff] %v229_v19   ;;  %v237_v21 = vld [vmem:[%s4701_s25 + $0xa8] sm:$0xff]   ;;  %v241_v22 = vld [vmem:[%s4701_s25 + $0xb0] sm:$0xff]  }
  0x1d   : > { %234 = vst [vmem:[%s4706_s26 + $0xa0] sm:$0xff] %v233_v20   ;;  %v245_v23 = vld [vmem:[%s4701_s25 + $0xb8] sm:$0xff]   ;;  %238 = vst [vmem:[%s4706_s26 + $0xa8] sm:$0xff] %v237_v21   ;;  %v249_v24 = vld [vmem:[%s4701_s25 + $0xc0] sm:$0xff]  }
  0x1e   : > { %242 = vst [vmem:[%s4706_s26 + $0xb0] sm:$0xff] %v241_v22   ;;  %246 = vst [vmem:[%s4706_s26 + $0xb8] sm:$0xff] %v245_v23   ;;  %v253_v25 = vld [vmem:[%s4701_s25 + $0xc8] sm:$0xff]   ;;  %v257_v26 = vld [vmem:[%s4701_s25 + $0xd0] sm:$0xff]  }
  0x1f   : > { %250 = vst [vmem:[%s4706_s26 + $0xc0] sm:$0xff] %v249_v24   ;;  %254 = vst [vmem:[%s4706_s26 + $0xc8] sm:$0xff] %v253_v25   ;;  %v261_v27 = vld [vmem:[%s4701_s25 + $0xd8] sm:$0xff]   ;;  %v265_v28 = vld [vmem:[%s4701_s25 + $0xe0] sm:$0xff]  }
  0x20   : > { %258 = vst [vmem:[%s4706_s26 + $0xd0] sm:$0xff] %v257_v26   ;;  %v269_v29 = vld [vmem:[%s4701_s25 + $0x740] sm:$0xff]   ;;  %262 = vst [vmem:[%s4706_s26 + $0xd8] sm:$0xff] %v261_v27   ;;  %v273_v30 = vld [vmem:[%s4701_s25 + $0x748] sm:$0xff]  }
  0x21   : > { %266 = vst [vmem:[%s4706_s26 + $0xe0] sm:$0xff] %v265_v28   ;;  %270 = vst [vmem:[%s4706_s26 + $0xe8] sm:$0xff] %v269_v29   ;;  %v277_v31 = vld [vmem:[%s4701_s25 + $0x750] sm:$0xff]   ;;  %v281_v32 = vld [vmem:[%s4701_s25 + $0x758] sm:$0xff]  }
  0x22   : > { %274 = vst [vmem:[%s4706_s26 + $0xf0] sm:$0xff] %v273_v30   ;;  %278 = vst [vmem:[%s4706_s26 + $0xf8] sm:$0xff] %v277_v31   ;;  %v285_v33 = vld [vmem:[%s4701_s25 + $0x760] sm:$0xff]   ;;  %v289_v34 = vld [vmem:[%s4701_s25 + $0x768] sm:$0xff]  }
  0x23   : > { %282 = vst [vmem:[%s4706_s26 + $0x100] sm:$0xff] %v281_v32   ;;  %v293_v35 = vld [vmem:[%s4701_s25 + $0x770] sm:$0xff]   ;;  %286 = vst [vmem:[%s4706_s26 + $0x108] sm:$0xff] %v285_v33   ;;  %v297_v36 = vld [vmem:[%s4701_s25 + $0x778] sm:$0xff]  }
  0x24   : > { %290 = vst [vmem:[%s4706_s26 + $0x110] sm:$0xff] %v289_v34   ;;  %294 = vst [vmem:[%s4706_s26 + $0x118] sm:$0xff] %v293_v35   ;;  %v301_v37 = vld [vmem:[%s4701_s25 + $0x780] sm:$0xff]   ;;  %v305_v38 = vld [vmem:[%s4701_s25 + $0x788] sm:$0xff]  }
  0x25   : > { %298 = vst [vmem:[%s4706_s26 + $0x120] sm:$0xff] %v297_v36   ;;  %302 = vst [vmem:[%s4706_s26 + $0x128] sm:$0xff] %v301_v37   ;;  %v309_v39 = vld [vmem:[%s4701_s25 + $0x790] sm:$0xff]   ;;  %v313_v40 = vld [vmem:[%s4701_s25 + $0x798] sm:$0xff]  }
  0x26   : > { %306 = vst [vmem:[%s4706_s26 + $0x130] sm:$0xff] %v305_v38   ;;  %v317_v41 = vld [vmem:[%s4701_s25 + $0x7a0] sm:$0xff]   ;;  %310 = vst [vmem:[%s4706_s26 + $0x138] sm:$0xff] %v309_v39   ;;  %v321_v42 = vld [vmem:[%s4701_s25 + $0x7a8] sm:$0xff]  }
  0x27   : > { %314 = vst [vmem:[%s4706_s26 + $0x140] sm:$0xff] %v313_v40   ;;  %318 = vst [vmem:[%s4706_s26 + $0x148] sm:$0xff] %v317_v41   ;;  %v325_v43 = vld [vmem:[%s4701_s25 + $0x7b0] sm:$0xff]   ;;  %v329_v44 = vld [vmem:[%s4701_s25 + $0x7b8] sm:$0xff]  }
  0x28   : > { %322 = vst [vmem:[%s4706_s26 + $0x150] sm:$0xff] %v321_v42   ;;  %326 = vst [vmem:[%s4706_s26 + $0x158] sm:$0xff] %v325_v43   ;;  %v333_v45 = vld [vmem:[%s4701_s25 + $0x7c0] sm:$0xff]   ;;  %v337_v46 = vld [vmem:[%s4701_s25 + $0x7c8] sm:$0xff]  }
  0x29   : > { %330 = vst [vmem:[%s4706_s26 + $0x160] sm:$0xff] %v329_v44   ;;  %v341_v47 = vld [vmem:[%s4701_s25 + $0x7d0] sm:$0xff]   ;;  %334 = vst [vmem:[%s4706_s26 + $0x168] sm:$0xff] %v333_v45   ;;  %v345_v48 = vld [vmem:[%s4701_s25 + $0x7d8] sm:$0xff]  }
  0x2a   : > { %338 = vst [vmem:[%s4706_s26 + $0x170] sm:$0xff] %v337_v46   ;;  %342 = vst [vmem:[%s4706_s26 + $0x178] sm:$0xff] %v341_v47   ;;  %v349_v49 = vld [vmem:[%s4701_s25 + $0x7e0] sm:$0xff]   ;;  %v353_v50 = vld [vmem:[%s4701_s25 + $0x7e8] sm:$0xff]  }
  0x2b   : > { %346 = vst [vmem:[%s4706_s26 + $0x180] sm:$0xff] %v345_v48   ;;  %350 = vst [vmem:[%s4706_s26 + $0x188] sm:$0xff] %v349_v49   ;;  %v357_v51 = vld [vmem:[%s4701_s25 + $0x7f0] sm:$0xff]   ;;  %v361_v52 = vld [vmem:[%s4701_s25 + $0x7f8] sm:$0xff]  }
  0x2c   : > { %354 = vst [vmem:[%s4706_s26 + $0x190] sm:$0xff] %v353_v50   ;;  %v365_v53 = vld [vmem:[%s4701_s25 + $0x800] sm:$0xff]   ;;  %358 = vst [vmem:[%s4706_s26 + $0x198] sm:$0xff] %v357_v51   ;;  %v369_v54 = vld [vmem:[%s4701_s25 + $0x808] sm:$0xff]  }
  0x2d   : > { %362 = vst [vmem:[%s4706_s26 + $0x1a0] sm:$0xff] %v361_v52   ;;  %366 = vst [vmem:[%s4706_s26 + $0x1a8] sm:$0xff] %v365_v53   ;;  %v373_v55 = vld [vmem:[%s4701_s25 + $0x810] sm:$0xff]   ;;  %v377_v56 = vld [vmem:[%s4701_s25 + $0x818] sm:$0xff]  }
  0x2e   : > { %370 = vst [vmem:[%s4706_s26 + $0x1b0] sm:$0xff] %v369_v54   ;;  %374 = vst [vmem:[%s4706_s26 + $0x1b8] sm:$0xff] %v373_v55   ;;  %v381_v57 = vld [vmem:[%s4701_s25 + $0x820] sm:$0xff]   ;;  %v389_v59 = vld [vmem:[%s4701_s25 + $0xe88] sm:$0xff]  }
  0x2f   : > { %378 = vst [vmem:[%s4706_s26 + $0x1c0] sm:$0xff] %v377_v56   ;;  %v385_v58 = vld [vmem:[%s4701_s25 + $0xe80] sm:$0xff]   ;;  %382 = vst [vmem:[%s4706_s26 + $0x1c8] sm:$0xff] %v381_v57   ;;  %v393_v60 = vld [vmem:[%s4701_s25 + $0xe90] sm:$0xff]  }
  0x30   : > { %386 = vst [vmem:[%s4706_s26 + $0x1d0] sm:$0xff] %v385_v58   ;;  %390 = vst [vmem:[%s4706_s26 + $0x1d8] sm:$0xff] %v389_v59   ;;  %v397_v61 = vld [vmem:[%s4701_s25 + $0xe98] sm:$0xff]   ;;  %v401_v62 = vld [vmem:[%s4701_s25 + $0xea0] sm:$0xff]  }
  0x31   : > { %394 = vst [vmem:[%s4706_s26 + $0x1e0] sm:$0xff] %v393_v60   ;;  %398 = vst [vmem:[%s4706_s26 + $0x1e8] sm:$0xff] %v397_v61   ;;  %v405_v63 = vld [vmem:[%s4701_s25 + $0xea8] sm:$0xff]   ;;  %v409_v0 = vld [vmem:[%s4701_s25 + $0xeb0] sm:$0xff]  }
  0x32   : > { %402 = vst [vmem:[%s4706_s26 + $0x1f0] sm:$0xff] %v401_v62   ;;  %v413_v1 = vld [vmem:[%s4701_s25 + $0xeb8] sm:$0xff]   ;;  %406 = vst [vmem:[%s4706_s26 + $0x1f8] sm:$0xff] %v405_v63   ;;  %v417_v2 = vld [vmem:[%s4701_s25 + $0xec0] sm:$0xff]  }
  0x33   : > { %410 = vst [vmem:[%s4706_s26 + $0x200] sm:$0xff] %v409_v0   ;;  %414 = vst [vmem:[%s4706_s26 + $0x208] sm:$0xff] %v413_v1   ;;  %v421_v3 = vld [vmem:[%s4701_s25 + $0xec8] sm:$0xff]   ;;  %v425_v4 = vld [vmem:[%s4701_s25 + $0xed0] sm:$0xff]  }
  0x34   : > { %418 = vst [vmem:[%s4706_s26 + $0x210] sm:$0xff] %v417_v2   ;;  %422 = vst [vmem:[%s4706_s26 + $0x218] sm:$0xff] %v421_v3   ;;  %v429_v5 = vld [vmem:[%s4701_s25 + $0xed8] sm:$0xff]   ;;  %v433_v6 = vld [vmem:[%s4701_s25 + $0xee0] sm:$0xff]  }
  0x35   : > { %426 = vst [vmem:[%s4706_s26 + $0x220] sm:$0xff] %v425_v4   ;;  %v437_v7 = vld [vmem:[%s4701_s25 + $0xee8] sm:$0xff]   ;;  %430 = vst [vmem:[%s4706_s26 + $0x228] sm:$0xff] %v429_v5   ;;  %v441_v8 = vld [vmem:[%s4701_s25 + $0xef0] sm:$0xff]  }
  0x36   : > { %434 = vst [vmem:[%s4706_s26 + $0x230] sm:$0xff] %v433_v6   ;;  %438 = vst [vmem:[%s4706_s26 + $0x238] sm:$0xff] %v437_v7   ;;  %v445_v9 = vld [vmem:[%s4701_s25 + $0xef8] sm:$0xff]   ;;  %v449_v10 = vld [vmem:[%s4701_s25 + $0xf00] sm:$0xff]  }
  0x37   : > { %442 = vst [vmem:[%s4706_s26 + $0x240] sm:$0xff] %v441_v8   ;;  %446 = vst [vmem:[%s4706_s26 + $0x248] sm:$0xff] %v445_v9   ;;  %v453_v11 = vld [vmem:[%s4701_s25 + $0xf08] sm:$0xff]   ;;  %v457_v12 = vld [vmem:[%s4701_s25 + $0xf10] sm:$0xff]  }
  0x38   : > { %450 = vst [vmem:[%s4706_s26 + $0x250] sm:$0xff] %v449_v10   ;;  %v461_v13 = vld [vmem:[%s4701_s25 + $0xf18] sm:$0xff]   ;;  %454 = vst [vmem:[%s4706_s26 + $0x258] sm:$0xff] %v453_v11   ;;  %v465_v14 = vld [vmem:[%s4701_s25 + $0xf20] sm:$0xff]  }
  0x39   : > { %458 = vst [vmem:[%s4706_s26 + $0x260] sm:$0xff] %v457_v12   ;;  %462 = vst [vmem:[%s4706_s26 + $0x268] sm:$0xff] %v461_v13   ;;  %v469_v15 = vld [vmem:[%s4701_s25 + $0xf28] sm:$0xff]   ;;  %v473_v16 = vld [vmem:[%s4701_s25 + $0xf30] sm:$0xff]  }
  0x3a   : > { %466 = vst [vmem:[%s4706_s26 + $0x270] sm:$0xff] %v465_v14   ;;  %470 = vst [vmem:[%s4706_s26 + $0x278] sm:$0xff] %v469_v15   ;;  %v477_v17 = vld [vmem:[%s4701_s25 + $0xf38] sm:$0xff]   ;;  %v481_v18 = vld [vmem:[%s4701_s25 + $0xf40] sm:$0xff]  }
  0x3b   : > { %474 = vst [vmem:[%s4706_s26 + $0x280] sm:$0xff] %v473_v16   ;;  %v485_v19 = vld [vmem:[%s4701_s25 + $0xf48] sm:$0xff]   ;;  %478 = vst [vmem:[%s4706_s26 + $0x288] sm:$0xff] %v477_v17   ;;  %v489_v20 = vld [vmem:[%s4701_s25 + $0xf50] sm:$0xff]  }
  0x3c   : > { %482 = vst [vmem:[%s4706_s26 + $0x290] sm:$0xff] %v481_v18   ;;  %486 = vst [vmem:[%s4706_s26 + $0x298] sm:$0xff] %v485_v19   ;;  %v493_v21 = vld [vmem:[%s4701_s25 + $0xf58] sm:$0xff]   ;;  %v497_v22 = vld [vmem:[%s4701_s25 + $0xf60] sm:$0xff]  }
  0x3d   : > { %490 = vst [vmem:[%s4706_s26 + $0x2a0] sm:$0xff] %v489_v20   ;;  %494 = vst [vmem:[%s4706_s26 + $0x2a8] sm:$0xff] %v493_v21  }
  0x3e   : > { %498 = vst [vmem:[%s4706_s26 + $0x2b0] sm:$0xff] %v497_v22  }
  0x3f PF: > { %p3467_p5 = scmp.ge.s32.totalorder %s4643_s14, 1  ;;  %p870_p6 = scmp.lt.s32.totalorder %s4643_s14, 9 }
  0x41   : > { %p871_p7 = pnand %p3467_p5, %p870_p6 }
  0x43   : > { %874 = sbr.rel (%p871_p7) target bundleno = 675 (0x2a3), region = 69 }
  0x4a   : > { %v4524_v23 = vld [vmem:[%s5657_s1] sm:$0xff]   ;;  %v5660_v24 = vmov 0.0   ;;  %v4525_v25 = vld [vmem:[%s5657_s1 + $0x8] sm:$0xff]   ;;  %s877_s4 = sand.u32 1, %s4635_s12   ;;  %vm4646_vm0 = vmmov 0   ;;  %v4526_v26 = vld [vmem:[%s5657_s1 + $0x10] sm:$0xff]  }
  0x4b   : > { %4084 = vmatprep.subr.bf16.mxu0 %v5660_v24  ;;  %4480 = vmatprep.subr.bf16.mxu1 %v5660_v24  ;;  %s4497_s5 = smul.u32 696, %s877_s4  ;;  %v4527_v27 = vld [vmem:[%s5657_s1 + $0x18] sm:$0xff]   ;;  %v4528_v28 = vld [vmem:[%s5657_s1 + $0x20] sm:$0xff]   ;;  %v4529_v29 = vld [vmem:[%s5657_s1 + $0x28] sm:$0xff]  }
  0x4c   : > { %4085 = vmatpush3.bf16.msra.mxu0 %v4524_v23  ;;  %4488 = vmatpush3.bf16.msra.mxu1 %v4524_v23  ;;  %v4530_v30 = vld [vmem:[%s5657_s1 + $0x30] sm:$0xff]   ;;  %v4531_v31 = vld [vmem:[%s5657_s1 + $0x38] sm:$0xff]   ;;  %s5323_s26 = smul.u32 58, %s3462_s15 }
  0x4d   : > { %4086 = vmatprep.subr.bf16.mxu0 %v5660_v24  ;;  %4481 = vmatprep.subr.bf16.mxu1 %v5660_v24  ;;  %s4901_s8 = scalar_lea.vmem [#allocation2], %s4497_s5 }
  0x4e   : > { %4100 = vmatprep.mubr.msk.bf16.mxu0 %vm4646_vm0, %v5660_v24  ;;  %4160 = vmatprep.mubr.msk.bf16.mxu1 %vm4646_vm0, %v5660_v24  ;;  %v4532_v32 = vld [vmem:[%s4901_s8] sm:$0xff]   ;;  %v4533_v33 = vld [vmem:[%s4901_s8 + $0x78] sm:$0xff]   ;;  %v4534_v34 = vld [vmem:[%s4901_s8 + $0x8] sm:$0xff]   ;;  %p902_p8 = scmp.lt.s32.totalorder %s5323_s26, 463 }
  0x4f   : > { %v4535_v35 = vld [vmem:[%s4901_s8 + $0x80] sm:$0xff]   ;;  %v4536_v36 = vld [vmem:[%s4901_s8 + $0x10] sm:$0xff]   ;;  %v4537_v37 = vld [vmem:[%s4901_s8 + $0x88] sm:$0xff]  }
  0x50   : > { %4087 = vmatpush3.bf16.msra.mxu0 %v4525_v25  ;;  %4489 = vmatpush3.bf16.msra.mxu1 %v4525_v25  ;;  %v4538_v38 = vld [vmem:[%s4901_s8 + $0x18] sm:$0xff]   ;;  %v4539_v39 = vld [vmem:[%s4901_s8 + $0x90] sm:$0xff]   ;;  %v4540_v40 = vld [vmem:[%s4901_s8 + $0x20] sm:$0xff]   ;;  %s5697_s26 = smov (!%p902_p8, %s5323_s26), 463 }
  0x51   : > { %4088 = vmatprep.subr.bf16.mxu0 %v5660_v24  ;;  %4482 = vmatprep.subr.bf16.mxu1 %v5660_v24  ;;  %v4541_v41 = vld [vmem:[%s4901_s8 + $0x98] sm:$0xff]   ;;  %v4542_v42 = vld [vmem:[%s4901_s8 + $0x28] sm:$0xff]   ;;  %v4543_v43 = vld [vmem:[%s4901_s8 + $0xa0] sm:$0xff]   ;;  %s3468_s14 = sshll.u32 %s5697_s26, 2 }
  0x52   : > { %v4544_v44 = vld [vmem:[%s4901_s8 + $0x30] sm:$0xff]   ;;  %v4545_v45 = vld [vmem:[%s4901_s8 + $0xa8] sm:$0xff]   ;;  %v4546_v46 = vld [vmem:[%s4901_s8 + $0x38] sm:$0xff]   ;;  %s5363_s28 = scalar_lea.vmem %s5659_s3, %s3468_s14 }
  0x53   : > { %v4547_v47 = vld [vmem:[%s4901_s8 + $0xb0] sm:$0xff]   ;;  %v4548_v48 = vld [vmem:[%s4901_s8 + $0x40] sm:$0xff]   ;;  %v4549_v49 = vld [vmem:[%s4901_s8 + $0xb8] sm:$0xff]  }
  0x54   : > { %4089 = vmatpush3.bf16.msra.mxu0 %v4526_v26  ;;  %4490 = vmatpush3.bf16.msra.mxu1 %v4526_v26  ;;  %v4550_v50 = vld [vmem:[%s4901_s8 + $0x48] sm:$0xff]   ;;  %v4551_v51 = vld [vmem:[%s4901_s8 + $0xc0] sm:$0xff]   ;;  %v4552_v52 = vld [vmem:[%s4901_s8 + $0x50] sm:$0xff]  }
  0x55   : > { %4090 = vmatprep.subr.bf16.mxu0 %v5660_v24  ;;  %4483 = vmatprep.subr.bf16.mxu1 %v5660_v24  ;;  %v4553_v53 = vld [vmem:[%s4901_s8 + $0xc8] sm:$0xff]   ;;  %v4554_v54 = vld [vmem:[%s4901_s8 + $0x58] sm:$0xff]   ;;  %v4555_v55 = vld [vmem:[%s4901_s8 + $0xd0] sm:$0xff]  }
  0x56   : > { %v4556_v56 = vld [vmem:[%s4901_s8 + $0x60] sm:$0xff]   ;;  %v4557_v57 = vld [vmem:[%s4901_s8 + $0xd8] sm:$0xff]   ;;  %v4558_v58 = vld [vmem:[%s4901_s8 + $0x68] sm:$0xff]  }
  0x57   : > { %v4559_v59 = vld [vmem:[%s4901_s8 + $0xe0] sm:$0xff]   ;;  %v4560_v60 = vld [vmem:[%s4901_s8 + $0x70] sm:$0xff]   ;;  %v4561_v61 = vld [vmem:[%s4901_s8 + $0xe8] sm:$0xff]  }
  0x58   : > { %4091 = vmatpush3.bf16.msra.mxu0 %v4527_v27  ;;  %4491 = vmatpush3.bf16.msra.mxu1 %v4527_v27  ;;  %v4562_v62 = vld [vmem:[%s4901_s8 + $0xf0] sm:$0xff]   ;;  %v4564_v0 = vld [vmem:[%s4901_s8 + $0xf8] sm:$0xff]   ;;  %v4566_v2 = vld [vmem:[%s4901_s8 + $0x100] sm:$0xff]  }
  0x59   : > { %4092 = vmatprep.subr.bf16.mxu0 %v5660_v24  ;;  %4484 = vmatprep.subr.bf16.mxu1 %v5660_v24  ;;  %v4563_v63 = vld [vmem:[%s4901_s8 + $0x1d0] sm:$0xff]   ;;  %v4565_v1 = vld [vmem:[%s4901_s8 + $0x1d8] sm:$0xff]   ;;  %v4567_v3 = vld [vmem:[%s4901_s8 + $0x1e0] sm:$0xff]  }
  0x5a   : > { %v4568_v4 = vld [vmem:[%s4901_s8 + $0x108] sm:$0xff]   ;;  %v4570_v6 = vld [vmem:[%s4901_s8 + $0x110] sm:$0xff]   ;;  %v4572_v8 = vld [vmem:[%s4901_s8 + $0x118] sm:$0xff]  }
  0x5b   : > { %v4569_v5 = vld [vmem:[%s4901_s8 + $0x1e8] sm:$0xff]   ;;  %v4571_v7 = vld [vmem:[%s4901_s8 + $0x1f0] sm:$0xff]   ;;  %v4573_v9 = vld [vmem:[%s4901_s8 + $0x1f8] sm:$0xff]  }
  0x5c   : > { %4093 = vmatpush3.bf16.msra.mxu0 %v4528_v28  ;;  %4492 = vmatpush3.bf16.msra.mxu1 %v4528_v28  ;;  %v4574_v10 = vld [vmem:[%s4901_s8 + $0x120] sm:$0xff]   ;;  %v4576_v12 = vld [vmem:[%s4901_s8 + $0x128] sm:$0xff]   ;;  %v4578_v14 = vld [vmem:[%s4901_s8 + $0x130] sm:$0xff]  }
  0x5d   : > { %4094 = vmatprep.subr.bf16.mxu0 %v5660_v24  ;;  %4485 = vmatprep.subr.bf16.mxu1 %v5660_v24  ;;  %v4575_v11 = vld [vmem:[%s4901_s8 + $0x200] sm:$0xff]   ;;  %v4577_v13 = vld [vmem:[%s4901_s8 + $0x208] sm:$0xff]   ;;  %v4579_v15 = vld [vmem:[%s4901_s8 + $0x210] sm:$0xff]  }
  0x5e   : > { %v4580_v16 = vld [vmem:[%s4901_s8 + $0x138] sm:$0xff]   ;;  %v4582_v18 = vld [vmem:[%s4901_s8 + $0x140] sm:$0xff]   ;;  %v4584_v20 = vld [vmem:[%s4901_s8 + $0x148] sm:$0xff]  }
  0x5f   : > { %v4581_v17 = vld [vmem:[%s4901_s8 + $0x218] sm:$0xff]   ;;  %v4583_v19 = vld [vmem:[%s4901_s8 + $0x220] sm:$0xff]   ;;  %v4585_v21 = vld [vmem:[%s4901_s8 + $0x228] sm:$0xff]  }
  0x60   : > { %4095 = vmatpush3.bf16.msra.mxu0 %v4529_v29  ;;  %4493 = vmatpush3.bf16.msra.mxu1 %v4529_v29 }
  0x61   : > { %4096 = vmatprep.subr.bf16.mxu0 %v5660_v24  ;;  %4486 = vmatprep.subr.bf16.mxu1 %v5660_v24 }
  0x64   : > { %4097 = vmatpush3.bf16.msra.mxu0 %v4530_v30  ;;  %4494 = vmatpush3.bf16.msra.mxu1 %v4530_v30 }
  0x65   : > { %4098 = vmatprep.subr.bf16.mxu0 %v5660_v24  ;;  %4487 = vmatprep.subr.bf16.mxu1 %v5660_v24 }
  0x68   : > { %4099 = vmatpush3.bf16.msra.mxu0 %v4531_v31  ;;  %4495 = vmatpush3.bf16.msra.mxu1 %v4531_v31 }
  0x69   : > { %4348 = vmatprep.subr.bf16.mxu0 %v5660_v24  ;;  %4216 = vmatprep.subr.bf16.mxu1 %v5660_v24 }
  0x6b   : > { %4101 = vmatmul.mubr.bf16.vlgmr.msra.gmra.mrb[0].mxu0 %v4532_v32  ;;  %4161 = vmatmul.mubr.bf16.vlgmr.msra.gmra.mrb[0].mxu1 %v4533_v33 }
  0x6c   : > { %4349 = vmatpush3.bf16.msra.mxu0 %v4524_v23  ;;  %4104 = vmatprep.mubr.msk.bf16.mxu0 %vm4646_vm0, %v5660_v24 }
  0x6d   : > { %4164 = vmatprep.mubr.msk.bf16.mxu1 %vm4646_vm0, %v5660_v24  ;;  %4217 = vmatpush3.bf16.msra.mxu1 %v4524_v23 }
  0x6e   : > { %4350 = vmatprep.subr.bf16.mxu0 %v5660_v24  ;;  %4218 = vmatprep.subr.bf16.mxu1 %v5660_v24 }
  0x70   : > { %4351 = vmatpush3.bf16.msra.mxu0 %v4525_v25 }
  0x71   : > { %4219 = vmatpush3.bf16.msra.mxu1 %v4525_v25  ;;  %4352 = vmatprep.subr.bf16.mxu0 %v5660_v24 }
  0x72   : > { %4220 = vmatprep.subr.bf16.mxu1 %v5660_v24 }
  0x73   : > { %4105 = vmatmul.mubr.bf16.gmra.mrb[4].mxu0 %v4534_v34  ;;  %4165 = vmatmul.mubr.bf16.gmra.mrb[4].mxu1 %v4535_v35 }
  0x74   : > { %4108 = vmatprep.mubr.msk.bf16.mxu0 %vm4646_vm0, %v5660_v24  ;;  %4168 = vmatprep.mubr.msk.bf16.mxu1 %vm4646_vm0, %v5660_v24 }
  0x75   : > { %4353 = vmatpush3.bf16.msra.mxu0 %v4526_v26  ;;  %4221 = vmatpush3.bf16.msra.mxu1 %v4526_v26 }
  0x76   : > { %4354 = vmatprep.subr.bf16.mxu0 %v5660_v24  ;;  %4222 = vmatprep.subr.bf16.mxu1 %v5660_v24 }
  0x79   : > { %4355 = vmatpush3.bf16.msra.mxu0 %v4527_v27  ;;  %4223 = vmatpush3.bf16.msra.mxu1 %v4527_v27  ;;  %v4586_v27 = vld [vmem:[%s4901_s8 + $0x150] sm:$0xff]  }
  0x7a   : > { %4356 = vmatprep.subr.bf16.mxu0 %v5660_v24  ;;  %4224 = vmatprep.subr.bf16.mxu1 %v5660_v24 }
  0x7b   : > { %4109 = vmatmul.mubr.bf16.gmra.mrb[8].mxu0 %v4536_v36  ;;  %4169 = vmatmul.mubr.bf16.gmra.mrb[8].mxu1 %v4537_v37  ;;  %v4588_v37 = vld [vmem:[%s4901_s8 + $0x158] sm:$0xff]  }
  0x7c   : > { %4112 = vmatprep.mubr.msk.bf16.mxu0 %vm4646_vm0, %v5660_v24  ;;  %4172 = vmatprep.mubr.msk.bf16.mxu1 %vm4646_vm0, %v5660_v24 }
  0x7d   : > { %4357 = vmatpush3.bf16.msra.mxu0 %v4528_v28  ;;  %4225 = vmatpush3.bf16.msra.mxu1 %v4528_v28  ;;  %v4587_v28 = vld [vmem:[%s4901_s8 + $0x230] sm:$0xff]  }
  0x7e   : > { %4358 = vmatprep.subr.bf16.mxu0 %v5660_v24  ;;  %4226 = vmatprep.subr.bf16.mxu1 %v5660_v24 }
  0x81   : > { %4359 = vmatpush3.bf16.msra.mxu0 %v4529_v29  ;;  %4227 = vmatpush3.bf16.msra.mxu1 %v4529_v29 }
  0x82   : > { %4228 = vmatprep.subr.bf16.mxu1 %v5660_v24  ;;  %4360 = vmatprep.subr.bf16.mxu0 %v5660_v24 }
  0x83   : > { %4113 = vmatmul.mubr.bf16.gmra.mrb[12].mxu0 %v4538_v38  ;;  %4173 = vmatmul.mubr.bf16.gmra.mrb[12].mxu1 %v4539_v39  ;;  %v4589_v38 = vld [vmem:[%s4901_s8 + $0x238] sm:$0xff]  }
  0x84   : > { %4116 = vmatprep.mubr.msk.bf16.mxu0 %vm4646_vm0, %v5660_v24  ;;  %4176 = vmatprep.mubr.msk.bf16.mxu1 %vm4646_vm0, %v5660_v24 }
  0x85   : > { %4229 = vmatpush3.bf16.msra.mxu1 %v4530_v30  ;;  %4361 = vmatpush3.bf16.msra.mxu0 %v4530_v30 }
  0x86   : > { %4230 = vmatprep.subr.bf16.mxu1 %v5660_v24  ;;  %4362 = vmatprep.subr.bf16.mxu0 %v5660_v24 }
  0x89   : > { %4231 = vmatpush3.bf16.msra.mxu1 %v4531_v31  ;;  %4363 = vmatpush3.bf16.msra.mxu0 %v4531_v31 }
  0x8b   : > { %4117 = vmatmul.mubr.bf16.gmra.mrb[16].mxu0 %v4540_v40  ;;  %4177 = vmatmul.mubr.bf16.gmra.mrb[16].mxu1 %v4541_v41 }
  0x8c   : > { %4120 = vmatprep.mubr.msk.bf16.mxu0 %vm4646_vm0, %v5660_v24  ;;  %4180 = vmatprep.mubr.msk.bf16.mxu1 %vm4646_vm0, %v5660_v24 }
  0x93   : > { %4121 = vmatmul.mubr.bf16.gmra.mrb[20].mxu0 %v4542_v42  ;;  %4181 = vmatmul.mubr.bf16.gmra.mrb[20].mxu1 %v4543_v43 }
  0x94   : > { %4124 = vmatprep.mubr.msk.bf16.mxu0 %vm4646_vm0, %v5660_v24  ;;  %4184 = vmatprep.mubr.msk.bf16.mxu1 %vm4646_vm0, %v5660_v24 }
  0x9b   : > { %4125 = vmatmul.mubr.bf16.gmra.mrb[24].mxu0 %v4544_v44  ;;  %4185 = vmatmul.mubr.bf16.gmra.mrb[24].mxu1 %v4545_v45 }
  0x9c   : > { %4128 = vmatprep.mubr.msk.bf16.mxu0 %vm4646_vm0, %v5660_v24  ;;  %4188 = vmatprep.mubr.msk.bf16.mxu1 %vm4646_vm0, %v5660_v24 }
  0xa3   : > { %4129 = vmatmul.mubr.bf16.gmra.mrb[28].mxu0 %v4546_v46  ;;  %4189 = vmatmul.mubr.bf16.gmra.mrb[28].mxu1 %v4547_v47  ;;  %v4590_v47 = vld [vmem:[%s4901_s8 + $0x160] sm:$0xff]  }
  0xa4   : > { %4132 = vmatprep.mubr.msk.bf16.mxu0 %vm4646_vm0, %v5660_v24  ;;  %4192 = vmatprep.mubr.msk.bf16.mxu1 %vm4646_vm0, %v5660_v24 }
  0xab   : > { %4133 = vmatmul.mubr.bf16.gmra.mrb[32].mxu0 %v4548_v48  ;;  %4193 = vmatmul.mubr.bf16.gmra.mrb[32].mxu1 %v4549_v49  ;;  %v4591_v48 = vld [vmem:[%s4901_s8 + $0x240] sm:$0xff]  }
  0xac   : > { %4136 = vmatprep.mubr.msk.bf16.mxu0 %vm4646_vm0, %v5660_v24  ;;  %4196 = vmatprep.mubr.msk.bf16.mxu1 %vm4646_vm0, %v5660_v24 }
  0xb3   : > { %4137 = vmatmul.mubr.bf16.gmra.mrb[36].mxu0 %v4550_v50  ;;  %4197 = vmatmul.mubr.bf16.gmra.mrb[36].mxu1 %v4551_v51 }
  0xb4   : > { %4140 = vmatprep.mubr.msk.bf16.mxu0 %vm4646_vm0, %v5660_v24  ;;  %4200 = vmatprep.mubr.msk.bf16.mxu1 %vm4646_vm0, %v5660_v24 }
  0xbb   : > { %4141 = vmatmul.mubr.bf16.gmra.mrb[40].mxu0 %v4552_v52  ;;  %4201 = vmatmul.mubr.bf16.gmra.mrb[40].mxu1 %v4553_v53 }
  0xbc   : > { %4144 = vmatprep.mubr.msk.bf16.mxu0 %vm4646_vm0, %v5660_v24  ;;  %4204 = vmatprep.mubr.msk.bf16.mxu1 %vm4646_vm0, %v5660_v24 }
  0xc3   : > { %4145 = vmatmul.mubr.bf16.gmra.mrb[44].mxu0 %v4554_v54  ;;  %4205 = vmatmul.mubr.bf16.gmra.mrb[44].mxu1 %v4555_v55 }
  0xc4   : > { %4148 = vmatprep.mubr.msk.bf16.mxu0 %vm4646_vm0, %v5660_v24  ;;  %4208 = vmatprep.mubr.msk.bf16.mxu1 %vm4646_vm0, %v5660_v24 }
  0xcb   : > { %4149 = vmatmul.mubr.bf16.gmra.mrb[48].mxu0 %v4556_v56  ;;  %4209 = vmatmul.mubr.bf16.gmra.mrb[48].mxu1 %v4557_v57  ;;  %v4592_v57 = vld [vmem:[%s4901_s8 + $0x168] sm:$0xff]  }
  0xcc   : > { %4152 = vmatprep.mubr.msk.bf16.mxu0 %vm4646_vm0, %v5660_v24  ;;  %4212 = vmatprep.mubr.msk.bf16.mxu1 %vm4646_vm0, %v5660_v24 }
  0xd3   : > { %4153 = vmatmul.mubr.bf16.gmra.mrb[52].mxu0 %v4558_v58  ;;  %4213 = vmatmul.mubr.bf16.gmra.mrb[52].mxu1 %v4559_v59  ;;  %v4593_v58 = vld [vmem:[%s4901_s8 + $0x248] sm:$0xff]  }
  0xd4   : > { %4156 = vmatprep.mubr.msk.bf16.mxu0 %vm4646_vm0, %v5660_v24  ;;  %4232 = vmatprep.mubr.msk.bf16.mxu1 %vm4646_vm0, %v5660_v24 }
  0xdb   : > { %4157 = vmatmul.mubr.bf16.gmra.mrb[56].mxu0 %v4560_v60  ;;  %4233 = vmatmul.mubr.bf16.vlgmr.msra.gmra.mrb[56].mxu1 %v4561_v61 }
  0xdc   : > { %4236 = vmatprep.mubr.msk.bf16.mxu1 %vm4646_vm0, %v5660_v24  ;;  %4364 = vmatprep.mubr.msk.bf16.mxu0 %vm4646_vm0, %v5660_v24 }
  0xe3   : > { %4237 = vmatmul.mubr.bf16.gmra.mrb[60].mxu1 %v4562_v62  ;;  %4365 = vmatmul.mubr.bf16.vlgmr.msra.gmra.mrb[60].mxu0 %v4563_v63 }
  0xe4   : > { %4240 = vmatprep.mubr.msk.bf16.mxu1 %vm4646_vm0, %v5660_v24  ;;  %4368 = vmatprep.mubr.msk.bf16.mxu0 %vm4646_vm0, %v5660_v24 }
  0xeb   : > { %4241 = vmatmul.mubr.bf16.gmra.mrb[64].mxu1 %v4564_v0  ;;  %4369 = vmatmul.mubr.bf16.gmra.mrb[64].mxu0 %v4565_v1 }
  0xec   : > { %4244 = vmatprep.mubr.msk.bf16.mxu1 %vm4646_vm0, %v5660_v24  ;;  %4372 = vmatprep.mubr.msk.bf16.mxu0 %vm4646_vm0, %v5660_v24 }
  0xf3   : > { %4245 = vmatmul.mubr.bf16.gmra.mrb[68].mxu1 %v4566_v2  ;;  %4373 = vmatmul.mubr.bf16.gmra.mrb[68].mxu0 %v4567_v3  ;;  %v4594_v3 = vld [vmem:[%s4901_s8 + $0x170] sm:$0xff]  }
  0xf4   : > { %4248 = vmatprep.mubr.msk.bf16.mxu1 %vm4646_vm0, %v5660_v24  ;;  %4376 = vmatprep.mubr.msk.bf16.mxu0 %vm4646_vm0, %v5660_v24 }
  0xfb   : > { %4249 = vmatmul.mubr.bf16.gmra.mrb[72].mxu1 %v4568_v4  ;;  %4377 = vmatmul.mubr.bf16.gmra.mrb[72].mxu0 %v4569_v5  ;;  %v4595_v4 = vld [vmem:[%s4901_s8 + $0x250] sm:$0xff]  }
  0xfc   : > { %4252 = vmatprep.mubr.msk.bf16.mxu1 %vm4646_vm0, %v5660_v24  ;;  %4380 = vmatprep.mubr.msk.bf16.mxu0 %vm4646_vm0, %v5660_v24 }
 0x103   : > { %4253 = vmatmul.mubr.bf16.gmra.mrb[76].mxu1 %v4570_v6  ;;  %4381 = vmatmul.mubr.bf16.gmra.mrb[76].mxu0 %v4571_v7 }
 0x104   : > { %4256 = vmatprep.mubr.msk.bf16.mxu1 %vm4646_vm0, %v5660_v24  ;;  %4384 = vmatprep.mubr.msk.bf16.mxu0 %vm4646_vm0, %v5660_v24 }
 0x10b   : > { %4257 = vmatmul.mubr.bf16.gmra.mrb[80].mxu1 %v4572_v8  ;;  %4385 = vmatmul.mubr.bf16.gmra.mrb[80].mxu0 %v4573_v9 }
 0x10c   : > { %4260 = vmatprep.mubr.msk.bf16.mxu1 %vm4646_vm0, %v5660_v24  ;;  %4388 = vmatprep.mubr.msk.bf16.mxu0 %vm4646_vm0, %v5660_v24 }
 0x113   : > { %4261 = vmatmul.mubr.bf16.gmra.mrb[84].mxu1 %v4574_v10  ;;  %4389 = vmatmul.mubr.bf16.gmra.mrb[84].mxu0 %v4575_v11 }
 0x114   : > { %4264 = vmatprep.mubr.msk.bf16.mxu1 %vm4646_vm0, %v5660_v24  ;;  %4392 = vmatprep.mubr.msk.bf16.mxu0 %vm4646_vm0, %v5660_v24 }
 0x11b   : > { %4265 = vmatmul.mubr.bf16.gmra.mrb[88].mxu1 %v4576_v12  ;;  %4393 = vmatmul.mubr.bf16.gmra.mrb[88].mxu0 %v4577_v13  ;;  %v4596_v13 = vld [vmem:[%s4901_s8 + $0x178] sm:$0xff]  }
 0x11c   : > { %4268 = vmatprep.mubr.msk.bf16.mxu1 %vm4646_vm0, %v5660_v24  ;;  %4396 = vmatprep.mubr.msk.bf16.mxu0 %vm4646_vm0, %v5660_v24 }
 0x123   : > { %4269 = vmatmul.mubr.bf16.gmra.mrb[92].mxu1 %v4578_v14  ;;  %4397 = vmatmul.mubr.bf16.gmra.mrb[92].mxu0 %v4579_v15  ;;  %v4597_v14 = vld [vmem:[%s4901_s8 + $0x258] sm:$0xff]  }
 0x124   : > { %4272 = vmatprep.mubr.msk.bf16.mxu1 %vm4646_vm0, %v5660_v24  ;;  %4400 = vmatprep.mubr.msk.bf16.mxu0 %vm4646_vm0, %v5660_v24 }
 0x12b   : > { %4273 = vmatmul.mubr.bf16.gmra.mrb[96].mxu1 %v4580_v16  ;;  %4401 = vmatmul.mubr.bf16.gmra.mrb[96].mxu0 %v4581_v17 }
 0x12c   : > { %4276 = vmatprep.mubr.msk.bf16.mxu1 %vm4646_vm0, %v5660_v24  ;;  %4404 = vmatprep.mubr.msk.bf16.mxu0 %vm4646_vm0, %v5660_v24 }
 0x133   : > { %4277 = vmatmul.mubr.bf16.gmra.mrb[100].mxu1 %v4582_v18  ;;  %4405 = vmatmul.mubr.bf16.gmra.mrb[100].mxu0 %v4583_v19 }
 0x134   : > { %4280 = vmatprep.mubr.msk.bf16.mxu1 %vm4646_vm0, %v5660_v24  ;;  %4408 = vmatprep.mubr.msk.bf16.mxu0 %vm4646_vm0, %v5660_v24 }
 0x13b   : > { %4281 = vmatmul.mubr.bf16.gmra.mrb[104].mxu1 %v4584_v20  ;;  %4409 = vmatmul.mubr.bf16.gmra.mrb[104].mxu0 %v4585_v21 }
 0x13c   : > { %4284 = vmatprep.mubr.msk.bf16.mxu1 %vm4646_vm0, %v5660_v24  ;;  %4412 = vmatprep.mubr.msk.bf16.mxu0 %vm4646_vm0, %v5660_v24 }
 0x13e   : > { %v5106_v22 = vpop.f32.mrb[0].mxu0  ;;  %v5108_v23 = vpop.f32.mrb[0].mxu1 }
 0x13f   : > { %v4102_v25 = vpop.f32.mrb[1].mxu0  ;;  %v4162_v26 = vpop.f32.mrb[1].mxu1 }
 0x140   : > { %v5112_v29 = vpop.f32.mrb[2].mxu0  ;;  %v5114_v30 = vpop.f32.mrb[2].mxu1  ;;  %v4598_v26 = vld [vmem:[%s4901_s8 + $0x180] sm:$0xff]  }
 0x141   : > { %v4103_v31 = vpop.f32.mrb[3].mxu0  ;;  %v4163_v32 = vpop.f32.mrb[3].mxu1 }
 0x143   : > { %4285 = vmatmul.mubr.bf16.gmra.mrb[108].mxu1 %v4586_v27  ;;  %4413 = vmatmul.mubr.bf16.gmra.mrb[108].mxu0 %v4587_v28  ;;  %v4599_v27 = vld [vmem:[%s4901_s8 + $0x260] sm:$0xff]  }
 0x144   : > { %4288 = vmatprep.mubr.msk.bf16.mxu1 %vm4646_vm0, %v5660_v24  ;;  %4416 = vmatprep.mubr.msk.bf16.mxu0 %vm4646_vm0, %v5660_v24 }
 0x146   : > { %v5120_v33 = vpop.f32.mrb[4].mxu0  ;;  %v5122_v34 = vpop.f32.mrb[4].mxu1 }
 0x147   : > { %v4106_v35 = vpop.f32.mrb[5].mxu0  ;;  %v4166_v36 = vpop.f32.mrb[5].mxu1 }
 0x148   : > { %v5126_v39 = vpop.f32.mrb[6].mxu0  ;;  %v5128_v40 = vpop.f32.mrb[6].mxu1 }
 0x149   : > { %v4107_v41 = vpop.f32.mrb[7].mxu0  ;;  %v4167_v42 = vpop.f32.mrb[7].mxu1 }
 0x14a   : > { %v4600_v42 = vld [vmem:[%s4901_s8 + $0x188] sm:$0xff]  }
 0x14b   : > { %4289 = vmatmul.mubr.bf16.gmra.mrb[112].mxu1 %v4588_v37  ;;  %4417 = vmatmul.mubr.bf16.gmra.mrb[112].mxu0 %v4589_v38 }
 0x14c   : > { %4292 = vmatprep.mubr.msk.bf16.mxu1 %vm4646_vm0, %v5660_v24  ;;  %4420 = vmatprep.mubr.msk.bf16.mxu0 %vm4646_vm0, %v5660_v24 }
 0x14e   : > { %v5134_v43 = vpop.f32.mrb[8].mxu0  ;;  %v5136_v44 = vpop.f32.mrb[8].mxu1 }
 0x14f   : > { %v4110_v45 = vpop.f32.mrb[9].mxu0  ;;  %v4170_v46 = vpop.f32.mrb[9].mxu1 }
 0x150   : > { %v5140_v49 = vpop.f32.mrb[10].mxu0  ;;  %v5142_v50 = vpop.f32.mrb[10].mxu1  ;;  %v4601_v45 = vld [vmem:[%s4901_s8 + $0x268] sm:$0xff]  }
 0x151   : > { %v4111_v51 = vpop.f32.mrb[11].mxu0  ;;  %v4171_v52 = vpop.f32.mrb[11].mxu1 }
 0x153   : > { %4293 = vmatmul.mubr.bf16.gmra.mrb[116].mxu1 %v4590_v47  ;;  %4421 = vmatmul.mubr.bf16.gmra.mrb[116].mxu0 %v4591_v48 }
 0x154   : > { %4296 = vmatprep.mubr.msk.bf16.mxu1 %vm4646_vm0, %v5660_v24  ;;  %4424 = vmatprep.mubr.msk.bf16.mxu0 %vm4646_vm0, %v5660_v24 }
 0x156   : > { %v5148_v53 = vpop.f32.mrb[12].mxu0  ;;  %v5150_v54 = vpop.f32.mrb[12].mxu1 }
 0x157   : > { %v4114_v55 = vpop.f32.mrb[13].mxu0  ;;  %v4174_v56 = vpop.f32.mrb[13].mxu1 }
 0x158   : > { %v5154_v59 = vpop.f32.mrb[14].mxu0  ;;  %v5156_v60 = vpop.f32.mrb[14].mxu1 }
 0x159   : > { %v4115_v61 = vpop.f32.mrb[15].mxu0  ;;  %v4175_v62 = vpop.f32.mrb[15].mxu1 }
 0x15a   : > { %v4603_v61 = vld [vmem:[%s4901_s8 + $0x270] sm:$0xff]  }
 0x15b   : > { %4297 = vmatmul.mubr.bf16.gmra.mrb[120].mxu1 %v4592_v57  ;;  %4425 = vmatmul.mubr.bf16.gmra.mrb[120].mxu0 %v4593_v58  ;;  %v4602_v58 = vld [vmem:[%s4901_s8 + $0x190] sm:$0xff]  }
 0x15c   : > { %4300 = vmatprep.mubr.msk.bf16.mxu1 %vm4646_vm0, %v5660_v24  ;;  %4428 = vmatprep.mubr.msk.bf16.mxu0 %vm4646_vm0, %v5660_v24 }
 0x15e   : > { %v5162_v63 = vpop.f32.mrb[16].mxu0  ;;  %v5164_v0 = vpop.f32.mrb[16].mxu1 }
 0x15f   : > { %v4118_v1 = vpop.f32.mrb[17].mxu0  ;;  %v4178_v2 = vpop.f32.mrb[17].mxu1 }
 0x160   : > { %v5168_v5 = vpop.f32.mrb[18].mxu0  ;;  %v5170_v6 = vpop.f32.mrb[18].mxu1 }
 0x161   : > { %v4119_v7 = vpop.f32.mrb[19].mxu0  ;;  %v4179_v8 = vpop.f32.mrb[19].mxu1 }
 0x163   : > { %4301 = vmatmul.mubr.bf16.gmra.mrb[124].mxu1 %v4594_v3  ;;  %4429 = vmatmul.mubr.bf16.gmra.mrb[124].mxu0 %v4595_v4 }
 0x164   : > { %4304 = vmatprep.mubr.msk.bf16.mxu1 %vm4646_vm0, %v5660_v24  ;;  %4432 = vmatprep.mubr.msk.bf16.mxu0 %vm4646_vm0, %v5660_v24 }
 0x166   : > { %v5176_v9 = vpop.f32.mrb[20].mxu0  ;;  %v5178_v10 = vpop.f32.mrb[20].mxu1 }
 0x167   : > { %v4122_v11 = vpop.f32.mrb[21].mxu0  ;;  %v4182_v12 = vpop.f32.mrb[21].mxu1 }
 0x168   : > { %v5182_v15 = vpop.f32.mrb[22].mxu0  ;;  %v5184_v16 = vpop.f32.mrb[22].mxu1  ;;  %v4604_v12 = vld [vmem:[%s4901_s8 + $0x198] sm:$0xff]  }
 0x169   : > { %v4123_v17 = vpop.f32.mrb[23].mxu0  ;;  %v4183_v18 = vpop.f32.mrb[23].mxu1 }
 0x16b   : > { %4305 = vmatmul.mubr.bf16.gmra.mrb[128].mxu1 %v4596_v13  ;;  %4433 = vmatmul.mubr.bf16.gmra.mrb[128].mxu0 %v4597_v14  ;;  %v4605_v13 = vld [vmem:[%s4901_s8 + $0x278] sm:$0xff]  }
 0x16c   : > { %4308 = vmatprep.mubr.msk.bf16.mxu1 %vm4646_vm0, %v5660_v24  ;;  %4436 = vmatprep.mubr.msk.bf16.mxu0 %vm4646_vm0, %v5660_v24 }
 0x16e   : > { %v5190_v19 = vpop.f32.mrb[24].mxu0  ;;  %v5192_v20 = vpop.f32.mrb[24].mxu1 }
 0x16f   : > { %v4126_v21 = vpop.f32.mrb[25].mxu0  ;;  %v4186_v25 = vpop.f32.mrb[25].mxu1 }
 0x170   : > { %v5196_v28 = vpop.f32.mrb[26].mxu0  ;;  %v5198_v31 = vpop.f32.mrb[26].mxu1 }
 0x171   : > { %5662 = vst [vmem:[#allocation3_spill] sm:$0xff] %v5198_v31  ;;  %v4127_v32 = vpop.f32.mrb[27].mxu0  ;;  %v4187_v35 = vpop.f32.mrb[27].mxu1 }
 0x172   : > { %v4606_v35 = vld [vmem:[%s4901_s8 + $0x1a0] sm:$0xff]  }
 0x173   : > { %4309 = vmatmul.mubr.bf16.gmra.mrb[132].mxu1 %v4598_v26  ;;  %4437 = vmatmul.mubr.bf16.gmra.mrb[132].mxu0 %v4599_v27 }
 0x174   : > { %4312 = vmatprep.mubr.msk.bf16.mxu1 %vm4646_vm0, %v5660_v24  ;;  %4440 = vmatprep.mubr.msk.bf16.mxu0 %vm4646_vm0, %v5660_v24 }
 0x176   : > { %v5204_v36 = vpop.f32.mrb[28].mxu0  ;;  %v5206_v37 = vpop.f32.mrb[28].mxu1 }
 0x177   : > { %5663 = vst [vmem:[#allocation4_spill] sm:$0xff] %v5206_v37  ;;  %v4130_v38 = vpop.f32.mrb[29].mxu0  ;;  %v4190_v41 = vpop.f32.mrb[29].mxu1 }
 0x178   : > { %v5210_v46 = vpop.f32.mrb[30].mxu0  ;;  %v5212_v47 = vpop.f32.mrb[30].mxu1  ;;  %v4607_v38 = vld [vmem:[%s4901_s8 + $0x280] sm:$0xff]  }
 0x179   : > { %5664 = vst [vmem:[#allocation5_spill] sm:$0xff] %v5212_v47  ;;  %v4131_v48 = vpop.f32.mrb[31].mxu0  ;;  %v4191_v51 = vpop.f32.mrb[31].mxu1 }
 0x17b   : > { %4313 = vmatmul.mubr.bf16.gmra.mrb[136].mxu1 %v4600_v42  ;;  %4441 = vmatmul.mubr.bf16.gmra.mrb[136].mxu0 %v4601_v45 }
 0x17c   : > { %4316 = vmatprep.mubr.msk.bf16.mxu1 %vm4646_vm0, %v5660_v24  ;;  %4444 = vmatprep.mubr.msk.bf16.mxu0 %vm4646_vm0, %v5660_v24 }
 0x17e   : > { %v5218_v52 = vpop.f32.mrb[32].mxu0  ;;  %v5220_v55 = vpop.f32.mrb[32].mxu1 }
 0x17f   : > { %5665 = vst [vmem:[#allocation6_spill] sm:$0xff] %v5220_v55  ;;  %v4134_v56 = vpop.f32.mrb[33].mxu0  ;;  %v4194_v57 = vpop.f32.mrb[33].mxu1 }
 0x180   : > { %v5224_v62 = vpop.f32.mrb[34].mxu0  ;;  %v5226_v1 = vpop.f32.mrb[34].mxu1 }
 0x181   : > { %5666 = vst [vmem:[#allocation7_spill] sm:$0xff] %v5226_v1  ;;  %v4135_v2 = vpop.f32.mrb[35].mxu0  ;;  %v4195_v3 = vpop.f32.mrb[35].mxu1  ;;  %v4616_v1 = vld [vmem:[%s4901_s8 + $0x1c8] sm:$0xff]  }
 0x182   : > { %v4609_v2 = vld [vmem:[%s4901_s8 + $0x288] sm:$0xff]  }
 0x183   : > { %4317 = vmatmul.mubr.bf16.gmra.mrb[140].mxu1 %v4602_v58  ;;  %4445 = vmatmul.mubr.bf16.gmra.mrb[140].mxu0 %v4603_v61  ;;  %v4608_v61 = vld [vmem:[%s4901_s8 + $0x1a8] sm:$0xff]  }
 0x184   : > { %4320 = vmatprep.mubr.msk.bf16.mxu1 %vm4646_vm0, %v5660_v24  ;;  %4448 = vmatprep.mubr.msk.bf16.mxu0 %vm4646_vm0, %v5660_v24 }
 0x186   : > { %v5232_v4 = vpop.f32.mrb[36].mxu0  ;;  %v5234_v7 = vpop.f32.mrb[36].mxu1 }
 0x187   : > { %5667 = vst [vmem:[#allocation8_spill] sm:$0xff] %v5234_v7  ;;  %v4138_v8 = vpop.f32.mrb[37].mxu0  ;;  %v4198_v11 = vpop.f32.mrb[37].mxu1 }
 0x188   : > { %v5238_v14 = vpop.f32.mrb[38].mxu0  ;;  %v5240_v17 = vpop.f32.mrb[38].mxu1 }
 0x189   : > { %5668 = vst [vmem:[#allocation9_spill] sm:$0xff] %v5240_v17  ;;  %v4139_v18 = vpop.f32.mrb[39].mxu0  ;;  %v4199_v21 = vpop.f32.mrb[39].mxu1 }
 0x18b   : > { %4321 = vmatmul.mubr.bf16.gmra.mrb[144].mxu1 %v4604_v12  ;;  %4449 = vmatmul.mubr.bf16.gmra.mrb[144].mxu0 %v4605_v13 }
 0x18c   : > { %4324 = vmatprep.mubr.msk.bf16.mxu1 %vm4646_vm0, %v5660_v24  ;;  %4452 = vmatprep.mubr.msk.bf16.mxu0 %vm4646_vm0, %v5660_v24 }
 0x18e   : > { %v5246_v25 = vpop.f32.mrb[40].mxu0  ;;  %v5248_v26 = vpop.f32.mrb[40].mxu1 }
 0x18f   : > { %5669 = vst [vmem:[#allocation10_spill] sm:$0xff] %v5248_v26  ;;  %v4142_v27 = vpop.f32.mrb[41].mxu0  ;;  %v4202_v32 = vpop.f32.mrb[41].mxu1 }
 0x190   : > { %v5252_v41 = vpop.f32.mrb[42].mxu0  ;;  %v5254_v42 = vpop.f32.mrb[42].mxu1  ;;  %v4610_v32 = vld [vmem:[%s4901_s8 + $0x1b0] sm:$0xff]  }
 0x191   : > { %5670 = vst [vmem:[#allocation11_spill] sm:$0xff] %v5254_v42  ;;  %v4143_v45 = vpop.f32.mrb[43].mxu0  ;;  %v4203_v48 = vpop.f32.mrb[43].mxu1 }
 0x193   : > { %4325 = vmatmul.mubr.bf16.gmra.mrb[148].mxu1 %v4606_v35  ;;  %4453 = vmatmul.mubr.bf16.gmra.mrb[148].mxu0 %v4607_v38  ;;  %v4611_v35 = vld [vmem:[%s4901_s8 + $0x290] sm:$0xff]  }
 0x194   : > { %4328 = vmatprep.mubr.msk.bf16.mxu1 %vm4646_vm0, %v5660_v24  ;;  %4456 = vmatprep.mubr.msk.bf16.mxu0 %vm4646_vm0, %v5660_v24 }
 0x196   : > { %v5260_v51 = vpop.f32.mrb[44].mxu0  ;;  %v5262_v56 = vpop.f32.mrb[44].mxu1 }
 0x197   : > { %5671 = vst [vmem:[#allocation12_spill] sm:$0xff] %v5262_v56  ;;  %v4146_v57 = vpop.f32.mrb[45].mxu0  ;;  %v4206_v58 = vpop.f32.mrb[45].mxu1 }
 0x198   : > { %v5266_v3 = vpop.f32.mrb[46].mxu0  ;;  %v5268_v8 = vpop.f32.mrb[46].mxu1 }
 0x199   : > { %5672 = vst [vmem:[#allocation13_spill] sm:$0xff] %v5268_v8  ;;  %v4147_v11 = vpop.f32.mrb[47].mxu0  ;;  %v4207_v12 = vpop.f32.mrb[47].mxu1 }
 0x19a   : > { %v4612_v12 = vld [vmem:[%s4901_s8 + $0x1b8] sm:$0xff]  }
 0x19b   : > { %4329 = vmatmul.mubr.bf16.gmra.mrb[152].mxu1 %v4608_v61  ;;  %4457 = vmatmul.mubr.bf16.gmra.mrb[152].mxu0 %v4609_v2 }
 0x19c   : > { %4332 = vmatprep.mubr.msk.bf16.mxu1 %vm4646_vm0, %v5660_v24  ;;  %4460 = vmatprep.mubr.msk.bf16.mxu0 %vm4646_vm0, %v5660_v24 }
 0x19e   : > { %v5274_v13 = vpop.f32.mrb[48].mxu0  ;;  %v5276_v18 = vpop.f32.mrb[48].mxu1 }
 0x19f   : > { %5673 = vst [vmem:[#allocation14_spill] sm:$0xff] %v5276_v18  ;;  %v4150_v21 = vpop.f32.mrb[49].mxu0  ;;  %v4210_v27 = vpop.f32.mrb[49].mxu1 }
 0x1a0   : > { %v5280_v38 = vpop.f32.mrb[50].mxu0  ;;  %v5282_v45 = vpop.f32.mrb[50].mxu1  ;;  %v4613_v21 = vld [vmem:[%s4901_s8 + $0x298] sm:$0xff]   ;;  %v5297_v27 = vld [vmem:[%s5658_s2] ss:$0 sm:$0xff] }
 0x1a1   : > { %5674 = vst [vmem:[#allocation15_spill] sm:$0xff] %v5282_v45  ;;  %v4151_v48 = vpop.f32.mrb[51].mxu0  ;;  %v4211_v57 = vpop.f32.mrb[51].mxu1  ;;  %v1254_v18 = vadd.f32 %v5297_v27, %v5120_v33 }
 0x1a3   : > { %4333 = vmatmul.mubr.bf16.gmra.mrb[156].mxu1 %v4610_v32  ;;  %4461 = vmatmul.mubr.bf16.gmra.mrb[156].mxu0 %v4611_v35  ;;  %v1536_v33 = vmul.f32 0.01, %v1254_v18  ;;  %vm1478_vm5 = vcmp.ge.f32.partialorder %v1254_v18, 0.0 }
 0x1a4   : > { %4336 = vmatprep.mubr.msk.bf16.mxu1 %vm4646_vm0, %v5660_v24  ;;  %4464 = vmatprep.mubr.msk.bf16.mxu0 %vm4646_vm0, %v5660_v24  ;;  %v1246_v24 = vadd.f32 %v5297_v27, %v5106_v22 }
 0x1a6   : > { %v5288_v58 = vpop.f32.mrb[52].mxu0  ;;  %v5290_v61 = vpop.f32.mrb[52].mxu1  ;;  %v1534_v45 = vmul.f32 0.01, %v1246_v24  ;;  %vm1476_vm1 = vcmp.ge.f32.partialorder %v1246_v24, 0.0 }
 0x1a7   : > { %5675 = vst [vmem:[#allocation16_spill] sm:$0xff] %v5290_v61  ;;  %v4154_v2 = vpop.f32.mrb[53].mxu0  ;;  %v4214_v11 = vpop.f32.mrb[53].mxu1 }
 0x1a8   : > { %v5299_v32 = vpop.f32.mrb[54].mxu0  ;;  %v5301_v35 = vpop.f32.mrb[54].mxu1  ;;  %v5677_v2 = vmov 0.0   ;;  %v1249_v11 = vadd.f32 %v5297_v27, %v5112_v29 }
 0x1a9   : > { %5676 = vst [vmem:[#allocation17_spill] sm:$0xff] %v5301_v35  ;;  %v4155_v48 = vpop.f32.mrb[55].mxu0  ;;  %v4215_v57 = vpop.f32.mrb[55].mxu1 }
 0x1aa   : > { %v1535_v42 = vmul.f32 0.01, %v1249_v11  ;;  %vm1477_vm3 = vcmp.ge.f32.partialorder %v1249_v11, 0.0 }
 0x1ab   : > { %4337 = vmatmul.mubr.bf16.gmra.mrb[160].mxu1 %v4612_v12  ;;  %4465 = vmatmul.mubr.bf16.gmra.mrb[160].mxu0 %v4613_v21  ;;  %v4614_v12 = vld [vmem:[%s4901_s8 + $0x1c0] sm:$0xff]  }
 0x1ac   : > { %4340 = vmatprep.mubr.msk.bf16.mxu1 %vm4646_vm0, %v5677_v2  ;;  %4468 = vmatprep.mubr.msk.bf16.mxu0 %vm4646_vm0, %v5677_v2  ;;  %v4615_v21 = vld [vmem:[%s4901_s8 + $0x2a0] sm:$0xff]  }
 0x1ae   : > { %v5311_v61 = vpop.f32.mrb[56].mxu0  ;;  %v1917_v35 = vpop.f32.mrb[56].mxu1 }
 0x1af   : > { %v1918_v48 = vadd.f32 %v5297_v27, %v1917_v35  ;;  %v4158_v57 = vpop.f32.mrb[57].mxu0  ;;  %v4234_v22 = vpop.f32.mrb[57].mxu1  ;;  %v1592_v35 = vsel %vm1476_vm1, %v1246_v24, %v1534_v45  ;;  %v1257_v24 = vadd.f32 %v5297_v27, %v5126_v39 }
 0x1b0   : > { %v5318_v8 = vpop.f32.mrb[58].mxu0  ;;  %v1920_v56 = vpop.f32.mrb[58].mxu1 }
 0x1b1   : > { %vm2148_vm2 = vcmp.ge.f32.partialorder %v1918_v48, 0.0  ;;  %v2206_v29 = vmul.f32 0.01, %v1918_v48  ;;  %v1921_v26 = vadd.f32 %v5297_v27, %v1920_v56  ;;  %v4159_v17 = vpop.f32.mrb[59].mxu0  ;;  %v4235_v7 = vpop.f32.mrb[59].mxu1  ;;  %vm1479_vm8 = vcmp.ge.f32.partialorder %v1257_v24, 0.0 }
 0x1b2   : > { %v1593_v17 = vsel %vm1477_vm3, %v1249_v11, %v1535_v42  ;;  %v4617_v42 = vld [vmem:[%s4901_s8 + $0x2a8] sm:$0xff]   ;;  %v5338_v11 = vsel %vm1478_vm5, %v1254_v18, %v1536_v33  ;;  %v1265_v33 = vadd.f32 %v5297_v27, %v5140_v49  ;;  %v1270_v49 = vadd.f32 %v5297_v27, %v5148_v53 }
 0x1b3   : > { %v2264_v57 = vsel %vm2148_vm2, %v1918_v48, %v2206_v29  ;;  %4341 = vmatmul.mubr.bf16.gmra.mrb[164].mxu1 %v4614_v12  ;;  %4469 = vmatmul.mubr.bf16.gmra.mrb[164].mxu0 %v4615_v21  ;;  %vm2149_vm4 = vcmp.ge.f32.partialorder %v1921_v26, 0.0  ;;  %v2207_v7 = vmul.f32 0.01, %v1921_v26  ;;  %v1262_v48 = vadd.f32 %v5297_v27, %v5134_v43 }
 0x1b4   : > { %v2322_v22 = vmax.f32 %v1592_v35, %v2264_v57  ;;  %4344 = vmatprep.mubr.msk.bf16.mxu1 %vm4646_vm0, %v5677_v2  ;;  %4472 = vmatprep.mubr.msk.bf16.mxu0 %vm4646_vm0, %v5677_v2  ;;  %vm1481_vm12 = vcmp.ge.f32.partialorder %v1265_v33, 0.0 }
 0x1b5   : > { %v2265_v12 = vsel %vm2149_vm4, %v1921_v26, %v2207_v7  ;;  %v1537_v26 = vmul.f32 0.01, %v1257_v24  ;;  %v1538_v18 = vmul.f32 0.01, %v1262_v48  ;;  %vm1480_vm10 = vcmp.ge.f32.partialorder %v1262_v48, 0.0 }
 0x1b6   : > { %v1925_v56 = vpop.f32.mrb[60].mxu1  ;;  %v2647_v45 = vpop.f32.mrb[60].mxu0  ;;  %v2323_v39 = vmax.f32 %v1593_v17, %v2265_v12 }
 0x1b7   : > { %v1926_v21 = vadd.f32 %v5297_v27, %v1925_v56  ;;  %v2648_v29 = vadd.f32 %v5297_v27, %v2647_v45  ;;  %v4238_v35 = vpop.f32.mrb[61].mxu1  ;;  %v4366_v57 = vpop.f32.mrb[61].mxu0 }
 0x1b8   : > { %v1928_v55 = vpop.f32.mrb[62].mxu1  ;;  %v2650_v47 = vpop.f32.mrb[62].mxu0 }
 0x1b9   : > { %vm2150_vm6 = vcmp.ge.f32.partialorder %v1926_v21, 0.0  ;;  %v2208_v37 = vmul.f32 0.01, %v1926_v21  ;;  %vm2878_vm7 = vcmp.ge.f32.partialorder %v2648_v29, 0.0  ;;  %v2936_v43 = vmul.f32 0.01, %v2648_v29 }
 0x1ba   : > { %v1929_v7 = vadd.f32 %v5297_v27, %v1928_v55  ;;  %v2651_v56 = vadd.f32 %v5297_v27, %v2650_v47  ;;  %v4367_v45 = vpop.f32.mrb[63].mxu0  ;;  %v4239_v35 = vpop.f32.mrb[63].mxu1 }
 0x1bb   : > { %v2266_v17 = vsel %vm2150_vm6, %v1926_v21, %v2208_v37  ;;  %v2994_v12 = vsel %vm2878_vm7, %v2648_v29, %v2936_v43  ;;  %4345 = vmatmul.mubr.bf16.gmra.mrb[168].mxu1 %v4616_v1  ;;  %4473 = vmatmul.mubr.bf16.gmra.mrb[168].mxu0 %v4617_v42  ;;  %v1595_v45 = vsel %vm1479_vm8, %v1257_v24, %v1537_v26  ;;  %v4618_v35 = vld [vmem:[%s4901_s8 + $0x2b0] sm:$0xff]  }
 0x1bc   : > { %v2324_v57 = vmax.f32 %v5338_v11, %v2266_v17  ;;  %v3052_v31 = vmax.f32 %v2322_v22, %v2994_v12  ;;  %vm2151_vm9 = vcmp.ge.f32.partialorder %v1929_v7, 0.0  ;;  %v2209_v55 = vmul.f32 0.01, %v1929_v7  ;;  %4476 = vmatprep.mubr.msk.bf16.mxu0 %vm4646_vm0, %v5677_v2 }
 0x1bd   : > { %vm2879_vm11 = vcmp.ge.f32.partialorder %v2651_v56, 0.0  ;;  %v2937_v47 = vmul.f32 0.01, %v2651_v56  ;;  %v1596_v17 = vsel %vm1480_vm10, %v1262_v48, %v1538_v18  ;;  %vm1482_vm0 = vcmp.ge.f32.partialorder %v1270_v49, 0.0 }
 0x1be   : > { %v2267_v37 = vsel %vm2151_vm9, %v1929_v7, %v2209_v55  ;;  %v1933_v1 = vpop.f32.mrb[64].mxu1  ;;  %v2655_v21 = vpop.f32.mrb[64].mxu0 }
 0x1bf   : > { %v2325_v29 = vmax.f32 %v1595_v45, %v2267_v37  ;;  %v2995_v22 = vsel %vm2879_vm11, %v2651_v56, %v2937_v47  ;;  %v1934_v42 = vadd.f32 %v5297_v27, %v1933_v1  ;;  %v2656_v11 = vadd.f32 %v5297_v27, %v2655_v21  ;;  %v4242_v2 = vpop.f32.mrb[65].mxu1  ;;  %v4370_v43 = vpop.f32.mrb[65].mxu0 }
 0x1c0   : > { %v3053_v24 = vmax.f32 %v2323_v39, %v2995_v22  ;;  %v1936_v26 = vpop.f32.mrb[66].mxu1  ;;  %v2658_v12 = vpop.f32.mrb[66].mxu0  ;;  %v1539_v56 = vmul.f32 0.01, %v1265_v33  ;;  %v1540_v45 = vmul.f32 0.01, %v1270_v49  ;;  %v1273_v37 = vadd.f32 %v5297_v27, %v5154_v59 }
 0x1c1   : > { %vm2152_vm13 = vcmp.ge.f32.partialorder %v1934_v42, 0.0  ;;  %v2210_v53 = vmul.f32 0.01, %v1934_v42  ;;  %vm2880_vm14 = vcmp.ge.f32.partialorder %v2656_v11, 0.0  ;;  %v2938_v7 = vmul.f32 0.01, %v2656_v11 }
 0x1c2   : > { %v3803_v55 = vpack.c.bf16 %v3053_v24, %v3052_v31  ;;  %v1937_v47 = vadd.f32 %v5297_v27, %v1936_v26  ;;  %v2659_v48 = vadd.f32 %v5297_v27, %v2658_v12  ;;  %v4371_v18 = vpop.f32.mrb[67].mxu0  ;;  %v4243_v39 = vpop.f32.mrb[67].mxu1  ;;  %v1597_v24 = vsel %vm1481_vm12, %v1265_v33, %v1539_v56 }
 0x1c3   : > { %v2268_v1 = vsel %vm2152_vm13, %v1934_v42, %v2210_v53  ;;  %v2996_v21 = vsel %vm2880_vm14, %v2656_v11, %v2938_v7  ;;  %4477 = vmatmul.mubr.bf16.gmra.mrb[172].mxu0 %v4618_v35  ;;  %v1278_v26 = vadd.f32 %v5297_v27, %v5162_v63  ;;  %v1598_v53 = vsel %vm1482_vm0, %v1270_v49, %v1540_v45 }
 0x1c4   : > { %3804 = vst [vmem:[%s5363_s28] sm:$0xff] %v3803_v55   ;;  %v2326_v22 = vmax.f32 %v1596_v17, %v2268_v1  ;;  %v3054_v2 = vmax.f32 %v2324_v57, %v2996_v21  ;;  %vm2153_vm15 = vcmp.ge.f32.partialorder %v1937_v47, 0.0  ;;  %v2211_v43 = vmul.f32 0.01, %v1937_v47 }
 0x1c5   : > { %vm2881_vm1 = vcmp.ge.f32.partialorder %v2659_v48, 0.0  ;;  %v2939_v31 = vmul.f32 0.01, %v2659_v48  ;;  %vm1483_vm2 = vcmp.ge.f32.partialorder %v1273_v37, 0.0  ;;  %v1281_v49 = vadd.f32 %v5297_v27, %v5168_v5 }
 0x1c6   : > { %v2269_v12 = vsel %vm2153_vm15, %v1937_v47, %v2211_v43  ;;  %v1941_v18 = vpop.f32.mrb[68].mxu1  ;;  %v2663_v39 = vpop.f32.mrb[68].mxu0  ;;  %v1541_v47 = vmul.f32 0.01, %v1273_v37  ;;  %vm1484_vm6 = vcmp.ge.f32.partialorder %v1278_v26, 0.0 }
 0x1c7   : > { %v2327_v59 = vmax.f32 %v1597_v24, %v2269_v12  ;;  %v2997_v42 = vsel %vm2881_vm1, %v2659_v48, %v2939_v31  ;;  %v1942_v11 = vadd.f32 %v5297_v27, %v1941_v18  ;;  %v2664_v35 = vadd.f32 %v5297_v27, %v2663_v39  ;;  %v4246_v57 = vpop.f32.mrb[69].mxu1  ;;  %v4374_v17 = vpop.f32.mrb[69].mxu0 }
 0x1c8   : > { %v3055_v7 = vmax.f32 %v2325_v29, %v2997_v42  ;;  %v1944_v55 = vpop.f32.mrb[70].mxu1  ;;  %v2666_v33 = vpop.f32.mrb[70].mxu0  ;;  %v1542_v24 = vmul.f32 0.01, %v1278_v26  ;;  %v1599_v42 = vsel %vm1483_vm2, %v1273_v37, %v1541_v47  ;;  %v1286_v57 = vadd.f32 %v5297_v27, %v5176_v9 }
 0x1c9   : > { %vm2154_vm3 = vcmp.ge.f32.partialorder %v1942_v11, 0.0  ;;  %v2212_v56 = vmul.f32 0.01, %v1942_v11  ;;  %vm2882_vm4 = vcmp.ge.f32.partialorder %v2664_v35, 0.0  ;;  %v2940_v63 = vmul.f32 0.01, %v2664_v35 }
 0x1ca   : > { %v3808_v1 = vpack.c.bf16 %v3055_v7, %v3054_v2  ;;  %v1945_v48 = vadd.f32 %v5297_v27, %v1944_v55  ;;  %v2667_v21 = vadd.f32 %v5297_v27, %v2666_v33  ;;  %v4375_v43 = vpop.f32.mrb[71].mxu0  ;;  %v4247_v31 = vpop.f32.mrb[71].mxu1  ;;  %vm1485_vm8 = vcmp.ge.f32.partialorder %v1281_v49, 0.0 }
 0x1cb   : > { %v2270_v29 = vsel %vm2154_vm3, %v1942_v11, %v2212_v56  ;;  %v2998_v45 = vsel %vm2882_vm4, %v2664_v35, %v2940_v63  ;;  %v1600_v56 = vsel %vm1484_vm6, %v1278_v26, %v1542_v24  ;;  %v1289_v26 = vadd.f32 %v5297_v27, %v5182_v15 }
 0x1cc   : > { %3945 = vst [vmem:[%s5363_s28 + $0x8] sm:$0xff] %v3808_v1   ;;  %v2328_v12 = vmax.f32 %v1598_v53, %v2270_v29  ;;  %v3056_v18 = vmax.f32 %v2326_v22, %v2998_v45  ;;  %vm2155_vm5 = vcmp.ge.f32.partialorder %v1945_v48, 0.0  ;;  %v2213_v39 = vmul.f32 0.01, %v1945_v48 }
 0x1cd   : > { %vm2883_vm7 = vcmp.ge.f32.partialorder %v2667_v21, 0.0  ;;  %v2941_v2 = vmul.f32 0.01, %v2667_v21  ;;  %vm1486_vm12 = vcmp.ge.f32.partialorder %v1286_v57, 0.0  ;;  %vm1487_vm14 = vcmp.ge.f32.partialorder %v1289_v26, 0.0 }
 0x1ce   : > { %v2271_v17 = vsel %vm2155_vm5, %v1945_v48, %v2213_v39  ;;  %v1949_v7 = vpop.f32.mrb[72].mxu1  ;;  %v2671_v55 = vpop.f32.mrb[72].mxu0  ;;  %v1543_v48 = vmul.f32 0.01, %v1281_v49  ;;  %v1544_v39 = vmul.f32 0.01, %v1286_v57 }
 0x1cf   : > { %v2329_v33 = vmax.f32 %v1599_v42, %v2271_v17  ;;  %v2999_v5 = vsel %vm2883_vm7, %v2667_v21, %v2941_v2  ;;  %v1950_v11 = vadd.f32 %v5297_v27, %v1949_v7  ;;  %v2672_v35 = vadd.f32 %v5297_v27, %v2671_v55  ;;  %v4250_v22 = vpop.f32.mrb[73].mxu1  ;;  %v4378_v53 = vpop.f32.mrb[73].mxu0 }
 0x1d0   : > { %v3057_v63 = vmax.f32 %v2327_v59, %v2999_v5  ;;  %v1952_v1 = vpop.f32.mrb[74].mxu1  ;;  %v2674_v37 = vpop.f32.mrb[74].mxu0  ;;  %v1601_v7 = vsel %vm1485_vm8, %v1281_v49, %v1543_v48  ;;  %v1294_v55 = vadd.f32 %v5297_v27, %v5190_v19  ;;  %v1545_v48 = vmul.f32 0.01, %v1289_v26 }
 0x1d1   : > { %vm2156_vm9 = vcmp.ge.f32.partialorder %v1950_v11, 0.0  ;;  %v2214_v47 = vmul.f32 0.01, %v1950_v11  ;;  %vm2884_vm10 = vcmp.ge.f32.partialorder %v2672_v35, 0.0  ;;  %v2942_v9 = vmul.f32 0.01, %v2672_v35 }
 0x1d2   : > { %v3813_v43 = vpack.c.bf16 %v3057_v63, %v3056_v18  ;;  %v1953_v21 = vadd.f32 %v5297_v27, %v1952_v1  ;;  %v2675_v31 = vadd.f32 %v5297_v27, %v2674_v37  ;;  %v4379_v29 = vpop.f32.mrb[75].mxu0  ;;  %v4251_v45 = vpop.f32.mrb[75].mxu1  ;;  %v1602_v1 = vsel %vm1486_vm12, %v1286_v57, %v1544_v39 }
 0x1d3   : > { %v2272_v59 = vsel %vm2156_vm9, %v1950_v11, %v2214_v47  ;;  %v3000_v24 = vsel %vm2884_vm10, %v2672_v35, %v2942_v9  ;;  %v1297_v57 = vadd.f32 %v5297_v27, %v5196_v28  ;;  %vm1488_vm2 = vcmp.ge.f32.partialorder %v1294_v55, 0.0 }
 0x1d4   : > { %3946 = vst [vmem:[%s5363_s28 + $0x10] sm:$0xff] %v3813_v43   ;;  %v2330_v2 = vmax.f32 %v1600_v56, %v2272_v59  ;;  %v3058_v42 = vmax.f32 %v2328_v12, %v3000_v24  ;;  %vm2157_vm11 = vcmp.ge.f32.partialorder %v1953_v21, 0.0  ;;  %v2215_v17 = vmul.f32 0.01, %v1953_v21 }
 0x1d5   : > { %vm2885_vm13 = vcmp.ge.f32.partialorder %v2675_v31, 0.0  ;;  %v2943_v18 = vmul.f32 0.01, %v2675_v31  ;;  %v1546_v59 = vmul.f32 0.01, %v1294_v55  ;;  %vm1489_vm4 = vcmp.ge.f32.partialorder %v1297_v57, 0.0 }
 0x1d6   : > { %v2273_v5 = vsel %vm2157_vm11, %v1953_v21, %v2215_v17  ;;  %v1957_v22 = vpop.f32.mrb[76].mxu1  ;;  %v2679_v53 = vpop.f32.mrb[76].mxu0 }
 0x1d7   : > { %v2331_v63 = vmax.f32 %v1601_v7, %v2273_v5  ;;  %v3001_v15 = vsel %vm2885_vm13, %v2675_v31, %v2943_v18  ;;  %v1958_v11 = vadd.f32 %v5297_v27, %v1957_v22  ;;  %v2680_v35 = vadd.f32 %v5297_v27, %v2679_v53  ;;  %v4254_v12 = vpop.f32.mrb[77].mxu1  ;;  %v4382_v56 = vpop.f32.mrb[77].mxu0 }
 0x1d8   : > { %v3059_v37 = vmax.f32 %v2329_v33, %v3001_v15  ;;  %v1960_v47 = vpop.f32.mrb[78].mxu1  ;;  %v2682_v49 = vpop.f32.mrb[78].mxu0  ;;  %v1603_v7 = vsel %vm1487_vm14, %v1289_v26, %v1545_v48  ;;  %v1302_v5 = vadd.f32 %v5297_v27, %v5204_v36 }
 0x1d9   : > { %vm2158_vm15 = vcmp.ge.f32.partialorder %v1958_v11, 0.0  ;;  %v2216_v9 = vmul.f32 0.01, %v1958_v11  ;;  %vm2886_vm0 = vcmp.ge.f32.partialorder %v2680_v35, 0.0  ;;  %v2944_v19 = vmul.f32 0.01, %v2680_v35 }
 0x1da   : > { %v3818_v43 = vpack.c.bf16 %v3059_v37, %v3058_v42  ;;  %v1961_v21 = vadd.f32 %v5297_v27, %v1960_v47  ;;  %v2683_v31 = vadd.f32 %v5297_v27, %v2682_v49  ;;  %v4383_v29 = vpop.f32.mrb[79].mxu0  ;;  %v4255_v45 = vpop.f32.mrb[79].mxu1  ;;  %vm1490_vm8 = vcmp.ge.f32.partialorder %v1302_v5, 0.0 }
 0x1db   : > { %v2274_v33 = vsel %vm2158_vm15, %v1958_v11, %v2216_v9  ;;  %v3002_v39 = vsel %vm2886_vm0, %v2680_v35, %v2944_v19  ;;  %v1547_v9 = vmul.f32 0.01, %v1297_v57  ;;  %v1548_v29 = vmul.f32 0.01, %v1302_v5 }
 0x1dc   : > { %3947 = vst [vmem:[%s5363_s28 + $0x18] sm:$0xff] %v3818_v43   ;;  %v2332_v24 = vmax.f32 %v1602_v1, %v2274_v33  ;;  %v3060_v17 = vmax.f32 %v2330_v2, %v3002_v39  ;;  %vm2159_vm1 = vcmp.ge.f32.partialorder %v1961_v21, 0.0  ;;  %v2217_v18 = vmul.f32 0.01, %v1961_v21 }
 0x1dd   : > { %vm2887_vm3 = vcmp.ge.f32.partialorder %v2683_v31, 0.0  ;;  %v2945_v42 = vmul.f32 0.01, %v2683_v31  ;;  %v1604_v1 = vsel %vm1488_vm2, %v1294_v55, %v1546_v59  ;;  %v1305_v55 = vadd.f32 %v5297_v27, %v5210_v46 }
 0x1de   : > { %v2275_v22 = vsel %vm2159_vm1, %v1961_v21, %v2217_v18  ;;  %v1965_v53 = vpop.f32.mrb[80].mxu1  ;;  %v2687_v15 = vpop.f32.mrb[80].mxu0  ;;  %v1605_v18 = vsel %vm1489_vm4, %v1297_v57, %v1547_v9 }
 0x1df   : > { %v2333_v12 = vmax.f32 %v1603_v7, %v2275_v22  ;;  %v3003_v28 = vsel %vm2887_vm3, %v2683_v31, %v2945_v42  ;;  %v1966_v11 = vadd.f32 %v5297_v27, %v1965_v53  ;;  %v2688_v35 = vadd.f32 %v5297_v27, %v2687_v15  ;;  %v4258_v2 = vpop.f32.mrb[81].mxu1  ;;  %v4386_v56 = vpop.f32.mrb[81].mxu0 }
 0x1e0   : > { %v3061_v37 = vmax.f32 %v2331_v63, %v3003_v28  ;;  %v1968_v47 = vpop.f32.mrb[82].mxu1  ;;  %v2690_v26 = vpop.f32.mrb[82].mxu0  ;;  %v1310_v42 = vadd.f32 %v5297_v27, %v5218_v52  ;;  %v1606_v2 = vsel %vm1490_vm8, %v1302_v5, %v1548_v29  ;;  %vm1491_vm10 = vcmp.ge.f32.partialorder %v1305_v55, 0.0 }
 0x1e1   : > { %vm2160_vm5 = vcmp.ge.f32.partialorder %v1966_v11, 0.0  ;;  %v2218_v49 = vmul.f32 0.01, %v1966_v11  ;;  %vm2888_vm6 = vcmp.ge.f32.partialorder %v2688_v35, 0.0  ;;  %v2946_v36 = vmul.f32 0.01, %v2688_v35 }
 0x1e2   : > { %v3823_v19 = vpack.c.bf16 %v3061_v37, %v3060_v17  ;;  %v1969_v48 = vadd.f32 %v5297_v27, %v1968_v47  ;;  %v2691_v43 = vadd.f32 %v5297_v27, %v2690_v26  ;;  %v4387_v21 = vpop.f32.mrb[83].mxu0  ;;  %v4259_v31 = vpop.f32.mrb[83].mxu1  ;;  %v1549_v47 = vmul.f32 0.01, %v1305_v55 }
 0x1e3   : > { %v2276_v63 = vsel %vm2160_vm5, %v1966_v11, %v2218_v49  ;;  %v3004_v45 = vsel %vm2888_vm6, %v2688_v35, %v2946_v36  ;;  %v1313_v5 = vadd.f32 %v5297_v27, %v5224_v62  ;;  %vm1492_vm14 = vcmp.ge.f32.partialorder %v1310_v42, 0.0 }
 0x1e4   : > { %3948 = vst [vmem:[%s5363_s28 + $0x20] sm:$0xff] %v3823_v19   ;;  %v2334_v59 = vmax.f32 %v1604_v1, %v2276_v63  ;;  %v3062_v33 = vmax.f32 %v2332_v24, %v3004_v45  ;;  %vm2161_vm7 = vcmp.ge.f32.partialorder %v1969_v48, 0.0  ;;  %v2219_v39 = vmul.f32 0.01, %v1969_v48 }
 0x1e5   : > { %vm2889_vm9 = vcmp.ge.f32.partialorder %v2691_v43, 0.0  ;;  %v2947_v17 = vmul.f32 0.01, %v2691_v43  ;;  %v1607_v45 = vsel %vm1491_vm10, %v1305_v55, %v1549_v47  ;;  %vm1493_vm0 = vcmp.ge.f32.partialorder %v1313_v5, 0.0 }
 0x1e6   : > { %v2277_v7 = vsel %vm2161_vm7, %v1969_v48, %v2219_v39  ;;  %v1973_v22 = vpop.f32.mrb[84].mxu1  ;;  %v2695_v53 = vpop.f32.mrb[84].mxu0  ;;  %v1550_v48 = vmul.f32 0.01, %v1310_v42 }
 0x1e7   : > { %v2335_v15 = vmax.f32 %v1605_v18, %v2277_v7  ;;  %v3005_v46 = vsel %vm2889_vm9, %v2691_v43, %v2947_v17  ;;  %v1974_v28 = vadd.f32 %v5297_v27, %v1973_v22  ;;  %v2696_v11 = vadd.f32 %v5297_v27, %v2695_v53  ;;  %v4262_v24 = vpop.f32.mrb[85].mxu1  ;;  %v4390_v35 = vpop.f32.mrb[85].mxu0 }
 0x1e8   : > { %v3063_v56 = vmax.f32 %v2333_v12, %v3005_v46  ;;  %v1976_v1 = vpop.f32.mrb[86].mxu1  ;;  %v2698_v57 = vpop.f32.mrb[86].mxu0 }
 0x1e9   : > { %vm2162_vm11 = vcmp.ge.f32.partialorder %v1974_v28, 0.0  ;;  %v2220_v37 = vmul.f32 0.01, %v1974_v28  ;;  %vm2890_vm12 = vcmp.ge.f32.partialorder %v2696_v11, 0.0  ;;  %v2948_v52 = vmul.f32 0.01, %v2696_v11 }
 0x1ea   : > { %v3828_v26 = vpack.c.bf16 %v3063_v56, %v3062_v33  ;;  %v1977_v49 = vadd.f32 %v5297_v27, %v1976_v1  ;;  %v2699_v36 = vadd.f32 %v5297_v27, %v2698_v57  ;;  %v4391_v9 = vpop.f32.mrb[87].mxu0  ;;  %v4263_v19 = vpop.f32.mrb[87].mxu1  ;;  %v1318_v33 = vadd.f32 %v5297_v27, %v5232_v4 }
 0x1eb   : > { %v2278_v12 = vsel %vm2162_vm11, %v1974_v28, %v2220_v37  ;;  %v3006_v43 = vsel %vm2890_vm12, %v2696_v11, %v2948_v52  ;;  %v1608_v28 = vsel %vm1492_vm14, %v1310_v42, %v1550_v48  ;;  %v1321_v42 = vadd.f32 %v5297_v27, %v5238_v14 }
 0x1ec   : > { %3949 = vst [vmem:[%s5363_s28 + $0x28] sm:$0xff] %v3828_v26   ;;  %v2336_v21 = vmax.f32 %v1606_v2, %v2278_v12  ;;  %v3064_v31 = vmax.f32 %v2334_v59, %v3006_v43  ;;  %vm2163_vm13 = vcmp.ge.f32.partialorder %v1977_v49, 0.0  ;;  %v2221_v29 = vmul.f32 0.01, %v1977_v49 }
 0x1ed   : > { %vm2891_vm15 = vcmp.ge.f32.partialorder %v2699_v36, 0.0  ;;  %v2949_v63 = vmul.f32 0.01, %v2699_v36  ;;  %v1551_v2 = vmul.f32 0.01, %v1313_v5  ;;  %vm1494_vm4 = vcmp.ge.f32.partialorder %v1318_v33, 0.0 }
 0x1ee   : > { %v2279_v39 = vsel %vm2163_vm13, %v1977_v49, %v2221_v29  ;;  %v1981_v17 = vpop.f32.mrb[88].mxu1  ;;  %v2703_v18 = vpop.f32.mrb[88].mxu0  ;;  %v1552_v47 = vmul.f32 0.01, %v1318_v33  ;;  %v1326_v12 = vadd.f32 %v5297_v27, %v5246_v25  ;;  %vm1495_vm6 = vcmp.ge.f32.partialorder %v1321_v42, 0.0 }
 0x1ef   : > { %v2337_v7 = vmax.f32 %v1607_v45, %v2279_v39  ;;  %v3007_v62 = vsel %vm2891_vm15, %v2699_v36, %v2949_v63  ;;  %v1982_v22 = vadd.f32 %v5297_v27, %v1981_v17  ;;  %v2704_v53 = vadd.f32 %v5297_v27, %v2703_v18  ;;  %v4266_v59 = vpop.f32.mrb[89].mxu1  ;;  %v4394_v46 = vpop.f32.mrb[89].mxu0 }
 0x1f0   : > { %v3065_v11 = vmax.f32 %v2335_v15, %v3007_v62  ;;  %v1984_v24 = vpop.f32.mrb[90].mxu1  ;;  %v2706_v55 = vpop.f32.mrb[90].mxu0  ;;  %v1609_v48 = vsel %vm1493_vm0, %v1313_v5, %v1551_v2  ;;  %v1610_v18 = vsel %vm1494_vm4, %v1318_v33, %v1552_v47  ;;  %v1553_v59 = vmul.f32 0.01, %v1321_v42 }
 0x1f1   : > { %vm2164_vm1 = vcmp.ge.f32.partialorder %v1982_v22, 0.0  ;;  %v2222_v35 = vmul.f32 0.01, %v1982_v22  ;;  %vm2892_vm2 = vcmp.ge.f32.partialorder %v2704_v53, 0.0  ;;  %v2950_v4 = vmul.f32 0.01, %v2704_v53 }
 0x1f2   : > { %v3833_v56 = vpack.c.bf16 %v3065_v11, %v3064_v31  ;;  %v1985_v1 = vadd.f32 %v5297_v27, %v1984_v24  ;;  %v2707_v57 = vadd.f32 %v5297_v27, %v2706_v55  ;;  %v4395_v37 = vpop.f32.mrb[91].mxu0  ;;  %v4267_v52 = vpop.f32.mrb[91].mxu1  ;;  %v1329_v33 = vadd.f32 %v5297_v27, %v5252_v41 }
 0x1f3   : > { %v2280_v15 = vsel %vm2164_vm1, %v1982_v22, %v2222_v35  ;;  %v3008_v26 = vsel %vm2892_vm2, %v2704_v53, %v2950_v4  ;;  %v1554_v35 = vmul.f32 0.01, %v1326_v12  ;;  %vm1496_vm10 = vcmp.ge.f32.partialorder %v1326_v12, 0.0 }
 0x1f4   : > { %3950 = vst [vmem:[%s5363_s28 + $0x30] sm:$0xff] %v3833_v56   ;;  %v2338_v49 = vmax.f32 %v1608_v28, %v2280_v15  ;;  %v3066_v36 = vmax.f32 %v2336_v21, %v3008_v26  ;;  %vm2165_vm3 = vcmp.ge.f32.partialorder %v1985_v1, 0.0  ;;  %v2223_v9 = vmul.f32 0.01, %v1985_v1 }
 0x1f5   : > { %vm2893_vm5 = vcmp.ge.f32.partialorder %v2707_v57, 0.0  ;;  %v2951_v19 = vmul.f32 0.01, %v2707_v57  ;;  %v1611_v37 = vsel %vm1495_vm6, %v1321_v42, %v1553_v59  ;;  %v1334_v52 = vadd.f32 %v5297_v27, %v5260_v51 }
 0x1f6   : > { %v2281_v43 = vsel %vm2165_vm3, %v1985_v1, %v2223_v9  ;;  %v1989_v31 = vpop.f32.mrb[92].mxu1  ;;  %v2711_v29 = vpop.f32.mrb[92].mxu0  ;;  %vm1497_vm12 = vcmp.ge.f32.partialorder %v1329_v33, 0.0 }
 0x1f7   : > { %v2339_v63 = vmax.f32 %v1609_v48, %v2281_v43  ;;  %v3009_v14 = vsel %vm2893_vm5, %v2707_v57, %v2951_v19  ;;  %v1990_v45 = vadd.f32 %v5297_v27, %v1989_v31  ;;  %v2712_v39 = vadd.f32 %v5297_v27, %v2711_v29  ;;  %v4270_v21 = vpop.f32.mrb[93].mxu1  ;;  %v4398_v17 = vpop.f32.mrb[93].mxu0 }
 0x1f8   : > { %v3067_v62 = vmax.f32 %v2337_v7, %v3009_v14  ;;  %v1992_v22 = vpop.f32.mrb[94].mxu1  ;;  %v2714_v5 = vpop.f32.mrb[94].mxu0  ;;  %v1612_v43 = vsel %vm1496_vm10, %v1326_v12, %v1554_v35  ;;  %v1337_v12 = vadd.f32 %v5297_v27, %v5266_v3  ;;  %vm1498_vm0 = vcmp.ge.f32.partialorder %v1334_v52, 0.0 }
 0x1f9   : > { %vm2166_vm7 = vcmp.ge.f32.partialorder %v1990_v45, 0.0  ;;  %v2224_v53 = vmul.f32 0.01, %v1990_v45  ;;  %vm2894_vm8 = vcmp.ge.f32.partialorder %v2712_v39, 0.0  ;;  %v2952_v25 = vmul.f32 0.01, %v2712_v39 }
 0x1fa   : > { %v3838_v46 = vpack.c.bf16 %v3067_v62, %v3066_v36  ;;  %v1993_v28 = vadd.f32 %v5297_v27, %v1992_v22  ;;  %v2715_v11 = vadd.f32 %v5297_v27, %v2714_v5  ;;  %v4399_v24 = vpop.f32.mrb[95].mxu0  ;;  %v4271_v55 = vpop.f32.mrb[95].mxu1  ;;  %v1556_v22 = vmul.f32 0.01, %v1334_v52 }
 0x1fb   : > { %v2282_v7 = vsel %vm2166_vm7, %v1990_v45, %v2224_v53  ;;  %v3010_v4 = vsel %vm2894_vm8, %v2712_v39, %v2952_v25  ;;  %v1555_v45 = vmul.f32 0.01, %v1329_v33  ;;  %vm1499_vm2 = vcmp.ge.f32.partialorder %v1337_v12, 0.0 }
 0x1fc   : > { %3951 = vst [vmem:[%s5363_s28 + $0x38] sm:$0xff] %v3838_v46   ;;  %v2340_v2 = vmax.f32 %v1610_v18, %v2282_v7  ;;  %v3068_v56 = vmax.f32 %v2338_v49, %v3010_v4  ;;  %vm2167_vm9 = vcmp.ge.f32.partialorder %v1993_v28, 0.0  ;;  %v2225_v1 = vmul.f32 0.01, %v1993_v28 }
 0x1fd   : > { %vm2895_vm11 = vcmp.ge.f32.partialorder %v2715_v11, 0.0  ;;  %v2953_v57 = vmul.f32 0.01, %v2715_v11 }
 0x1fe   : > { %v2283_v47 = vsel %vm2167_vm9, %v1993_v28, %v2225_v1  ;;  %v1997_v15 = vpop.f32.mrb[96].mxu1  ;;  %v2719_v26 = vpop.f32.mrb[96].mxu0  ;;  %v1613_v28 = vsel %vm1497_vm12, %v1329_v33, %v1555_v45 }
 0x1ff   : > { %v2341_v36 = vmax.f32 %v1611_v37, %v2283_v47  ;;  %v3011_v41 = vsel %vm2895_vm11, %v2715_v11, %v2953_v57  ;;  %v1998_v9 = vadd.f32 %v5297_v27, %v1997_v15  ;;  %v2720_v19 = vadd.f32 %v5297_v27, %v2719_v26  ;;  %v4274_v49 = vpop.f32.mrb[97].mxu1  ;;  %v4402_v48 = vpop.f32.mrb[97].mxu0 }
 0x200   : > { %v3069_v31 = vmax.f32 %v2339_v63, %v3011_v41  ;;  %v2000_v29 = vpop.f32.mrb[98].mxu1  ;;  %v2722_v42 = vpop.f32.mrb[98].mxu0  ;;  %v1342_v11 = vadd.f32 %v5297_v27, %v5274_v13  ;;  %v1614_v57 = vsel %vm1498_vm0, %v1334_v52, %v1556_v22  ;;  %v1557_v26 = vmul.f32 0.01, %v1337_v12 }
 0x201   : > { %vm2168_vm13 = vcmp.ge.f32.partialorder %v1998_v9, 0.0  ;;  %v2226_v14 = vmul.f32 0.01, %v1998_v9  ;;  %vm2896_vm14 = vcmp.ge.f32.partialorder %v2720_v19, 0.0  ;;  %v2954_v51 = vmul.f32 0.01, %v2720_v19 }
 0x202   : > { %v3843_v39 = vpack.c.bf16 %v3069_v31, %v3068_v56  ;;  %v2001_v21 = vadd.f32 %v5297_v27, %v2000_v29  ;;  %v2723_v17 = vadd.f32 %v5297_v27, %v2722_v42  ;;  %v4403_v18 = vpop.f32.mrb[99].mxu0  ;;  %v4275_v62 = vpop.f32.mrb[99].mxu1  ;;  %v1345_v52 = vadd.f32 %v5297_v27, %v5280_v38 }
 0x203   : > { %v2284_v63 = vsel %vm2168_vm13, %v1998_v9, %v2226_v14  ;;  %v3012_v5 = vsel %vm2896_vm14, %v2720_v19, %v2954_v51  ;;  %vm1500_vm6 = vcmp.ge.f32.partialorder %v1342_v11, 0.0  ;;  %v1615_v45 = vsel %vm1499_vm2, %v1337_v12, %v1557_v26 }
 0x204   : > { %3952 = vst [vmem:[%s5363_s28 + $0x40] sm:$0xff] %v3843_v39   ;;  %v2342_v53 = vmax.f32 %v1612_v43, %v2284_v63  ;;  %v3070_v25 = vmax.f32 %v2340_v2, %v3012_v5  ;;  %vm2169_vm15 = vcmp.ge.f32.partialorder %v2001_v21, 0.0  ;;  %v2227_v59 = vmul.f32 0.01, %v2001_v21 }
 0x205   : > { %vm2897_vm1 = vcmp.ge.f32.partialorder %v2723_v17, 0.0  ;;  %v2955_v46 = vmul.f32 0.01, %v2723_v17  ;;  %v1558_v43 = vmul.f32 0.01, %v1342_v11  ;;  %vm1501_vm10 = vcmp.ge.f32.partialorder %v1345_v52, 0.0 }
 0x206   : > { %v2285_v24 = vsel %vm2169_vm15, %v2001_v21, %v2227_v59  ;;  %v2005_v55 = vpop.f32.mrb[100].mxu1  ;;  %v2727_v35 = vpop.f32.mrb[100].mxu0 }
 0x207   : > { %v2343_v7 = vmax.f32 %v1613_v28, %v2285_v24  ;;  %v3013_v3 = vsel %vm2897_vm1, %v2723_v17, %v2955_v46  ;;  %v2006_v4 = vadd.f32 %v5297_v27, %v2005_v55  ;;  %v2728_v56 = vadd.f32 %v5297_v27, %v2727_v35  ;;  %v4278_v2 = vpop.f32.mrb[101].mxu1  ;;  %v4406_v1 = vpop.f32.mrb[101].mxu0 }
 0x208   : > { %v3071_v37 = vmax.f32 %v2341_v36, %v3013_v3  ;;  %v2008_v47 = vpop.f32.mrb[102].mxu1  ;;  %v2730_v33 = vpop.f32.mrb[102].mxu0  ;;  %v1350_v55 = vadd.f32 %v5297_v27, %v5288_v58 }
 0x209   : > { %vm2170_vm3 = vcmp.ge.f32.partialorder %v2006_v4, 0.0  ;;  %v2228_v15 = vmul.f32 0.01, %v2006_v4  ;;  %vm2898_vm4 = vcmp.ge.f32.partialorder %v2728_v56, 0.0  ;;  %v2956_v13 = vmul.f32 0.01, %v2728_v56 }
 0x20a   : > { %v3848_v41 = vpack.c.bf16 %v3071_v37, %v3070_v25  ;;  %v2009_v9 = vadd.f32 %v5297_v27, %v2008_v47  ;;  %v2731_v19 = vadd.f32 %v5297_v27, %v2730_v33  ;;  %v4407_v49 = vpop.f32.mrb[103].mxu0  ;;  %v4279_v48 = vpop.f32.mrb[103].mxu1  ;;  %v1616_v25 = vsel %vm1500_vm6, %v1342_v11, %v1558_v43 }
 0x20b   : > { %v2286_v36 = vsel %vm2170_vm3, %v2006_v4, %v2228_v15  ;;  %v3014_v31 = vsel %vm2898_vm4, %v2728_v56, %v2956_v13  ;;  %v1353_v11 = vadd.f32 %v5297_v27, %v5299_v32  ;;  %v1560_v15 = vmul.f32 0.01, %v1350_v55  ;;  %v5474_v32 = vld [vmem:[%s5658_s2] ss:$0 sm:$0xff] }
 0x20c   : > { %3953 = vst [vmem:[%s5363_s28 + $0x48] sm:$0xff] %v3848_v41   ;;  %v2344_v29 = vmax.f32 %v1614_v57, %v2286_v36  ;;  %v3072_v42 = vmax.f32 %v2342_v53, %v3014_v31  ;;  %vm2171_vm5 = vcmp.ge.f32.partialorder %v2009_v9, 0.0  ;;  %v2229_v14 = vmul.f32 0.01, %v2009_v9 }
 0x20d   : > { %vm2899_vm7 = vcmp.ge.f32.partialorder %v2731_v19, 0.0  ;;  %v2957_v51 = vmul.f32 0.01, %v2731_v19  ;;  %v1559_v53 = vmul.f32 0.01, %v1345_v52  ;;  %vm1502_vm13 = vcmp.ge.f32.partialorder %v1350_v55, 0.0 }
 0x20e   : > { %v2287_v39 = vsel %vm2171_vm5, %v2009_v9, %v2229_v14  ;;  %v2013_v21 = vpop.f32.mrb[104].mxu1  ;;  %v2735_v17 = vpop.f32.mrb[104].mxu0  ;;  %v1561_v31 = vmul.f32 0.01, %v1353_v11  ;;  %vm1503_vm0 = vcmp.ge.f32.partialorder %v1353_v11, 0.0 }
 0x20f   : > { %v2345_v18 = vmax.f32 %v1615_v45, %v2287_v39  ;;  %v3015_v62 = vsel %vm2899_vm7, %v2731_v19, %v2957_v51  ;;  %v2014_v22 = vadd.f32 %v5297_v27, %v2013_v21  ;;  %v2736_v38 = vadd.f32 %v5297_v27, %v2735_v17  ;;  %v4282_v63 = vpop.f32.mrb[105].mxu1  ;;  %v4410_v5 = vpop.f32.mrb[105].mxu0 }
 0x210   : > { %v3073_v59 = vmax.f32 %v2343_v7, %v3015_v62  ;;  %v2016_v46 = vpop.f32.mrb[106].mxu1  ;;  %v2738_v28 = vpop.f32.mrb[106].mxu0  ;;  %v1617_v33 = vsel %vm1501_vm10, %v1345_v52, %v1559_v53  ;;  %v5479_v52 = vadd.f32 %v5474_v32, %v5108_v23  ;;  %v1358_v45 = vadd.f32 %v5474_v32, %v5311_v61 }
 0x211   : > { %vm2172_vm8 = vcmp.ge.f32.partialorder %v2014_v22, 0.0  ;;  %v2230_v24 = vmul.f32 0.01, %v2014_v22  ;;  %vm2900_vm9 = vcmp.ge.f32.partialorder %v2736_v38, 0.0  ;;  %v2958_v12 = vmul.f32 0.01, %v2736_v38 }
 0x212   : > { %v3853_v35 = vpack.c.bf16 %v3073_v59, %v3072_v42  ;;  %v2017_v3 = vadd.f32 %v5297_v27, %v2016_v46  ;;  %v2739_v4 = vadd.f32 %v5297_v27, %v2738_v28  ;;  %v4411_v56 = vpop.f32.mrb[107].mxu0  ;;  %v4283_v2 = vpop.f32.mrb[107].mxu1  ;;  %v1619_v59 = vsel %vm1503_vm0, %v1353_v11, %v1561_v31 }
 0x213   : > { %v2288_v7 = vsel %vm2172_vm8, %v2014_v22, %v2230_v24  ;;  %v3016_v1 = vsel %vm2900_vm9, %v2736_v38, %v2958_v12  ;;  %v1618_v22 = vsel %vm1502_vm13, %v1350_v55, %v1560_v15  ;;  %v1562_v61 = vmul.f32 0.01, %v1358_v45 }
 0x214   : > { %3954 = vst [vmem:[%s5363_s28 + $0x50] sm:$0xff] %v3853_v35   ;;  %v2346_v57 = vmax.f32 %v1616_v25, %v2288_v7  ;;  %v3074_v37 = vmax.f32 %v2344_v29, %v3016_v1  ;;  %vm2173_vm11 = vcmp.ge.f32.partialorder %v2017_v3, 0.0  ;;  %v2231_v47 = vmul.f32 0.01, %v2017_v3 }
 0x215   : > { %vm2901_vm12 = vcmp.ge.f32.partialorder %v2739_v4, 0.0  ;;  %v2959_v58 = vmul.f32 0.01, %v2739_v4  ;;  %v1361_v46 = vadd.f32 %v5474_v32, %v5318_v8  ;;  %v1564_v7 = vmul.f32 0.01, %v5479_v52 }
 0x216   : > { %v2289_v13 = vsel %vm2173_vm11, %v2017_v3, %v2231_v47  ;;  %v2021_v26 = vpop.f32.mrb[108].mxu1  ;;  %v2743_v41 = vpop.f32.mrb[108].mxu0  ;;  %v5493_v11 = vadd.f32 %v5474_v32, %v5114_v30  ;;  %vm1504_vm3 = vcmp.ge.f32.partialorder %v1358_v45, 0.0  ;;  %vm1506_vm8 = vcmp.ge.f32.partialorder %v5479_v52, 0.0 }
 0x217   : > { %v2347_v9 = vmax.f32 %v1617_v33, %v2289_v13  ;;  %v3017_v19 = vsel %vm2901_vm12, %v2739_v4, %v2959_v58  ;;  %v2022_v49 = vadd.f32 %v5297_v27, %v2021_v26  ;;  %v2744_v48 = vadd.f32 %v5474_v32, %v2743_v41  ;;  %v4286_v43 = vpop.f32.mrb[109].mxu1  ;;  %v4414_v36 = vpop.f32.mrb[109].mxu0 }
 0x218   : > { %v3075_v29 = vmax.f32 %v2345_v18, %v3017_v19  ;;  %v2024_v42 = vpop.f32.mrb[110].mxu1  ;;  %v2746_v14 = vpop.f32.mrb[110].mxu0  ;;  %v1563_v58 = vmul.f32 0.01, %v1361_v46  ;;  %v1620_v19 = vsel %vm1504_vm3, %v1358_v45, %v1562_v61  ;;  %vm1505_vm6 = vcmp.ge.f32.partialorder %v1361_v46, 0.0 }
 0x219   : > { %vm2174_vm14 = vcmp.ge.f32.partialorder %v2022_v49, 0.0  ;;  %v2232_v27 = vmul.f32 0.01, %v2022_v49  ;;  %vm2902_vm15 = vcmp.ge.f32.partialorder %v2744_v48, 0.0  ;;  %v2960_v51 = vmul.f32 0.01, %v2744_v48 }
 0x21a   : > { %v3858_v39 = vpack.c.bf16 %v3075_v29, %v3074_v37  ;;  %v2025_v21 = vadd.f32 %v5474_v32, %v2024_v42  ;;  %v2747_v17 = vadd.f32 %v5474_v32, %v2746_v14  ;;  %v4415_v23 = vpop.f32.mrb[111].mxu0  ;;  %v4287_v62 = vpop.f32.mrb[111].mxu1  ;;  %v1374_v31 = vadd.f32 %v5474_v32, %v5122_v34 }
 0x21b   : > { %v2290_v18 = vsel %vm2174_vm14, %v2022_v49, %v2232_v27  ;;  %v3018_v38 = vsel %vm2902_vm15, %v2744_v48, %v2960_v51  ;;  %v1621_v29 = vsel %vm1505_vm6, %v1361_v46, %v1563_v58  ;;  %v1622_v62 = vsel %vm1506_vm8, %v5479_v52, %v1564_v7 }
 0x21c   : > { %3955 = vst [vmem:[%s5363_s28 + $0x58] sm:$0xff] %v3858_v39   ;;  %v2348_v63 = vmax.f32 %v1618_v22, %v2290_v18  ;;  %v3076_v5 = vmax.f32 %v2346_v57, %v3018_v38  ;;  %vm2175_vm1 = vcmp.ge.f32.partialorder %v2025_v21, 0.0  ;;  %v2233_v25 = vmul.f32 0.01, %v2025_v21 }
 0x21d   : > { %vm2903_vm2 = vcmp.ge.f32.partialorder %v2747_v17, 0.0  ;;  %v2961_v53 = vmul.f32 0.01, %v2747_v17  ;;  %vm1507_vm10 = vcmp.ge.f32.partialorder %v5493_v11, 0.0  ;;  %v1566_v52 = vmul.f32 0.01, %v1374_v31 }
 0x21e   : > { %v2291_v28 = vsel %vm2175_vm1, %v2025_v21, %v2233_v25  ;;  %v2029_v24 = vpop.f32.mrb[112].mxu1  ;;  %v2751_v12 = vpop.f32.mrb[112].mxu0  ;;  %vm1508_vm14 = vcmp.ge.f32.partialorder %v1374_v31, 0.0 }
 0x21f   : > { %v2349_v35 = vmax.f32 %v1619_v59, %v2291_v28  ;;  %v3019_v55 = vsel %vm2903_vm2, %v2747_v17, %v2961_v53  ;;  %v2030_v3 = vadd.f32 %v5474_v32, %v2029_v24  ;;  %v2752_v4 = vadd.f32 %v5474_v32, %v2751_v12  ;;  %v4290_v56 = vpop.f32.mrb[113].mxu1  ;;  %v4418_v2 = vpop.f32.mrb[113].mxu0 }
 0x220   : > { %v3077_v1 = vmax.f32 %v2347_v9, %v3019_v55  ;;  %v2032_v8 = vpop.f32.mrb[114].mxu1  ;;  %v2754_v57 = vpop.f32.mrb[114].mxu0  ;;  %v1377_v28 = vadd.f32 %v5474_v32, %v5128_v40  ;;  %v1382_v2 = vadd.f32 %v5474_v32, %v5136_v44 }
 0x221   : > { %vm2176_vm4 = vcmp.ge.f32.partialorder %v2030_v3, 0.0  ;;  %v2234_v37 = vmul.f32 0.01, %v2030_v3  ;;  %vm2904_vm5 = vcmp.ge.f32.partialorder %v2752_v4, 0.0  ;;  %v2962_v47 = vmul.f32 0.01, %v2752_v4 }
 0x222   : > { %v3863_v33 = vpack.c.bf16 %v3077_v1, %v3076_v5  ;;  %v2033_v15 = vadd.f32 %v5474_v32, %v2032_v8  ;;  %v2755_v13 = vadd.f32 %v5474_v32, %v2754_v57  ;;  %v4419_v26 = vpop.f32.mrb[115].mxu0  ;;  %v4291_v41 = vpop.f32.mrb[115].mxu1  ;;  %v1565_v5 = vmul.f32 0.01, %v5493_v11 }
 0x223   : > { %v2292_v30 = vsel %vm2176_vm4, %v2030_v3, %v2234_v37  ;;  %v3020_v49 = vsel %vm2904_vm5, %v2752_v4, %v2962_v47  ;;  %vm1509_vm0 = vcmp.ge.f32.partialorder %v1377_v28, 0.0  ;;  %vm1510_vm4 = vcmp.ge.f32.partialorder %v1382_v2, 0.0 }
 0x224   : > { %3956 = vst [vmem:[%s5363_s28 + $0x60] sm:$0xff] %v3863_v33   ;;  %v2350_v9 = vmax.f32 %v1620_v19, %v2292_v30  ;;  %v3078_v48 = vmax.f32 %v2348_v63, %v3020_v49  ;;  %vm2177_vm7 = vcmp.ge.f32.partialorder %v2033_v15, 0.0  ;;  %v2235_v43 = vmul.f32 0.01, %v2033_v15 }
 0x225   : > { %vm2905_vm9 = vcmp.ge.f32.partialorder %v2755_v13, 0.0  ;;  %v2963_v36 = vmul.f32 0.01, %v2755_v13  ;;  %v1623_v56 = vsel %vm1507_vm10, %v5493_v11, %v1565_v5  ;;  %v1567_v19 = vmul.f32 0.01, %v1377_v28 }
 0x226   : > { %v2293_v42 = vsel %vm2177_vm7, %v2033_v15, %v2235_v43  ;;  %v2037_v14 = vpop.f32.mrb[116].mxu1  ;;  %v2759_v27 = vpop.f32.mrb[116].mxu0  ;;  %v1624_v15 = vsel %vm1508_vm14, %v1374_v31, %v1566_v52  ;;  %v1385_v31 = vadd.f32 %v5474_v32, %v5142_v50 }
 0x227   : > { %v2351_v51 = vmax.f32 %v1621_v29, %v2293_v42  ;;  %v3021_v45 = vsel %vm2905_vm9, %v2755_v13, %v2963_v36  ;;  %v2038_v39 = vadd.f32 %v5474_v32, %v2037_v14  ;;  %v2760_v21 = vadd.f32 %v5474_v32, %v2759_v27  ;;  %v4294_v17 = vpop.f32.mrb[117].mxu1  ;;  %v4422_v23 = vpop.f32.mrb[117].mxu0 }
 0x228   : > { %v3079_v22 = vmax.f32 %v2349_v35, %v3021_v45  ;;  %v2040_v18 = vpop.f32.mrb[118].mxu1  ;;  %v2762_v34 = vpop.f32.mrb[118].mxu0  ;;  %v1568_v36 = vmul.f32 0.01, %v1382_v2  ;;  %vm1511_vm6 = vcmp.ge.f32.partialorder %v1385_v31, 0.0 }
 0x229   : > { %vm2178_vm11 = vcmp.ge.f32.partialorder %v2038_v39, 0.0  ;;  %v2236_v38 = vmul.f32 0.01, %v2038_v39  ;;  %vm2906_vm12 = vcmp.ge.f32.partialorder %v2760_v21, 0.0  ;;  %v2964_v63 = vmul.f32 0.01, %v2760_v21 }
 0x22a   : > { %v3868_v25 = vpack.c.bf16 %v3079_v22, %v3078_v48  ;;  %v2041_v53 = vadd.f32 %v5474_v32, %v2040_v18  ;;  %v2763_v59 = vadd.f32 %v5474_v32, %v2762_v34  ;;  %v4423_v61 = vpop.f32.mrb[119].mxu0  ;;  %v4295_v46 = vpop.f32.mrb[119].mxu1  ;;  %v1626_v5 = vsel %vm1510_vm4, %v1382_v2, %v1568_v36 }
 0x22b   : > { %v2294_v24 = vsel %vm2178_vm11, %v2038_v39, %v2236_v38  ;;  %v3022_v12 = vsel %vm2906_vm12, %v2760_v21, %v2964_v63  ;;  %v1625_v39 = vsel %vm1509_vm0, %v1377_v28, %v1567_v19  ;;  %v1390_v21 = vadd.f32 %v5474_v32, %v5150_v54 }
 0x22c   : > { %3957 = vst [vmem:[%s5363_s28 + $0x68] sm:$0xff] %v3868_v25   ;;  %v2352_v35 = vmax.f32 %v1622_v62, %v2294_v24  ;;  %v3080_v55 = vmax.f32 %v2350_v9, %v3022_v12  ;;  %vm2179_vm13 = vcmp.ge.f32.partialorder %v2041_v53, 0.0  ;;  %v2237_v3 = vmul.f32 0.01, %v2041_v53 }
 0x22d   : > { %vm2907_vm15 = vcmp.ge.f32.partialorder %v2763_v59, 0.0  ;;  %v2965_v4 = vmul.f32 0.01, %v2763_v59  ;;  %v1569_v46 = vmul.f32 0.01, %v1385_v31  ;;  %vm1512_vm10 = vcmp.ge.f32.partialorder %v1390_v21, 0.0 }
 0x22e   : > { %v2295_v7 = vsel %vm2179_vm13, %v2041_v53, %v2237_v3  ;;  %v2045_v1 = vpop.f32.mrb[120].mxu1  ;;  %v2767_v40 = vpop.f32.mrb[120].mxu0  ;;  %v1393_v3 = vadd.f32 %v5474_v32, %v5156_v60 }
 0x22f   : > { %v2353_v8 = vmax.f32 %v1623_v56, %v2295_v7  ;;  %v3023_v57 = vsel %vm2907_vm15, %v2763_v59, %v2965_v4  ;;  %v2046_v37 = vadd.f32 %v5474_v32, %v2045_v1  ;;  %v2768_v47 = vadd.f32 %v5474_v32, %v2767_v40  ;;  %v4298_v58 = vpop.f32.mrb[121].mxu1  ;;  %v4426_v33 = vpop.f32.mrb[121].mxu0 }
 0x230   : > { %v3081_v13 = vmax.f32 %v2351_v51, %v3023_v57  ;;  %v2048_v26 = vpop.f32.mrb[122].mxu1  ;;  %v2770_v11 = vpop.f32.mrb[122].mxu0  ;;  %v1398_v57 = vadd.f32 %v5474_v32, %v5164_v0  ;;  %vm1513_vm12 = vcmp.ge.f32.partialorder %v1393_v3, 0.0 }
 0x231   : > { %vm2180_vm1 = vcmp.ge.f32.partialorder %v2046_v37, 0.0  ;;  %v2238_v41 = vmul.f32 0.01, %v2046_v37  ;;  %vm2908_vm2 = vcmp.ge.f32.partialorder %v2768_v47, 0.0  ;;  %v2966_v44 = vmul.f32 0.01, %v2768_v47 }
 0x232   : > { %v3873_v30 = vpack.c.bf16 %v3081_v13, %v3080_v55  ;;  %v2049_v49 = vadd.f32 %v5474_v32, %v2048_v26  ;;  %v2771_v9 = vadd.f32 %v5474_v32, %v2770_v11  ;;  %v4427_v48 = vpop.f32.mrb[123].mxu0  ;;  %v4299_v43 = vpop.f32.mrb[123].mxu1  ;;  %v1570_v55 = vmul.f32 0.01, %v1390_v21 }
 0x233   : > { %v2296_v29 = vsel %vm2180_vm1, %v2046_v37, %v2238_v41  ;;  %v3024_v42 = vsel %vm2908_vm2, %v2768_v47, %v2966_v44  ;;  %vm1514_vm0 = vcmp.ge.f32.partialorder %v1398_v57, 0.0 }
 0x234   : > { %3958 = vst [vmem:[%s5363_s28 + $0x70] sm:$0xff] %v3873_v30   ;;  %v2354_v14 = vmax.f32 %v1624_v15, %v2296_v29  ;;  %v3082_v27 = vmax.f32 %v2352_v35, %v3024_v42  ;;  %vm2181_vm3 = vcmp.ge.f32.partialorder %v2049_v49, 0.0  ;;  %v2239_v51 = vmul.f32 0.01, %v2049_v49 }
 0x235   : > { %vm2909_vm5 = vcmp.ge.f32.partialorder %v2771_v9, 0.0  ;;  %v2967_v45 = vmul.f32 0.01, %v2771_v9  ;;  %v1628_v41 = vsel %vm1512_vm10, %v1390_v21, %v1570_v55  ;;  %v1572_v42 = vmul.f32 0.01, %v1398_v57 }
 0x236   : > { %v2297_v17 = vsel %vm2181_vm3, %v2049_v49, %v2239_v51  ;;  %v2053_v23 = vpop.f32.mrb[124].mxu1  ;;  %v2775_v62 = vpop.f32.mrb[124].mxu0 }
 0x237   : > { %v2355_v22 = vmax.f32 %v1625_v39, %v2297_v17  ;;  %v3025_v50 = vsel %vm2909_vm5, %v2771_v9, %v2967_v45  ;;  %v2054_v18 = vadd.f32 %v5474_v32, %v2053_v23  ;;  %v2776_v34 = vadd.f32 %v5474_v32, %v2775_v62  ;;  %v4302_v38 = vpop.f32.mrb[125].mxu1  ;;  %v4430_v63 = vpop.f32.mrb[125].mxu0 }
 0x238   : > { %v3083_v25 = vmax.f32 %v2353_v8, %v3025_v50  ;;  %v2056_v53 = vpop.f32.mrb[126].mxu1  ;;  %v2778_v59 = vpop.f32.mrb[126].mxu0  ;;  %v1627_v8 = vsel %vm1511_vm6, %v1385_v31, %v1569_v46  ;;  %v1571_v9 = vmul.f32 0.01, %v1393_v3  ;;  %v1406_v62 = vadd.f32 %v5474_v32, %v5178_v10 }
 0x239   : > { %vm2182_vm7 = vcmp.ge.f32.partialorder %v2054_v18, 0.0  ;;  %v2240_v61 = vmul.f32 0.01, %v2054_v18  ;;  %vm2910_vm8 = vcmp.ge.f32.partialorder %v2776_v34, 0.0  ;;  %v2968_v54 = vmul.f32 0.01, %v2776_v34 }
 0x23a   : > { %v3878_v52 = vpack.c.bf16 %v3083_v25, %v3082_v27  ;;  %v2057_v28 = vadd.f32 %v5474_v32, %v2056_v53  ;;  %v2779_v24 = vadd.f32 %v5474_v32, %v2778_v59  ;;  %v4431_v12 = vpop.f32.mrb[127].mxu0  ;;  %v4303_v35 = vpop.f32.mrb[127].mxu1  ;;  %v1629_v23 = vsel %vm1513_vm12, %v1393_v3, %v1571_v9 }
 0x23b   : > { %v2298_v4 = vsel %vm2182_vm7, %v2054_v18, %v2240_v61  ;;  %v3026_v56 = vsel %vm2910_vm8, %v2776_v34, %v2968_v54  ;;  %v1630_v53 = vsel %vm1514_vm0, %v1398_v57, %v1572_v42  ;;  %v1574_v3 = vmul.f32 0.01, %v1406_v62  ;;  %v5678_v42 = vld [vmem:[#allocation3_spill] sm:$0xff] }
 0x23c   : > { %3959 = vst [vmem:[%s5363_s28 + $0x78] sm:$0xff] %v3878_v52   ;;  %v2356_v2 = vmax.f32 %v1626_v5, %v2298_v4  ;;  %v3084_v7 = vmax.f32 %v2354_v14, %v3026_v56  ;;  %vm2183_vm9 = vcmp.ge.f32.partialorder %v2057_v28, 0.0  ;;  %v2241_v1 = vmul.f32 0.01, %v2057_v28 }
 0x23d   : > { %vm2911_vm11 = vcmp.ge.f32.partialorder %v2779_v24, 0.0  ;;  %v2969_v40 = vmul.f32 0.01, %v2779_v24  ;;  %v1401_v14 = vadd.f32 %v5474_v32, %v5170_v6  ;;  %v1409_v4 = vadd.f32 %v5474_v32, %v5184_v16 }
 0x23e   : > { %v2299_v37 = vsel %vm2183_vm9, %v2057_v28, %v2241_v1  ;;  %v2061_v47 = vpop.f32.mrb[128].mxu1  ;;  %v2783_v58 = vpop.f32.mrb[128].mxu0  ;;  %vm1516_vm6 = vcmp.ge.f32.partialorder %v1406_v62, 0.0 }
 0x23f   : > { %v2357_v33 = vmax.f32 %v1627_v8, %v2299_v37  ;;  %v3027_v60 = vsel %vm2911_vm11, %v2779_v24, %v2969_v40  ;;  %v2062_v15 = vadd.f32 %v5474_v32, %v2061_v47  ;;  %v2784_v13 = vadd.f32 %v5474_v32, %v2783_v58  ;;  %v4306_v26 = vpop.f32.mrb[129].mxu1  ;;  %v4434_v11 = vpop.f32.mrb[129].mxu0 }
 0x240   : > { %v3085_v44 = vmax.f32 %v2355_v22, %v3027_v60  ;;  %v2064_v19 = vpop.f32.mrb[130].mxu1  ;;  %v2786_v30 = vpop.f32.mrb[130].mxu0  ;;  %vm1515_vm2 = vcmp.ge.f32.partialorder %v1401_v14, 0.0  ;;  %v1573_v52 = vmul.f32 0.01, %v1401_v14  ;;  %v1414_v37 = vadd.f32 %v5474_v32, %v5192_v20 }
 0x241   : > { %vm2184_vm13 = vcmp.ge.f32.partialorder %v2062_v15, 0.0  ;;  %v2242_v49 = vmul.f32 0.01, %v2062_v15  ;;  %vm2912_vm14 = vcmp.ge.f32.partialorder %v2784_v13, 0.0  ;;  %v2970_v0 = vmul.f32 0.01, %v2784_v13 }
 0x242   : > { %v3883_v48 = vpack.c.bf16 %v3085_v44, %v3084_v7  ;;  %v2065_v43 = vadd.f32 %v5474_v32, %v2064_v19  ;;  %v2787_v36 = vadd.f32 %v5474_v32, %v2786_v30  ;;  %v4435_v31 = vpop.f32.mrb[131].mxu0  ;;  %v4307_v29 = vpop.f32.mrb[131].mxu1  ;;  %v1631_v57 = vsel %vm1515_vm2, %v1401_v14, %v1573_v52 }
 0x243   : > { %v2300_v27 = vsel %vm2184_vm13, %v2062_v15, %v2242_v49  ;;  %v3028_v51 = vsel %vm2912_vm14, %v2784_v13, %v2970_v0  ;;  %vm1517_vm8 = vcmp.ge.f32.partialorder %v1409_v4, 0.0  ;;  %v1575_v0 = vmul.f32 0.01, %v1409_v4 }
 0x244   : > { %3960 = vst [vmem:[%s5363_s28 + $0x80] sm:$0xff] %v3883_v48   ;;  %v2358_v45 = vmax.f32 %v1628_v41, %v2300_v27  ;;  %v3086_v39 = vmax.f32 %v2356_v2, %v3028_v51  ;;  %vm2185_vm15 = vcmp.ge.f32.partialorder %v2065_v43, 0.0  ;;  %v2243_v21 = vmul.f32 0.01, %v2065_v43 }
 0x245   : > { %vm2913_vm1 = vcmp.ge.f32.partialorder %v2787_v36, 0.0  ;;  %v2971_v17 = vmul.f32 0.01, %v2787_v36  ;;  %v1632_v41 = vsel %vm1516_vm6, %v1406_v62, %v1574_v3  ;;  %v1576_v29 = vmul.f32 0.01, %v1414_v37  ;;  %v5679_v62 = vld [vmem:[#allocation4_spill] sm:$0xff] }
 0x246   : > { %v2301_v22 = vsel %vm2185_vm15, %v2065_v43, %v2243_v21  ;;  %v2069_v50 = vpop.f32.mrb[132].mxu1  ;;  %v2791_v18 = vpop.f32.mrb[132].mxu0  ;;  %v1417_v14 = vadd.f32 %v5474_v32, %v5678_v42  ;;  %vm1518_vm12 = vcmp.ge.f32.partialorder %v1414_v37, 0.0 }
 0x247   : > { %v2359_v34 = vmax.f32 %v1629_v23, %v2301_v22  ;;  %v3029_v6 = vsel %vm2913_vm1, %v2787_v36, %v2971_v17  ;;  %v2070_v38 = vadd.f32 %v5474_v32, %v2069_v50  ;;  %v2792_v63 = vadd.f32 %v5474_v32, %v2791_v18  ;;  %v4310_v5 = vpop.f32.mrb[133].mxu1  ;;  %v4438_v25 = vpop.f32.mrb[133].mxu0 }
 0x248   : > { %v3087_v59 = vmax.f32 %v2357_v33, %v3029_v6  ;;  %v2072_v61 = vpop.f32.mrb[134].mxu1  ;;  %v2794_v54 = vpop.f32.mrb[134].mxu0  ;;  %v1633_v23 = vsel %vm1517_vm8, %v1409_v4, %v1575_v0  ;;  %v1422_v22 = vadd.f32 %v5474_v32, %v5679_v62  ;;  %vm1519_vm14 = vcmp.ge.f32.partialorder %v1417_v14, 0.0 }
 0x249   : > { %vm2186_vm3 = vcmp.ge.f32.partialorder %v2070_v38, 0.0  ;;  %v2244_v46 = vmul.f32 0.01, %v2070_v38  ;;  %vm2914_vm4 = vcmp.ge.f32.partialorder %v2792_v63, 0.0  ;;  %v2972_v10 = vmul.f32 0.01, %v2792_v63 }
 0x24a   : > { %v3888_v28 = vpack.c.bf16 %v3087_v59, %v3086_v39  ;;  %v2073_v24 = vadd.f32 %v5474_v32, %v2072_v61  ;;  %v2795_v12 = vadd.f32 %v5474_v32, %v2794_v54  ;;  %v4439_v35 = vpop.f32.mrb[135].mxu0  ;;  %v4311_v55 = vpop.f32.mrb[135].mxu1  ;;  %v1634_v59 = vsel %vm1518_vm12, %v1414_v37, %v1576_v29 }
 0x24b   : > { %v2302_v56 = vsel %vm2186_vm3, %v2070_v38, %v2244_v46  ;;  %v3030_v2 = vsel %vm2914_vm4, %v2792_v63, %v2972_v10  ;;  %v1578_v4 = vmul.f32 0.01, %v1422_v22  ;;  %vm1520_vm2 = vcmp.ge.f32.partialorder %v1422_v22, 0.0 }
 0x24c   : > { %3961 = vst [vmem:[%s5363_s28 + $0x88] sm:$0xff] %v3888_v28   ;;  %v2360_v7 = vmax.f32 %v1630_v53, %v2302_v56  ;;  %v3088_v1 = vmax.f32 %v2358_v45, %v3030_v2  ;;  %vm2187_vm5 = vcmp.ge.f32.partialorder %v2073_v24, 0.0  ;;  %v2245_v40 = vmul.f32 0.01, %v2073_v24  ;;  %v5680_v56 = vld [vmem:[#allocation5_spill] sm:$0xff] }
 0x24d   : > { %vm2915_vm7 = vcmp.ge.f32.partialorder %v2795_v12, 0.0  ;;  %v2973_v8 = vmul.f32 0.01, %v2795_v12  ;;  %v1577_v28 = vmul.f32 0.01, %v1417_v14  ;;  %v1425_v2 = vadd.f32 %v5474_v32, %v5680_v56 }
 0x24e   : > { %v2303_v47 = vsel %vm2187_vm5, %v2073_v24, %v2245_v40  ;;  %v2077_v58 = vpop.f32.mrb[136].mxu1  ;;  %v2799_v33 = vpop.f32.mrb[136].mxu0 }
 0x24f   : > { %v2361_v60 = vmax.f32 %v1631_v57, %v2303_v47  ;;  %v3031_v16 = vsel %vm2915_vm7, %v2795_v12, %v2973_v8  ;;  %v2078_v15 = vadd.f32 %v5474_v32, %v2077_v58  ;;  %v2800_v13 = vadd.f32 %v5474_v32, %v2799_v33  ;;  %v4314_v26 = vpop.f32.mrb[137].mxu1  ;;  %v4442_v11 = vpop.f32.mrb[137].mxu0  ;;  %v5681_v58 = vld [vmem:[#allocation6_spill] sm:$0xff] }
 0x250   : > { %v3089_v44 = vmax.f32 %v2359_v34, %v3031_v16  ;;  %v2080_v19 = vpop.f32.mrb[138].mxu1  ;;  %v2802_v30 = vpop.f32.mrb[138].mxu0  ;;  %v1635_v47 = vsel %vm1519_vm14, %v1417_v14, %v1577_v28  ;;  %v1430_v33 = vadd.f32 %v5474_v32, %v5681_v58  ;;  %vm1521_vm4 = vcmp.ge.f32.partialorder %v1425_v2, 0.0 }
 0x251   : > { %vm2188_vm9 = vcmp.ge.f32.partialorder %v2078_v15, 0.0  ;;  %v2246_v49 = vmul.f32 0.01, %v2078_v15  ;;  %vm2916_vm10 = vcmp.ge.f32.partialorder %v2800_v13, 0.0  ;;  %v2974_v20 = vmul.f32 0.01, %v2800_v13 }
 0x252   : > { %v3893_v9 = vpack.c.bf16 %v3089_v44, %v3088_v1  ;;  %v2081_v48 = vadd.f32 %v5474_v32, %v2080_v19  ;;  %v2803_v43 = vadd.f32 %v5474_v32, %v2802_v30  ;;  %v4443_v36 = vpop.f32.mrb[139].mxu0  ;;  %v4315_v31 = vpop.f32.mrb[139].mxu1  ;;  %v1636_v30 = vsel %vm1520_vm2, %v1422_v22, %v1578_v4 }
 0x253   : > { %v2304_v27 = vsel %vm2188_vm9, %v2078_v15, %v2246_v49  ;;  %v3032_v51 = vsel %vm2916_vm10, %v2800_v13, %v2974_v20  ;;  %vm1522_vm8 = vcmp.ge.f32.partialorder %v1430_v33, 0.0 }
 0x254   : > { %3962 = vst [vmem:[%s5363_s28 + $0x90] sm:$0xff] %v3893_v9   ;;  %v2362_v45 = vmax.f32 %v1632_v41, %v2304_v27  ;;  %v3090_v39 = vmax.f32 %v2360_v7, %v3032_v51  ;;  %vm2189_vm11 = vcmp.ge.f32.partialorder %v2081_v48, 0.0  ;;  %v2247_v21 = vmul.f32 0.01, %v2081_v48  ;;  %v5682_v51 = vld [vmem:[#allocation7_spill] sm:$0xff] }
 0x255   : > { %vm2917_vm13 = vcmp.ge.f32.partialorder %v2803_v43, 0.0  ;;  %v2975_v17 = vmul.f32 0.01, %v2803_v43  ;;  %v1580_v27 = vmul.f32 0.01, %v1430_v33 }
 0x256   : > { %v2305_v50 = vsel %vm2189_vm11, %v2081_v48, %v2247_v21  ;;  %v2085_v18 = vpop.f32.mrb[140].mxu1  ;;  %v2807_v34 = vpop.f32.mrb[140].mxu0 }
 0x257   : > { %v2363_v6 = vmax.f32 %v1633_v23, %v2305_v50  ;;  %v3033_v38 = vsel %vm2917_vm13, %v2803_v43, %v2975_v17  ;;  %v2086_v63 = vadd.f32 %v5474_v32, %v2085_v18  ;;  %v2808_v5 = vadd.f32 %v5474_v32, %v2807_v34  ;;  %v4318_v25 = vpop.f32.mrb[141].mxu1  ;;  %v4446_v53 = vpop.f32.mrb[141].mxu0  ;;  %v5683_v18 = vld [vmem:[#allocation8_spill] sm:$0xff] }
 0x258   : > { %v3091_v61 = vmax.f32 %v2361_v60, %v3033_v38  ;;  %v2088_v54 = vpop.f32.mrb[142].mxu1  ;;  %v2810_v46 = vpop.f32.mrb[142].mxu0  ;;  %v1579_v43 = vmul.f32 0.01, %v1425_v2  ;;  %v1438_v34 = vadd.f32 %v5474_v32, %v5683_v18 }
 0x259   : > { %vm2190_vm15 = vcmp.ge.f32.partialorder %v2086_v63, 0.0  ;;  %v2248_v10 = vmul.f32 0.01, %v2086_v63  ;;  %vm2918_vm0 = vcmp.ge.f32.partialorder %v2808_v5, 0.0  ;;  %v2976_v52 = vmul.f32 0.01, %v2808_v5 }
 0x25a   : > { %v3898_v24 = vpack.c.bf16 %v3091_v61, %v3090_v39  ;;  %v2089_v12 = vadd.f32 %v5474_v32, %v2088_v54  ;;  %v2811_v35 = vadd.f32 %v5474_v32, %v2810_v46  ;;  %v4447_v55 = vpop.f32.mrb[143].mxu0  ;;  %v4319_v3 = vpop.f32.mrb[143].mxu1  ;;  %v1637_v50 = vsel %vm1521_vm4, %v1425_v2, %v1579_v43 }
 0x25b   : > { %v2306_v7 = vsel %vm2190_vm15, %v2086_v63, %v2248_v10  ;;  %v3034_v1 = vsel %vm2918_vm0, %v2808_v5, %v2976_v52  ;;  %v1638_v46 = vsel %vm1522_vm8, %v1430_v33, %v1580_v27  ;;  %vm1524_vm14 = vcmp.ge.f32.partialorder %v1438_v34, 0.0 }
 0x25c   : > { %3963 = vst [vmem:[%s5363_s28 + $0x98] sm:$0xff] %v3898_v24   ;;  %v2364_v40 = vmax.f32 %v1634_v59, %v2306_v7  ;;  %v3092_v8 = vmax.f32 %v2362_v45, %v3034_v1  ;;  %vm2191_vm1 = vcmp.ge.f32.partialorder %v2089_v12, 0.0  ;;  %v2249_v57 = vmul.f32 0.01, %v2089_v12  ;;  %v5684_v1 = vld [vmem:[#allocation9_spill] sm:$0xff] }
 0x25d   : > { %vm2919_vm3 = vcmp.ge.f32.partialorder %v2811_v35, 0.0  ;;  %v2977_v37 = vmul.f32 0.01, %v2811_v35  ;;  %v1433_v45 = vadd.f32 %v5474_v32, %v5682_v51  ;;  %v1582_v7 = vmul.f32 0.01, %v1438_v34 }
 0x25e   : > { %v2307_v60 = vsel %vm2191_vm1, %v2089_v12, %v2249_v57  ;;  %v2093_v16 = vpop.f32.mrb[144].mxu1  ;;  %v2815_v15 = vpop.f32.mrb[144].mxu0 }
 0x25f   : > { %v2365_v13 = vmax.f32 %v1635_v47, %v2307_v60  ;;  %v3035_v26 = vsel %vm2919_vm3, %v2811_v35, %v2977_v37  ;;  %v2094_v11 = vadd.f32 %v5474_v32, %v2093_v16  ;;  %v2816_v41 = vadd.f32 %v5474_v32, %v2815_v15  ;;  %v4322_v44 = vpop.f32.mrb[145].mxu1  ;;  %v4450_v19 = vpop.f32.mrb[145].mxu0  ;;  %v5685_v16 = vld [vmem:[#allocation10_spill] sm:$0xff] }
 0x260   : > { %v3093_v49 = vmax.f32 %v2363_v6, %v3035_v26  ;;  %v2096_v20 = vpop.f32.mrb[146].mxu1  ;;  %v2818_v0 = vpop.f32.mrb[146].mxu0  ;;  %vm1523_vm10 = vcmp.ge.f32.partialorder %v1433_v45, 0.0  ;;  %v1581_v35 = vmul.f32 0.01, %v1433_v45  ;;  %v1446_v15 = vadd.f32 %v5474_v32, %v5685_v16 }
 0x261   : > { %vm2192_vm5 = vcmp.ge.f32.partialorder %v2094_v11, 0.0  ;;  %v2250_v9 = vmul.f32 0.01, %v2094_v11  ;;  %vm2920_vm6 = vcmp.ge.f32.partialorder %v2816_v41, 0.0  ;;  %v2978_v48 = vmul.f32 0.01, %v2816_v41 }
 0x262   : > { %v3903_v36 = vpack.c.bf16 %v3093_v49, %v3092_v8  ;;  %v2097_v31 = vadd.f32 %v5474_v32, %v2096_v20  ;;  %v2819_v29 = vadd.f32 %v5474_v32, %v2818_v0  ;;  %v4451_v42 = vpop.f32.mrb[147].mxu0  ;;  %v4323_v14 = vpop.f32.mrb[147].mxu1  ;;  %v1639_v60 = vsel %vm1523_vm10, %v1433_v45, %v1581_v35 }
 0x263   : > { %v2308_v39 = vsel %vm2192_vm5, %v2094_v11, %v2250_v9  ;;  %v3036_v21 = vsel %vm2920_vm6, %v2816_v41, %v2978_v48  ;;  %v1640_v0 = vsel %vm1524_vm14, %v1438_v34, %v1582_v7  ;;  %vm1526_vm4 = vcmp.ge.f32.partialorder %v1446_v15, 0.0 }
 0x264   : > { %3964 = vst [vmem:[%s5363_s28 + $0xa0] sm:$0xff] %v3903_v36   ;;  %v2366_v17 = vmax.f32 %v1636_v30, %v2308_v39  ;;  %v3094_v23 = vmax.f32 %v2364_v40, %v3036_v21  ;;  %vm2193_vm7 = vcmp.ge.f32.partialorder %v2097_v31, 0.0  ;;  %v2251_v62 = vmul.f32 0.01, %v2097_v31  ;;  %v5686_v21 = vld [vmem:[#allocation11_spill] sm:$0xff] }
 0x265   : > { %vm2921_vm9 = vcmp.ge.f32.partialorder %v2819_v29, 0.0  ;;  %v2979_v22 = vmul.f32 0.01, %v2819_v29  ;;  %v1441_v40 = vadd.f32 %v5474_v32, %v5684_v1  ;;  %v1584_v39 = vmul.f32 0.01, %v1446_v15 }
 0x266   : > { %v2309_v6 = vsel %vm2193_vm7, %v2097_v31, %v2251_v62  ;;  %v2101_v38 = vpop.f32.mrb[148].mxu1  ;;  %v2823_v63 = vpop.f32.mrb[148].mxu0 }
 0x267   : > { %v2367_v5 = vmax.f32 %v1637_v50, %v2309_v6  ;;  %v3037_v25 = vsel %vm2921_vm9, %v2819_v29, %v2979_v22  ;;  %v2102_v53 = vadd.f32 %v5474_v32, %v2101_v38  ;;  %v2824_v59 = vadd.f32 %v5474_v32, %v2823_v63  ;;  %v4326_v61 = vpop.f32.mrb[149].mxu1  ;;  %v4454_v54 = vpop.f32.mrb[149].mxu0  ;;  %v5687_v38 = vld [vmem:[#allocation12_spill] sm:$0xff] }
 0x268   : > { %v3095_v10 = vmax.f32 %v2365_v13, %v3037_v25  ;;  %v2104_v52 = vpop.f32.mrb[150].mxu1  ;;  %v2826_v28 = vpop.f32.mrb[150].mxu0  ;;  %vm1525_vm0 = vcmp.ge.f32.partialorder %v1441_v40, 0.0  ;;  %v1583_v29 = vmul.f32 0.01, %v1441_v40  ;;  %v1454_v63 = vadd.f32 %v5474_v32, %v5687_v38 }
 0x269   : > { %vm2194_vm11 = vcmp.ge.f32.partialorder %v2102_v53, 0.0  ;;  %v2252_v24 = vmul.f32 0.01, %v2102_v53  ;;  %vm2922_vm12 = vcmp.ge.f32.partialorder %v2824_v59, 0.0  ;;  %v2980_v12 = vmul.f32 0.01, %v2824_v59 }
 0x26a   : > { %v3908_v55 = vpack.c.bf16 %v3095_v10, %v3094_v23  ;;  %v2105_v3 = vadd.f32 %v5474_v32, %v2104_v52  ;;  %v2827_v4 = vadd.f32 %v5474_v32, %v2826_v28  ;;  %v4455_v56 = vpop.f32.mrb[151].mxu0  ;;  %v4327_v2 = vpop.f32.mrb[151].mxu1  ;;  %v1641_v6 = vsel %vm1525_vm0, %v1441_v40, %v1583_v29 }
 0x26b   : > { %v2310_v8 = vsel %vm2194_vm11, %v2102_v53, %v2252_v24  ;;  %v3038_v57 = vsel %vm2922_vm12, %v2824_v59, %v2980_v12  ;;  %v1642_v28 = vsel %vm1526_vm4, %v1446_v15, %v1584_v39  ;;  %vm1528_vm10 = vcmp.ge.f32.partialorder %v1454_v63, 0.0 }
 0x26c   : > { %3965 = vst [vmem:[%s5363_s28 + $0xa8] sm:$0xff] %v3908_v55   ;;  %v2368_v37 = vmax.f32 %v1638_v46, %v2310_v8  ;;  %v3096_v47 = vmax.f32 %v2366_v17, %v3038_v57  ;;  %vm2195_vm13 = vcmp.ge.f32.partialorder %v2105_v3, 0.0  ;;  %v2253_v58 = vmul.f32 0.01, %v2105_v3  ;;  %v5688_v57 = vld [vmem:[#allocation13_spill] sm:$0xff] }
 0x26d   : > { %vm2923_vm15 = vcmp.ge.f32.partialorder %v2827_v4, 0.0  ;;  %v2981_v33 = vmul.f32 0.01, %v2827_v4  ;;  %v1449_v17 = vadd.f32 %v5474_v32, %v5686_v21  ;;  %v1586_v8 = vmul.f32 0.01, %v1454_v63 }
 0x26e   : > { %v2311_v13 = vsel %vm2195_vm13, %v2105_v3, %v2253_v58  ;;  %v2109_v26 = vpop.f32.mrb[152].mxu1  ;;  %v2831_v11 = vpop.f32.mrb[152].mxu0 }
 0x26f   : > { %v2369_v41 = vmax.f32 %v1639_v60, %v2311_v13  ;;  %v3039_v44 = vsel %vm2923_vm15, %v2827_v4, %v2981_v33  ;;  %v2110_v19 = vadd.f32 %v5474_v32, %v2109_v26  ;;  %v2832_v30 = vadd.f32 %v5474_v32, %v2831_v11  ;;  %v4330_v49 = vpop.f32.mrb[153].mxu1  ;;  %v4458_v20 = vpop.f32.mrb[153].mxu0 }
 0x270   : > { %v3097_v9 = vmax.f32 %v2367_v5, %v3039_v44  ;;  %v2112_v48 = vpop.f32.mrb[154].mxu1  ;;  %v2834_v43 = vpop.f32.mrb[154].mxu0  ;;  %vm1527_vm6 = vcmp.ge.f32.partialorder %v1449_v17, 0.0  ;;  %v1585_v4 = vmul.f32 0.01, %v1449_v17 }
 0x271   : > { %vm2196_vm1 = vcmp.ge.f32.partialorder %v2110_v19, 0.0  ;;  %v2254_v36 = vmul.f32 0.01, %v2110_v19  ;;  %vm2924_vm2 = vcmp.ge.f32.partialorder %v2832_v30, 0.0  ;;  %v2982_v31 = vmul.f32 0.01, %v2832_v30 }
 0x272   : > { %v3913_v42 = vpack.c.bf16 %v3097_v9, %v3096_v47  ;;  %v2113_v14 = vadd.f32 %v5474_v32, %v2112_v48  ;;  %v2835_v27 = vadd.f32 %v5474_v32, %v2834_v43  ;;  %v4459_v51 = vpop.f32.mrb[155].mxu0  ;;  %v4331_v45 = vpop.f32.mrb[155].mxu1  ;;  %v1643_v13 = vsel %vm1527_vm6, %v1449_v17, %v1585_v4 }
 0x273   : > { %v2312_v23 = vsel %vm2196_vm1, %v2110_v19, %v2254_v36  ;;  %v3040_v62 = vsel %vm2924_vm2, %v2832_v30, %v2982_v31  ;;  %v1644_v9 = vsel %vm1528_vm10, %v1454_v63, %v1586_v8 }
 0x274   : > { %3966 = vst [vmem:[%s5363_s28 + $0xb0] sm:$0xff] %v3913_v42   ;;  %v2370_v22 = vmax.f32 %v1640_v0, %v2312_v23  ;;  %v3098_v50 = vmax.f32 %v2368_v37, %v3040_v62  ;;  %vm2197_vm3 = vcmp.ge.f32.partialorder %v2113_v14, 0.0  ;;  %v2255_v18 = vmul.f32 0.01, %v2113_v14  ;;  %v5623_v23 = vld [vmem:[%s5658_s2] ss:$0 sm:$0xff] }
 0x275   : > { %vm2925_vm5 = vcmp.ge.f32.partialorder %v2835_v27, 0.0  ;;  %v2983_v34 = vmul.f32 0.01, %v2835_v27  ;;  %v1457_v37 = vadd.f32 %v5474_v32, %v5688_v57  ;;  %v5690_v62 = vld [vmem:[#allocation15_spill] sm:$0xff] }
 0x276   : > { %v2313_v5 = vsel %vm2197_vm3, %v2113_v14, %v2255_v18  ;;  %v2117_v25 = vpop.f32.mrb[156].mxu1  ;;  %v2839_v53 = vpop.f32.mrb[156].mxu0  ;;  %v5689_v14 = vld [vmem:[#allocation14_spill] sm:$0xff] }
 0x277   : > { %v2371_v59 = vmax.f32 %v1641_v6, %v2313_v5  ;;  %v3041_v61 = vsel %vm2925_vm5, %v2835_v27, %v2983_v34  ;;  %v2118_v54 = vadd.f32 %v5474_v32, %v2117_v25  ;;  %v2840_v46 = vadd.f32 %v5474_v32, %v2839_v53  ;;  %v4334_v10 = vpop.f32.mrb[157].mxu1  ;;  %v4462_v52 = vpop.f32.mrb[157].mxu0 }
 0x278   : > { %v3099_v24 = vmax.f32 %v2369_v41, %v3041_v61  ;;  %v2120_v12 = vpop.f32.mrb[158].mxu1  ;;  %v2842_v35 = vpop.f32.mrb[158].mxu0  ;;  %v1587_v48 = vmul.f32 0.01, %v1457_v37  ;;  %v1462_v27 = vadd.f32 %v5474_v32, %v5689_v14  ;;  %vm1529_vm14 = vcmp.ge.f32.partialorder %v1457_v37, 0.0 }
 0x279   : > { %vm2198_vm7 = vcmp.ge.f32.partialorder %v2118_v54, 0.0  ;;  %v2256_v55 = vmul.f32 0.01, %v2118_v54  ;;  %vm2926_vm8 = vcmp.ge.f32.partialorder %v2840_v46, 0.0  ;;  %v2984_v3 = vmul.f32 0.01, %v2840_v46 }
 0x27a   : > { %v3918_v56 = vpack.c.bf16 %v3099_v24, %v3098_v50  ;;  %v2121_v2 = vadd.f32 %v5474_v32, %v2120_v12  ;;  %v2843_v7 = vadd.f32 %v5474_v32, %v2842_v35  ;;  %v4463_v1 = vpop.f32.mrb[159].mxu0  ;;  %v4335_v40 = vpop.f32.mrb[159].mxu1  ;;  %v1645_v63 = vsel %vm1529_vm14, %v1457_v37, %v1587_v48 }
 0x27b   : > { %v2314_v47 = vsel %vm2198_vm7, %v2118_v54, %v2256_v55  ;;  %v3042_v58 = vsel %vm2926_vm8, %v2840_v46, %v2984_v3  ;;  %v1588_v5 = vmul.f32 0.01, %v1462_v27  ;;  %vm1530_vm1 = vcmp.ge.f32.partialorder %v1462_v27, 0.0 }
 0x27c   : > { %3967 = vst [vmem:[%s5363_s28 + $0xb8] sm:$0xff] %v3918_v56   ;;  %v2372_v33 = vmax.f32 %v1642_v28, %v2314_v47  ;;  %v3100_v60 = vmax.f32 %v2370_v22, %v3042_v58  ;;  %vm2199_vm9 = vcmp.ge.f32.partialorder %v2121_v2, 0.0  ;;  %v2257_v16 = vmul.f32 0.01, %v2121_v2  ;;  %v5691_v56 = vld [vmem:[#allocation16_spill] sm:$0xff] }
 0x27d   : > { %vm2927_vm11 = vcmp.ge.f32.partialorder %v2843_v7, 0.0  ;;  %v2985_v15 = vmul.f32 0.01, %v2843_v7  ;;  %v1465_v22 = vadd.f32 %v5623_v23, %v5690_v62  ;;  %v1646_v37 = vsel %vm1530_vm1, %v1462_v27, %v1588_v5 }
 0x27e   : > { %v2315_v26 = vsel %vm2199_vm9, %v2121_v2, %v2257_v16  ;;  %v2125_v11 = vpop.f32.mrb[160].mxu1  ;;  %v2847_v41 = vpop.f32.mrb[160].mxu0  ;;  %v1470_v2 = vadd.f32 %v5623_v23, %v5691_v56 }
 0x27f   : > { %v2373_v44 = vmax.f32 %v1643_v13, %v2315_v26  ;;  %v3043_v19 = vsel %vm2927_vm11, %v2843_v7, %v2985_v15  ;;  %v2126_v30 = vadd.f32 %v5474_v32, %v2125_v11  ;;  %v2848_v49 = vadd.f32 %v5474_v32, %v2847_v41  ;;  %v4338_v20 = vpop.f32.mrb[161].mxu1  ;;  %v4466_v0 = vpop.f32.mrb[161].mxu0  ;;  %v5692_v11 = vld [vmem:[#allocation17_spill] sm:$0xff] }
 0x280   : > { %v3101_v43 = vmax.f32 %v2371_v59, %v3043_v19  ;;  %v2128_v36 = vpop.f32.mrb[162].mxu1  ;;  %v2850_v31 = vpop.f32.mrb[162].mxu0  ;;  %v1589_v24 = vmul.f32 0.01, %v1465_v22  ;;  %vm1531_vm4 = vcmp.ge.f32.partialorder %v1465_v22, 0.0  ;;  %v1473_v41 = vadd.f32 %v5623_v23, %v5692_v11 }
 0x281   : > { %vm2200_vm12 = vcmp.ge.f32.partialorder %v2126_v30, 0.0  ;;  %v2258_v29 = vmul.f32 0.01, %v2126_v30  ;;  %vm2928_vm13 = vcmp.ge.f32.partialorder %v2848_v49, 0.0  ;;  %v2986_v42 = vmul.f32 0.01, %v2848_v49 }
 0x282   : > { %v3923_v51 = vpack.c.bf16 %v3101_v43, %v3100_v60  ;;  %v2129_v45 = vadd.f32 %v5474_v32, %v2128_v36  ;;  %v2851_v39 = vadd.f32 %v5474_v32, %v2850_v31  ;;  %v4467_v21 = vpop.f32.mrb[163].mxu0  ;;  %v4339_v17 = vpop.f32.mrb[163].mxu1  ;;  %v1647_v13 = vsel %vm1531_vm4, %v1465_v22, %v1589_v24 }
 0x283   : > { %v2316_v50 = vsel %vm2200_vm12, %v2126_v30, %v2258_v29  ;;  %v3044_v18 = vsel %vm2928_vm13, %v2848_v49, %v2986_v42  ;;  %v1590_v26 = vmul.f32 0.01, %v1470_v2  ;;  %vm1532_vm7 = vcmp.ge.f32.partialorder %v1470_v2, 0.0 }
 0x284   : > { %3968 = vst [vmem:[%s5363_s28 + $0xc0] sm:$0xff] %v3923_v51   ;;  %v2374_v34 = vmax.f32 %v1644_v9, %v2316_v50  ;;  %v3102_v6 = vmax.f32 %v2372_v33, %v3044_v18  ;;  %vm2201_vm15 = vcmp.ge.f32.partialorder %v2129_v45, 0.0  ;;  %v2259_v38 = vmul.f32 0.01, %v2129_v45 }
 0x285   : > { %vm2929_vm0 = vcmp.ge.f32.partialorder %v2851_v39, 0.0  ;;  %v2987_v32 = vmul.f32 0.01, %v2851_v39  ;;  %v1591_v27 = vmul.f32 0.01, %v1473_v41  ;;  %v1648_v62 = vsel %vm1532_vm7, %v1470_v2, %v1590_v26 }
 0x286   : > { %v2317_v25 = vsel %vm2201_vm15, %v2129_v45, %v2259_v38  ;;  %v2133_v53 = vpop.f32.mrb[164].mxu1  ;;  %v2855_v59 = vpop.f32.mrb[164].mxu0  ;;  %vm1533_vm10 = vcmp.ge.f32.partialorder %v1473_v41, 0.0 }
 0x287   : > { %v2375_v61 = vmax.f32 %v1645_v63, %v2317_v25  ;;  %v3045_v54 = vsel %vm2929_vm0, %v2851_v39, %v2987_v32  ;;  %v2134_v46 = vadd.f32 %v5623_v23, %v2133_v53  ;;  %v2856_v10 = vadd.f32 %v5623_v23, %v2855_v59  ;;  %v4342_v52 = vpop.f32.mrb[165].mxu1  ;;  %v4470_v28 = vpop.f32.mrb[165].mxu0 }
 0x288   : > { %v3103_v12 = vmax.f32 %v2373_v44, %v3045_v54  ;;  %v2136_v35 = vpop.f32.mrb[166].mxu1  ;;  %v2858_v55 = vpop.f32.mrb[166].mxu0  ;;  %v1649_v32 = vsel %vm1533_vm10, %v1473_v41, %v1591_v27 }
 0x289   : > { %vm2202_vm2 = vcmp.ge.f32.partialorder %v2134_v46, 0.0  ;;  %v2260_v3 = vmul.f32 0.01, %v2134_v46  ;;  %vm2930_vm3 = vcmp.ge.f32.partialorder %v2856_v10, 0.0  ;;  %v2988_v4 = vmul.f32 0.01, %v2856_v10 }
 0x28a   : > { %v3928_v7 = vpack.c.bf16 %v3103_v12, %v3102_v6  ;;  %v2137_v1 = vadd.f32 %v5623_v23, %v2136_v35  ;;  %v2859_v40 = vadd.f32 %v5623_v23, %v2858_v55  ;;  %v4471_v8 = vpop.f32.mrb[167].mxu0  ;;  %v4343_v57 = vpop.f32.mrb[167].mxu1 }
 0x28b   : > { %v2318_v47 = vsel %vm2202_vm2, %v2134_v46, %v2260_v3  ;;  %v3046_v58 = vsel %vm2930_vm3, %v2856_v10, %v2988_v4 }
 0x28c   : > { %3969 = vst [vmem:[%s5363_s28 + $0xc8] sm:$0xff] %v3928_v7   ;;  %v2376_v33 = vmax.f32 %v1646_v37, %v2318_v47  ;;  %v3104_v60 = vmax.f32 %v2374_v34, %v3046_v58  ;;  %vm2203_vm5 = vcmp.ge.f32.partialorder %v2137_v1, 0.0  ;;  %v2261_v16 = vmul.f32 0.01, %v2137_v1 }
 0x28d   : > { %vm2931_vm6 = vcmp.ge.f32.partialorder %v2859_v40, 0.0  ;;  %v2989_v15 = vmul.f32 0.01, %v2859_v40 }
 0x28e   : > { %v2319_v44 = vsel %vm2203_vm5, %v2137_v1, %v2261_v16  ;;  %v2141_v19 = vpop.f32.mrb[168].mxu1  ;;  %v2863_v30 = vpop.f32.mrb[168].mxu0 }
 0x28f   : > { %v2377_v49 = vmax.f32 %v1647_v13, %v2319_v44  ;;  %v3047_v20 = vsel %vm2931_vm6, %v2859_v40, %v2989_v15  ;;  %v2142_v0 = vadd.f32 %v5623_v23, %v2141_v19  ;;  %v2864_v9 = vadd.f32 %v5623_v23, %v2863_v30  ;;  %v4346_v48 = vpop.f32.mrb[169].mxu1  ;;  %v4474_v43 = vpop.f32.mrb[169].mxu0 }
 0x290   : > { %v3105_v36 = vmax.f32 %v2375_v61, %v3047_v20  ;;  %v2144_v31 = vpop.f32.mrb[170].mxu1  ;;  %v2866_v29 = vpop.f32.mrb[170].mxu0 }
 0x291   : > { %vm2204_vm8 = vcmp.ge.f32.partialorder %v2142_v0, 0.0  ;;  %v2262_v42 = vmul.f32 0.01, %v2142_v0  ;;  %vm2932_vm9 = vcmp.ge.f32.partialorder %v2864_v9, 0.0  ;;  %v2990_v14 = vmul.f32 0.01, %v2864_v9 }
 0x292   : > { %v3933_v51 = vpack.c.bf16 %v3105_v36, %v3104_v60  ;;  %v2145_v45 = vadd.f32 %v5623_v23, %v2144_v31  ;;  %v2867_v39 = vadd.f32 %v5623_v23, %v2866_v29  ;;  %v4475_v21 = vpop.f32.mrb[171].mxu0  ;;  %v4347_v17 = vpop.f32.mrb[171].mxu1 }
 0x293   : > { %v2320_v22 = vsel %vm2204_vm8, %v2142_v0, %v2262_v42  ;;  %v3048_v50 = vsel %vm2932_vm9, %v2864_v9, %v2990_v14 }
 0x294   : > { %3970 = vst [vmem:[%s5363_s28 + $0xd0] sm:$0xff] %v3933_v51   ;;  %v2378_v18 = vmax.f32 %v1648_v62, %v2320_v22  ;;  %v3106_v34 = vmax.f32 %v2376_v33, %v3048_v50  ;;  %vm2205_vm11 = vcmp.ge.f32.partialorder %v2145_v45, 0.0  ;;  %v2263_v6 = vmul.f32 0.01, %v2145_v45 }
 0x295   : > { %vm2933_vm12 = vcmp.ge.f32.partialorder %v2867_v39, 0.0  ;;  %v2991_v38 = vmul.f32 0.01, %v2867_v39 }
 0x296   : > { %v2321_v63 = vsel %vm2205_vm11, %v2145_v45, %v2263_v6  ;;  %v2871_v5 = vpop.f32.mrb[172].mxu0 }
 0x297   : > { %v2379_v25 = vmax.f32 %v1649_v32, %v2321_v63  ;;  %v3049_v53 = vsel %vm2933_vm12, %v2867_v39, %v2991_v38  ;;  %v2872_v59 = vadd.f32 %v5623_v23, %v2871_v5  ;;  %v4478_v61 = vpop.f32.mrb[173].mxu0 }
 0x298   : > { %v3107_v54 = vmax.f32 %v2377_v49, %v3049_v53  ;;  %v2874_v46 = vpop.f32.mrb[174].mxu0 }
 0x299   : > { %vm2934_vm13 = vcmp.ge.f32.partialorder %v2872_v59, 0.0  ;;  %v2992_v10 = vmul.f32 0.01, %v2872_v59  ;;  %v2875_v52 = vadd.f32 %v5623_v23, %v2874_v46  ;;  %v4479_v28 = vpop.f32.mrb[175].mxu0 }
 0x29a   : > { %v3938_v24 = vpack.c.bf16 %v3107_v54, %v3106_v34 }
 0x29b   : > { %v3050_v12 = vsel %vm2934_vm13, %v2872_v59, %v2992_v10  ;;  %vm2935_vm14 = vcmp.ge.f32.partialorder %v2875_v52, 0.0  ;;  %v2993_v35 = vmul.f32 0.01, %v2875_v52 }
 0x29c   : > { %3971 = vst [vmem:[%s5363_s28 + $0xd8] sm:$0xff] %v3938_v24   ;;  %v3108_v55 = vmax.f32 %v2378_v18, %v3050_v12 }
 0x29d   : > { %v3051_v3 = vsel %vm2935_vm14, %v2875_v52, %v2993_v35 }
 0x29e   : > { %v3109_v4 = vmax.f32 %v2379_v25, %v3051_v3 }
 0x2a0   : > { %v3943_v56 = vpack.c.bf16 %v3109_v4, %v3108_v55 }
 0x2a2   : > { %3972 = vst [vmem:[%s5363_s28 + $0xe0] sm:$0xff] %v3943_v56  }
 0x2a3 PF: > { %p10_p9 = scmp.ge.s32.totalorder %s4684_s16, 10   ;;  %s5693_s12 = smov %s4639_s13 }
 0x2a4   : > { %s5694_s13 = smov %s4693_s19  ;;  %s5695_s14 = smov %s4684_s16 }
 0x2a5   :  { %12 = sbr.rel (!%p10_p9) target bundleno = 2 (0x2), region = 110 }

// kernel: encoder_net_forward.6
= control target key start
LH: loop header
LB: loop body
LE: loop exit
PB: predicated region body
PF: predicated region fallthrough
CT: control target
= control target key end

     0   :  { %v13210_v0 = vmov 0   ;;  %s13206_s1 = inlined_call_operand.vmem [shape: bf16[1024,128], index: 1, kind: input, shape index: {}]   ;;  %s13207_s0 = inlined_call_operand.vmem [shape: bf16[3,400,1024], index: 0, kind: input, shape index: {}]   ;;  %s13208_s2 = inlined_call_operand.vmem [shape: f32[1,128], index: 2, kind: input, shape index: {}]   ;;  %s13209_s3 = inlined_call_operand.vmem [shape: bf16[400,128], index: 3, kind: output, shape index: {}]  }
   0x1   :  { %1734 = vmatprep.subr.bf16.mxu1 %v13210_v0  ;;  %2200 = vmatprep.subr.bf16.mxu0 %v13210_v0  ;;  %v10051_v1 = vld [vmem:[%s13206_s1] sm:$0xff]   ;;  %v10053_v3 = vld [vmem:[%s13206_s1 + $0x8] sm:$0xff]   ;;  %v10055_v5 = vld [vmem:[%s13206_s1 + $0x10] sm:$0xff]  }
   0x2   :  { %v10052_v2 = vld [vmem:[%s13206_s1 + $0x100] sm:$0xff]   ;;  %1735 = vmatpush1.bf16.msra.mxu1 %v10051_v1  ;;  %v10054_v4 = vld [vmem:[%s13206_s1 + $0x108] sm:$0xff]   ;;  %v10056_v6 = vld [vmem:[%s13206_s1 + $0x110] sm:$0xff]  }
   0x3   :  { %2201 = vmatpush1.bf16.msra.mxu0 %v10052_v2  ;;  %1736 = vmatprep.subr.bf16.mxu1 %v13210_v0  ;;  %v10057_v7 = vld [vmem:[%s13206_s1 + $0x18] sm:$0xff]   ;;  %v10059_v9 = vld [vmem:[%s13206_s1 + $0x20] sm:$0xff]   ;;  %v10061_v11 = vld [vmem:[%s13206_s1 + $0x28] sm:$0xff]  }
   0x4   :  { %2202 = vmatprep.subr.bf16.mxu0 %v13210_v0  ;;  %v10058_v8 = vld [vmem:[%s13206_s1 + $0x118] sm:$0xff]   ;;  %v10060_v10 = vld [vmem:[%s13206_s1 + $0x120] sm:$0xff]   ;;  %v10062_v12 = vld [vmem:[%s13206_s1 + $0x128] sm:$0xff]  }
   0x5   :  { %v10063_v13 = vld [vmem:[%s13206_s1 + $0x30] sm:$0xff]   ;;  %v10065_v15 = vld [vmem:[%s13206_s1 + $0x38] sm:$0xff]   ;;  %v10067_v17 = vld [vmem:[%s13206_s1 + $0x40] sm:$0xff]  }
   0x6   :  { %1737 = vmatpush1.bf16.msra.mxu1 %v10053_v3  ;;  %v10064_v14 = vld [vmem:[%s13206_s1 + $0x130] sm:$0xff]   ;;  %v10066_v16 = vld [vmem:[%s13206_s1 + $0x138] sm:$0xff]   ;;  %v10068_v18 = vld [vmem:[%s13206_s1 + $0x140] sm:$0xff]  }
   0x7   :  { %2203 = vmatpush1.bf16.msra.mxu0 %v10054_v4  ;;  %1738 = vmatprep.subr.bf16.mxu1 %v13210_v0  ;;  %v10278_v19 = vld [vmem:[%s13207_s0] sm:$0xff]  ;;  %v10288_v21 = vld [vmem:[%s13207_s0 + $0x10] sm:$0xff]  ;;  %v10069_v24 = vld [vmem:[%s13206_s1 + $0x48] sm:$0xff]  }
   0x8   :  { %2204 = vmatprep.subr.bf16.mxu0 %v13210_v0  ;;  %v10283_v20 = vld [vmem:[%s13207_s0 + $0x20] sm:$0xff]  ;;  %v150_v23 = vld [vmem:[%s13207_s0 + $0x30] sm:$0xff]  ;;  %v10070_v26 = vld [vmem:[%s13206_s1 + $0x148] sm:$0xff]  }
   0x9   :  { %v7738_v22 = vcombine.high %v10278_v19, %v10283_v20  ;;  %v7742_v25 = vcombine.high %v10288_v21, %v150_v23  ;;  %v10071_v27 = vld [vmem:[%s13206_s1 + $0x50] sm:$0xff]   ;;  %v10073_v29 = vld [vmem:[%s13206_s1 + $0x58] sm:$0xff]   ;;  %v10075_v31 = vld [vmem:[%s13206_s1 + $0x60] sm:$0xff]   ;;  %v7737_v41 = vcombine.low %v10278_v19, %v10283_v20  ;;  %v7741_v44 = vcombine.low %v10288_v21, %v150_v23 }
   0xa   :  { %1739 = vmatpush1.bf16.msra.mxu1 %v10055_v5  ;;  %v10072_v28 = vld [vmem:[%s13206_s1 + $0x150] sm:$0xff]   ;;  %v10074_v30 = vld [vmem:[%s13206_s1 + $0x158] sm:$0xff]   ;;  %v10076_v32 = vld [vmem:[%s13206_s1 + $0x160] sm:$0xff]  }
   0xb   :  { %2205 = vmatpush1.bf16.msra.mxu0 %v10056_v6  ;;  %1740 = vmatprep.subr.bf16.mxu1 %v13210_v0  ;;  %v10077_v33 = vld [vmem:[%s13206_s1 + $0x68] sm:$0xff]   ;;  %v10079_v35 = vld [vmem:[%s13206_s1 + $0x70] sm:$0xff]   ;;  %v10081_v37 = vld [vmem:[%s13206_s1 + $0x78] sm:$0xff]  }
   0xc   :  { %2206 = vmatprep.subr.bf16.mxu0 %v13210_v0  ;;  %1766 = vmatprep.mubr.bf16.mxu1 %v7738_v22  ;;  %v10078_v34 = vld [vmem:[%s13206_s1 + $0x168] sm:$0xff]   ;;  %v10080_v36 = vld [vmem:[%s13206_s1 + $0x170] sm:$0xff]   ;;  %v10082_v38 = vld [vmem:[%s13206_s1 + $0x178] sm:$0xff]  }
   0xd   :  { %2232 = vmatprep.mubr.bf16.mxu0 %v7742_v25  ;;  %v152_v39 = vld [vmem:[%s13207_s0 + $0x40] sm:$0xff]  ;;  %v154_v42 = vld [vmem:[%s13207_s0 + $0x50] sm:$0xff]  ;;  %v10085_v49 = vld [vmem:[%s13206_s1 + $0x88] sm:$0xff]  }
   0xe   :  { %1741 = vmatpush1.bf16.msra.mxu1 %v10057_v7  ;;  %v156_v40 = vld [vmem:[%s13207_s0 + $0x60] sm:$0xff]  ;;  %v158_v43 = vld [vmem:[%s13207_s0 + $0x70] sm:$0xff]  ;;  %v10086_v52 = vld [vmem:[%s13206_s1 + $0x188] sm:$0xff]  }
   0xf   :  { %2207 = vmatpush1.bf16.msra.mxu0 %v10058_v8  ;;  %1742 = vmatprep.subr.bf16.mxu1 %v13210_v0  ;;  %v10083_v45 = vld [vmem:[%s13206_s1 + $0x80] sm:$0xff]   ;;  %v7746_v47 = vcombine.high %v152_v39, %v156_v40  ;;  %v7750_v48 = vcombine.high %v154_v42, %v158_v43  ;;  %v162_v53 = vld [vmem:[%s13207_s0 + $0x90] sm:$0xff]  ;;  %v7745_v55 = vcombine.low %v152_v39, %v156_v40  ;;  %v10089_v1 = vld [vmem:[%s13206_s1 + $0x98] sm:$0xff]  }
  0x10   :  { %2208 = vmatprep.subr.bf16.mxu0 %v13210_v0  ;;  %v10084_v46 = vld [vmem:[%s13206_s1 + $0x180] sm:$0xff]   ;;  %v166_v54 = vld [vmem:[%s13207_s0 + $0xb0] sm:$0xff]  ;;  %v7749_v56 = vcombine.low %v154_v42, %v158_v43  ;;  %v10090_v3 = vld [vmem:[%s13206_s1 + $0x198] sm:$0xff]  }
  0x11   :  { %v160_v50 = vld [vmem:[%s13207_s0 + $0x80] sm:$0xff]  ;;  %v7758_v58 = vcombine.high %v162_v53, %v166_v54  ;;  %v10087_v59 = vld [vmem:[%s13206_s1 + $0x90] sm:$0xff]   ;;  %v7757_v5 = vcombine.low %v162_v53, %v166_v54  ;;  %v10102_v39 = vld [vmem:[%s13206_s1 + $0x1c8] sm:$0xff]  }
  0x12   :  { %1743 = vmatpush1.bf16.msra.mxu1 %v10059_v9  ;;  %v164_v51 = vld [vmem:[%s13207_s0 + $0xa0] sm:$0xff]  ;;  %v10088_v60 = vld [vmem:[%s13206_s1 + $0x190] sm:$0xff]  }
  0x13   :  { %2209 = vmatpush1.bf16.msra.mxu0 %v10060_v10  ;;  %1744 = vmatprep.subr.bf16.mxu1 %v13210_v0  ;;  %v7754_v57 = vcombine.high %v160_v50, %v164_v51  ;;  %v168_v61 = vld [vmem:[%s13207_s0 + $0xc0] sm:$0xff]  ;;  %v170_v63 = vld [vmem:[%s13207_s0 + $0xd0] sm:$0xff]  ;;  %v7753_v4 = vcombine.low %v160_v50, %v164_v51  ;;  %v10106_v51 = vld [vmem:[%s13206_s1 + $0x1d8] sm:$0xff]  }
  0x14   :  { %2210 = vmatprep.subr.bf16.mxu0 %v13210_v0  ;;  %v172_v62 = vld [vmem:[%s13207_s0 + $0xe0] sm:$0xff]  ;;  %v174_v2 = vld [vmem:[%s13207_s0 + $0xf0] sm:$0xff] }
  0x15   :  { %v7762_v6 = vcombine.high %v168_v61, %v172_v62  ;;  %v7766_v7 = vcombine.high %v170_v63, %v174_v2  ;;  %v10091_v8 = vld [vmem:[%s13206_s1 + $0xa0] sm:$0xff]   ;;  %v10096_v21 = vld [vmem:[%s13206_s1 + $0x1b0] sm:$0xff]  }
  0x16   :  { %1745 = vmatpush1.bf16.msra.mxu1 %v10061_v11  ;;  %v10092_v9 = vld [vmem:[%s13206_s1 + $0x1a0] sm:$0xff]   ;;  %v186_v25 = vld [vmem:[%s13207_s0 + $0x150] sm:$0xff] }
  0x17   :  { %2211 = vmatpush1.bf16.msra.mxu0 %v10062_v12  ;;  %1746 = vmatprep.subr.bf16.mxu1 %v13210_v0  ;;  %v176_v10 = vld [vmem:[%s13207_s0 + $0x100] sm:$0xff]  ;;  %v178_v12 = vld [vmem:[%s13207_s0 + $0x110] sm:$0xff] }
  0x18   :  { %2212 = vmatprep.subr.bf16.mxu0 %v13210_v0  ;;  %v180_v11 = vld [vmem:[%s13207_s0 + $0x120] sm:$0xff]  ;;  %v206_v50 = vld [vmem:[%s13207_s0 + $0x1f0] sm:$0xff] }
  0x19   :  { %v7770_v19 = vcombine.high %v176_v10, %v180_v11  ;;  %v184_v22 = vld [vmem:[%s13207_s0 + $0x140] sm:$0xff] }
  0x1a   :  { %1747 = vmatpush1.bf16.msra.mxu1 %v10063_v13  ;;  %v182_v13 = vld [vmem:[%s13207_s0 + $0x130] sm:$0xff]  ;;  %v188_v23 = vld [vmem:[%s13207_s0 + $0x160] sm:$0xff] }
  0x1b   :  { %2213 = vmatpush1.bf16.msra.mxu0 %v10064_v14  ;;  %1748 = vmatprep.subr.bf16.mxu1 %v13210_v0  ;;  %v10093_v14 = vld [vmem:[%s13206_s1 + $0xa8] sm:$0xff]   ;;  %v7774_v20 = vcombine.high %v178_v12, %v182_v13  ;;  %v7777_v40 = vcombine.low %v184_v22, %v188_v23 }
  0x1c   :  { %2214 = vmatprep.subr.bf16.mxu0 %v13210_v0 }
  0x1e   :  { %1749 = vmatpush1.bf16.msra.mxu1 %v10065_v15  ;;  %v10094_v15 = vld [vmem:[%s13206_s1 + $0x1a8] sm:$0xff]  }
  0x1f   :  { %2215 = vmatpush1.bf16.msra.mxu0 %v10066_v16  ;;  %1750 = vmatprep.subr.bf16.mxu1 %v13210_v0  ;;  %v7761_v16 = vcombine.low %v168_v61, %v172_v62  ;;  %v210_v61 = vld [vmem:[%s13207_s0 + $0x210] sm:$0xff] }
  0x20   :  { %2216 = vmatprep.subr.bf16.mxu0 %v13210_v0  ;;  %v214_v62 = vld [vmem:[%s13207_s0 + $0x230] sm:$0xff] }
  0x22   :  { %1751 = vmatpush1.bf16.msra.mxu1 %v10067_v17  ;;  %v10095_v17 = vld [vmem:[%s13206_s1 + $0xb0] sm:$0xff]  }
  0x23   :  { %2217 = vmatpush1.bf16.msra.mxu0 %v10068_v18  ;;  %1752 = vmatprep.subr.bf16.mxu1 %v13210_v0  ;;  %v7765_v18 = vcombine.low %v170_v63, %v174_v2  ;;  %v10110_v63 = vld [vmem:[%s13206_s1 + $0x1e8] sm:$0xff]  }
  0x24   :  { %2218 = vmatprep.subr.bf16.mxu0 %v13210_v0 }
  0x26   :  { %1753 = vmatpush1.bf16.msra.mxu1 %v10069_v24  ;;  %v10097_v24 = vld [vmem:[%s13206_s1 + $0xb8] sm:$0xff]  }
  0x27   :  { %2219 = vmatpush1.bf16.msra.mxu0 %v10070_v26  ;;  %1754 = vmatprep.subr.bf16.mxu1 %v13210_v0  ;;  %v190_v26 = vld [vmem:[%s13207_s0 + $0x170] sm:$0xff] }
  0x28   :  { %2220 = vmatprep.subr.bf16.mxu0 %v13210_v0 }
  0x2a   :  { %1755 = vmatpush1.bf16.msra.mxu1 %v10071_v27  ;;  %v10098_v27 = vld [vmem:[%s13206_s1 + $0x1b8] sm:$0xff]  }
  0x2b   :  { %2221 = vmatpush1.bf16.msra.mxu0 %v10072_v28  ;;  %1756 = vmatprep.subr.bf16.mxu1 %v13210_v0  ;;  %v7769_v28 = vcombine.low %v176_v10, %v180_v11  ;;  %v218_v10 = vld [vmem:[%s13207_s0 + $0x250] sm:$0xff] }
  0x2c   :  { %2222 = vmatprep.subr.bf16.mxu0 %v13210_v0  ;;  %v222_v11 = vld [vmem:[%s13207_s0 + $0x270] sm:$0xff] }
  0x2e   :  { %1757 = vmatpush1.bf16.msra.mxu1 %v10073_v29  ;;  %v7773_v29 = vcombine.low %v178_v12, %v182_v13  ;;  %v10114_v12 = vld [vmem:[%s13206_s1 + $0x1f8] sm:$0xff]  }
  0x2f   :  { %2223 = vmatpush1.bf16.msra.mxu0 %v10074_v30  ;;  %1758 = vmatprep.subr.bf16.mxu1 %v13210_v0  ;;  %v7778_v30 = vcombine.high %v184_v22, %v188_v23  ;;  %v7813_v22 = vcombine.low %v218_v10, %v222_v11 }
  0x30   :  { %2224 = vmatprep.subr.bf16.mxu0 %v13210_v0 }
  0x32   :  { %1759 = vmatpush1.bf16.msra.mxu1 %v10075_v31  ;;  %v7782_v31 = vcombine.high %v186_v25, %v190_v26 }
  0x33   :  { %2225 = vmatpush1.bf16.msra.mxu0 %v10076_v32  ;;  %1760 = vmatprep.subr.bf16.mxu1 %v13210_v0  ;;  %v10099_v32 = vld [vmem:[%s13206_s1 + $0xc0] sm:$0xff]  }
  0x34   :  { %2226 = vmatprep.subr.bf16.mxu0 %v13210_v0 }
  0x36   :  { %1761 = vmatpush1.bf16.msra.mxu1 %v10077_v33  ;;  %v10100_v33 = vld [vmem:[%s13206_s1 + $0x1c0] sm:$0xff]  }
  0x37   :  { %2227 = vmatpush1.bf16.msra.mxu0 %v10078_v34  ;;  %1762 = vmatprep.subr.bf16.mxu1 %v13210_v0  ;;  %v192_v34 = vld [vmem:[%s13207_s0 + $0x180] sm:$0xff] }
  0x38   :  { %2228 = vmatprep.subr.bf16.mxu0 %v13210_v0 }
  0x3a   :  { %1763 = vmatpush1.bf16.msra.mxu1 %v10079_v35  ;;  %v196_v35 = vld [vmem:[%s13207_s0 + $0x1a0] sm:$0xff] }
  0x3b   :  { %2229 = vmatpush1.bf16.msra.mxu0 %v10080_v36  ;;  %1764 = vmatprep.subr.bf16.mxu1 %v13210_v0  ;;  %v10101_v36 = vld [vmem:[%s13206_s1 + $0xc8] sm:$0xff]   ;;  %v7786_v42 = vcombine.high %v192_v34, %v196_v35 }
  0x3c   :  { %2230 = vmatprep.subr.bf16.mxu0 %v13210_v0 }
  0x3e   :  { %1765 = vmatpush1.bf16.msra.mxu1 %v10081_v37  ;;  %v194_v37 = vld [vmem:[%s13207_s0 + $0x190] sm:$0xff] }
  0x3f   :  { %2231 = vmatpush1.bf16.msra.mxu0 %v10082_v38  ;;  %1967 = vmatprep.subr.bf16.mxu1 %v13210_v0  ;;  %v198_v38 = vld [vmem:[%s13207_s0 + $0x1b0] sm:$0xff] }
  0x40   :  { %2433 = vmatprep.subr.bf16.mxu0 %v13210_v0  ;;  %v7790_v43 = vcombine.high %v194_v37, %v198_v38  ;;  %v7789_v53 = vcombine.low %v194_v37, %v198_v38 }
  0x41   :  { %1767 = vmatmul.mubr.bf16.vlgmr.msra.gmra.mrb[0].mxu1 %v7737_v41  ;;  %v7781_v41 = vcombine.low %v186_v25, %v190_v26  ;;  %v232_v25 = vld [vmem:[%s13207_s0 + $0x2c0] sm:$0xff] }
  0x42   :  { %2233 = vmatmul.mubr.bf16.vlgmr.msra.gmra.mrb[0].mxu0 %v7741_v44  ;;  %1968 = vmatpush1.bf16.msra.mxu1 %v10083_v45  ;;  %v10103_v44 = vld [vmem:[%s13206_s1 + $0xd0] sm:$0xff]   ;;  %v236_v26 = vld [vmem:[%s13207_s0 + $0x2e0] sm:$0xff] }
  0x43   :  { %2434 = vmatpush1.bf16.msra.mxu0 %v10084_v46  ;;  %1774 = vmatprep.mubr.bf16.mxu1 %v7746_v47  ;;  %v10104_v45 = vld [vmem:[%s13206_s1 + $0x1d0] sm:$0xff]   ;;  %v200_v46 = vld [vmem:[%s13207_s0 + $0x1c0] sm:$0xff]  ;;  %v7825_v37 = vcombine.low %v232_v25, %v236_v26 }
  0x44   :  { %2240 = vmatprep.mubr.bf16.mxu0 %v7750_v48  ;;  %1969 = vmatprep.subr.bf16.mxu1 %v13210_v0  ;;  %v204_v47 = vld [vmem:[%s13207_s0 + $0x1e0] sm:$0xff]  ;;  %v10105_v48 = vld [vmem:[%s13206_s1 + $0xd8] sm:$0xff]  }
  0x45   :  { %2435 = vmatprep.subr.bf16.mxu0 %v13210_v0  ;;  %v7794_v54 = vcombine.high %v200_v46, %v204_v47 }
  0x46   :  { %1970 = vmatpush1.bf16.msra.mxu1 %v10085_v49  ;;  %v202_v49 = vld [vmem:[%s13207_s0 + $0x1d0] sm:$0xff] }
  0x47   :  { %2436 = vmatpush1.bf16.msra.mxu0 %v10086_v52  ;;  %1971 = vmatprep.subr.bf16.mxu1 %v13210_v0  ;;  %v7785_v52 = vcombine.low %v192_v34, %v196_v35  ;;  %v7797_v2 = vcombine.low %v202_v49, %v206_v50  ;;  %v244_v34 = vld [vmem:[%s13207_s0 + $0x320] sm:$0xff]  ;;  %v242_v35 = vld [vmem:[%s13207_s0 + $0x310] sm:$0xff] }
  0x48   :  { %2437 = vmatprep.subr.bf16.mxu0 %v13210_v0 }
  0x49   :  { %1775 = vmatmul.mubr.bf16.gmra.mrb[4].mxu1 %v7745_v55  ;;  %v7798_v55 = vcombine.high %v202_v49, %v206_v50  ;;  %v256_v49 = vld [vmem:[%s13207_s0 + $0x380] sm:$0xff] }
  0x4a   :  { %2241 = vmatmul.mubr.bf16.gmra.mrb[4].mxu0 %v7749_v56  ;;  %1782 = vmatprep.mubr.bf16.mxu1 %v7754_v57  ;;  %v10107_v56 = vld [vmem:[%s13206_s1 + $0xe0] sm:$0xff]  }
  0x4b   :  { %2248 = vmatprep.mubr.bf16.mxu0 %v7758_v58  ;;  %1972 = vmatpush1.bf16.msra.mxu1 %v10087_v59  ;;  %v10108_v57 = vld [vmem:[%s13206_s1 + $0x1e0] sm:$0xff]  }
  0x4c   :  { %2438 = vmatpush1.bf16.msra.mxu0 %v10088_v60  ;;  %1973 = vmatprep.subr.bf16.mxu1 %v13210_v0  ;;  %v208_v58 = vld [vmem:[%s13207_s0 + $0x200] sm:$0xff]  ;;  %v10109_v60 = vld [vmem:[%s13206_s1 + $0xe8] sm:$0xff]  }
  0x4d   :  { %2439 = vmatprep.subr.bf16.mxu0 %v13210_v0  ;;  %v212_v59 = vld [vmem:[%s13207_s0 + $0x220] sm:$0xff] }
  0x4e   :  { %v7801_v13 = vcombine.low %v208_v58, %v212_v59  ;;  %v260_v50 = vld [vmem:[%s13207_s0 + $0x3a0] sm:$0xff] }
  0x4f   :  { %1974 = vmatpush1.bf16.msra.mxu1 %v10089_v1  ;;  %v7793_v1 = vcombine.low %v200_v46, %v204_v47 }
  0x50   :  { %2440 = vmatpush1.bf16.msra.mxu0 %v10090_v3  ;;  %1975 = vmatprep.subr.bf16.mxu1 %v13210_v0  ;;  %v7802_v3 = vcombine.high %v208_v58, %v212_v59  ;;  %v268_v58 = vld [vmem:[%s13207_s0 + $0x3e0] sm:$0xff]  ;;  %v266_v59 = vld [vmem:[%s13207_s0 + $0x3d0] sm:$0xff] }
  0x51   :  { %1783 = vmatmul.mubr.bf16.gmra.mrb[8].mxu1 %v7753_v4  ;;  %2441 = vmatprep.subr.bf16.mxu0 %v13210_v0  ;;  %v7806_v4 = vcombine.high %v210_v61, %v214_v62 }
  0x52   :  { %2249 = vmatmul.mubr.bf16.gmra.mrb[8].mxu0 %v7757_v5  ;;  %1790 = vmatprep.mubr.bf16.mxu1 %v7762_v6  ;;  %v10111_v5 = vld [vmem:[%s13206_s1 + $0xf0] sm:$0xff]  }
  0x53   :  { %2256 = vmatprep.mubr.bf16.mxu0 %v7766_v7  ;;  %1976 = vmatpush1.bf16.msra.mxu1 %v10091_v8  ;;  %v10112_v6 = vld [vmem:[%s13206_s1 + $0x1f0] sm:$0xff]   ;;  %v216_v7 = vld [vmem:[%s13207_s0 + $0x240] sm:$0xff] }
  0x54   :  { %2442 = vmatpush1.bf16.msra.mxu0 %v10092_v9  ;;  %1977 = vmatprep.subr.bf16.mxu1 %v13210_v0  ;;  %v220_v8 = vld [vmem:[%s13207_s0 + $0x260] sm:$0xff]  ;;  %v10113_v9 = vld [vmem:[%s13206_s1 + $0xf8] sm:$0xff]  }
  0x55   :  { %2443 = vmatprep.subr.bf16.mxu0 %v13210_v0 }
  0x57   :  { %1978 = vmatpush1.bf16.msra.mxu1 %v10093_v14  ;;  %v7805_v14 = vcombine.low %v210_v61, %v214_v62  ;;  %v7849_v61 = vcombine.low %v256_v49, %v260_v50 }
  0x58   :  { %2444 = vmatpush1.bf16.msra.mxu0 %v10094_v15  ;;  %1979 = vmatprep.subr.bf16.mxu1 %v13210_v0  ;;  %v7810_v15 = vcombine.high %v216_v7, %v220_v8 }
  0x59   :  { %1791 = vmatmul.mubr.bf16.gmra.mrb[12].mxu1 %v7761_v16  ;;  %2445 = vmatprep.subr.bf16.mxu0 %v13210_v0  ;;  %v7814_v16 = vcombine.high %v218_v10, %v222_v11  ;;  %v280_v10 = vld [vmem:[%s13207_s0 + $0x440] sm:$0xff] }
  0x5a   :  { %2257 = vmatmul.mubr.bf16.gmra.mrb[12].mxu0 %v7765_v18  ;;  %1798 = vmatprep.mubr.bf16.mxu1 %v7770_v19  ;;  %v228_v18 = vld [vmem:[%s13207_s0 + $0x2a0] sm:$0xff]  ;;  %v226_v19 = vld [vmem:[%s13207_s0 + $0x290] sm:$0xff] }
  0x5b   :  { %2264 = vmatprep.mubr.bf16.mxu0 %v7774_v20  ;;  %1980 = vmatpush1.bf16.msra.mxu1 %v10095_v17  ;;  %v224_v17 = vld [vmem:[%s13207_s0 + $0x280] sm:$0xff]  ;;  %v230_v20 = vld [vmem:[%s13207_s0 + $0x2b0] sm:$0xff] }
  0x5c   :  { %2446 = vmatpush1.bf16.msra.mxu0 %v10096_v21  ;;  %1981 = vmatprep.subr.bf16.mxu1 %v13210_v0  ;;  %v7809_v21 = vcombine.low %v216_v7, %v220_v8  ;;  %v7818_v23 = vcombine.high %v224_v17, %v228_v18  ;;  %v284_v11 = vld [vmem:[%s13207_s0 + $0x460] sm:$0xff] }
  0x5d   :  { %2447 = vmatprep.subr.bf16.mxu0 %v13210_v0 }
  0x5f   :  { %1982 = vmatpush1.bf16.msra.mxu1 %v10097_v24  ;;  %v7822_v24 = vcombine.high %v226_v19, %v230_v20 }
  0x60   :  { %2448 = vmatpush1.bf16.msra.mxu0 %v10098_v27  ;;  %1983 = vmatprep.subr.bf16.mxu1 %v13210_v0  ;;  %v234_v27 = vld [vmem:[%s13207_s0 + $0x2d0] sm:$0xff] }
  0x61   :  { %1799 = vmatmul.mubr.bf16.gmra.mrb[16].mxu1 %v7769_v28  ;;  %2449 = vmatprep.subr.bf16.mxu0 %v13210_v0  ;;  %v238_v28 = vld [vmem:[%s13207_s0 + $0x2f0] sm:$0xff] }
  0x62   :  { %2265 = vmatmul.mubr.bf16.gmra.mrb[16].mxu0 %v7773_v29  ;;  %1806 = vmatprep.mubr.bf16.mxu1 %v7778_v30  ;;  %v7817_v29 = vcombine.low %v224_v17, %v228_v18  ;;  %v7821_v30 = vcombine.low %v226_v19, %v230_v20  ;;  %v7829_v38 = vcombine.low %v234_v27, %v238_v28  ;;  %v288_v18 = vld [vmem:[%s13207_s0 + $0x480] sm:$0xff]  ;;  %v290_v20 = vld [vmem:[%s13207_s0 + $0x490] sm:$0xff] }
  0x63   :  { %2272 = vmatprep.mubr.bf16.mxu0 %v7782_v31  ;;  %1984 = vmatpush1.bf16.msra.mxu1 %v10099_v32  ;;  %v7826_v31 = vcombine.high %v232_v25, %v236_v26  ;;  %v7830_v32 = vcombine.high %v234_v27, %v238_v28  ;;  %v292_v19 = vld [vmem:[%s13207_s0 + $0x4a0] sm:$0xff]  ;;  %v298_v28 = vld [vmem:[%s13207_s0 + $0x4d0] sm:$0xff] }
  0x64   :  { %2450 = vmatpush1.bf16.msra.mxu0 %v10100_v33  ;;  %1985 = vmatprep.subr.bf16.mxu1 %v13210_v0  ;;  %v240_v33 = vld [vmem:[%s13207_s0 + $0x300] sm:$0xff] }
  0x65   :  { %2451 = vmatprep.subr.bf16.mxu0 %v13210_v0  ;;  %v296_v26 = vld [vmem:[%s13207_s0 + $0x4c0] sm:$0xff] }
  0x66   :  { %v300_v27 = vld [vmem:[%s13207_s0 + $0x4e0] sm:$0xff] }
  0x67   :  { %1986 = vmatpush1.bf16.msra.mxu1 %v10101_v36  ;;  %v246_v36 = vld [vmem:[%s13207_s0 + $0x330] sm:$0xff] }
  0x68   :  { %2452 = vmatpush1.bf16.msra.mxu0 %v10102_v39  ;;  %1987 = vmatprep.subr.bf16.mxu1 %v13210_v0  ;;  %v7834_v39 = vcombine.high %v240_v33, %v244_v34  ;;  %v7837_v46 = vcombine.low %v242_v35, %v246_v36 }
  0x69   :  { %1807 = vmatmul.mubr.bf16.gmra.mrb[20].mxu1 %v7777_v40  ;;  %2453 = vmatprep.subr.bf16.mxu0 %v13210_v0  ;;  %v7838_v40 = vcombine.high %v242_v35, %v246_v36  ;;  %v308_v35 = vld [vmem:[%s13207_s0 + $0x520] sm:$0xff]  ;;  %v306_v36 = vld [vmem:[%s13207_s0 + $0x510] sm:$0xff] }
  0x6a   :  { %2273 = vmatmul.mubr.bf16.gmra.mrb[20].mxu0 %v7781_v41  ;;  %1814 = vmatprep.mubr.bf16.mxu1 %v7786_v42  ;;  %v248_v41 = vld [vmem:[%s13207_s0 + $0x340] sm:$0xff] }
  0x6b   :  { %2280 = vmatprep.mubr.bf16.mxu0 %v7790_v43  ;;  %1988 = vmatpush1.bf16.msra.mxu1 %v10103_v44  ;;  %v252_v42 = vld [vmem:[%s13207_s0 + $0x360] sm:$0xff]  ;;  %v250_v43 = vld [vmem:[%s13207_s0 + $0x350] sm:$0xff] }
  0x6c   :  { %2454 = vmatpush1.bf16.msra.mxu0 %v10104_v45  ;;  %1989 = vmatprep.subr.bf16.mxu1 %v13210_v0  ;;  %v254_v44 = vld [vmem:[%s13207_s0 + $0x370] sm:$0xff]  ;;  %v7833_v45 = vcombine.low %v240_v33, %v244_v34  ;;  %v7842_v47 = vcombine.high %v248_v41, %v252_v42  ;;  %v304_v34 = vld [vmem:[%s13207_s0 + $0x500] sm:$0xff] }
  0x6d   :  { %2455 = vmatprep.subr.bf16.mxu0 %v13210_v0 }
  0x6f   :  { %1990 = vmatpush1.bf16.msra.mxu1 %v10105_v48  ;;  %v7846_v48 = vcombine.high %v250_v43, %v254_v44 }
  0x70   :  { %2456 = vmatpush1.bf16.msra.mxu0 %v10106_v51  ;;  %1991 = vmatprep.subr.bf16.mxu1 %v13210_v0  ;;  %v258_v51 = vld [vmem:[%s13207_s0 + $0x390] sm:$0xff] }
  0x71   :  { %1815 = vmatmul.mubr.bf16.gmra.mrb[24].mxu1 %v7785_v52  ;;  %2457 = vmatprep.subr.bf16.mxu0 %v13210_v0  ;;  %v262_v52 = vld [vmem:[%s13207_s0 + $0x3b0] sm:$0xff] }
  0x72   :  { %2281 = vmatmul.mubr.bf16.gmra.mrb[24].mxu0 %v7789_v53  ;;  %1822 = vmatprep.mubr.bf16.mxu1 %v7794_v54  ;;  %v7841_v53 = vcombine.low %v248_v41, %v252_v42  ;;  %v7845_v54 = vcombine.low %v250_v43, %v254_v44  ;;  %v7853_v62 = vcombine.low %v258_v51, %v262_v52  ;;  %v312_v42 = vld [vmem:[%s13207_s0 + $0x540] sm:$0xff]  ;;  %v314_v44 = vld [vmem:[%s13207_s0 + $0x550] sm:$0xff] }
  0x73   :  { %2288 = vmatprep.mubr.bf16.mxu0 %v7798_v55  ;;  %1992 = vmatpush1.bf16.msra.mxu1 %v10107_v56  ;;  %v7850_v55 = vcombine.high %v256_v49, %v260_v50  ;;  %v7854_v56 = vcombine.high %v258_v51, %v262_v52  ;;  %v316_v43 = vld [vmem:[%s13207_s0 + $0x560] sm:$0xff]  ;;  %v322_v52 = vld [vmem:[%s13207_s0 + $0x590] sm:$0xff] }
  0x74   :  { %2458 = vmatpush1.bf16.msra.mxu0 %v10108_v57  ;;  %1993 = vmatprep.subr.bf16.mxu1 %v13210_v0  ;;  %v264_v57 = vld [vmem:[%s13207_s0 + $0x3c0] sm:$0xff] }
  0x75   :  { %2459 = vmatprep.subr.bf16.mxu0 %v13210_v0  ;;  %v320_v50 = vld [vmem:[%s13207_s0 + $0x580] sm:$0xff] }
  0x76   :  { %v324_v51 = vld [vmem:[%s13207_s0 + $0x5a0] sm:$0xff] }
  0x77   :  { %1994 = vmatpush1.bf16.msra.mxu1 %v10109_v60  ;;  %v270_v60 = vld [vmem:[%s13207_s0 + $0x3f0] sm:$0xff] }
  0x78   :  { %2460 = vmatpush1.bf16.msra.mxu0 %v10110_v63  ;;  %1995 = vmatprep.subr.bf16.mxu1 %v13210_v0  ;;  %v7858_v63 = vcombine.high %v264_v57, %v268_v58  ;;  %v7861_v7 = vcombine.low %v266_v59, %v270_v60 }
  0x79   :  { %1823 = vmatmul.mubr.bf16.gmra.mrb[28].mxu1 %v7793_v1  ;;  %2461 = vmatprep.subr.bf16.mxu0 %v13210_v0  ;;  %v7862_v1 = vcombine.high %v266_v59, %v270_v60  ;;  %v332_v59 = vld [vmem:[%s13207_s0 + $0x5e0] sm:$0xff]  ;;  %v330_v60 = vld [vmem:[%s13207_s0 + $0x5d0] sm:$0xff] }
  0x7a   :  { %2289 = vmatmul.mubr.bf16.gmra.mrb[28].mxu0 %v7797_v2  ;;  %1830 = vmatprep.mubr.bf16.mxu1 %v7802_v3  ;;  %v272_v2 = vld [vmem:[%s13207_s0 + $0x400] sm:$0xff] }
  0x7b   :  { %2296 = vmatprep.mubr.bf16.mxu0 %v7806_v4  ;;  %1996 = vmatpush1.bf16.msra.mxu1 %v10111_v5  ;;  %v276_v3 = vld [vmem:[%s13207_s0 + $0x420] sm:$0xff]  ;;  %v274_v4 = vld [vmem:[%s13207_s0 + $0x410] sm:$0xff] }
  0x7c   :  { %2462 = vmatpush1.bf16.msra.mxu0 %v10112_v6  ;;  %1997 = vmatprep.subr.bf16.mxu1 %v13210_v0  ;;  %v278_v5 = vld [vmem:[%s13207_s0 + $0x430] sm:$0xff]  ;;  %v7857_v6 = vcombine.low %v264_v57, %v268_v58  ;;  %v7866_v8 = vcombine.high %v272_v2, %v276_v3  ;;  %v328_v58 = vld [vmem:[%s13207_s0 + $0x5c0] sm:$0xff] }
  0x7d   :  { %2463 = vmatprep.subr.bf16.mxu0 %v13210_v0 }
  0x7f   :  { %1998 = vmatpush1.bf16.msra.mxu1 %v10113_v9  ;;  %v7870_v9 = vcombine.high %v274_v4, %v278_v5 }
  0x80   :  { %2464 = vmatpush1.bf16.msra.mxu0 %v10114_v12  ;;  %4017 = vmatprep.subr.bf16.mxu1 %v13210_v0  ;;  %v282_v12 = vld [vmem:[%s13207_s0 + $0x450] sm:$0xff] }
  0x81   :  { %1831 = vmatmul.mubr.bf16.gmra.mrb[32].mxu1 %v7801_v13  ;;  %6350 = vmatprep.subr.bf16.mxu0 %v13210_v0  ;;  %v286_v13 = vld [vmem:[%s13207_s0 + $0x470] sm:$0xff] }
  0x82   :  { %2297 = vmatmul.mubr.bf16.gmra.mrb[32].mxu0 %v7805_v14  ;;  %1838 = vmatprep.mubr.bf16.mxu1 %v7810_v15  ;;  %v7865_v14 = vcombine.low %v272_v2, %v276_v3  ;;  %v7869_v15 = vcombine.low %v274_v4, %v278_v5  ;;  %v7878_v17 = vcombine.high %v282_v12, %v286_v13  ;;  %v336_v3 = vld [vmem:[%s13207_s0 + $0x600] sm:$0xff]  ;;  %v338_v5 = vld [vmem:[%s13207_s0 + $0x610] sm:$0xff] }
  0x83   :  { %2304 = vmatprep.mubr.bf16.mxu0 %v7814_v16  ;;  %v7874_v16 = vcombine.high %v280_v10, %v284_v11  ;;  %v340_v4 = vld [vmem:[%s13207_s0 + $0x620] sm:$0xff] }
  0x89   :  { %1839 = vmatmul.mubr.bf16.gmra.mrb[36].mxu1 %v7809_v21  ;;  %v294_v21 = vld [vmem:[%s13207_s0 + $0x4b0] sm:$0xff] }
  0x8a   :  { %2305 = vmatmul.mubr.bf16.gmra.mrb[36].mxu0 %v7813_v22  ;;  %1846 = vmatprep.mubr.bf16.mxu1 %v7818_v23  ;;  %v7873_v22 = vcombine.low %v280_v10, %v284_v11  ;;  %v7877_v23 = vcombine.low %v282_v12, %v286_v13  ;;  %v7886_v25 = vcombine.high %v290_v20, %v294_v21  ;;  %v145_v11 = vld [vmem:[%s13207_s0 + $0x8] sm:$0xff]  ;;  %v147_v13 = vld [vmem:[%s13207_s0 + $0x18] sm:$0xff] }
  0x8b   :  { %2312 = vmatprep.mubr.bf16.mxu0 %v7822_v24  ;;  %v7882_v24 = vcombine.high %v288_v18, %v292_v19  ;;  %v149_v12 = vld [vmem:[%s13207_s0 + $0x28] sm:$0xff] }
  0x91   :  { %1847 = vmatmul.mubr.bf16.gmra.mrb[40].mxu1 %v7817_v29  ;;  %v302_v29 = vld [vmem:[%s13207_s0 + $0x4f0] sm:$0xff] }
  0x92   :  { %2313 = vmatmul.mubr.bf16.gmra.mrb[40].mxu0 %v7821_v30  ;;  %1854 = vmatprep.mubr.bf16.mxu1 %v7826_v31  ;;  %v7881_v30 = vcombine.low %v288_v18, %v292_v19  ;;  %v7885_v31 = vcombine.low %v290_v20, %v294_v21  ;;  %v7894_v33 = vcombine.high %v298_v28, %v302_v29  ;;  %v153_v19 = vld [vmem:[%s13207_s0 + $0x48] sm:$0xff] }
  0x93   :  { %2320 = vmatprep.mubr.bf16.mxu0 %v7830_v32  ;;  %v7890_v32 = vcombine.high %v296_v26, %v300_v27  ;;  %v157_v20 = vld [vmem:[%s13207_s0 + $0x68] sm:$0xff]  ;;  %v7739_v21 = vcombine.low %v145_v11, %v149_v12 }
  0x99   :  { %1855 = vmatmul.mubr.bf16.gmra.mrb[44].mxu1 %v7825_v37  ;;  %v310_v37 = vld [vmem:[%s13207_s0 + $0x530] sm:$0xff] }
  0x9a   :  { %2321 = vmatmul.mubr.bf16.gmra.mrb[44].mxu0 %v7829_v38  ;;  %1862 = vmatprep.mubr.bf16.mxu1 %v7834_v39  ;;  %v7889_v38 = vcombine.low %v296_v26, %v300_v27  ;;  %v7893_v39 = vcombine.low %v298_v28, %v302_v29  ;;  %v7902_v41 = vcombine.high %v306_v36, %v310_v37  ;;  %v10115_v27 = vld [vmem:[%s13206_s1] sm:$0xff]   ;;  %v161_v28 = vld [vmem:[%s13207_s0 + $0x88] sm:$0xff] }
  0x9b   :  { %2328 = vmatprep.mubr.bf16.mxu0 %v7838_v40  ;;  %v7898_v40 = vcombine.high %v304_v34, %v308_v35  ;;  %v165_v29 = vld [vmem:[%s13207_s0 + $0xa8] sm:$0xff] }
  0xa1   :  { %1863 = vmatmul.mubr.bf16.gmra.mrb[48].mxu1 %v7833_v45  ;;  %v318_v45 = vld [vmem:[%s13207_s0 + $0x570] sm:$0xff] }
  0xa2   :  { %2329 = vmatmul.mubr.bf16.gmra.mrb[48].mxu0 %v7837_v46  ;;  %1870 = vmatprep.mubr.bf16.mxu1 %v7842_v47  ;;  %v7897_v46 = vcombine.low %v304_v34, %v308_v35  ;;  %v7901_v47 = vcombine.low %v306_v36, %v310_v37  ;;  %v7910_v49 = vcombine.high %v314_v44, %v318_v45  ;;  %v10116_v34 = vld [vmem:[%s13206_s1 + $0x8] sm:$0xff]  }
  0xa3   :  { %2336 = vmatprep.mubr.bf16.mxu0 %v7846_v48  ;;  %v7906_v48 = vcombine.high %v312_v42, %v316_v43  ;;  %v7756_v35 = vcombine.high %v161_v28, %v165_v29  ;;  %v169_v37 = vld [vmem:[%s13207_s0 + $0xc8] sm:$0xff] }
  0xa9   :  { %1871 = vmatmul.mubr.bf16.gmra.mrb[52].mxu1 %v7841_v53  ;;  %v326_v53 = vld [vmem:[%s13207_s0 + $0x5b0] sm:$0xff] }
  0xaa   :  { %2337 = vmatmul.mubr.bf16.gmra.mrb[52].mxu0 %v7845_v54  ;;  %1878 = vmatprep.mubr.bf16.mxu1 %v7850_v55  ;;  %v7905_v54 = vcombine.low %v312_v42, %v316_v43  ;;  %v7909_v55 = vcombine.low %v314_v44, %v318_v45  ;;  %v7918_v57 = vcombine.high %v322_v52, %v326_v53 }
  0xab   :  { %2344 = vmatprep.mubr.bf16.mxu0 %v7854_v56  ;;  %v7914_v56 = vcombine.high %v320_v50, %v324_v51  ;;  %v7755_v42 = vcombine.low %v161_v28, %v165_v29  ;;  %v215_v28 = vld [vmem:[%s13207_s0 + $0x238] sm:$0xff] }
  0xb1   :  { %1879 = vmatmul.mubr.bf16.gmra.mrb[56].mxu1 %v7849_v61  ;;  %v334_v61 = vld [vmem:[%s13207_s0 + $0x5f0] sm:$0xff] }
  0xb2   :  { %2345 = vmatmul.mubr.bf16.gmra.mrb[56].mxu0 %v7853_v62  ;;  %1886 = vmatprep.mubr.bf16.mxu1 %v7858_v63  ;;  %v7913_v62 = vcombine.low %v320_v50, %v324_v51  ;;  %v7917_v63 = vcombine.low %v322_v52, %v326_v53  ;;  %v7926_v2 = vcombine.high %v330_v60, %v334_v61  ;;  %v179_v50 = vld [vmem:[%s13207_s0 + $0x118] sm:$0xff] }
  0xb3   :  { %2352 = vmatprep.mubr.bf16.mxu0 %v7862_v1  ;;  %v7922_v1 = vcombine.high %v328_v58, %v332_v59  ;;  %v183_v51 = vld [vmem:[%s13207_s0 + $0x138] sm:$0xff] }
  0xb9   :  { %1887 = vmatmul.mubr.bf16.gmra.mrb[60].mxu1 %v7857_v6  ;;  %v342_v6 = vld [vmem:[%s13207_s0 + $0x630] sm:$0xff] }
  0xba   :  { %2353 = vmatmul.mubr.bf16.gmra.mrb[60].mxu0 %v7861_v7  ;;  %1894 = vmatprep.mubr.bf16.mxu1 %v7866_v8  ;;  %v7921_v7 = vcombine.low %v328_v58, %v332_v59  ;;  %v7925_v8 = vcombine.low %v330_v60, %v334_v61  ;;  %v7934_v10 = vcombine.high %v338_v5, %v342_v6  ;;  %v189_v58 = vld [vmem:[%s13207_s0 + $0x168] sm:$0xff]  ;;  %v10121_v59 = vld [vmem:[%s13206_s1 + $0x30] sm:$0xff]   ;;  %v187_v60 = vld [vmem:[%s13207_s0 + $0x158] sm:$0xff] }
  0xbb   :  { %2360 = vmatprep.mubr.bf16.mxu0 %v7870_v9  ;;  %v7930_v9 = vcombine.high %v336_v3, %v340_v4  ;;  %v191_v61 = vld [vmem:[%s13207_s0 + $0x178] sm:$0xff] }
  0xc1   :  { %1895 = vmatmul.mubr.bf16.gmra.mrb[64].mxu1 %v7865_v14  ;;  %v151_v14 = vld [vmem:[%s13207_s0 + $0x38] sm:$0xff] }
  0xc2   :  { %2361 = vmatmul.mubr.bf16.gmra.mrb[64].mxu0 %v7869_v15  ;;  %1902 = vmatprep.mubr.bf16.mxu1 %v7874_v16  ;;  %v7929_v15 = vcombine.low %v336_v3, %v340_v4  ;;  %v7933_v16 = vcombine.low %v338_v5, %v342_v6  ;;  %v7744_v18 = vcombine.high %v147_v13, %v151_v14  ;;  %v10122_v3 = vld [vmem:[%s13206_s1 + $0x38] sm:$0xff]   ;;  %v193_v4 = vld [vmem:[%s13207_s0 + $0x188] sm:$0xff]  ;;  %v10123_v6 = vld [vmem:[%s13206_s1 + $0x40] sm:$0xff]  }
  0xc3   :  { %2368 = vmatprep.mubr.bf16.mxu0 %v7878_v17  ;;  %v7740_v17 = vcombine.high %v145_v11, %v149_v12  ;;  %v197_v5 = vld [vmem:[%s13207_s0 + $0x1a8] sm:$0xff] }
  0xc4   :  { %v7788_v11 = vcombine.high %v193_v4, %v197_v5 }
  0xc9   :  { %1903 = vmatmul.mubr.bf16.gmra.mrb[68].mxu1 %v7873_v22  ;;  %v155_v22 = vld [vmem:[%s13207_s0 + $0x58] sm:$0xff] }
  0xca   :  { %2369 = vmatmul.mubr.bf16.gmra.mrb[68].mxu0 %v7877_v23  ;;  %1910 = vmatprep.mubr.bf16.mxu1 %v7882_v24  ;;  %v159_v23 = vld [vmem:[%s13207_s0 + $0x78] sm:$0xff]  ;;  %v7743_v24 = vcombine.low %v147_v13, %v151_v14  ;;  %v10124_v13 = vld [vmem:[%s13206_s1 + $0x48] sm:$0xff]  }
  0xcb   :  { %2376 = vmatprep.mubr.bf16.mxu0 %v7886_v25  ;;  %v7748_v25 = vcombine.high %v153_v19, %v157_v20  ;;  %v7752_v26 = vcombine.high %v155_v22, %v159_v23  ;;  %v201_v14 = vld [vmem:[%s13207_s0 + $0x1c8] sm:$0xff] }
  0xd1   :  { %1911 = vmatmul.mubr.bf16.gmra.mrb[72].mxu1 %v7881_v30  ;;  %v163_v30 = vld [vmem:[%s13207_s0 + $0x98] sm:$0xff] }
  0xd2   :  { %2377 = vmatmul.mubr.bf16.gmra.mrb[72].mxu0 %v7885_v31  ;;  %1918 = vmatprep.mubr.bf16.mxu1 %v7890_v32  ;;  %v167_v31 = vld [vmem:[%s13207_s0 + $0xb8] sm:$0xff]  ;;  %v7747_v32 = vcombine.low %v153_v19, %v157_v20  ;;  %v7787_v19 = vcombine.low %v193_v4, %v197_v5  ;;  %v249_v5 = vld [vmem:[%s13207_s0 + $0x348] sm:$0xff] }
  0xd3   :  { %2384 = vmatprep.mubr.bf16.mxu0 %v7894_v33  ;;  %v7751_v33 = vcombine.low %v155_v22, %v159_v23  ;;  %v7760_v36 = vcombine.high %v163_v30, %v167_v31  ;;  %v7759_v43 = vcombine.low %v163_v30, %v167_v31  ;;  %v10126_v23 = vld [vmem:[%s13206_s1 + $0x58] sm:$0xff]  }
  0xd9   :  { %1919 = vmatmul.mubr.bf16.gmra.mrb[76].mxu1 %v7889_v38  ;;  %v173_v38 = vld [vmem:[%s13207_s0 + $0xe8] sm:$0xff] }
  0xda   :  { %2385 = vmatmul.mubr.bf16.gmra.mrb[76].mxu0 %v7893_v39  ;;  %1926 = vmatprep.mubr.bf16.mxu1 %v7898_v40  ;;  %v10117_v39 = vld [vmem:[%s13206_s1 + $0x10] sm:$0xff]   ;;  %v171_v40 = vld [vmem:[%s13207_s0 + $0xd8] sm:$0xff]  ;;  %v7764_v44 = vcombine.high %v169_v37, %v173_v38  ;;  %v7763_v52 = vcombine.low %v169_v37, %v173_v38 }
  0xdb   :  { %2392 = vmatprep.mubr.bf16.mxu0 %v7902_v41  ;;  %v175_v41 = vld [vmem:[%s13207_s0 + $0xf8] sm:$0xff] }
  0xdc   :  { %v7768_v45 = vcombine.high %v171_v40, %v175_v41  ;;  %v7767_v53 = vcombine.low %v171_v40, %v175_v41  ;;  %v219_v37 = vld [vmem:[%s13207_s0 + $0x258] sm:$0xff] }
  0xdd   :  { %v223_v38 = vld [vmem:[%s13207_s0 + $0x278] sm:$0xff] }
  0xe1   :  { %1927 = vmatmul.mubr.bf16.gmra.mrb[80].mxu1 %v7897_v46  ;;  %v10118_v46 = vld [vmem:[%s13206_s1 + $0x18] sm:$0xff]  }
  0xe2   :  { %2393 = vmatmul.mubr.bf16.gmra.mrb[80].mxu0 %v7901_v47  ;;  %1934 = vmatprep.mubr.bf16.mxu1 %v7906_v48  ;;  %v177_v47 = vld [vmem:[%s13207_s0 + $0x108] sm:$0xff] }
  0xe3   :  { %2400 = vmatprep.mubr.bf16.mxu0 %v7910_v49  ;;  %v181_v48 = vld [vmem:[%s13207_s0 + $0x128] sm:$0xff]  ;;  %v10119_v49 = vld [vmem:[%s13206_s1 + $0x20] sm:$0xff]  }
  0xe9   :  { %1935 = vmatmul.mubr.bf16.gmra.mrb[84].mxu1 %v7905_v54  ;;  %v7772_v54 = vcombine.high %v177_v47, %v181_v48 }
  0xea   :  { %2401 = vmatmul.mubr.bf16.gmra.mrb[84].mxu0 %v7909_v55  ;;  %1942 = vmatprep.mubr.bf16.mxu1 %v7914_v56  ;;  %v7776_v55 = vcombine.high %v179_v50, %v183_v51  ;;  %v10120_v56 = vld [vmem:[%s13206_s1 + $0x28] sm:$0xff]  }
  0xeb   :  { %2408 = vmatprep.mubr.bf16.mxu0 %v7918_v57  ;;  %v185_v57 = vld [vmem:[%s13207_s0 + $0x148] sm:$0xff] }
  0xf1   :  { %1943 = vmatmul.mubr.bf16.gmra.mrb[88].mxu1 %v7913_v62  ;;  %v7771_v62 = vcombine.low %v177_v47, %v181_v48  ;;  %v231_v47 = vld [vmem:[%s13207_s0 + $0x2b8] sm:$0xff] }
  0xf2   :  { %2409 = vmatmul.mubr.bf16.gmra.mrb[88].mxu0 %v7917_v63  ;;  %1950 = vmatprep.mubr.bf16.mxu1 %v7922_v1  ;;  %v7775_v63 = vcombine.low %v179_v50, %v183_v51  ;;  %v7780_v1 = vcombine.high %v185_v57, %v189_v58 }
  0xf3   :  { %2416 = vmatprep.mubr.bf16.mxu0 %v7926_v2  ;;  %v7784_v2 = vcombine.high %v187_v60, %v191_v61 }
  0xf9   :  { %1951 = vmatmul.mubr.bf16.gmra.mrb[92].mxu1 %v7921_v7  ;;  %v195_v7 = vld [vmem:[%s13207_s0 + $0x198] sm:$0xff] }
  0xfa   :  { %2417 = vmatmul.mubr.bf16.gmra.mrb[92].mxu0 %v7925_v8  ;;  %1958 = vmatprep.mubr.bf16.mxu1 %v7930_v9  ;;  %v199_v8 = vld [vmem:[%s13207_s0 + $0x1b8] sm:$0xff]  ;;  %v7779_v9 = vcombine.low %v185_v57, %v189_v58 }
  0xfb   :  { %2424 = vmatprep.mubr.bf16.mxu0 %v7934_v10  ;;  %v7783_v10 = vcombine.low %v187_v60, %v191_v61  ;;  %v7792_v12 = vcombine.high %v195_v7, %v199_v8  ;;  %v7791_v20 = vcombine.low %v195_v7, %v199_v8  ;;  %v241_v60 = vld [vmem:[%s13207_s0 + $0x308] sm:$0xff]  ;;  %v251_v7 = vld [vmem:[%s13207_s0 + $0x358] sm:$0xff] }
  0xfc   :  { %v245_v61 = vld [vmem:[%s13207_s0 + $0x328] sm:$0xff]  ;;  %v255_v8 = vld [vmem:[%s13207_s0 + $0x378] sm:$0xff] }
 0x101   :  { %1959 = vmatmul.mubr.bf16.gmra.mrb[96].mxu1 %v7929_v15  ;;  %v205_v15 = vld [vmem:[%s13207_s0 + $0x1e8] sm:$0xff] }
 0x102   :  { %2425 = vmatmul.mubr.bf16.gmra.mrb[96].mxu0 %v7933_v16  ;;  %1999 = vmatprep.mubr.bf16.mxu1 %v7740_v17  ;;  %v10125_v16 = vld [vmem:[%s13206_s1 + $0x50] sm:$0xff]   ;;  %v203_v17 = vld [vmem:[%s13207_s0 + $0x1d8] sm:$0xff]  ;;  %v7795_v29 = vcombine.low %v201_v14, %v205_v15 }
 0x103   :  { %2465 = vmatprep.mubr.bf16.mxu0 %v7744_v18  ;;  %v207_v18 = vld [vmem:[%s13207_s0 + $0x1f8] sm:$0xff] }
 0x104   :  { %v7800_v22 = vcombine.high %v203_v17, %v207_v18  ;;  %v7799_v30 = vcombine.low %v203_v17, %v207_v18  ;;  %v7847_v18 = vcombine.low %v251_v7, %v255_v8 }
 0x109   :  { %2000 = vmatmul.mubr.bf16.vlgmr.msra.gmra.mrb[0].mxu1 %v7739_v21  ;;  %v7796_v21 = vcombine.high %v201_v14, %v205_v15  ;;  %v261_v14 = vld [vmem:[%s13207_s0 + $0x3a8] sm:$0xff]  ;;  %v259_v15 = vld [vmem:[%s13207_s0 + $0x398] sm:$0xff] }
 0x10a   :  { %2466 = vmatmul.mubr.bf16.vlgmr.msra.gmra.mrb[0].mxu0 %v7743_v24  ;;  %4018 = vmatpush1.bf16.msra.mxu1 %v10115_v27  ;;  %v209_v24 = vld [vmem:[%s13207_s0 + $0x208] sm:$0xff] }
 0x10b   :  { %6351 = vmatpush1.bf16.msra.mxu0 %v10115_v27  ;;  %2007 = vmatprep.mubr.bf16.mxu1 %v7748_v25  ;;  %v213_v25 = vld [vmem:[%s13207_s0 + $0x228] sm:$0xff]  ;;  %v211_v27 = vld [vmem:[%s13207_s0 + $0x218] sm:$0xff] }
 0x10c   :  { %2473 = vmatprep.mubr.bf16.mxu0 %v7752_v26  ;;  %4019 = vmatprep.subr.bf16.mxu1 %v13210_v0  ;;  %v10127_v26 = vld [vmem:[%s13206_s1 + $0x60] sm:$0xff]   ;;  %v7804_v31 = vcombine.high %v209_v24, %v213_v25  ;;  %v7807_v40 = vcombine.low %v211_v27, %v215_v28 }
 0x10d   :  { %6352 = vmatprep.subr.bf16.mxu0 %v13210_v0 }
 0x10e   :  { %4020 = vmatpush1.bf16.msra.mxu1 %v10116_v34 }
 0x10f   :  { %6353 = vmatpush1.bf16.msra.mxu0 %v10116_v34  ;;  %4021 = vmatprep.subr.bf16.mxu1 %v13210_v0  ;;  %v217_v34 = vld [vmem:[%s13207_s0 + $0x248] sm:$0xff] }
 0x110   :  { %6354 = vmatprep.subr.bf16.mxu0 %v13210_v0 }
 0x111   :  { %2008 = vmatmul.mubr.bf16.gmra.mrb[4].mxu1 %v7747_v32  ;;  %v7808_v32 = vcombine.high %v211_v27, %v215_v28 }
 0x112   :  { %2474 = vmatmul.mubr.bf16.gmra.mrb[4].mxu0 %v7751_v33  ;;  %2015 = vmatprep.mubr.bf16.mxu1 %v7756_v35  ;;  %v10128_v33 = vld [vmem:[%s13206_s1 + $0x68] sm:$0xff]  }
 0x113   :  { %2481 = vmatprep.mubr.bf16.mxu0 %v7760_v36  ;;  %4022 = vmatpush1.bf16.msra.mxu1 %v10117_v39  ;;  %v221_v35 = vld [vmem:[%s13207_s0 + $0x268] sm:$0xff]  ;;  %v10129_v36 = vld [vmem:[%s13206_s1 + $0x70] sm:$0xff]  }
 0x114   :  { %6355 = vmatpush1.bf16.msra.mxu0 %v10117_v39  ;;  %4023 = vmatprep.subr.bf16.mxu1 %v13210_v0  ;;  %v7803_v39 = vcombine.low %v209_v24, %v213_v25  ;;  %v7812_v41 = vcombine.high %v217_v34, %v221_v35  ;;  %v7811_v48 = vcombine.low %v217_v34, %v221_v35  ;;  %v271_v24 = vld [vmem:[%s13207_s0 + $0x3f8] sm:$0xff] }
 0x115   :  { %6356 = vmatprep.subr.bf16.mxu0 %v13210_v0 }
 0x117   :  { %4024 = vmatpush1.bf16.msra.mxu1 %v10118_v46 }
 0x118   :  { %6357 = vmatpush1.bf16.msra.mxu0 %v10118_v46  ;;  %4025 = vmatprep.subr.bf16.mxu1 %v13210_v0  ;;  %v227_v46 = vld [vmem:[%s13207_s0 + $0x298] sm:$0xff] }
 0x119   :  { %2016 = vmatmul.mubr.bf16.gmra.mrb[8].mxu1 %v7755_v42  ;;  %6358 = vmatprep.subr.bf16.mxu0 %v13210_v0  ;;  %v7816_v42 = vcombine.high %v219_v37, %v223_v38  ;;  %v7824_v51 = vcombine.high %v227_v46, %v231_v47  ;;  %v7823_v57 = vcombine.low %v227_v46, %v231_v47  ;;  %v293_v46 = vld [vmem:[%s13207_s0 + $0x4a8] sm:$0xff]  ;;  %v291_v47 = vld [vmem:[%s13207_s0 + $0x498] sm:$0xff] }
 0x11a   :  { %2482 = vmatmul.mubr.bf16.gmra.mrb[8].mxu0 %v7759_v43  ;;  %2023 = vmatprep.mubr.bf16.mxu1 %v7764_v44  ;;  %v10130_v43 = vld [vmem:[%s13206_s1 + $0x78] sm:$0xff]   ;;  %v225_v44 = vld [vmem:[%s13207_s0 + $0x288] sm:$0xff] }
 0x11b   :  { %2489 = vmatprep.mubr.bf16.mxu0 %v7768_v45  ;;  %4026 = vmatpush1.bf16.msra.mxu1 %v10119_v49  ;;  %v229_v45 = vld [vmem:[%s13207_s0 + $0x2a8] sm:$0xff] }
 0x11c   :  { %6359 = vmatpush1.bf16.msra.mxu0 %v10119_v49  ;;  %4027 = vmatprep.subr.bf16.mxu1 %v13210_v0  ;;  %v7815_v49 = vcombine.low %v219_v37, %v223_v38  ;;  %v7820_v50 = vcombine.high %v225_v44, %v229_v45  ;;  %v281_v37 = vld [vmem:[%s13207_s0 + $0x448] sm:$0xff] }
 0x11d   :  { %6360 = vmatprep.subr.bf16.mxu0 %v13210_v0  ;;  %v285_v38 = vld [vmem:[%s13207_s0 + $0x468] sm:$0xff] }
 0x11f   :  { %4028 = vmatpush1.bf16.msra.mxu1 %v10120_v56 }
 0x120   :  { %6361 = vmatpush1.bf16.msra.mxu0 %v10120_v56  ;;  %4029 = vmatprep.subr.bf16.mxu1 %v13210_v0  ;;  %v7819_v56 = vcombine.low %v225_v44, %v229_v45  ;;  %v289_v45 = vld [vmem:[%s13207_s0 + $0x488] sm:$0xff] }
 0x121   :  { %2024 = vmatmul.mubr.bf16.gmra.mrb[12].mxu1 %v7763_v52  ;;  %6362 = vmatprep.subr.bf16.mxu0 %v13210_v0  ;;  %v233_v52 = vld [vmem:[%s13207_s0 + $0x2c8] sm:$0xff] }
 0x122   :  { %2490 = vmatmul.mubr.bf16.gmra.mrb[12].mxu0 %v7767_v53  ;;  %2031 = vmatprep.mubr.bf16.mxu1 %v7772_v54  ;;  %v237_v53 = vld [vmem:[%s13207_s0 + $0x2e8] sm:$0xff]  ;;  %v235_v54 = vld [vmem:[%s13207_s0 + $0x2d8] sm:$0xff] }
 0x123   :  { %2497 = vmatprep.mubr.bf16.mxu0 %v7776_v55  ;;  %4030 = vmatpush1.bf16.msra.mxu1 %v10121_v59  ;;  %v239_v55 = vld [vmem:[%s13207_s0 + $0x2f8] sm:$0xff]  ;;  %v7828_v58 = vcombine.high %v233_v52, %v237_v53 }
 0x124   :  { %6363 = vmatpush1.bf16.msra.mxu0 %v10121_v59  ;;  %4031 = vmatprep.subr.bf16.mxu1 %v13210_v0  ;;  %v7832_v59 = vcombine.high %v235_v54, %v239_v55 }
 0x125   :  { %6364 = vmatprep.subr.bf16.mxu0 %v13210_v0 }
 0x127   :  { %4032 = vmatpush1.bf16.msra.mxu1 %v10122_v3 }
 0x128   :  { %6365 = vmatpush1.bf16.msra.mxu0 %v10122_v3  ;;  %4033 = vmatprep.subr.bf16.mxu1 %v13210_v0  ;;  %v7836_v3 = vcombine.high %v241_v60, %v245_v61 }
 0x129   :  { %2032 = vmatmul.mubr.bf16.gmra.mrb[16].mxu1 %v7771_v62  ;;  %6366 = vmatprep.subr.bf16.mxu0 %v13210_v0  ;;  %v243_v62 = vld [vmem:[%s13207_s0 + $0x318] sm:$0xff] }
 0x12a   :  { %2498 = vmatmul.mubr.bf16.gmra.mrb[16].mxu0 %v7775_v63  ;;  %2039 = vmatprep.mubr.bf16.mxu1 %v7780_v1  ;;  %v247_v63 = vld [vmem:[%s13207_s0 + $0x338] sm:$0xff]  ;;  %v7827_v1 = vcombine.low %v233_v52, %v237_v53  ;;  %v297_v53 = vld [vmem:[%s13207_s0 + $0x4c8] sm:$0xff] }
 0x12b   :  { %2505 = vmatprep.mubr.bf16.mxu0 %v7784_v2  ;;  %4034 = vmatpush1.bf16.msra.mxu1 %v10123_v6  ;;  %v7831_v2 = vcombine.low %v235_v54, %v239_v55  ;;  %v7840_v4 = vcombine.high %v243_v62, %v247_v63  ;;  %v301_v54 = vld [vmem:[%s13207_s0 + $0x4e8] sm:$0xff]  ;;  %v299_v55 = vld [vmem:[%s13207_s0 + $0x4d8] sm:$0xff] }
 0x12c   :  { %6367 = vmatpush1.bf16.msra.mxu0 %v10123_v6  ;;  %4035 = vmatprep.subr.bf16.mxu1 %v13210_v0  ;;  %v253_v6 = vld [vmem:[%s13207_s0 + $0x368] sm:$0xff] }
 0x12d   :  { %6368 = vmatprep.subr.bf16.mxu0 %v13210_v0  ;;  %v7843_v17 = vcombine.low %v249_v5, %v253_v6 }
 0x12f   :  { %4036 = vmatpush1.bf16.msra.mxu1 %v10124_v13 }
 0x130   :  { %6369 = vmatpush1.bf16.msra.mxu0 %v10124_v13  ;;  %4037 = vmatprep.subr.bf16.mxu1 %v13210_v0  ;;  %v257_v13 = vld [vmem:[%s13207_s0 + $0x388] sm:$0xff] }
 0x131   :  { %2040 = vmatmul.mubr.bf16.gmra.mrb[20].mxu1 %v7779_v9  ;;  %6370 = vmatprep.subr.bf16.mxu0 %v13210_v0  ;;  %v7835_v9 = vcombine.low %v241_v60, %v245_v61  ;;  %v7851_v25 = vcombine.low %v257_v13, %v261_v14  ;;  %v305_v61 = vld [vmem:[%s13207_s0 + $0x508] sm:$0xff] }
 0x132   :  { %2506 = vmatmul.mubr.bf16.gmra.mrb[20].mxu0 %v7783_v10  ;;  %2047 = vmatprep.mubr.bf16.mxu1 %v7788_v11  ;;  %v7839_v10 = vcombine.low %v243_v62, %v247_v63  ;;  %v7844_v11 = vcombine.high %v249_v5, %v253_v6  ;;  %v309_v62 = vld [vmem:[%s13207_s0 + $0x528] sm:$0xff]  ;;  %v307_v63 = vld [vmem:[%s13207_s0 + $0x518] sm:$0xff] }
 0x133   :  { %2513 = vmatprep.mubr.bf16.mxu0 %v7792_v12  ;;  %4038 = vmatpush1.bf16.msra.mxu1 %v10125_v16  ;;  %v7848_v12 = vcombine.high %v251_v7, %v255_v8  ;;  %v313_v6 = vld [vmem:[%s13207_s0 + $0x548] sm:$0xff]  ;;  %v315_v8 = vld [vmem:[%s13207_s0 + $0x558] sm:$0xff] }
 0x134   :  { %6371 = vmatpush1.bf16.msra.mxu0 %v10125_v16  ;;  %4039 = vmatprep.subr.bf16.mxu1 %v13210_v0  ;;  %v263_v16 = vld [vmem:[%s13207_s0 + $0x3b8] sm:$0xff]  ;;  %v317_v7 = vld [vmem:[%s13207_s0 + $0x568] sm:$0xff] }
 0x135   :  { %6372 = vmatprep.subr.bf16.mxu0 %v13210_v0 }
 0x137   :  { %4040 = vmatpush1.bf16.msra.mxu1 %v10126_v23 }
 0x138   :  { %6373 = vmatpush1.bf16.msra.mxu0 %v10126_v23  ;;  %4041 = vmatprep.subr.bf16.mxu1 %v13210_v0  ;;  %v267_v23 = vld [vmem:[%s13207_s0 + $0x3d8] sm:$0xff] }
 0x139   :  { %2048 = vmatmul.mubr.bf16.gmra.mrb[24].mxu1 %v7787_v19  ;;  %6374 = vmatprep.subr.bf16.mxu0 %v13210_v0  ;;  %v7852_v19 = vcombine.high %v257_v13, %v261_v14  ;;  %v7864_v28 = vcombine.high %v267_v23, %v271_v24  ;;  %v7863_v34 = vcombine.low %v267_v23, %v271_v24  ;;  %v321_v14 = vld [vmem:[%s13207_s0 + $0x588] sm:$0xff]  ;;  %v331_v24 = vld [vmem:[%s13207_s0 + $0x5d8] sm:$0xff] }
 0x13a   :  { %2514 = vmatmul.mubr.bf16.gmra.mrb[24].mxu0 %v7791_v20  ;;  %2055 = vmatprep.mubr.bf16.mxu1 %v7796_v21  ;;  %v7856_v20 = vcombine.high %v259_v15, %v263_v16  ;;  %v265_v21 = vld [vmem:[%s13207_s0 + $0x3c8] sm:$0xff] }
 0x13b   :  { %2521 = vmatprep.mubr.bf16.mxu0 %v7800_v22  ;;  %4042 = vmatpush1.bf16.msra.mxu1 %v10127_v26  ;;  %v269_v22 = vld [vmem:[%s13207_s0 + $0x3e8] sm:$0xff] }
 0x13c   :  { %6375 = vmatpush1.bf16.msra.mxu0 %v10127_v26  ;;  %4043 = vmatprep.subr.bf16.mxu1 %v13210_v0  ;;  %v7855_v26 = vcombine.low %v259_v15, %v263_v16  ;;  %v7860_v27 = vcombine.high %v265_v21, %v269_v22  ;;  %v325_v15 = vld [vmem:[%s13207_s0 + $0x5a8] sm:$0xff]  ;;  %v323_v16 = vld [vmem:[%s13207_s0 + $0x598] sm:$0xff] }
 0x13d   :  { %6376 = vmatprep.subr.bf16.mxu0 %v13210_v0  ;;  %v333_v23 = vld [vmem:[%s13207_s0 + $0x5e8] sm:$0xff] }
 0x13f   :  { %4044 = vmatpush1.bf16.msra.mxu1 %v10128_v33 }
 0x140   :  { %6377 = vmatpush1.bf16.msra.mxu0 %v10128_v33  ;;  %4045 = vmatprep.subr.bf16.mxu1 %v13210_v0  ;;  %v7859_v33 = vcombine.low %v265_v21, %v269_v22  ;;  %v329_v22 = vld [vmem:[%s13207_s0 + $0x5c8] sm:$0xff] }
 0x141   :  { %2056 = vmatmul.mubr.bf16.gmra.mrb[28].mxu1 %v7795_v29  ;;  %6378 = vmatprep.subr.bf16.mxu0 %v13210_v0  ;;  %v273_v29 = vld [vmem:[%s13207_s0 + $0x408] sm:$0xff] }
 0x142   :  { %2522 = vmatmul.mubr.bf16.gmra.mrb[28].mxu0 %v7799_v30  ;;  %2063 = vmatprep.mubr.bf16.mxu1 %v7804_v31  ;;  %v277_v30 = vld [vmem:[%s13207_s0 + $0x428] sm:$0xff]  ;;  %v275_v31 = vld [vmem:[%s13207_s0 + $0x418] sm:$0xff] }
 0x143   :  { %2529 = vmatprep.mubr.bf16.mxu0 %v7808_v32  ;;  %4046 = vmatpush1.bf16.msra.mxu1 %v10129_v36  ;;  %v279_v32 = vld [vmem:[%s13207_s0 + $0x438] sm:$0xff]  ;;  %v7868_v35 = vcombine.high %v273_v29, %v277_v30 }
 0x144   :  { %6379 = vmatpush1.bf16.msra.mxu0 %v10129_v36  ;;  %4047 = vmatprep.subr.bf16.mxu1 %v13210_v0  ;;  %v7872_v36 = vcombine.high %v275_v31, %v279_v32 }
 0x145   :  { %6380 = vmatprep.subr.bf16.mxu0 %v13210_v0 }
 0x147   :  { %4048 = vmatpush1.bf16.msra.mxu1 %v10130_v43 }
 0x148   :  { %6381 = vmatpush1.bf16.msra.mxu0 %v10130_v43  ;;  %4250 = vmatprep.subr.bf16.mxu1 %v13210_v0  ;;  %v7876_v43 = vcombine.high %v281_v37, %v285_v38 }
 0x149   :  { %2064 = vmatmul.mubr.bf16.gmra.mrb[32].mxu1 %v7803_v39  ;;  %6583 = vmatprep.subr.bf16.mxu0 %v13210_v0  ;;  %v283_v39 = vld [vmem:[%s13207_s0 + $0x458] sm:$0xff] }
 0x14a   :  { %2530 = vmatmul.mubr.bf16.gmra.mrb[32].mxu0 %v7807_v40  ;;  %2071 = vmatprep.mubr.bf16.mxu1 %v7812_v41  ;;  %v287_v40 = vld [vmem:[%s13207_s0 + $0x478] sm:$0xff]  ;;  %v7867_v41 = vcombine.low %v273_v29, %v277_v30  ;;  %v337_v30 = vld [vmem:[%s13207_s0 + $0x608] sm:$0xff] }
 0x14b   :  { %2537 = vmatprep.mubr.bf16.mxu0 %v7816_v42  ;;  %v7871_v42 = vcombine.low %v275_v31, %v279_v32  ;;  %v7880_v44 = vcombine.high %v283_v39, %v287_v40  ;;  %v341_v31 = vld [vmem:[%s13207_s0 + $0x628] sm:$0xff]  ;;  %v339_v32 = vld [vmem:[%s13207_s0 + $0x618] sm:$0xff] }
 0x151   :  { %2072 = vmatmul.mubr.bf16.gmra.mrb[36].mxu1 %v7811_v48  ;;  %v295_v48 = vld [vmem:[%s13207_s0 + $0x4b8] sm:$0xff] }
 0x152   :  { %2538 = vmatmul.mubr.bf16.gmra.mrb[36].mxu0 %v7815_v49  ;;  %2079 = vmatprep.mubr.bf16.mxu1 %v7820_v50  ;;  %v7875_v49 = vcombine.low %v281_v37, %v285_v38  ;;  %v7879_v50 = vcombine.low %v283_v39, %v287_v40  ;;  %v7888_v52 = vcombine.high %v291_v47, %v295_v48  ;;  %v8001_v38 = vld [vmem:[%s13207_s0 + $0x640] sm:$0xff] }
 0x153   :  { %2545 = vmatprep.mubr.bf16.mxu0 %v7824_v51  ;;  %v7884_v51 = vcombine.high %v289_v45, %v293_v46  ;;  %v8005_v39 = vld [vmem:[%s13207_s0 + $0x660] sm:$0xff] }
 0x154   :  { %v8401_v40 = vld [vmem:[%s13207_s0 + $0xc80] sm:$0xff] }
 0x159   :  { %2080 = vmatmul.mubr.bf16.gmra.mrb[40].mxu1 %v7819_v56  ;;  %v303_v56 = vld [vmem:[%s13207_s0 + $0x4f8] sm:$0xff] }
 0x15a   :  { %2546 = vmatmul.mubr.bf16.gmra.mrb[40].mxu0 %v7823_v57  ;;  %2087 = vmatprep.mubr.bf16.mxu1 %v7828_v58  ;;  %v7883_v57 = vcombine.low %v289_v45, %v293_v46  ;;  %v7887_v58 = vcombine.low %v291_v47, %v295_v48  ;;  %v7896_v60 = vcombine.high %v299_v55, %v303_v56  ;;  %v8009_v46 = vld [vmem:[%s13207_s0 + $0x680] sm:$0xff] }
 0x15b   :  { %2553 = vmatprep.mubr.bf16.mxu0 %v7832_v59  ;;  %v7892_v59 = vcombine.high %v297_v53, %v301_v54  ;;  %v8013_v47 = vld [vmem:[%s13207_s0 + $0x6a0] sm:$0xff]  ;;  %v8201_v48 = vcombine.low %v8001_v38, %v8005_v39 }
 0x161   :  { %2088 = vmatmul.mubr.bf16.gmra.mrb[44].mxu1 %v7827_v1  ;;  %v311_v1 = vld [vmem:[%s13207_s0 + $0x538] sm:$0xff] }
 0x162   :  { %2554 = vmatmul.mubr.bf16.gmra.mrb[44].mxu0 %v7831_v2  ;;  %2095 = vmatprep.mubr.bf16.mxu1 %v7836_v3  ;;  %v7891_v2 = vcombine.low %v297_v53, %v301_v54  ;;  %v7895_v3 = vcombine.low %v299_v55, %v303_v56  ;;  %v7904_v5 = vcombine.high %v307_v63, %v311_v1  ;;  %v10131_v54 = vld [vmem:[%s13206_s1 + $0x80] sm:$0xff]  }
 0x163   :  { %2561 = vmatprep.mubr.bf16.mxu0 %v7840_v4  ;;  %v7900_v4 = vcombine.high %v305_v61, %v309_v62  ;;  %v8017_v55 = vld [vmem:[%s13207_s0 + $0x6c0] sm:$0xff] }
 0x164   :  { %v8021_v56 = vld [vmem:[%s13207_s0 + $0x6e0] sm:$0xff] }
 0x169   :  { %2096 = vmatmul.mubr.bf16.gmra.mrb[48].mxu1 %v7835_v9  ;;  %v319_v9 = vld [vmem:[%s13207_s0 + $0x578] sm:$0xff] }
 0x16a   :  { %2562 = vmatmul.mubr.bf16.gmra.mrb[48].mxu0 %v7839_v10  ;;  %2103 = vmatprep.mubr.bf16.mxu1 %v7844_v11  ;;  %v7899_v10 = vcombine.low %v305_v61, %v309_v62  ;;  %v7903_v11 = vcombine.low %v307_v63, %v311_v1  ;;  %v7912_v13 = vcombine.high %v315_v8, %v319_v9  ;;  %v10132_v61 = vld [vmem:[%s13206_s1 + $0x88] sm:$0xff]   ;;  %v11202_v1 = vld [vmem:[%s13208_s2] ss:$0 sm:$0xff] }
 0x16b   :  { %2569 = vmatprep.mubr.bf16.mxu0 %v7848_v12  ;;  %v7908_v12 = vcombine.high %v313_v6, %v317_v7  ;;  %v8218_v62 = vcombine.high %v8017_v55, %v8021_v56 }
 0x171   :  { %2104 = vmatmul.mubr.bf16.gmra.mrb[52].mxu1 %v7843_v17  ;;  %v327_v17 = vld [vmem:[%s13207_s0 + $0x5b8] sm:$0xff] }
 0x172   :  { %2570 = vmatmul.mubr.bf16.gmra.mrb[52].mxu0 %v7847_v18  ;;  %2111 = vmatprep.mubr.bf16.mxu1 %v7852_v19  ;;  %v7907_v18 = vcombine.low %v313_v6, %v317_v7  ;;  %v7911_v19 = vcombine.low %v315_v8, %v319_v9  ;;  %v7920_v21 = vcombine.high %v323_v16, %v327_v17  ;;  %v8425_v6 = vld [vmem:[%s13207_s0 + $0xd40] sm:$0xff] }
 0x173   :  { %2577 = vmatprep.mubr.bf16.mxu0 %v7856_v20  ;;  %v7916_v20 = vcombine.high %v321_v14, %v325_v15  ;;  %v8429_v7 = vld [vmem:[%s13207_s0 + $0xd60] sm:$0xff] }
 0x179   :  { %2112 = vmatmul.mubr.bf16.gmra.mrb[56].mxu1 %v7851_v25  ;;  %v335_v25 = vld [vmem:[%s13207_s0 + $0x5f8] sm:$0xff] }
 0x17a   :  { %2578 = vmatmul.mubr.bf16.gmra.mrb[56].mxu0 %v7855_v26  ;;  %2119 = vmatprep.mubr.bf16.mxu1 %v7860_v27  ;;  %v7915_v26 = vcombine.low %v321_v14, %v325_v15  ;;  %v7919_v27 = vcombine.low %v323_v16, %v327_v17  ;;  %v7928_v29 = vcombine.high %v331_v24, %v335_v25 }
 0x17b   :  { %2585 = vmatprep.mubr.bf16.mxu0 %v7864_v28  ;;  %v7924_v28 = vcombine.high %v329_v22, %v333_v23 }
 0x181   :  { %2120 = vmatmul.mubr.bf16.gmra.mrb[60].mxu1 %v7859_v33  ;;  %v343_v33 = vld [vmem:[%s13207_s0 + $0x638] sm:$0xff] }
 0x182   :  { %2586 = vmatmul.mubr.bf16.gmra.mrb[60].mxu0 %v7863_v34  ;;  %2127 = vmatprep.mubr.bf16.mxu1 %v7868_v35  ;;  %v7923_v34 = vcombine.low %v329_v22, %v333_v23  ;;  %v7927_v35 = vcombine.low %v331_v24, %v335_v25  ;;  %v7936_v37 = vcombine.high %v339_v32, %v343_v33  ;;  %v11238_v24 = vld [vmem:[%s13207_s0 + $0x740] sm:$0xff] }
 0x183   :  { %2593 = vmatprep.mubr.bf16.mxu0 %v7872_v36  ;;  %v7932_v36 = vcombine.high %v337_v30, %v341_v31  ;;  %v8037_v25 = vld [vmem:[%s13207_s0 + $0x760] sm:$0xff] }
 0x189   :  { %2128 = vmatmul.mubr.bf16.gmra.mrb[64].mxu1 %v7867_v41  ;;  %v8405_v41 = vld [vmem:[%s13207_s0 + $0xca0] sm:$0xff] }
 0x18a   :  { %2594 = vmatmul.mubr.bf16.gmra.mrb[64].mxu0 %v7871_v42  ;;  %2135 = vmatprep.mubr.bf16.mxu1 %v7876_v43  ;;  %v7931_v42 = vcombine.low %v337_v30, %v341_v31  ;;  %v7935_v43 = vcombine.low %v339_v32, %v343_v33  ;;  %v8602_v45 = vcombine.high %v8401_v40, %v8405_v41 }
 0x18b   :  { %2601 = vmatprep.mubr.bf16.mxu0 %v7880_v44  ;;  %v8202_v44 = vcombine.high %v8001_v38, %v8005_v39 }
 0x191   :  { %2136 = vmatmul.mubr.bf16.gmra.mrb[68].mxu1 %v7875_v49  ;;  %v8409_v49 = vld [vmem:[%s13207_s0 + $0xcc0] sm:$0xff] }
 0x192   :  { %2602 = vmatmul.mubr.bf16.gmra.mrb[68].mxu0 %v7879_v50  ;;  %2143 = vmatprep.mubr.bf16.mxu1 %v7884_v51  ;;  %v8413_v50 = vld [vmem:[%s13207_s0 + $0xce0] sm:$0xff]  ;;  %v8601_v51 = vcombine.low %v8401_v40, %v8405_v41 }
 0x193   :  { %2609 = vmatprep.mubr.bf16.mxu0 %v7888_v52  ;;  %v8210_v52 = vcombine.high %v8009_v46, %v8013_v47  ;;  %v8610_v53 = vcombine.high %v8409_v49, %v8413_v50 }
 0x199   :  { %2144 = vmatmul.mubr.bf16.gmra.mrb[72].mxu1 %v7883_v57  ;;  %v8417_v57 = vld [vmem:[%s13207_s0 + $0xd00] sm:$0xff] }
 0x19a   :  { %2610 = vmatmul.mubr.bf16.gmra.mrb[72].mxu0 %v7887_v58  ;;  %2151 = vmatprep.mubr.bf16.mxu1 %v7892_v59  ;;  %v8421_v58 = vld [vmem:[%s13207_s0 + $0xd20] sm:$0xff]  ;;  %v8209_v59 = vcombine.low %v8009_v46, %v8013_v47 }
 0x19b   :  { %2617 = vmatprep.mubr.bf16.mxu0 %v7896_v60  ;;  %v8609_v60 = vcombine.low %v8409_v49, %v8413_v50  ;;  %v8618_v63 = vcombine.high %v8417_v57, %v8421_v58  ;;  %v8617_v14 = vcombine.low %v8417_v57, %v8421_v58  ;;  %v11270_v46 = vld [vmem:[%s13207_s0 + $0x780] sm:$0xff] }
 0x19c   :  { %v8045_v47 = vld [vmem:[%s13207_s0 + $0x7a0] sm:$0xff] }
 0x19d   :  { %v8441_v50 = vld [vmem:[%s13207_s0 + $0xdc0] sm:$0xff] }
 0x1a1   :  { %2152 = vmatmul.mubr.bf16.gmra.mrb[76].mxu1 %v7891_v2  ;;  %v11207_v2 = vld [vmem:[%s13207_s0 + $0x700] sm:$0xff] }
 0x1a2   :  { %2618 = vmatmul.mubr.bf16.gmra.mrb[76].mxu0 %v7895_v3  ;;  %2159 = vmatprep.mubr.bf16.mxu1 %v7900_v4  ;;  %v8029_v3 = vld [vmem:[%s13207_s0 + $0x720] sm:$0xff]  ;;  %v10133_v4 = vld [vmem:[%s13206_s1 + $0x90] sm:$0xff]  }
 0x1a3   :  { %2625 = vmatprep.mubr.bf16.mxu0 %v7904_v5  ;;  %v8226_v15 = vcombine.high %v11207_v2, %v8029_v3  ;;  %v8225_v33 = vcombine.low %v11207_v2, %v8029_v3  ;;  %v10138_v3 = vld [vmem:[%s13206_s1 + $0xb8] sm:$0xff]  }
 0x1a9   :  { %2160 = vmatmul.mubr.bf16.gmra.mrb[80].mxu1 %v7899_v10 }
 0x1aa   :  { %2626 = vmatmul.mubr.bf16.gmra.mrb[80].mxu0 %v7903_v11  ;;  %2167 = vmatprep.mubr.bf16.mxu1 %v7908_v12  ;;  %v8217_v11 = vcombine.low %v8017_v55, %v8021_v56  ;;  %v8233_v55 = vcombine.low %v11238_v24, %v8037_v25 }
 0x1ab   :  { %2633 = vmatprep.mubr.bf16.mxu0 %v7912_v13 }
 0x1b1   :  { %2168 = vmatmul.mubr.bf16.gmra.mrb[84].mxu1 %v7907_v18 }
 0x1b2   :  { %2634 = vmatmul.mubr.bf16.gmra.mrb[84].mxu0 %v7911_v19  ;;  %2175 = vmatprep.mubr.bf16.mxu1 %v7916_v20  ;;  %v8626_v20 = vcombine.high %v8425_v6, %v8429_v7 }
 0x1b3   :  { %2641 = vmatprep.mubr.bf16.mxu0 %v7920_v21  ;;  %v10134_v21 = vld [vmem:[%s13206_s1 + $0x98] sm:$0xff]  }
 0x1b9   :  { %2176 = vmatmul.mubr.bf16.gmra.mrb[88].mxu1 %v7915_v26  ;;  %v10135_v26 = vld [vmem:[%s13206_s1 + $0xa0] sm:$0xff]  }
 0x1ba   :  { %2642 = vmatmul.mubr.bf16.gmra.mrb[88].mxu0 %v7919_v27  ;;  %2183 = vmatprep.mubr.bf16.mxu1 %v7924_v28  ;;  %v8433_v28 = vld [vmem:[%s13207_s0 + $0xd80] sm:$0xff] }
 0x1bb   :  { %2649 = vmatprep.mubr.bf16.mxu0 %v7928_v29  ;;  %v8437_v29 = vld [vmem:[%s13207_s0 + $0xda0] sm:$0xff] }
 0x1bc   :  { %v8633_v58 = vcombine.low %v8433_v28, %v8437_v29 }
 0x1c1   :  { %2184 = vmatmul.mubr.bf16.gmra.mrb[92].mxu1 %v7923_v34 }
 0x1c2   :  { %2650 = vmatmul.mubr.bf16.gmra.mrb[92].mxu0 %v7927_v35  ;;  %2191 = vmatprep.mubr.bf16.mxu1 %v7932_v36  ;;  %v8625_v36 = vcombine.low %v8425_v6, %v8429_v7  ;;  %v11302_v6 = vld [vmem:[%s13207_s0 + $0x7c0] sm:$0xff] }
 0x1c3   :  { %2657 = vmatprep.mubr.bf16.mxu0 %v7936_v37  ;;  %v8234_v37 = vcombine.high %v11238_v24, %v8037_v25  ;;  %v8053_v7 = vld [vmem:[%s13207_s0 + $0x7e0] sm:$0xff] }
 0x1c9   :  { %2192 = vmatmul.mubr.bf16.gmra.mrb[96].mxu1 %v7931_v42  ;;  %v8634_v42 = vcombine.high %v8433_v28, %v8437_v29 }
 0x1ca   :  { %2658 = vmatmul.mubr.bf16.gmra.mrb[96].mxu0 %v7935_v43  ;;  %4049 = vmatprep.mubr.bf16.mxu1 %v8202_v44  ;;  %v10136_v43 = vld [vmem:[%s13206_s1 + $0xa8] sm:$0xff]  }
 0x1cb   :  { %6382 = vmatprep.mubr.bf16.mxu0 %v8602_v45 }
 0x1d1   :  { %4050 = vmatmul.mubr.bf16.vlgmr.msra.gmra.mrb[100].mxu1 %v8201_v48  ;;  %v10137_v48 = vld [vmem:[%s13206_s1 + $0xb0] sm:$0xff]  }
 0x1d2   :  { %6383 = vmatmul.mubr.bf16.vlgmr.msra.gmra.mrb[100].mxu0 %v8601_v51  ;;  %4251 = vmatpush1.bf16.msra.mxu1 %v10131_v54  ;;  %v8445_v51 = vld [vmem:[%s13207_s0 + $0xde0] sm:$0xff] }
 0x1d3   :  { %6584 = vmatpush1.bf16.msra.mxu0 %v10131_v54  ;;  %4057 = vmatprep.mubr.bf16.mxu1 %v8210_v52  ;;  %v8642_v2 = vcombine.high %v8441_v50, %v8445_v51 }
 0x1d4   :  { %6390 = vmatprep.mubr.bf16.mxu0 %v8610_v53  ;;  %4252 = vmatprep.subr.bf16.mxu1 %v13210_v0 }
 0x1d5   :  { %6585 = vmatprep.subr.bf16.mxu0 %v13210_v0 }
 0x1d6   :  { %4253 = vmatpush1.bf16.msra.mxu1 %v10132_v61 }
 0x1d7   :  { %6586 = vmatpush1.bf16.msra.mxu0 %v10132_v61  ;;  %4254 = vmatprep.subr.bf16.mxu1 %v13210_v0 }
 0x1d8   :  { %6587 = vmatprep.subr.bf16.mxu0 %v13210_v0 }
 0x1d9   :  { %4058 = vmatmul.mubr.bf16.gmra.mrb[104].mxu1 %v8209_v59  ;;  %v8242_v59 = vcombine.high %v11270_v46, %v8045_v47 }
 0x1da   :  { %6391 = vmatmul.mubr.bf16.gmra.mrb[104].mxu0 %v8609_v60  ;;  %4065 = vmatprep.mubr.bf16.mxu1 %v8218_v62 }
 0x1db   :  { %6398 = vmatprep.mubr.bf16.mxu0 %v8618_v63  ;;  %4255 = vmatpush1.bf16.msra.mxu1 %v10133_v4 }
 0x1dc   :  { %v2001_v5 = vpop.f32.mrb[0].mxu1  ;;  %6588 = vmatpush1.bf16.msra.mxu0 %v10133_v4  ;;  %4256 = vmatprep.subr.bf16.mxu1 %v13210_v0 }
 0x1dd   :  { %v9050_v8 = vadd.f32 %v11202_v1, %v2001_v5  ;;  %v2467_v9 = vpop.f32.mrb[0].mxu0  ;;  %v2003_v10 = vpop.f32.mrb[1].mxu1  ;;  %6589 = vmatprep.subr.bf16.mxu0 %v13210_v0 }
 0x1de   :  { %v2469_v12 = vpop.f32.mrb[1].mxu0  ;;  %v2004_v13 = vpop.f32.mrb[2].mxu1  ;;  %v8449_v10 = vld [vmem:[%s13207_s0 + $0xe00] sm:$0xff] }
 0x1df   :  { %v11225_v16 = vadd.f32 %v9050_v8, %v2467_v9  ;;  %v9052_v17 = vadd.f32 %v11202_v1, %v2004_v13  ;;  %v2470_v18 = vpop.f32.mrb[2].mxu0  ;;  %v2006_v19 = vpop.f32.mrb[3].mxu1  ;;  %4257 = vmatpush1.bf16.msra.mxu1 %v10134_v21  ;;  %v10139_v8 = vld [vmem:[%s13206_s1 + $0xc0] sm:$0xff]  }
 0x1e0   :  { %v2472_v22 = vpop.f32.mrb[3].mxu0  ;;  %6590 = vmatpush1.bf16.msra.mxu0 %v10134_v21  ;;  %4258 = vmatprep.subr.bf16.mxu1 %v13210_v0  ;;  %v8641_v19 = vcombine.low %v8441_v50, %v8445_v51  ;;  %v10142_v51 = vld [vmem:[%s13206_s1 + $0xd8] sm:$0xff]  }
 0x1e1   :  { %v11232_v23 = vadd.f32 %v9052_v17, %v2470_v18  ;;  %4066 = vmatmul.mubr.bf16.gmra.mrb[108].mxu1 %v8217_v11  ;;  %6591 = vmatprep.subr.bf16.mxu0 %v13210_v0  ;;  %v8453_v11 = vld [vmem:[%s13207_s0 + $0xe20] sm:$0xff]  ;;  %vm2666_vm0 = vcmp.ge.f32.partialorder %v11225_v16, 0.0 }
 0x1e2   :  { %6399 = vmatmul.mubr.bf16.gmra.mrb[108].mxu0 %v8617_v14  ;;  %4073 = vmatprep.mubr.bf16.mxu1 %v8226_v15  ;;  %v8241_v15 = vcombine.low %v11270_v46, %v8045_v47 }
 0x1e3   :  { %6406 = vmatprep.mubr.bf16.mxu0 %v8626_v20  ;;  %4259 = vmatpush1.bf16.msra.mxu1 %v10135_v26  ;;  %v8250_v20 = vcombine.high %v11302_v6, %v8053_v7  ;;  %vm2667_vm2 = vcmp.ge.f32.partialorder %v11232_v23, 0.0 }
 0x1e4   :  { %v2009_v27 = vpop.f32.mrb[4].mxu1  ;;  %6592 = vmatpush1.bf16.msra.mxu0 %v10135_v26  ;;  %4260 = vmatprep.subr.bf16.mxu1 %v13210_v0  ;;  %v8650_v26 = vcombine.high %v8449_v10, %v8453_v11 }
 0x1e5   :  { %v9054_v30 = vadd.f32 %v11202_v1, %v2009_v27  ;;  %v2475_v31 = vpop.f32.mrb[4].mxu0  ;;  %v2011_v32 = vpop.f32.mrb[5].mxu1  ;;  %6593 = vmatprep.subr.bf16.mxu0 %v13210_v0  ;;  %v10140_v27 = vld [vmem:[%s13206_s1 + $0xc8] sm:$0xff]  }
 0x1e6   :  { %v2477_v34 = vpop.f32.mrb[5].mxu0  ;;  %v2012_v35 = vpop.f32.mrb[6].mxu1  ;;  %v10141_v32 = vld [vmem:[%s13206_s1 + $0xd0] sm:$0xff]  }
 0x1e7   :  { %v11257_v38 = vadd.f32 %v9054_v30, %v2475_v31  ;;  %v9056_v39 = vadd.f32 %v11202_v1, %v2012_v35  ;;  %v2478_v40 = vpop.f32.mrb[6].mxu0  ;;  %v2014_v41 = vpop.f32.mrb[7].mxu1  ;;  %4261 = vmatpush1.bf16.msra.mxu1 %v10136_v43  ;;  %v11334_v30 = vld [vmem:[%s13207_s0 + $0x800] sm:$0xff] }
 0x1e8   :  { %v2480_v44 = vpop.f32.mrb[7].mxu0  ;;  %6594 = vmatpush1.bf16.msra.mxu0 %v10136_v43  ;;  %4262 = vmatprep.subr.bf16.mxu1 %v13210_v0  ;;  %v8061_v31 = vld [vmem:[%s13207_s0 + $0x820] sm:$0xff]  ;;  %v8649_v43 = vcombine.low %v8449_v10, %v8453_v11 }
 0x1e9   :  { %v11264_v45 = vadd.f32 %v9056_v39, %v2478_v40  ;;  %4074 = vmatmul.mubr.bf16.gmra.mrb[112].mxu1 %v8225_v33  ;;  %6595 = vmatprep.subr.bf16.mxu0 %v13210_v0  ;;  %v8457_v34 = vld [vmem:[%s13207_s0 + $0xe40] sm:$0xff]  ;;  %v8249_v40 = vcombine.low %v11302_v6, %v8053_v7  ;;  %v8258_v44 = vcombine.high %v11334_v30, %v8061_v31  ;;  %vm2668_vm6 = vcmp.ge.f32.partialorder %v11257_v38, 0.0 }
 0x1ea   :  { %6407 = vmatmul.mubr.bf16.gmra.mrb[112].mxu0 %v8625_v36  ;;  %4081 = vmatprep.mubr.bf16.mxu1 %v8234_v37  ;;  %v8461_v35 = vld [vmem:[%s13207_s0 + $0xe60] sm:$0xff] }
 0x1eb   :  { %6414 = vmatprep.mubr.bf16.mxu0 %v8634_v42  ;;  %4263 = vmatpush1.bf16.msra.mxu1 %v10137_v48  ;;  %v8658_v50 = vcombine.high %v8457_v34, %v8461_v35  ;;  %v8657_v6 = vcombine.low %v8457_v34, %v8461_v35  ;;  %vm2669_vm7 = vcmp.ge.f32.partialorder %v11264_v45, 0.0 }
 0x1ec   :  { %v2017_v49 = vpop.f32.mrb[8].mxu1  ;;  %6596 = vmatpush1.bf16.msra.mxu0 %v10137_v48  ;;  %4264 = vmatprep.subr.bf16.mxu1 %v13210_v0 }
 0x1ed   :  { %v9058_v52 = vadd.f32 %v11202_v1, %v2017_v49  ;;  %v2483_v53 = vpop.f32.mrb[8].mxu0  ;;  %v2019_v54 = vpop.f32.mrb[9].mxu1  ;;  %6597 = vmatprep.subr.bf16.mxu0 %v13210_v0 }
 0x1ee   :  { %v2485_v56 = vpop.f32.mrb[9].mxu0  ;;  %v2020_v57 = vpop.f32.mrb[10].mxu1  ;;  %v11366_v54 = vld [vmem:[%s13207_s0 + $0x840] sm:$0xff] }
 0x1ef   :  { %v11289_v60 = vadd.f32 %v9058_v52, %v2483_v53  ;;  %v9060_v61 = vadd.f32 %v11202_v1, %v2020_v57  ;;  %v2486_v62 = vpop.f32.mrb[10].mxu0  ;;  %v2022_v63 = vpop.f32.mrb[11].mxu1  ;;  %4265 = vmatpush1.bf16.msra.mxu1 %v10138_v3  ;;  %v10143_v56 = vld [vmem:[%s13206_s1 + $0xe0] sm:$0xff]  }
 0x1f0   :  { %v2488_v4 = vpop.f32.mrb[11].mxu0  ;;  %6598 = vmatpush1.bf16.msra.mxu0 %v10138_v3  ;;  %4266 = vmatprep.subr.bf16.mxu1 %v13210_v0 }
 0x1f1   :  { %v11296_v5 = vadd.f32 %v9060_v61, %v2486_v62  ;;  %4082 = vmatmul.mubr.bf16.gmra.mrb[116].mxu1 %v8233_v55  ;;  %6599 = vmatprep.subr.bf16.mxu0 %v13210_v0  ;;  %v8069_v55 = vld [vmem:[%s13207_s0 + $0x860] sm:$0xff]  ;;  %vm2670_vm12 = vcmp.ge.f32.partialorder %v11289_v60, 0.0 }
 0x1f2   :  { %6415 = vmatmul.mubr.bf16.gmra.mrb[116].mxu0 %v8633_v58  ;;  %4089 = vmatprep.mubr.bf16.mxu1 %v8242_v59  ;;  %v8465_v58 = vld [vmem:[%s13207_s0 + $0xe80] sm:$0xff]  ;;  %v8266_v7 = vcombine.high %v11366_v54, %v8069_v55 }
 0x1f3   :  { %6422 = vmatprep.mubr.bf16.mxu0 %v8642_v2  ;;  %4267 = vmatpush1.bf16.msra.mxu1 %v10139_v8  ;;  %v8469_v59 = vld [vmem:[%s13207_s0 + $0xea0] sm:$0xff]  ;;  %v8257_v2 = vcombine.low %v11334_v30, %v8061_v31  ;;  %vm2671_vm13 = vcmp.ge.f32.partialorder %v11296_v5, 0.0 }
 0x1f4   :  { %v2025_v9 = vpop.f32.mrb[12].mxu1  ;;  %6600 = vmatpush1.bf16.msra.mxu0 %v10139_v8  ;;  %4268 = vmatprep.subr.bf16.mxu1 %v13210_v0 }
 0x1f5   :  { %v9062_v12 = vadd.f32 %v11202_v1, %v2025_v9  ;;  %v2491_v13 = vpop.f32.mrb[12].mxu0  ;;  %v2027_v14 = vpop.f32.mrb[13].mxu1  ;;  %6601 = vmatprep.subr.bf16.mxu0 %v13210_v0 }
 0x1f6   :  { %v2493_v17 = vpop.f32.mrb[13].mxu0  ;;  %v2028_v18 = vpop.f32.mrb[14].mxu1 }
 0x1f7   :  { %v11321_v21 = vadd.f32 %v9062_v12, %v2491_v13  ;;  %v9064_v22 = vadd.f32 %v11202_v1, %v2028_v18  ;;  %v2494_v24 = vpop.f32.mrb[14].mxu0  ;;  %v2030_v25 = vpop.f32.mrb[15].mxu1  ;;  %4269 = vmatpush1.bf16.msra.mxu1 %v10140_v27  ;;  %v8666_v12 = vcombine.high %v8465_v58, %v8469_v59  ;;  %v10144_v13 = vld [vmem:[%s13206_s1 + $0xe8] sm:$0xff]   ;;  %v8073_v17 = vld [vmem:[%s13207_s0 + $0x880] sm:$0xff] }
 0x1f8   :  { %v2496_v28 = vpop.f32.mrb[15].mxu0  ;;  %6602 = vmatpush1.bf16.msra.mxu0 %v10140_v27  ;;  %4270 = vmatprep.subr.bf16.mxu1 %v13210_v0  ;;  %v8077_v18 = vld [vmem:[%s13207_s0 + $0x8a0] sm:$0xff] }
 0x1f9   :  { %v11328_v29 = vadd.f32 %v9064_v22, %v2494_v24  ;;  %4090 = vmatmul.mubr.bf16.gmra.mrb[120].mxu1 %v8241_v15  ;;  %6603 = vmatprep.subr.bf16.mxu0 %v13210_v0  ;;  %v8473_v22 = vld [vmem:[%s13207_s0 + $0xec0] sm:$0xff]  ;;  %v8265_v28 = vcombine.low %v11366_v54, %v8069_v55  ;;  %v8273_v54 = vcombine.low %v8073_v17, %v8077_v18 }
 0x1fa   :  { %6423 = vmatmul.mubr.bf16.gmra.mrb[120].mxu0 %v8641_v19  ;;  %4097 = vmatprep.mubr.bf16.mxu1 %v8250_v20  ;;  %v10145_v19 = vld [vmem:[%s13206_s1 + $0xf0] sm:$0xff]   ;;  %v8477_v24 = vld [vmem:[%s13207_s0 + $0xee0] sm:$0xff] }
 0x1fb   :  { %6430 = vmatprep.mubr.bf16.mxu0 %v8650_v26  ;;  %4271 = vmatpush1.bf16.msra.mxu1 %v10141_v32 }
 0x1fc   :  { %v2033_v33 = vpop.f32.mrb[16].mxu1  ;;  %6604 = vmatpush1.bf16.msra.mxu0 %v10141_v32  ;;  %4272 = vmatprep.subr.bf16.mxu1 %v13210_v0  ;;  %v8665_v32 = vcombine.low %v8465_v58, %v8469_v59 }
 0x1fd   :  { %v9066_v36 = vadd.f32 %v11202_v1, %v2033_v33  ;;  %v2499_v37 = vpop.f32.mrb[16].mxu0  ;;  %v2035_v39 = vpop.f32.mrb[17].mxu1  ;;  %6605 = vmatprep.subr.bf16.mxu0 %v13210_v0  ;;  %v8274_v33 = vcombine.high %v8073_v17, %v8077_v18 }
 0x1fe   :  { %v2501_v41 = vpop.f32.mrb[17].mxu0  ;;  %v2036_v42 = vpop.f32.mrb[18].mxu1  ;;  %v8674_v39 = vcombine.high %v8473_v22, %v8477_v24 }
 0x1ff   :  { %v11353_v46 = vadd.f32 %v9066_v36, %v2499_v37  ;;  %v9068_v47 = vadd.f32 %v11202_v1, %v2036_v42  ;;  %v2502_v48 = vpop.f32.mrb[18].mxu0  ;;  %v2038_v49 = vpop.f32.mrb[19].mxu1  ;;  %4273 = vmatpush1.bf16.msra.mxu1 %v10142_v51 }
 0x200   :  { %v2504_v52 = vpop.f32.mrb[19].mxu0  ;;  %6606 = vmatpush1.bf16.msra.mxu0 %v10142_v51  ;;  %4274 = vmatprep.subr.bf16.mxu1 %v13210_v0  ;;  %v8485_v49 = vld [vmem:[%s13207_s0 + $0xf20] sm:$0xff] }
 0x201   :  { %v11360_v53 = vadd.f32 %v9068_v47, %v2502_v48  ;;  %4098 = vmatmul.mubr.bf16.gmra.mrb[124].mxu1 %v8249_v40  ;;  %6607 = vmatprep.subr.bf16.mxu0 %v13210_v0  ;;  %v10146_v40 = vld [vmem:[%s13206_s1 + $0xf8] sm:$0xff]   ;;  %v8481_v48 = vld [vmem:[%s13207_s0 + $0xf00] sm:$0xff] }
 0x202   :  { %6431 = vmatmul.mubr.bf16.gmra.mrb[124].mxu0 %v8649_v43  ;;  %4105 = vmatprep.mubr.bf16.mxu1 %v8258_v44  ;;  %v8081_v43 = vld [vmem:[%s13207_s0 + $0x8c0] sm:$0xff] }
 0x203   :  { %6438 = vmatprep.mubr.bf16.mxu0 %v8658_v50  ;;  %4275 = vmatpush1.bf16.msra.mxu1 %v10143_v56  ;;  %v8085_v44 = vld [vmem:[%s13207_s0 + $0x8e0] sm:$0xff] }
 0x204   :  { %v2041_v57 = vpop.f32.mrb[20].mxu1  ;;  %6608 = vmatpush1.bf16.msra.mxu0 %v10143_v56  ;;  %4276 = vmatprep.subr.bf16.mxu1 %v13210_v0  ;;  %v8282_v58 = vcombine.high %v8081_v43, %v8085_v44  ;;  %v8281_v17 = vcombine.low %v8081_v43, %v8085_v44 }
 0x205   :  { %v9070_v61 = vadd.f32 %v11202_v1, %v2041_v57  ;;  %v2507_v62 = vpop.f32.mrb[20].mxu0  ;;  %v2043_v63 = vpop.f32.mrb[21].mxu1  ;;  %6609 = vmatprep.subr.bf16.mxu0 %v13210_v0  ;;  %v8673_v57 = vcombine.low %v8473_v22, %v8477_v24 }
 0x206   :  { %v2509_v3 = vpop.f32.mrb[21].mxu0  ;;  %v2044_v4 = vpop.f32.mrb[22].mxu1 }
 0x207   :  { %v11385_v8 = vadd.f32 %v9070_v61, %v2507_v62  ;;  %v9072_v9 = vadd.f32 %v11202_v1, %v2044_v4  ;;  %v2510_v10 = vpop.f32.mrb[22].mxu0  ;;  %v2046_v11 = vpop.f32.mrb[23].mxu1  ;;  %4277 = vmatpush1.bf16.msra.mxu1 %v10144_v13 }
 0x208   :  { %v2512_v14 = vpop.f32.mrb[23].mxu0  ;;  %6610 = vmatpush1.bf16.msra.mxu0 %v10144_v13  ;;  %4278 = vmatprep.subr.bf16.mxu1 %v13210_v0  ;;  %v8493_v11 = vld [vmem:[%s13207_s0 + $0xf60] sm:$0xff] }
 0x209   :  { %v11392_v15 = vadd.f32 %v9072_v9, %v2510_v10  ;;  %4106 = vmatmul.mubr.bf16.gmra.mrb[128].mxu1 %v8257_v2  ;;  %6611 = vmatprep.subr.bf16.mxu0 %v13210_v0  ;;  %v8682_v2 = vcombine.high %v8481_v48, %v8485_v49  ;;  %v8489_v10 = vld [vmem:[%s13207_s0 + $0xf40] sm:$0xff] }
 0x20a   :  { %6439 = vmatmul.mubr.bf16.gmra.mrb[128].mxu0 %v8657_v6  ;;  %4113 = vmatprep.mubr.bf16.mxu1 %v8266_v7  ;;  %v8089_v6 = vld [vmem:[%s13207_s0 + $0x900] sm:$0xff] }
 0x20b   :  { %6446 = vmatprep.mubr.bf16.mxu0 %v8666_v12  ;;  %4279 = vmatpush1.bf16.msra.mxu1 %v10145_v19  ;;  %v8093_v7 = vld [vmem:[%s13207_s0 + $0x920] sm:$0xff] }
 0x20c   :  { %v2049_v20 = vpop.f32.mrb[24].mxu1  ;;  %6612 = vmatpush1.bf16.msra.mxu0 %v10145_v19  ;;  %4280 = vmatprep.subr.bf16.mxu1 %v13210_v0  ;;  %v8290_v22 = vcombine.high %v8089_v6, %v8093_v7  ;;  %v8289_v43 = vcombine.low %v8089_v6, %v8093_v7 }
 0x20d   :  { %v9074_v25 = vadd.f32 %v11202_v1, %v2049_v20  ;;  %v2515_v26 = vpop.f32.mrb[24].mxu0  ;;  %v2051_v27 = vpop.f32.mrb[25].mxu1  ;;  %6613 = vmatprep.subr.bf16.mxu0 %v13210_v0  ;;  %v8681_v20 = vcombine.low %v8481_v48, %v8485_v49  ;;  %v8689_v48 = vcombine.low %v8489_v10, %v8493_v11 }
 0x20e   :  { %v2517_v30 = vpop.f32.mrb[25].mxu0  ;;  %v2052_v31 = vpop.f32.mrb[26].mxu1 }
 0x20f   :  { %v11414_v34 = vadd.f32 %v9074_v25, %v2515_v26  ;;  %v9076_v35 = vadd.f32 %v11202_v1, %v2052_v31  ;;  %v2518_v36 = vpop.f32.mrb[26].mxu0  ;;  %v2054_v37 = vpop.f32.mrb[27].mxu1  ;;  %4281 = vmatpush1.bf16.msra.mxu1 %v10146_v40 }
 0x210   :  { %v2520_v41 = vpop.f32.mrb[27].mxu0  ;;  %6614 = vmatpush1.bf16.msra.mxu0 %v10146_v40  ;;  %4483 = vmatprep.subr.bf16.mxu1 %v13210_v0  ;;  %v8501_v37 = vld [vmem:[%s13207_s0 + $0xfa0] sm:$0xff] }
 0x211   :  { %v11421_v42 = vadd.f32 %v9076_v35, %v2518_v36  ;;  %4114 = vmatmul.mubr.bf16.gmra.mrb[132].mxu1 %v8265_v28  ;;  %6816 = vmatprep.subr.bf16.mxu0 %v13210_v0  ;;  %v8690_v28 = vcombine.high %v8489_v10, %v8493_v11  ;;  %v8497_v36 = vld [vmem:[%s13207_s0 + $0xf80] sm:$0xff] }
 0x212   :  { %6447 = vmatmul.mubr.bf16.gmra.mrb[132].mxu0 %v8665_v32  ;;  %4121 = vmatprep.mubr.bf16.mxu1 %v8274_v33  ;;  %v8097_v32 = vld [vmem:[%s13207_s0 + $0x940] sm:$0xff] }
 0x213   :  { %6454 = vmatprep.mubr.bf16.mxu0 %v8674_v39  ;;  %v8101_v33 = vld [vmem:[%s13207_s0 + $0x960] sm:$0xff] }
 0x214   :  { %v2057_v47 = vpop.f32.mrb[28].mxu1  ;;  %v8298_v49 = vcombine.high %v8097_v32, %v8101_v33 }
 0x215   :  { %v9078_v50 = vadd.f32 %v11202_v1, %v2057_v47  ;;  %v2523_v51 = vpop.f32.mrb[28].mxu0  ;;  %v2059_v52 = vpop.f32.mrb[29].mxu1 }
 0x216   :  { %v2525_v55 = vpop.f32.mrb[29].mxu0  ;;  %v2060_v56 = vpop.f32.mrb[30].mxu1 }
 0x217   :  { %v11437_v59 = vadd.f32 %v9078_v50, %v2523_v51  ;;  %v9080_v61 = vadd.f32 %v11202_v1, %v2060_v56  ;;  %v2526_v62 = vpop.f32.mrb[30].mxu0  ;;  %v2062_v63 = vpop.f32.mrb[31].mxu1  ;;  %v8698_v55 = vcombine.high %v8497_v36, %v8501_v37 }
 0x218   :  { %v2528_v3 = vpop.f32.mrb[31].mxu0  ;;  %v8505_v63 = vld [vmem:[%s13207_s0 + $0xfc0] sm:$0xff] }
 0x219   :  { %v11440_v4 = vadd.f32 %v9080_v61, %v2526_v62  ;;  %4122 = vmatmul.mubr.bf16.gmra.mrb[136].mxu1 %v8273_v54  ;;  %v8109_v61 = vld [vmem:[%s13207_s0 + $0x9a0] sm:$0xff] }
 0x21a   :  { %6455 = vmatmul.mubr.bf16.gmra.mrb[136].mxu0 %v8673_v57  ;;  %4129 = vmatprep.mubr.bf16.mxu1 %v8282_v58  ;;  %v8105_v58 = vld [vmem:[%s13207_s0 + $0x980] sm:$0xff] }
 0x21b   :  { %6462 = vmatprep.mubr.bf16.mxu0 %v8682_v2  ;;  %v8509_v2 = vld [vmem:[%s13207_s0 + $0xfe0] sm:$0xff] }
 0x21c   :  { %v2065_v9 = vpop.f32.mrb[32].mxu1 }
 0x21d   :  { %v9082_v12 = vadd.f32 %v11202_v1, %v2065_v9  ;;  %v2531_v13 = vpop.f32.mrb[32].mxu0  ;;  %v2067_v14 = vpop.f32.mrb[33].mxu1  ;;  %v8297_v9 = vcombine.low %v8097_v32, %v8101_v33  ;;  %v8517_v32 = vld [vmem:[%s13207_s0 + $0x1020] sm:$0xff] }
 0x21e   :  { %v2533_v18 = vpop.f32.mrb[33].mxu0  ;;  %v2068_v19 = vpop.f32.mrb[34].mxu1 }
 0x21f   :  { %v11455_v24 = vadd.f32 %v9082_v12, %v2531_v13  ;;  %v9084_v25 = vadd.f32 %v11202_v1, %v2068_v19  ;;  %v2534_v26 = vpop.f32.mrb[34].mxu0  ;;  %v2070_v27 = vpop.f32.mrb[35].mxu1  ;;  %v8697_v12 = vcombine.low %v8497_v36, %v8501_v37  ;;  %v8306_v13 = vcombine.high %v8105_v58, %v8109_v61 }
 0x220   :  { %v2536_v30 = vpop.f32.mrb[35].mxu0  ;;  %v8117_v27 = vld [vmem:[%s13207_s0 + $0x9e0] sm:$0xff]  ;;  %v8305_v37 = vcombine.low %v8105_v58, %v8109_v61 }
 0x221   :  { %v11458_v31 = vadd.f32 %v9084_v25, %v2534_v26  ;;  %4130 = vmatmul.mubr.bf16.gmra.mrb[140].mxu1 %v8281_v17  ;;  %v8113_v26 = vld [vmem:[%s13207_s0 + $0x9c0] sm:$0xff] }
 0x222   :  { %6463 = vmatmul.mubr.bf16.gmra.mrb[140].mxu0 %v8681_v20  ;;  %4137 = vmatprep.mubr.bf16.mxu1 %v8290_v22  ;;  %v8706_v20 = vcombine.high %v8505_v63, %v8509_v2  ;;  %v8513_v30 = vld [vmem:[%s13207_s0 + $0x1000] sm:$0xff] }
 0x223   :  { %6470 = vmatprep.mubr.bf16.mxu0 %v8690_v28  ;;  %v8521_v61 = vld [vmem:[%s13207_s0 + $0x1040] sm:$0xff] }
 0x224   :  { %v2073_v35 = vpop.f32.mrb[36].mxu1 }
 0x225   :  { %v9086_v39 = vadd.f32 %v11202_v1, %v2073_v35  ;;  %v2539_v40 = vpop.f32.mrb[36].mxu0  ;;  %v2075_v41 = vpop.f32.mrb[37].mxu1 }
 0x226   :  { %v2541_v44 = vpop.f32.mrb[37].mxu0  ;;  %v2076_v47 = vpop.f32.mrb[38].mxu1  ;;  %v8705_v41 = vcombine.low %v8505_v63, %v8509_v2 }
 0x227   :  { %v11473_v50 = vadd.f32 %v9086_v39, %v2539_v40  ;;  %v9088_v51 = vadd.f32 %v11202_v1, %v2076_v47  ;;  %v2542_v52 = vpop.f32.mrb[38].mxu0  ;;  %v2078_v54 = vpop.f32.mrb[39].mxu1 }
 0x228   :  { %v2544_v56 = vpop.f32.mrb[39].mxu0 }
 0x229   :  { %v11476_v57 = vadd.f32 %v9088_v51, %v2542_v52  ;;  %4138 = vmatmul.mubr.bf16.gmra.mrb[144].mxu1 %v8289_v43  ;;  %v8314_v43 = vcombine.high %v8113_v26, %v8117_v27  ;;  %v8714_v51 = vcombine.high %v8513_v30, %v8517_v32  ;;  %v8125_v56 = vld [vmem:[%s13207_s0 + $0xa20] sm:$0xff] }
 0x22a   :  { %6471 = vmatmul.mubr.bf16.gmra.mrb[144].mxu0 %v8689_v48  ;;  %4145 = vmatprep.mubr.bf16.mxu1 %v8298_v49 }
 0x22b   :  { %6478 = vmatprep.mubr.bf16.mxu0 %v8698_v55  ;;  %v8121_v55 = vld [vmem:[%s13207_s0 + $0xa00] sm:$0xff] }
 0x22c   :  { %v2081_v62 = vpop.f32.mrb[40].mxu1 }
 0x22d   :  { %v9090_v3 = vadd.f32 %v11202_v1, %v2081_v62  ;;  %v2547_v6 = vpop.f32.mrb[40].mxu0  ;;  %v2083_v7 = vpop.f32.mrb[41].mxu1  ;;  %v8525_v62 = vld [vmem:[%s13207_s0 + $0x1060] sm:$0xff] }
 0x22e   :  { %v2549_v10 = vpop.f32.mrb[41].mxu0  ;;  %v2084_v11 = vpop.f32.mrb[42].mxu1 }
 0x22f   :  { %v11491_v14 = vadd.f32 %v9090_v3, %v2547_v6  ;;  %v9092_v17 = vadd.f32 %v11202_v1, %v2084_v11  ;;  %v2550_v18 = vpop.f32.mrb[42].mxu0  ;;  %v2086_v19 = vpop.f32.mrb[43].mxu1  ;;  %v8313_v6 = vcombine.low %v8113_v26, %v8117_v27  ;;  %v8713_v10 = vcombine.low %v8513_v30, %v8517_v32  ;;  %v8129_v26 = vld [vmem:[%s13207_s0 + $0xa40] sm:$0xff] }
 0x230   :  { %v2552_v22 = vpop.f32.mrb[43].mxu0  ;;  %v8322_v11 = vcombine.high %v8121_v55, %v8125_v56  ;;  %v8722_v19 = vcombine.high %v8521_v61, %v8525_v62  ;;  %v8133_v27 = vld [vmem:[%s13207_s0 + $0xa60] sm:$0xff] }
 0x231   :  { %v11494_v25 = vadd.f32 %v9092_v17, %v2550_v18  ;;  %4146 = vmatmul.mubr.bf16.gmra.mrb[148].mxu1 %v8297_v9  ;;  %v8529_v30 = vld [vmem:[%s13207_s0 + $0x1080] sm:$0xff] }
 0x232   :  { %6479 = vmatmul.mubr.bf16.gmra.mrb[148].mxu0 %v8697_v12  ;;  %4153 = vmatprep.mubr.bf16.mxu1 %v8306_v13  ;;  %v8533_v32 = vld [vmem:[%s13207_s0 + $0x10a0] sm:$0xff] }
 0x233   :  { %6486 = vmatprep.mubr.bf16.mxu0 %v8706_v20 }
 0x234   :  { %v2089_v28 = vpop.f32.mrb[44].mxu1 }
 0x235   :  { %v9094_v33 = vadd.f32 %v11202_v1, %v2089_v28  ;;  %v2555_v35 = vpop.f32.mrb[44].mxu0  ;;  %v2091_v36 = vpop.f32.mrb[45].mxu1 }
 0x236   :  { %v2557_v39 = vpop.f32.mrb[45].mxu0  ;;  %v2092_v40 = vpop.f32.mrb[46].mxu1 }
 0x237   :  { %v11509_v44 = vadd.f32 %v9094_v33, %v2555_v35  ;;  %v9096_v47 = vadd.f32 %v11202_v1, %v2092_v40  ;;  %v2558_v48 = vpop.f32.mrb[46].mxu0  ;;  %v2094_v49 = vpop.f32.mrb[47].mxu1 }
 0x238   :  { %v2560_v52 = vpop.f32.mrb[47].mxu0 }
 0x239   :  { %v11512_v54 = vadd.f32 %v9096_v47, %v2558_v48  ;;  %4154 = vmatmul.mubr.bf16.gmra.mrb[152].mxu1 %v8305_v37  ;;  %v8321_v37 = vcombine.low %v8121_v55, %v8125_v56  ;;  %v8730_v52 = vcombine.high %v8529_v30, %v8533_v32  ;;  %v8137_v55 = vld [vmem:[%s13207_s0 + $0xa80] sm:$0xff] }
 0x23a   :  { %6487 = vmatmul.mubr.bf16.gmra.mrb[152].mxu0 %v8705_v41  ;;  %4161 = vmatprep.mubr.bf16.mxu1 %v8314_v43  ;;  %v8721_v41 = vcombine.low %v8521_v61, %v8525_v62  ;;  %v8330_v43 = vcombine.high %v8129_v26, %v8133_v27  ;;  %v8141_v56 = vld [vmem:[%s13207_s0 + $0xaa0] sm:$0xff] }
 0x23b   :  { %6494 = vmatprep.mubr.bf16.mxu0 %v8714_v51  ;;  %v8537_v62 = vld [vmem:[%s13207_s0 + $0x10c0] sm:$0xff] }
 0x23c   :  { %v2097_v58 = vpop.f32.mrb[48].mxu1 }
 0x23d   :  { %v9098_v63 = vadd.f32 %v11202_v1, %v2097_v58  ;;  %v2563_v2 = vpop.f32.mrb[48].mxu0  ;;  %v2099_v3 = vpop.f32.mrb[49].mxu1 }
 0x23e   :  { %v2565_v7 = vpop.f32.mrb[49].mxu0  ;;  %v2100_v9 = vpop.f32.mrb[50].mxu1 }
 0x23f   :  { %v11527_v12 = vadd.f32 %v9098_v63, %v2563_v2  ;;  %v9100_v13 = vadd.f32 %v11202_v1, %v2100_v9  ;;  %v2566_v17 = vpop.f32.mrb[50].mxu0  ;;  %v2102_v18 = vpop.f32.mrb[51].mxu1  ;;  %v8541_v2 = vld [vmem:[%s13207_s0 + $0x10e0] sm:$0xff]  ;;  %v8329_v9 = vcombine.low %v8129_v26, %v8133_v27 }
 0x240   :  { %v2568_v20 = vpop.f32.mrb[51].mxu0  ;;  %v8145_v26 = vld [vmem:[%s13207_s0 + $0xac0] sm:$0xff] }
 0x241   :  { %v11530_v22 = vadd.f32 %v9100_v13, %v2566_v17  ;;  %4162 = vmatmul.mubr.bf16.gmra.mrb[156].mxu1 %v8313_v6  ;;  %v8729_v13 = vcombine.low %v8529_v30, %v8533_v32  ;;  %v8338_v17 = vcombine.high %v8137_v55, %v8141_v56  ;;  %v8149_v27 = vld [vmem:[%s13207_s0 + $0xae0] sm:$0xff] }
 0x242   :  { %6495 = vmatmul.mubr.bf16.gmra.mrb[156].mxu0 %v8713_v10  ;;  %4169 = vmatprep.mubr.bf16.mxu1 %v8322_v11  ;;  %v8545_v32 = vld [vmem:[%s13207_s0 + $0x1100] sm:$0xff] }
 0x243   :  { %6502 = vmatprep.mubr.bf16.mxu0 %v8722_v19 }
 0x244   :  { %v2105_v28 = vpop.f32.mrb[52].mxu1 }
 0x245   :  { %v9102_v33 = vadd.f32 %v11202_v1, %v2105_v28  ;;  %v2571_v35 = vpop.f32.mrb[52].mxu0  ;;  %v2107_v36 = vpop.f32.mrb[53].mxu1 }
 0x246   :  { %v2573_v39 = vpop.f32.mrb[53].mxu0  ;;  %v2108_v40 = vpop.f32.mrb[54].mxu1 }
 0x247   :  { %v11545_v47 = vadd.f32 %v9102_v33, %v2571_v35  ;;  %v9104_v48 = vadd.f32 %v11202_v1, %v2108_v40  ;;  %v2574_v49 = vpop.f32.mrb[54].mxu0  ;;  %v2110_v51 = vpop.f32.mrb[55].mxu1  ;;  %v8738_v33 = vcombine.high %v8537_v62, %v8541_v2 }
 0x248   :  { %v2576_v58 = vpop.f32.mrb[55].mxu0  ;;  %v8737_v51 = vcombine.low %v8537_v62, %v8541_v2  ;;  %v8553_v2 = vld [vmem:[%s13207_s0 + $0x1140] sm:$0xff] }
 0x249   :  { %v11548_v63 = vadd.f32 %v9104_v48, %v2574_v49  ;;  %4170 = vmatmul.mubr.bf16.gmra.mrb[160].mxu1 %v8321_v37  ;;  %v8549_v37 = vld [vmem:[%s13207_s0 + $0x1120] sm:$0xff] }
 0x24a   :  { %6503 = vmatmul.mubr.bf16.gmra.mrb[160].mxu0 %v8721_v41  ;;  %4177 = vmatprep.mubr.bf16.mxu1 %v8330_v43  ;;  %v8337_v43 = vcombine.low %v8137_v55, %v8141_v56  ;;  %v8153_v55 = vld [vmem:[%s13207_s0 + $0xb00] sm:$0xff] }
 0x24b   :  { %6510 = vmatprep.mubr.bf16.mxu0 %v8730_v52  ;;  %v8346_v52 = vcombine.high %v8145_v26, %v8149_v27  ;;  %v8157_v56 = vld [vmem:[%s13207_s0 + $0xb20] sm:$0xff] }
 0x24c   :  { %v2113_v61 = vpop.f32.mrb[56].mxu1 }
 0x24d   :  { %v9106_v3 = vadd.f32 %v11202_v1, %v2113_v61  ;;  %v2579_v6 = vpop.f32.mrb[56].mxu0  ;;  %v2115_v7 = vpop.f32.mrb[57].mxu1 }
 0x24e   :  { %v2581_v10 = vpop.f32.mrb[57].mxu0  ;;  %v2116_v11 = vpop.f32.mrb[58].mxu1  ;;  %v8746_v7 = vcombine.high %v8545_v32, %v8549_v37 }
 0x24f   :  { %v11563_v18 = vadd.f32 %v9106_v3, %v2579_v6  ;;  %v9108_v19 = vadd.f32 %v11202_v1, %v2116_v11  ;;  %v2582_v20 = vpop.f32.mrb[58].mxu0  ;;  %v2118_v28 = vpop.f32.mrb[59].mxu1  ;;  %v8557_v11 = vld [vmem:[%s13207_s0 + $0x1160] sm:$0xff] }
 0x250   :  { %v2584_v35 = vpop.f32.mrb[59].mxu0 }
 0x251   :  { %v11566_v36 = vadd.f32 %v9108_v19, %v2582_v20  ;;  %4178 = vmatmul.mubr.bf16.gmra.mrb[164].mxu1 %v8329_v9  ;;  %v8345_v20 = vcombine.low %v8145_v26, %v8149_v27  ;;  %v8745_v35 = vcombine.low %v8545_v32, %v8549_v37  ;;  %v8161_v26 = vld [vmem:[%s13207_s0 + $0xb40] sm:$0xff] }
 0x252   :  { %6511 = vmatmul.mubr.bf16.gmra.mrb[164].mxu0 %v8729_v13  ;;  %4185 = vmatprep.mubr.bf16.mxu1 %v8338_v17  ;;  %v8165_v27 = vld [vmem:[%s13207_s0 + $0xb60] sm:$0xff] }
 0x253   :  { %6518 = vmatprep.mubr.bf16.mxu0 %v8738_v33  ;;  %v8561_v37 = vld [vmem:[%s13207_s0 + $0x1180] sm:$0xff] }
 0x254   :  { %v2121_v30 = vpop.f32.mrb[60].mxu1 }
 0x255   :  { %v9110_v39 = vadd.f32 %v11202_v1, %v2121_v30  ;;  %v2587_v40 = vpop.f32.mrb[60].mxu0  ;;  %v2123_v41 = vpop.f32.mrb[61].mxu1  ;;  %v8354_v30 = vcombine.high %v8153_v55, %v8157_v56 }
 0x256   :  { %v2589_v48 = vpop.f32.mrb[61].mxu0  ;;  %v2124_v49 = vpop.f32.mrb[62].mxu1 }
 0x257   :  { %v11581_v58 = vadd.f32 %v9110_v39, %v2587_v40  ;;  %v9112_v61 = vadd.f32 %v11202_v1, %v2124_v49  ;;  %v2590_v3 = vpop.f32.mrb[62].mxu0  ;;  %v2126_v6 = vpop.f32.mrb[63].mxu1  ;;  %v8754_v48 = vcombine.high %v8553_v2, %v8557_v11 }
 0x258   :  { %v2592_v9 = vpop.f32.mrb[63].mxu0 }
 0x259   :  { %v11584_v10 = vadd.f32 %v9112_v61, %v2590_v3  ;;  %4186 = vmatmul.mubr.bf16.gmra.mrb[168].mxu1 %v8337_v43 }
 0x25a   :  { %6519 = vmatmul.mubr.bf16.gmra.mrb[168].mxu0 %v8737_v51  ;;  %4193 = vmatprep.mubr.bf16.mxu1 %v8346_v52  ;;  %v8565_v52 = vld [vmem:[%s13207_s0 + $0x11a0] sm:$0xff] }
 0x25b   :  { %6526 = vmatprep.mubr.bf16.mxu0 %v8746_v7  ;;  %v8353_v7 = vcombine.low %v8153_v55, %v8157_v56  ;;  %v8169_v55 = vld [vmem:[%s13207_s0 + $0xb80] sm:$0xff] }
 0x25c   :  { %v2129_v62 = vpop.f32.mrb[64].mxu1  ;;  %v8173_v56 = vld [vmem:[%s13207_s0 + $0xba0] sm:$0xff] }
 0x25d   :  { %v9114_v13 = vadd.f32 %v11202_v1, %v2129_v62  ;;  %v2595_v17 = vpop.f32.mrb[64].mxu0  ;;  %v2131_v19 = vpop.f32.mrb[65].mxu1 }
 0x25e   :  { %v2597_v28 = vpop.f32.mrb[65].mxu0  ;;  %v2132_v33 = vpop.f32.mrb[66].mxu1 }
 0x25f   :  { %v11599_v39 = vadd.f32 %v9114_v13, %v2595_v17  ;;  %v9116_v40 = vadd.f32 %v11202_v1, %v2132_v33  ;;  %v2598_v41 = vpop.f32.mrb[66].mxu0  ;;  %v2134_v43 = vpop.f32.mrb[67].mxu1  ;;  %v8753_v13 = vcombine.low %v8553_v2, %v8557_v11  ;;  %v8362_v17 = vcombine.high %v8161_v26, %v8165_v27  ;;  %v8569_v11 = vld [vmem:[%s13207_s0 + $0x11c0] sm:$0xff] }
 0x260   :  { %v2600_v49 = vpop.f32.mrb[67].mxu0 }
 0x261   :  { %v11602_v51 = vadd.f32 %v9116_v40, %v2598_v41  ;;  %4194 = vmatmul.mubr.bf16.gmra.mrb[172].mxu1 %v8345_v20  ;;  %v8573_v41 = vld [vmem:[%s13207_s0 + $0x11e0] sm:$0xff] }
 0x262   :  { %6527 = vmatmul.mubr.bf16.gmra.mrb[172].mxu0 %v8745_v35  ;;  %4201 = vmatprep.mubr.bf16.mxu1 %v8354_v30  ;;  %v8762_v35 = vcombine.high %v8561_v37, %v8565_v52 }
 0x263   :  { %6534 = vmatprep.mubr.bf16.mxu0 %v8754_v48 }
 0x264   :  { %v2137_v32 = vpop.f32.mrb[68].mxu1 }
 0x265   :  { %v9118_v61 = vadd.f32 %v11202_v1, %v2137_v32  ;;  %v2603_v3 = vpop.f32.mrb[68].mxu0  ;;  %v2139_v6 = vpop.f32.mrb[69].mxu1  ;;  %v8361_v32 = vcombine.low %v8161_v26, %v8165_v27  ;;  %v8177_v26 = vld [vmem:[%s13207_s0 + $0xbc0] sm:$0xff] }
 0x266   :  { %v2605_v9 = vpop.f32.mrb[69].mxu0  ;;  %v2140_v62 = vpop.f32.mrb[70].mxu1  ;;  %v8761_v6 = vcombine.low %v8561_v37, %v8565_v52  ;;  %v8181_v27 = vld [vmem:[%s13207_s0 + $0xbe0] sm:$0xff] }
 0x267   :  { %v11617_v19 = vadd.f32 %v9118_v61, %v2603_v3  ;;  %v9120_v20 = vadd.f32 %v11202_v1, %v2140_v62  ;;  %v2606_v28 = vpop.f32.mrb[70].mxu0  ;;  %v2142_v33 = vpop.f32.mrb[71].mxu1  ;;  %v8581_v52 = vld [vmem:[%s13207_s0 + $0x1220] sm:$0xff] }
 0x268   :  { %v2608_v30 = vpop.f32.mrb[71].mxu0 }
 0x269   :  { %v11620_v40 = vadd.f32 %v9120_v20, %v2606_v28  ;;  %4202 = vmatmul.mubr.bf16.gmra.mrb[176].mxu1 %v8353_v7  ;;  %v8370_v7 = vcombine.high %v8169_v55, %v8173_v56  ;;  %v8770_v20 = vcombine.high %v8569_v11, %v8573_v41 }
 0x26a   :  { %6535 = vmatmul.mubr.bf16.gmra.mrb[176].mxu0 %v8753_v13  ;;  %4209 = vmatprep.mubr.bf16.mxu1 %v8362_v17 }
 0x26b   :  { %6542 = vmatprep.mubr.bf16.mxu0 %v8762_v35  ;;  %v11655_v35 = vld [vmem:[%s13208_s2] ss:$0 sm:$0xff] }
 0x26c   :  { %v2145_v2 = vpop.f32.mrb[72].mxu1 }
 0x26d   :  { %v9122_v43 = vadd.f32 %v11202_v1, %v2145_v2  ;;  %v2611_v48 = vpop.f32.mrb[72].mxu0  ;;  %v2147_v49 = vpop.f32.mrb[73].mxu1 }
 0x26e   :  { %v2613_v61 = vpop.f32.mrb[73].mxu0  ;;  %v2148_v3 = vpop.f32.mrb[74].mxu1 }
 0x26f   :  { %v11635_v9 = vadd.f32 %v9122_v43, %v2611_v48  ;;  %v9124_v62 = vadd.f32 %v11202_v1, %v2148_v3  ;;  %v2614_v13 = vpop.f32.mrb[74].mxu0  ;;  %v2150_v17 = vpop.f32.mrb[75].mxu1  ;;  %v8577_v1 = vld [vmem:[%s13207_s0 + $0x1200] sm:$0xff]  ;;  %v8369_v48 = vcombine.low %v8169_v55, %v8173_v56  ;;  %v8769_v61 = vcombine.low %v8569_v11, %v8573_v41 }
 0x270   :  { %v2616_v28 = vpop.f32.mrb[75].mxu0  ;;  %v8378_v3 = vcombine.high %v8177_v26, %v8181_v27  ;;  %v8778_v17 = vcombine.high %v8577_v1, %v8581_v52  ;;  %v8185_v55 = vld [vmem:[%s13207_s0 + $0xc00] sm:$0xff] }
 0x271   :  { %v11638_v33 = vadd.f32 %v9124_v62, %v2614_v13  ;;  %4210 = vmatmul.mubr.bf16.gmra.mrb[180].mxu1 %v8361_v32  ;;  %v8189_v56 = vld [vmem:[%s13207_s0 + $0xc20] sm:$0xff] }
 0x272   :  { %6543 = vmatmul.mubr.bf16.gmra.mrb[180].mxu0 %v8761_v6  ;;  %4217 = vmatprep.mubr.bf16.mxu1 %v8370_v7  ;;  %v8585_v41 = vld [vmem:[%s13207_s0 + $0x1240] sm:$0xff] }
 0x273   :  { %6550 = vmatprep.mubr.bf16.mxu0 %v8770_v20 }
 0x274   :  { %v2153_v37 = vpop.f32.mrb[76].mxu1 }
 0x275   :  { %v9126_v30 = vadd.f32 %v11655_v35, %v2153_v37  ;;  %v2619_v2 = vpop.f32.mrb[76].mxu0  ;;  %v2155_v43 = vpop.f32.mrb[77].mxu1  ;;  %v8589_v37 = vld [vmem:[%s13207_s0 + $0x1260] sm:$0xff] }
 0x276   :  { %v2621_v49 = vpop.f32.mrb[77].mxu0  ;;  %v2156_v32 = vpop.f32.mrb[78].mxu1 }
 0x277   :  { %v11658_v6 = vadd.f32 %v9126_v30, %v2619_v2  ;;  %v9128_v7 = vadd.f32 %v11655_v35, %v2156_v32  ;;  %v2622_v62 = vpop.f32.mrb[78].mxu0  ;;  %v2158_v13 = vpop.f32.mrb[79].mxu1 }
 0x278   :  { %v2624_v20 = vpop.f32.mrb[79].mxu0 }
 0x279   :  { %v11661_v28 = vadd.f32 %v9128_v7, %v2622_v62  ;;  %4218 = vmatmul.mubr.bf16.gmra.mrb[184].mxu1 %v8369_v48  ;;  %v8377_v48 = vcombine.low %v8177_v26, %v8181_v27  ;;  %v8786_v20 = vcombine.high %v8585_v41, %v8589_v37  ;;  %v8193_v26 = vld [vmem:[%s13207_s0 + $0xc40] sm:$0xff] }
 0x27a   :  { %6551 = vmatmul.mubr.bf16.gmra.mrb[184].mxu0 %v8769_v61  ;;  %4225 = vmatprep.mubr.bf16.mxu1 %v8378_v3  ;;  %v8777_v61 = vcombine.low %v8577_v1, %v8581_v52  ;;  %v8386_v3 = vcombine.high %v8185_v55, %v8189_v56  ;;  %v8197_v27 = vld [vmem:[%s13207_s0 + $0xc60] sm:$0xff] }
 0x27b   :  { %13222 = vst [vmem:[#allocation2_spill] sm:$0xff] %v11661_v28  ;;  %6558 = vmatprep.mubr.bf16.mxu0 %v8778_v17  ;;  %v8593_v52 = vld [vmem:[%s13207_s0 + $0x1280] sm:$0xff] }
 0x27c   :  { %v2161_v11 = vpop.f32.mrb[80].mxu1 }
 0x27d   :  { %v9130_v30 = vadd.f32 %v11655_v35, %v2161_v11  ;;  %v2627_v2 = vpop.f32.mrb[80].mxu0  ;;  %v2163_v43 = vpop.f32.mrb[81].mxu1 }
 0x27e   :  { %v2629_v49 = vpop.f32.mrb[81].mxu0  ;;  %v2164_v32 = vpop.f32.mrb[82].mxu1  ;;  %v8385_v43 = vcombine.low %v8185_v55, %v8189_v56  ;;  %v8002_v55 = vld [vmem:[%s13207_s0 + $0x648] sm:$0xff] }
 0x27f   :  { %v11676_v7 = vadd.f32 %v9130_v30, %v2627_v2  ;;  %v9132_v62 = vadd.f32 %v11655_v35, %v2164_v32  ;;  %v2630_v13 = vpop.f32.mrb[82].mxu0  ;;  %v2166_v17 = vpop.f32.mrb[83].mxu1  ;;  %v8785_v32 = vcombine.low %v8585_v41, %v8589_v37  ;;  %v8006_v56 = vld [vmem:[%s13207_s0 + $0x668] sm:$0xff] }
 0x280   :  { %v2632_v0 = vpop.f32.mrb[83].mxu0  ;;  %v8402_v37 = vld [vmem:[%s13207_s0 + $0xc88] sm:$0xff] }
 0x281   :  { %13223 = vst [vmem:[#allocation3_spill] sm:$0xff] %v11676_v7  ;;  %v11679_v28 = vadd.f32 %v9132_v62, %v2630_v13  ;;  %4226 = vmatmul.mubr.bf16.gmra.mrb[188].mxu1 %v8377_v48  ;;  %v8597_v0 = vld [vmem:[%s13207_s0 + $0x12a0] sm:$0xff] }
 0x282   :  { %6559 = vmatmul.mubr.bf16.gmra.mrb[188].mxu0 %v8777_v61  ;;  %4233 = vmatprep.mubr.bf16.mxu1 %v8386_v3  ;;  %v8394_v61 = vcombine.high %v8193_v26, %v8197_v27 }
 0x283   :  { %13224 = vst [vmem:[#allocation4_spill] sm:$0xff] %v11679_v28  ;;  %6566 = vmatprep.mubr.bf16.mxu0 %v8786_v20  ;;  %v8794_v20 = vcombine.high %v8593_v52, %v8597_v0 }
 0x284   :  { %v2169_v1 = vpop.f32.mrb[84].mxu1 }
 0x285   :  { %v9134_v11 = vadd.f32 %v11655_v35, %v2169_v1  ;;  %v2635_v30 = vpop.f32.mrb[84].mxu0  ;;  %v2171_v2 = vpop.f32.mrb[85].mxu1 }
 0x286   :  { %v2637_v48 = vpop.f32.mrb[85].mxu0  ;;  %v2172_v49 = vpop.f32.mrb[86].mxu1  ;;  %v8393_v2 = vcombine.low %v8193_v26, %v8197_v27  ;;  %v8010_v26 = vld [vmem:[%s13207_s0 + $0x688] sm:$0xff] }
 0x287   :  { %v11694_v3 = vadd.f32 %v9134_v11, %v2635_v30  ;;  %v9136_v62 = vadd.f32 %v11655_v35, %v2172_v49  ;;  %v2638_v13 = vpop.f32.mrb[86].mxu0  ;;  %v2174_v17 = vpop.f32.mrb[87].mxu1  ;;  %v8793_v49 = vcombine.low %v8593_v52, %v8597_v0  ;;  %v8014_v27 = vld [vmem:[%s13207_s0 + $0x6a8] sm:$0xff] }
 0x288   :  { %v2640_v28 = vpop.f32.mrb[87].mxu0 }
 0x289   :  { %13225 = vst [vmem:[#allocation5_spill] sm:$0xff] %v11694_v3  ;;  %v11697_v7 = vadd.f32 %v9136_v62, %v2638_v13  ;;  %4234 = vmatmul.mubr.bf16.gmra.mrb[192].mxu1 %v8385_v43  ;;  %v8406_v28 = vld [vmem:[%s13207_s0 + $0xca8] sm:$0xff] }
 0x28a   :  { %6567 = vmatmul.mubr.bf16.gmra.mrb[192].mxu0 %v8785_v32  ;;  %4241 = vmatprep.mubr.bf16.mxu1 %v8394_v61  ;;  %v8204_v32 = vcombine.high %v8002_v55, %v8006_v56 }
 0x28b   :  { %13226 = vst [vmem:[#allocation6_spill] sm:$0xff] %v11697_v7  ;;  %6574 = vmatprep.mubr.bf16.mxu0 %v8794_v20  ;;  %v8604_v20 = vcombine.high %v8402_v37, %v8406_v28 }
 0x28c   :  { %v2177_v41 = vpop.f32.mrb[88].mxu1 }
 0x28d   :  { %v9138_v1 = vadd.f32 %v11655_v35, %v2177_v41  ;;  %v2643_v11 = vpop.f32.mrb[88].mxu0  ;;  %v2179_v30 = vpop.f32.mrb[89].mxu1 }
 0x28e   :  { %v2645_v43 = vpop.f32.mrb[89].mxu0  ;;  %v2180_v48 = vpop.f32.mrb[90].mxu1  ;;  %v8414_v30 = vld [vmem:[%s13207_s0 + $0xce8] sm:$0xff] }
 0x28f   :  { %v11712_v61 = vadd.f32 %v9138_v1, %v2643_v11  ;;  %v9140_v62 = vadd.f32 %v11655_v35, %v2180_v48  ;;  %v2646_v13 = vpop.f32.mrb[90].mxu0  ;;  %v2182_v17 = vpop.f32.mrb[91].mxu1  ;;  %v8410_v11 = vld [vmem:[%s13207_s0 + $0xcc8] sm:$0xff]  ;;  %v8603_v48 = vcombine.low %v8402_v37, %v8406_v28 }
 0x290   :  { %v2648_v7 = vpop.f32.mrb[91].mxu0  ;;  %v8212_v17 = vcombine.high %v8010_v26, %v8014_v27  ;;  %v8018_v37 = vld [vmem:[%s13207_s0 + $0x6c8] sm:$0xff] }
 0x291   :  { %v11715_v3 = vadd.f32 %v9140_v62, %v2646_v13  ;;  %4242 = vmatmul.mubr.bf16.gmra.mrb[196].mxu1 %v8393_v2  ;;  %v8203_v7 = vcombine.low %v8002_v55, %v8006_v56  ;;  %v8612_v55 = vcombine.high %v8410_v11, %v8414_v30  ;;  %v8022_v28 = vld [vmem:[%s13207_s0 + $0x6e8] sm:$0xff] }
 0x292   :  { %6575 = vmatmul.mubr.bf16.gmra.mrb[196].mxu0 %v8793_v49  ;;  %4282 = vmatprep.mubr.bf16.mxu1 %v8204_v32 }
 0x293   :  { %13227 = vst [vmem:[#allocation7_spill] sm:$0xff] %v11715_v3  ;;  %6615 = vmatprep.mubr.bf16.mxu0 %v8604_v20 }
 0x294   :  { %v2185_v41 = vpop.f32.mrb[92].mxu1 }
 0x295   :  { %v9142_v52 = vadd.f32 %v11655_v35, %v2185_v41  ;;  %v2651_v0 = vpop.f32.mrb[92].mxu0  ;;  %v2187_v1 = vpop.f32.mrb[93].mxu1  ;;  %v10148_v41 = vld [vmem:[%s13206_s1 + $0x100] sm:$0xff]  }
 0x296   :  { %v2653_v2 = vpop.f32.mrb[93].mxu0  ;;  %v2188_v43 = vpop.f32.mrb[94].mxu1  ;;  %v8418_v1 = vld [vmem:[%s13207_s0 + $0xd08] sm:$0xff] }
 0x297   :  { %v11730_v49 = vadd.f32 %v9142_v52, %v2651_v0  ;;  %v9144_v32 = vadd.f32 %v11655_v35, %v2188_v43  ;;  %v2654_v62 = vpop.f32.mrb[94].mxu0  ;;  %v2190_v13 = vpop.f32.mrb[95].mxu1  ;;  %v13230_v0 = vmov 0  }
 0x298   :  { %v2656_v20 = vpop.f32.mrb[95].mxu0 }
 0x299   :  { %13228 = vst [vmem:[#allocation8_spill] sm:$0xff] %v11730_v49  ;;  %v11733_v56 = vadd.f32 %v9144_v32, %v2654_v62  ;;  %4283 = vmatmul.mubr.bf16.vlgmr.msra.gmra.mrb[100].mxu1 %v8203_v7  ;;  %v8422_v7 = vld [vmem:[%s13207_s0 + $0xd28] sm:$0xff]  ;;  %v8211_v32 = vcombine.low %v8010_v26, %v8014_v27 }
 0x29a   :  { %6616 = vmatmul.mubr.bf16.vlgmr.msra.gmra.mrb[100].mxu0 %v8603_v48  ;;  %4484 = vmatpush1.bf16.msra.mxu1 %v10148_v41  ;;  %v10149_v20 = vld [vmem:[%s13206_s1 + $0x108] sm:$0xff]   ;;  %v8620_v3 = vcombine.high %v8418_v1, %v8422_v7 }
 0x29b   :  { %13229 = vst [vmem:[#allocation9_spill] sm:$0xff] %v11733_v56  ;;  %6817 = vmatpush1.bf16.msra.mxu0 %v10148_v41  ;;  %4290 = vmatprep.mubr.bf16.mxu1 %v8212_v17  ;;  %v8611_v17 = vcombine.low %v8410_v11, %v8414_v30  ;;  %v8026_v11 = vld [vmem:[%s13207_s0 + $0x708] sm:$0xff]  ;;  %v10150_v30 = vld [vmem:[%s13206_s1 + $0x110] sm:$0xff]  }
 0x29c   :  { %v2193_v52 = vpop.f32.mrb[96].mxu1  ;;  %6623 = vmatprep.mubr.bf16.mxu0 %v8612_v55  ;;  %4485 = vmatprep.subr.bf16.mxu1 %v13230_v0  ;;  %v8220_v55 = vcombine.high %v8018_v37, %v8022_v28 }
 0x29d   :  { %v9146_v2 = vadd.f32 %v11655_v35, %v2193_v52  ;;  %v2659_v43 = vpop.f32.mrb[96].mxu0  ;;  %v2195_v48 = vpop.f32.mrb[97].mxu1  ;;  %6818 = vmatprep.subr.bf16.mxu0 %v13230_v0 }
 0x29e   :  { %v2661_v62 = vpop.f32.mrb[97].mxu0  ;;  %v2196_v13 = vpop.f32.mrb[98].mxu1  ;;  %4486 = vmatpush1.bf16.msra.mxu1 %v10149_v20 }
 0x29f   :  { %v11756_v41 = vadd.f32 %v9146_v2, %v2659_v43  ;;  %v9148_v56 = vadd.f32 %v11655_v35, %v2196_v13  ;;  %v2662_v49 = vpop.f32.mrb[98].mxu0  ;;  %v2198_v52 = vpop.f32.mrb[99].mxu1  ;;  %6819 = vmatpush1.bf16.msra.mxu0 %v10149_v20  ;;  %4487 = vmatprep.subr.bf16.mxu1 %v13230_v0  ;;  %v8030_v35 = vld [vmem:[%s13207_s0 + $0x728] sm:$0xff]  ;;  %v8619_v2 = vcombine.low %v8418_v1, %v8422_v7  ;;  %v10152_v1 = vld [vmem:[%s13206_s1 + $0x120] sm:$0xff]  }
 0x2a0   :  { %v2664_v26 = vpop.f32.mrb[99].mxu0  ;;  %6820 = vmatprep.subr.bf16.mxu0 %v13230_v0  ;;  %v8228_v43 = vcombine.high %v8026_v11, %v8030_v35  ;;  %v8434_v7 = vld [vmem:[%s13207_s0 + $0xd88] sm:$0xff]  ;;  %v8227_v13 = vcombine.low %v8026_v11, %v8030_v35  ;;  %v10154_v35 = vld [vmem:[%s13206_s1 + $0x130] sm:$0xff]  }
 0x2a1   :  { %13231 = vst [vmem:[#allocation10_spill] sm:$0xff] %v11756_v41  ;;  %v11761_v27 = vadd.f32 %v9148_v56, %v2662_v49  ;;  %4291 = vmatmul.mubr.bf16.gmra.mrb[104].mxu1 %v8211_v32  ;;  %v8426_v49 = vld [vmem:[%s13207_s0 + $0xd48] sm:$0xff]  ;;  %v8219_v56 = vcombine.low %v8018_v37, %v8022_v28  ;;  %v10151_v32 = vld [vmem:[%s13206_s1 + $0x118] sm:$0xff]  }
 0x2a2   :  { %6624 = vmatmul.mubr.bf16.gmra.mrb[104].mxu0 %v8611_v17  ;;  %4298 = vmatprep.mubr.bf16.mxu1 %v8220_v55  ;;  %v8034_v37 = vld [vmem:[%s13207_s0 + $0x748] sm:$0xff] }
 0x2a3   :  { %13232 = vst [vmem:[#allocation11_spill] sm:$0xff] %v11761_v27  ;;  %6631 = vmatprep.mubr.bf16.mxu0 %v8620_v3  ;;  %4488 = vmatpush1.bf16.msra.mxu1 %v10150_v30  ;;  %v8430_v3 = vld [vmem:[%s13207_s0 + $0xd68] sm:$0xff]  ;;  %v2718_v27 = vmul.f32 0.01, %v11257_v38 }
 0x2a4   :  { %6821 = vmatpush1.bf16.msra.mxu0 %v10150_v30  ;;  %4489 = vmatprep.subr.bf16.mxu1 %v13230_v0  ;;  %v8628_v48 = vcombine.high %v8426_v49, %v8430_v3  ;;  %v8038_v28 = vld [vmem:[%s13207_s0 + $0x768] sm:$0xff]  ;;  %v8627_v17 = vcombine.low %v8426_v49, %v8430_v3 }
 0x2a5   :  { %6822 = vmatprep.subr.bf16.mxu0 %v13230_v0  ;;  %v8438_v62 = vld [vmem:[%s13207_s0 + $0xda8] sm:$0xff]  ;;  %v8236_v20 = vcombine.high %v8034_v37, %v8038_v28  ;;  %v8235_v3 = vcombine.low %v8034_v37, %v8038_v28  ;;  %v10156_v28 = vld [vmem:[%s13206_s1 + $0x140] sm:$0xff]  }
 0x2a6   :  { %v8636_v55 = vcombine.high %v8434_v7, %v8438_v62  ;;  %v10153_v52 = vld [vmem:[%s13206_s1 + $0x128] sm:$0xff]  }
 0x2a7   :  { %4490 = vmatpush1.bf16.msra.mxu1 %v10151_v32  ;;  %v8042_v26 = vld [vmem:[%s13207_s0 + $0x788] sm:$0xff] }
 0x2a8   :  { %6823 = vmatpush1.bf16.msra.mxu0 %v10151_v32  ;;  %4491 = vmatprep.subr.bf16.mxu1 %v13230_v0  ;;  %v8046_v11 = vld [vmem:[%s13207_s0 + $0x7a8] sm:$0xff] }
 0x2a9   :  { %4299 = vmatmul.mubr.bf16.gmra.mrb[108].mxu1 %v8219_v56  ;;  %6824 = vmatprep.subr.bf16.mxu0 %v13230_v0  ;;  %v8442_v30 = vld [vmem:[%s13207_s0 + $0xdc8] sm:$0xff]  ;;  %v8635_v56 = vcombine.low %v8434_v7, %v8438_v62  ;;  %v8243_v62 = vcombine.low %v8042_v26, %v8046_v11 }
 0x2aa   :  { %6632 = vmatmul.mubr.bf16.gmra.mrb[108].mxu0 %v8619_v2  ;;  %4306 = vmatprep.mubr.bf16.mxu1 %v8228_v43  ;;  %v8446_v49 = vld [vmem:[%s13207_s0 + $0xde8] sm:$0xff]  ;;  %v8244_v2 = vcombine.high %v8042_v26, %v8046_v11  ;;  %v10158_v11 = vld [vmem:[%s13206_s1 + $0x150] sm:$0xff]  }
 0x2ab   :  { %6639 = vmatprep.mubr.bf16.mxu0 %v8628_v48  ;;  %4492 = vmatpush1.bf16.msra.mxu1 %v10152_v1  ;;  %v8644_v43 = vcombine.high %v8442_v30, %v8446_v49  ;;  %v10155_v48 = vld [vmem:[%s13206_s1 + $0x138] sm:$0xff]   ;;  %v8050_v32 = vld [vmem:[%s13207_s0 + $0x7c8] sm:$0xff] }
 0x2ac   :  { %6825 = vmatpush1.bf16.msra.mxu0 %v10152_v1  ;;  %4493 = vmatprep.subr.bf16.mxu1 %v13230_v0  ;;  %v8054_v37 = vld [vmem:[%s13207_s0 + $0x7e8] sm:$0xff] }
 0x2ad   :  { %6826 = vmatprep.subr.bf16.mxu0 %v13230_v0  ;;  %v8450_v1 = vld [vmem:[%s13207_s0 + $0xe08] sm:$0xff] }
 0x2ae   :  { %v8454_v7 = vld [vmem:[%s13207_s0 + $0xe28] sm:$0xff] }
 0x2af   :  { %4494 = vmatpush1.bf16.msra.mxu1 %v10153_v52  ;;  %v8062_v26 = vld [vmem:[%s13207_s0 + $0x828] sm:$0xff] }
 0x2b0   :  { %6827 = vmatpush1.bf16.msra.mxu0 %v10153_v52  ;;  %4495 = vmatprep.subr.bf16.mxu1 %v13230_v0  ;;  %v8058_v52 = vld [vmem:[%s13207_s0 + $0x808] sm:$0xff] }
 0x2b1   :  { %4307 = vmatmul.mubr.bf16.gmra.mrb[112].mxu1 %v8227_v13  ;;  %6828 = vmatprep.subr.bf16.mxu0 %v13230_v0  ;;  %v8643_v13 = vcombine.low %v8442_v30, %v8446_v49  ;;  %v8462_v30 = vld [vmem:[%s13207_s0 + $0xe68] sm:$0xff]  ;;  %v8251_v49 = vcombine.low %v8050_v32, %v8054_v37 }
 0x2b2   :  { %6640 = vmatmul.mubr.bf16.gmra.mrb[112].mxu0 %v8627_v17  ;;  %4314 = vmatprep.mubr.bf16.mxu1 %v8236_v20  ;;  %v8252_v17 = vcombine.high %v8050_v32, %v8054_v37  ;;  %v8652_v20 = vcombine.high %v8450_v1, %v8454_v7  ;;  %v8070_v32 = vld [vmem:[%s13207_s0 + $0x868] sm:$0xff]  ;;  %v10160_v37 = vld [vmem:[%s13206_s1 + $0x160] sm:$0xff]  }
 0x2b3   :  { %6647 = vmatprep.mubr.bf16.mxu0 %v8636_v55  ;;  %4496 = vmatpush1.bf16.msra.mxu1 %v10154_v35  ;;  %v10157_v55 = vld [vmem:[%s13206_s1 + $0x148] sm:$0xff]  }
 0x2b4   :  { %6829 = vmatpush1.bf16.msra.mxu0 %v10154_v35  ;;  %4497 = vmatprep.subr.bf16.mxu1 %v13230_v0  ;;  %v8458_v35 = vld [vmem:[%s13207_s0 + $0xe48] sm:$0xff] }
 0x2b5   :  { %6830 = vmatprep.subr.bf16.mxu0 %v13230_v0 }
 0x2b7   :  { %4498 = vmatpush1.bf16.msra.mxu1 %v10155_v48 }
 0x2b8   :  { %6831 = vmatpush1.bf16.msra.mxu0 %v10155_v48  ;;  %4499 = vmatprep.subr.bf16.mxu1 %v13230_v0  ;;  %v8066_v48 = vld [vmem:[%s13207_s0 + $0x848] sm:$0xff] }
 0x2b9   :  { %4315 = vmatmul.mubr.bf16.gmra.mrb[116].mxu1 %v8235_v3  ;;  %6832 = vmatprep.subr.bf16.mxu0 %v13230_v0  ;;  %v8651_v3 = vcombine.low %v8450_v1, %v8454_v7  ;;  %v8470_v1 = vld [vmem:[%s13207_s0 + $0xea8] sm:$0xff]  ;;  %v8259_v7 = vcombine.low %v8058_v52, %v8062_v26 }
 0x2ba   :  { %6648 = vmatmul.mubr.bf16.gmra.mrb[116].mxu0 %v8635_v56  ;;  %4322 = vmatprep.mubr.bf16.mxu1 %v8244_v2  ;;  %v8260_v56 = vcombine.high %v8058_v52, %v8062_v26  ;;  %v8660_v2 = vcombine.high %v8458_v35, %v8462_v30  ;;  %v8078_v52 = vld [vmem:[%s13207_s0 + $0x8a8] sm:$0xff]  ;;  %v10162_v26 = vld [vmem:[%s13206_s1 + $0x170] sm:$0xff]  }
 0x2bb   :  { %6655 = vmatprep.mubr.bf16.mxu0 %v8644_v43  ;;  %4500 = vmatpush1.bf16.msra.mxu1 %v10156_v28  ;;  %v10159_v43 = vld [vmem:[%s13206_s1 + $0x158] sm:$0xff]  }
 0x2bc   :  { %6833 = vmatpush1.bf16.msra.mxu0 %v10156_v28  ;;  %4501 = vmatprep.subr.bf16.mxu1 %v13230_v0  ;;  %v8466_v28 = vld [vmem:[%s13207_s0 + $0xe88] sm:$0xff] }
 0x2bd   :  { %6834 = vmatprep.subr.bf16.mxu0 %v13230_v0 }
 0x2bf   :  { %4502 = vmatpush1.bf16.msra.mxu1 %v10157_v55 }
 0x2c0   :  { %6835 = vmatpush1.bf16.msra.mxu0 %v10157_v55  ;;  %4503 = vmatprep.subr.bf16.mxu1 %v13230_v0  ;;  %v8074_v55 = vld [vmem:[%s13207_s0 + $0x888] sm:$0xff] }
 0x2c1   :  { %4323 = vmatmul.mubr.bf16.gmra.mrb[120].mxu1 %v8243_v62  ;;  %6836 = vmatprep.subr.bf16.mxu0 %v13230_v0  ;;  %v8659_v62 = vcombine.low %v8458_v35, %v8462_v30  ;;  %v8478_v35 = vld [vmem:[%s13207_s0 + $0xee8] sm:$0xff]  ;;  %v8267_v30 = vcombine.low %v8066_v48, %v8070_v32 }
 0x2c2   :  { %6656 = vmatmul.mubr.bf16.gmra.mrb[120].mxu0 %v8643_v13  ;;  %4330 = vmatprep.mubr.bf16.mxu1 %v8252_v17  ;;  %v8268_v13 = vcombine.high %v8066_v48, %v8070_v32  ;;  %v8668_v17 = vcombine.high %v8466_v28, %v8470_v1  ;;  %v8086_v48 = vld [vmem:[%s13207_s0 + $0x8e8] sm:$0xff] }
 0x2c3   :  { %6663 = vmatprep.mubr.bf16.mxu0 %v8652_v20  ;;  %4504 = vmatpush1.bf16.msra.mxu1 %v10158_v11  ;;  %v10161_v20 = vld [vmem:[%s13206_s1 + $0x168] sm:$0xff]  }
 0x2c4   :  { %6837 = vmatpush1.bf16.msra.mxu0 %v10158_v11  ;;  %4505 = vmatprep.subr.bf16.mxu1 %v13230_v0  ;;  %v8474_v11 = vld [vmem:[%s13207_s0 + $0xec8] sm:$0xff] }
 0x2c5   :  { %6838 = vmatprep.subr.bf16.mxu0 %v13230_v0  ;;  %v8482_v32 = vld [vmem:[%s13207_s0 + $0xf08] sm:$0xff] }
 0x2c7   :  { %4506 = vmatpush1.bf16.msra.mxu1 %v10159_v43 }
 0x2c8   :  { %6839 = vmatpush1.bf16.msra.mxu0 %v10159_v43  ;;  %4507 = vmatprep.subr.bf16.mxu1 %v13230_v0  ;;  %v8082_v43 = vld [vmem:[%s13207_s0 + $0x8c8] sm:$0xff] }
 0x2c9   :  { %4331 = vmatmul.mubr.bf16.gmra.mrb[124].mxu1 %v8251_v49  ;;  %6840 = vmatprep.subr.bf16.mxu0 %v13230_v0  ;;  %v8667_v49 = vcombine.low %v8466_v28, %v8470_v1  ;;  %v8275_v28 = vcombine.low %v8074_v55, %v8078_v52  ;;  %v8675_v1 = vcombine.low %v8474_v11, %v8478_v35 }
 0x2ca   :  { %6664 = vmatmul.mubr.bf16.gmra.mrb[124].mxu0 %v8651_v3  ;;  %4338 = vmatprep.mubr.bf16.mxu1 %v8260_v56  ;;  %v8276_v3 = vcombine.high %v8074_v55, %v8078_v52  ;;  %v8676_v56 = vcombine.high %v8474_v11, %v8478_v35  ;;  %v8494_v55 = vld [vmem:[%s13207_s0 + $0xf68] sm:$0xff]  ;;  %v8283_v52 = vcombine.low %v8082_v43, %v8086_v48 }
 0x2cb   :  { %6671 = vmatprep.mubr.bf16.mxu0 %v8660_v2  ;;  %4508 = vmatpush1.bf16.msra.mxu1 %v10160_v37  ;;  %v10163_v2 = vld [vmem:[%s13206_s1 + $0x178] sm:$0xff]  }
 0x2cc   :  { %6841 = vmatpush1.bf16.msra.mxu0 %v10160_v37  ;;  %4509 = vmatprep.subr.bf16.mxu1 %v13230_v0  ;;  %v8486_v37 = vld [vmem:[%s13207_s0 + $0xf28] sm:$0xff] }
 0x2cd   :  { %6842 = vmatprep.subr.bf16.mxu0 %v13230_v0 }
 0x2cf   :  { %4510 = vmatpush1.bf16.msra.mxu1 %v10161_v20 }
 0x2d0   :  { %6843 = vmatpush1.bf16.msra.mxu0 %v10161_v20  ;;  %4511 = vmatprep.subr.bf16.mxu1 %v13230_v0  ;;  %v8490_v20 = vld [vmem:[%s13207_s0 + $0xf48] sm:$0xff] }
 0x2d1   :  { %4339 = vmatmul.mubr.bf16.gmra.mrb[128].mxu1 %v8259_v7  ;;  %6844 = vmatprep.subr.bf16.mxu0 %v13230_v0  ;;  %v8284_v7 = vcombine.high %v8082_v43, %v8086_v48  ;;  %v8692_v35 = vcombine.high %v8490_v20, %v8494_v55  ;;  %v8691_v43 = vcombine.low %v8490_v20, %v8494_v55  ;;  %v8114_v55 = vld [vmem:[%s13207_s0 + $0x9c8] sm:$0xff] }
 0x2d2   :  { %6672 = vmatmul.mubr.bf16.gmra.mrb[128].mxu0 %v8659_v62  ;;  %4346 = vmatprep.mubr.bf16.mxu1 %v8268_v13  ;;  %v8684_v62 = vcombine.high %v8482_v32, %v8486_v37  ;;  %v8090_v13 = vld [vmem:[%s13207_s0 + $0x908] sm:$0xff] }
 0x2d3   :  { %6679 = vmatprep.mubr.bf16.mxu0 %v8668_v17  ;;  %4512 = vmatpush1.bf16.msra.mxu1 %v10162_v26  ;;  %v8094_v17 = vld [vmem:[%s13207_s0 + $0x928] sm:$0xff] }
 0x2d4   :  { %6845 = vmatpush1.bf16.msra.mxu0 %v10162_v26  ;;  %4513 = vmatprep.subr.bf16.mxu1 %v13230_v0  ;;  %v8683_v26 = vcombine.low %v8482_v32, %v8486_v37  ;;  %v8292_v11 = vcombine.high %v8090_v13, %v8094_v17  ;;  %v8106_v37 = vld [vmem:[%s13207_s0 + $0x988] sm:$0xff] }
 0x2d5   :  { %6846 = vmatprep.subr.bf16.mxu0 %v13230_v0 }
 0x2d7   :  { %4514 = vmatpush1.bf16.msra.mxu1 %v10163_v2 }
 0x2d8   :  { %6847 = vmatpush1.bf16.msra.mxu0 %v10163_v2  ;;  %4716 = vmatprep.subr.bf16.mxu1 %v13230_v0  ;;  %v8291_v2 = vcombine.low %v8090_v13, %v8094_v17 }
 0x2d9   :  { %4347 = vmatmul.mubr.bf16.gmra.mrb[132].mxu1 %v8267_v30  ;;  %7049 = vmatprep.subr.bf16.mxu0 %v13230_v0  ;;  %v8098_v30 = vld [vmem:[%s13207_s0 + $0x948] sm:$0xff] }
 0x2da   :  { %6680 = vmatmul.mubr.bf16.gmra.mrb[132].mxu0 %v8667_v49  ;;  %4354 = vmatprep.mubr.bf16.mxu1 %v8276_v3  ;;  %v8102_v49 = vld [vmem:[%s13207_s0 + $0x968] sm:$0xff] }
 0x2db   :  { %6687 = vmatprep.mubr.bf16.mxu0 %v8676_v56  ;;  %v8498_v3 = vld [vmem:[%s13207_s0 + $0xf88] sm:$0xff]  ;;  %v8300_v48 = vcombine.high %v8098_v30, %v8102_v49 }
 0x2dc   :  { %v8502_v56 = vld [vmem:[%s13207_s0 + $0xfa8] sm:$0xff] }
 0x2dd   :  { %v8700_v32 = vcombine.high %v8498_v3, %v8502_v56  ;;  %v8699_v13 = vcombine.low %v8498_v3, %v8502_v56  ;;  %v8122_v56 = vld [vmem:[%s13207_s0 + $0xa08] sm:$0xff] }
 0x2e1   :  { %4355 = vmatmul.mubr.bf16.gmra.mrb[136].mxu1 %v8275_v28  ;;  %v8110_v28 = vld [vmem:[%s13207_s0 + $0x9a8] sm:$0xff] }
 0x2e2   :  { %6688 = vmatmul.mubr.bf16.gmra.mrb[136].mxu0 %v8675_v1  ;;  %4362 = vmatprep.mubr.bf16.mxu1 %v8284_v7  ;;  %v8506_v1 = vld [vmem:[%s13207_s0 + $0xfc8] sm:$0xff]  ;;  %v8308_v17 = vcombine.high %v8106_v37, %v8110_v28 }
 0x2e3   :  { %6695 = vmatprep.mubr.bf16.mxu0 %v8684_v62  ;;  %v8510_v7 = vld [vmem:[%s13207_s0 + $0xfe8] sm:$0xff]  ;;  %v8299_v62 = vcombine.low %v8098_v30, %v8102_v49 }
 0x2e4   :  { %v8708_v20 = vcombine.high %v8506_v1, %v8510_v7  ;;  %v8707_v30 = vcombine.low %v8506_v1, %v8510_v7  ;;  %v8130_v7 = vld [vmem:[%s13207_s0 + $0xa48] sm:$0xff] }
 0x2e9   :  { %4363 = vmatmul.mubr.bf16.gmra.mrb[140].mxu1 %v8283_v52  ;;  %v8118_v52 = vld [vmem:[%s13207_s0 + $0x9e8] sm:$0xff] }
 0x2ea   :  { %6696 = vmatmul.mubr.bf16.gmra.mrb[140].mxu0 %v8683_v26  ;;  %4370 = vmatprep.mubr.bf16.mxu1 %v8292_v11  ;;  %v8514_v26 = vld [vmem:[%s13207_s0 + $0x1008] sm:$0xff]  ;;  %v8316_v49 = vcombine.high %v8114_v55, %v8118_v52 }
 0x2eb   :  { %6703 = vmatprep.mubr.bf16.mxu0 %v8692_v35  ;;  %v8518_v11 = vld [vmem:[%s13207_s0 + $0x1028] sm:$0xff]  ;;  %v8307_v35 = vcombine.low %v8106_v37, %v8110_v28 }
 0x2ec   :  { %v8716_v3 = vcombine.high %v8514_v26, %v8518_v11  ;;  %v8715_v37 = vcombine.low %v8514_v26, %v8518_v11  ;;  %v8138_v11 = vld [vmem:[%s13207_s0 + $0xa88] sm:$0xff] }
 0x2f1   :  { %4371 = vmatmul.mubr.bf16.gmra.mrb[144].mxu1 %v8291_v2  ;;  %v8126_v2 = vld [vmem:[%s13207_s0 + $0xa28] sm:$0xff] }
 0x2f2   :  { %6704 = vmatmul.mubr.bf16.gmra.mrb[144].mxu0 %v8691_v43  ;;  %4378 = vmatprep.mubr.bf16.mxu1 %v8300_v48  ;;  %v8522_v43 = vld [vmem:[%s13207_s0 + $0x1048] sm:$0xff]  ;;  %v8324_v28 = vcombine.high %v8122_v56, %v8126_v2 }
 0x2f3   :  { %6711 = vmatprep.mubr.bf16.mxu0 %v8700_v32  ;;  %v8526_v48 = vld [vmem:[%s13207_s0 + $0x1068] sm:$0xff]  ;;  %v8315_v32 = vcombine.low %v8114_v55, %v8118_v52 }
 0x2f4   :  { %v8724_v1 = vcombine.high %v8522_v43, %v8526_v48  ;;  %v8723_v55 = vcombine.low %v8522_v43, %v8526_v48  ;;  %v8146_v48 = vld [vmem:[%s13207_s0 + $0xac8] sm:$0xff] }
 0x2f9   :  { %4379 = vmatmul.mubr.bf16.gmra.mrb[148].mxu1 %v8299_v62  ;;  %v8134_v62 = vld [vmem:[%s13207_s0 + $0xa68] sm:$0xff] }
 0x2fa   :  { %6712 = vmatmul.mubr.bf16.gmra.mrb[148].mxu0 %v8699_v13  ;;  %4386 = vmatprep.mubr.bf16.mxu1 %v8308_v17  ;;  %v8530_v13 = vld [vmem:[%s13207_s0 + $0x1088] sm:$0xff]  ;;  %v8332_v52 = vcombine.high %v8130_v7, %v8134_v62 }
 0x2fb   :  { %6719 = vmatprep.mubr.bf16.mxu0 %v8708_v20  ;;  %v8534_v17 = vld [vmem:[%s13207_s0 + $0x10a8] sm:$0xff]  ;;  %v8323_v20 = vcombine.low %v8122_v56, %v8126_v2 }
 0x2fc   :  { %v8732_v26 = vcombine.high %v8530_v13, %v8534_v17  ;;  %v8731_v56 = vcombine.low %v8530_v13, %v8534_v17  ;;  %v8154_v17 = vld [vmem:[%s13207_s0 + $0xb08] sm:$0xff] }
 0x301   :  { %4387 = vmatmul.mubr.bf16.gmra.mrb[152].mxu1 %v8307_v35  ;;  %v8142_v35 = vld [vmem:[%s13207_s0 + $0xaa8] sm:$0xff] }
 0x302   :  { %6720 = vmatmul.mubr.bf16.gmra.mrb[152].mxu0 %v8707_v30  ;;  %4394 = vmatprep.mubr.bf16.mxu1 %v8316_v49  ;;  %v8538_v30 = vld [vmem:[%s13207_s0 + $0x10c8] sm:$0xff]  ;;  %v8340_v2 = vcombine.high %v8138_v11, %v8142_v35 }
 0x303   :  { %6727 = vmatprep.mubr.bf16.mxu0 %v8716_v3  ;;  %v8542_v49 = vld [vmem:[%s13207_s0 + $0x10e8] sm:$0xff]  ;;  %v8331_v3 = vcombine.low %v8130_v7, %v8134_v62 }
 0x304   :  { %v8740_v43 = vcombine.high %v8538_v30, %v8542_v49  ;;  %v8739_v7 = vcombine.low %v8538_v30, %v8542_v49  ;;  %v8162_v49 = vld [vmem:[%s13207_s0 + $0xb48] sm:$0xff] }
 0x309   :  { %4395 = vmatmul.mubr.bf16.gmra.mrb[156].mxu1 %v8315_v32  ;;  %v8150_v32 = vld [vmem:[%s13207_s0 + $0xae8] sm:$0xff] }
 0x30a   :  { %6728 = vmatmul.mubr.bf16.gmra.mrb[156].mxu0 %v8715_v37  ;;  %4402 = vmatprep.mubr.bf16.mxu1 %v8324_v28  ;;  %v8546_v37 = vld [vmem:[%s13207_s0 + $0x1108] sm:$0xff]  ;;  %v8348_v62 = vcombine.high %v8146_v48, %v8150_v32 }
 0x30b   :  { %6735 = vmatprep.mubr.bf16.mxu0 %v8724_v1  ;;  %v8550_v28 = vld [vmem:[%s13207_s0 + $0x1128] sm:$0xff]  ;;  %v8339_v1 = vcombine.low %v8138_v11, %v8142_v35 }
 0x30c   :  { %v8748_v13 = vcombine.high %v8546_v37, %v8550_v28  ;;  %v8747_v11 = vcombine.low %v8546_v37, %v8550_v28  ;;  %v8170_v28 = vld [vmem:[%s13207_s0 + $0xb88] sm:$0xff] }
 0x311   :  { %4403 = vmatmul.mubr.bf16.gmra.mrb[160].mxu1 %v8323_v20  ;;  %v8158_v20 = vld [vmem:[%s13207_s0 + $0xb28] sm:$0xff] }
 0x312   :  { %6736 = vmatmul.mubr.bf16.gmra.mrb[160].mxu0 %v8723_v55  ;;  %4410 = vmatprep.mubr.bf16.mxu1 %v8332_v52  ;;  %v8554_v55 = vld [vmem:[%s13207_s0 + $0x1148] sm:$0xff]  ;;  %v8356_v35 = vcombine.high %v8154_v17, %v8158_v20 }
 0x313   :  { %6743 = vmatprep.mubr.bf16.mxu0 %v8732_v26  ;;  %v8558_v52 = vld [vmem:[%s13207_s0 + $0x1168] sm:$0xff]  ;;  %v8347_v26 = vcombine.low %v8146_v48, %v8150_v32 }
 0x314   :  { %v8756_v30 = vcombine.high %v8554_v55, %v8558_v52  ;;  %v8755_v48 = vcombine.low %v8554_v55, %v8558_v52  ;;  %v8178_v52 = vld [vmem:[%s13207_s0 + $0xbc8] sm:$0xff] }
 0x319   :  { %4411 = vmatmul.mubr.bf16.gmra.mrb[164].mxu1 %v8331_v3  ;;  %v8166_v3 = vld [vmem:[%s13207_s0 + $0xb68] sm:$0xff] }
 0x31a   :  { %6744 = vmatmul.mubr.bf16.gmra.mrb[164].mxu0 %v8731_v56  ;;  %4418 = vmatprep.mubr.bf16.mxu1 %v8340_v2  ;;  %v8562_v56 = vld [vmem:[%s13207_s0 + $0x1188] sm:$0xff]  ;;  %v8364_v32 = vcombine.high %v8162_v49, %v8166_v3 }
 0x31b   :  { %6751 = vmatprep.mubr.bf16.mxu0 %v8740_v43  ;;  %v8566_v2 = vld [vmem:[%s13207_s0 + $0x11a8] sm:$0xff]  ;;  %v8355_v43 = vcombine.low %v8154_v17, %v8158_v20 }
 0x31c   :  { %v8764_v37 = vcombine.high %v8562_v56, %v8566_v2  ;;  %v8763_v17 = vcombine.low %v8562_v56, %v8566_v2  ;;  %v8186_v2 = vld [vmem:[%s13207_s0 + $0xc08] sm:$0xff] }
 0x321   :  { %4419 = vmatmul.mubr.bf16.gmra.mrb[168].mxu1 %v8339_v1  ;;  %v8174_v1 = vld [vmem:[%s13207_s0 + $0xba8] sm:$0xff] }
 0x322   :  { %6752 = vmatmul.mubr.bf16.gmra.mrb[168].mxu0 %v8739_v7  ;;  %4426 = vmatprep.mubr.bf16.mxu1 %v8348_v62  ;;  %v8570_v7 = vld [vmem:[%s13207_s0 + $0x11c8] sm:$0xff]  ;;  %v8372_v20 = vcombine.high %v8170_v28, %v8174_v1 }
 0x323   :  { %6759 = vmatprep.mubr.bf16.mxu0 %v8748_v13  ;;  %v8574_v62 = vld [vmem:[%s13207_s0 + $0x11e8] sm:$0xff]  ;;  %v8363_v13 = vcombine.low %v8162_v49, %v8166_v3 }
 0x324   :  { %v8772_v55 = vcombine.high %v8570_v7, %v8574_v62  ;;  %v8771_v49 = vcombine.low %v8570_v7, %v8574_v62  ;;  %v8194_v62 = vld [vmem:[%s13207_s0 + $0xc48] sm:$0xff] }
 0x329   :  { %4427 = vmatmul.mubr.bf16.gmra.mrb[172].mxu1 %v8347_v26  ;;  %v8182_v26 = vld [vmem:[%s13207_s0 + $0xbe8] sm:$0xff] }
 0x32a   :  { %6760 = vmatmul.mubr.bf16.gmra.mrb[172].mxu0 %v8747_v11  ;;  %4434 = vmatprep.mubr.bf16.mxu1 %v8356_v35  ;;  %v8578_v11 = vld [vmem:[%s13207_s0 + $0x1208] sm:$0xff]  ;;  %v8380_v3 = vcombine.high %v8178_v52, %v8182_v26 }
 0x32b   :  { %6767 = vmatprep.mubr.bf16.mxu0 %v8756_v30  ;;  %v8582_v35 = vld [vmem:[%s13207_s0 + $0x1228] sm:$0xff]  ;;  %v8371_v30 = vcombine.low %v8170_v28, %v8174_v1 }
 0x32c   :  { %v8780_v56 = vcombine.high %v8578_v11, %v8582_v35  ;;  %v8779_v28 = vcombine.low %v8578_v11, %v8582_v35  ;;  %v8003_v35 = vld [vmem:[%s13207_s0 + $0x650] sm:$0xff] }
 0x331   :  { %4435 = vmatmul.mubr.bf16.gmra.mrb[176].mxu1 %v8355_v43  ;;  %v8190_v43 = vld [vmem:[%s13207_s0 + $0xc28] sm:$0xff] }
 0x332   :  { %6768 = vmatmul.mubr.bf16.gmra.mrb[176].mxu0 %v8755_v48  ;;  %4442 = vmatprep.mubr.bf16.mxu1 %v8364_v32  ;;  %v8586_v48 = vld [vmem:[%s13207_s0 + $0x1248] sm:$0xff]  ;;  %v8388_v1 = vcombine.high %v8186_v2, %v8190_v43 }
 0x333   :  { %6775 = vmatprep.mubr.bf16.mxu0 %v8764_v37  ;;  %v8590_v32 = vld [vmem:[%s13207_s0 + $0x1268] sm:$0xff]  ;;  %v8379_v37 = vcombine.low %v8178_v52, %v8182_v26 }
 0x334   :  { %v8788_v7 = vcombine.high %v8586_v48, %v8590_v32  ;;  %v8787_v52 = vcombine.low %v8586_v48, %v8590_v32  ;;  %v8011_v32 = vld [vmem:[%s13207_s0 + $0x690] sm:$0xff] }
 0x339   :  { %4443 = vmatmul.mubr.bf16.gmra.mrb[180].mxu1 %v8363_v13  ;;  %v8198_v13 = vld [vmem:[%s13207_s0 + $0xc68] sm:$0xff] }
 0x33a   :  { %6776 = vmatmul.mubr.bf16.gmra.mrb[180].mxu0 %v8763_v17  ;;  %4450 = vmatprep.mubr.bf16.mxu1 %v8372_v20  ;;  %v8594_v17 = vld [vmem:[%s13207_s0 + $0x1288] sm:$0xff]  ;;  %v8396_v26 = vcombine.high %v8194_v62, %v8198_v13 }
 0x33b   :  { %6783 = vmatprep.mubr.bf16.mxu0 %v8772_v55  ;;  %v8598_v20 = vld [vmem:[%s13207_s0 + $0x12a8] sm:$0xff]  ;;  %v8387_v55 = vcombine.low %v8186_v2, %v8190_v43 }
 0x33c   :  { %v8796_v11 = vcombine.high %v8594_v17, %v8598_v20  ;;  %v8795_v2 = vcombine.low %v8594_v17, %v8598_v20  ;;  %v10164_v20 = vld [vmem:[%s13206_s1 + $0x180] sm:$0xff]  }
 0x341   :  { %4451 = vmatmul.mubr.bf16.gmra.mrb[184].mxu1 %v8371_v30  ;;  %v8007_v30 = vld [vmem:[%s13207_s0 + $0x670] sm:$0xff] }
 0x342   :  { %6784 = vmatmul.mubr.bf16.gmra.mrb[184].mxu0 %v8771_v49  ;;  %4458 = vmatprep.mubr.bf16.mxu1 %v8380_v3  ;;  %v8403_v49 = vld [vmem:[%s13207_s0 + $0xc90] sm:$0xff]  ;;  %v8206_v43 = vcombine.high %v8003_v35, %v8007_v30 }
 0x343   :  { %6791 = vmatprep.mubr.bf16.mxu0 %v8780_v56  ;;  %v8407_v3 = vld [vmem:[%s13207_s0 + $0xcb0] sm:$0xff]  ;;  %v8395_v56 = vcombine.low %v8194_v62, %v8198_v13 }
 0x344   :  { %v8606_v48 = vcombine.high %v8403_v49, %v8407_v3  ;;  %v8605_v62 = vcombine.low %v8403_v49, %v8407_v3  ;;  %v10165_v49 = vld [vmem:[%s13206_s1 + $0x188] sm:$0xff]  }
 0x349   :  { %4459 = vmatmul.mubr.bf16.gmra.mrb[188].mxu1 %v8379_v37  ;;  %v8015_v37 = vld [vmem:[%s13207_s0 + $0x6b0] sm:$0xff] }
 0x34a   :  { %6792 = vmatmul.mubr.bf16.gmra.mrb[188].mxu0 %v8779_v28  ;;  %4466 = vmatprep.mubr.bf16.mxu1 %v8388_v1  ;;  %v8205_v28 = vcombine.low %v8003_v35, %v8007_v30  ;;  %v8411_v1 = vld [vmem:[%s13207_s0 + $0xcd0] sm:$0xff]  ;;  %v8214_v13 = vcombine.high %v8011_v32, %v8015_v37  ;;  %v8213_v35 = vcombine.low %v8011_v32, %v8015_v37 }
 0x34b   :  { %6799 = vmatprep.mubr.bf16.mxu0 %v8788_v7  ;;  %v8415_v7 = vld [vmem:[%s13207_s0 + $0xcf0] sm:$0xff] }
 0x34c   :  { %v8614_v17 = vcombine.high %v8411_v1, %v8415_v7  ;;  %v8613_v30 = vcombine.low %v8411_v1, %v8415_v7  ;;  %v8427_v32 = vld [vmem:[%s13207_s0 + $0xd50] sm:$0xff] }
 0x34d   :  { %v8431_v37 = vld [vmem:[%s13207_s0 + $0xd70] sm:$0xff] }
 0x351   :  { %4467 = vmatmul.mubr.bf16.gmra.mrb[192].mxu1 %v8387_v55  ;;  %v8019_v55 = vld [vmem:[%s13207_s0 + $0x6d0] sm:$0xff] }
 0x352   :  { %6800 = vmatmul.mubr.bf16.gmra.mrb[192].mxu0 %v8787_v52  ;;  %4474 = vmatprep.mubr.bf16.mxu1 %v8396_v26  ;;  %v8023_v52 = vld [vmem:[%s13207_s0 + $0x6f0] sm:$0xff] }
 0x353   :  { %6807 = vmatprep.mubr.bf16.mxu0 %v8796_v11  ;;  %v8419_v26 = vld [vmem:[%s13207_s0 + $0xd10] sm:$0xff]  ;;  %v8222_v3 = vcombine.high %v8019_v55, %v8023_v52 }
 0x354   :  { %v8423_v11 = vld [vmem:[%s13207_s0 + $0xd30] sm:$0xff] }
 0x355   :  { %v8621_v1 = vcombine.low %v8419_v26, %v8423_v11 }
 0x359   :  { %4475 = vmatmul.mubr.bf16.gmra.mrb[196].mxu1 %v8395_v56  ;;  %v8622_v56 = vcombine.high %v8419_v26, %v8423_v11  ;;  %v8439_v26 = vld [vmem:[%s13207_s0 + $0xdb0] sm:$0xff] }
 0x35a   :  { %6808 = vmatmul.mubr.bf16.gmra.mrb[196].mxu0 %v8795_v2  ;;  %4515 = vmatprep.mubr.bf16.mxu1 %v8206_v43  ;;  %v8027_v2 = vld [vmem:[%s13207_s0 + $0x710] sm:$0xff] }
 0x35b   :  { %6848 = vmatprep.mubr.bf16.mxu0 %v8606_v48  ;;  %v8031_v43 = vld [vmem:[%s13207_s0 + $0x730] sm:$0xff] }
 0x35c   :  { %v10166_v48 = vld [vmem:[%s13206_s1 + $0x190] sm:$0xff]   ;;  %v8230_v7 = vcombine.high %v8027_v2, %v8031_v43  ;;  %v8229_v11 = vcombine.low %v8027_v2, %v8031_v43 }
 0x35d   :  { %v8047_v2 = vld [vmem:[%s13207_s0 + $0x7b0] sm:$0xff] }
 0x35e   :  { %v10170_v43 = vld [vmem:[%s13206_s1 + $0x1b0] sm:$0xff]  }
 0x361   :  { %4516 = vmatmul.mubr.bf16.vlgmr.msra.gmra.mrb[100].mxu1 %v8205_v28  ;;  %v8221_v28 = vcombine.low %v8019_v55, %v8023_v52  ;;  %v10168_v55 = vld [vmem:[%s13206_s1 + $0x1a0] sm:$0xff]   ;;  %v8435_v52 = vld [vmem:[%s13207_s0 + $0xd90] sm:$0xff] }
 0x362   :  { %6849 = vmatmul.mubr.bf16.vlgmr.msra.gmra.mrb[100].mxu0 %v8605_v62  ;;  %4717 = vmatpush1.bf16.msra.mxu1 %v10164_v20  ;;  %v8630_v62 = vcombine.high %v8427_v32, %v8431_v37 }
 0x363   :  { %7050 = vmatpush1.bf16.msra.mxu0 %v10164_v20  ;;  %4523 = vmatprep.mubr.bf16.mxu1 %v8214_v13  ;;  %v10167_v13 = vld [vmem:[%s13206_s1 + $0x198] sm:$0xff]   ;;  %v8039_v20 = vld [vmem:[%s13207_s0 + $0x770] sm:$0xff] }
 0x364   :  { %6856 = vmatprep.mubr.bf16.mxu0 %v8614_v17  ;;  %4718 = vmatprep.subr.bf16.mxu1 %v13230_v0  ;;  %v8035_v17 = vld [vmem:[%s13207_s0 + $0x750] sm:$0xff] }
 0x365   :  { %7051 = vmatprep.subr.bf16.mxu0 %v13230_v0 }
 0x366   :  { %4719 = vmatpush1.bf16.msra.mxu1 %v10165_v49 }
 0x367   :  { %7052 = vmatpush1.bf16.msra.mxu0 %v10165_v49  ;;  %4720 = vmatprep.subr.bf16.mxu1 %v13230_v0  ;;  %v8638_v49 = vcombine.high %v8435_v52, %v8439_v26 }
 0x368   :  { %7053 = vmatprep.subr.bf16.mxu0 %v13230_v0 }
 0x369   :  { %4524 = vmatmul.mubr.bf16.gmra.mrb[104].mxu1 %v8213_v35  ;;  %v8629_v35 = vcombine.low %v8427_v32, %v8431_v37  ;;  %v8447_v32 = vld [vmem:[%s13207_s0 + $0xdf0] sm:$0xff]  ;;  %v8237_v37 = vcombine.low %v8035_v17, %v8039_v20 }
 0x36a   :  { %6857 = vmatmul.mubr.bf16.gmra.mrb[104].mxu0 %v8613_v30  ;;  %4531 = vmatprep.mubr.bf16.mxu1 %v8222_v3  ;;  %v8238_v30 = vcombine.high %v8035_v17, %v8039_v20  ;;  %v10169_v3 = vld [vmem:[%s13206_s1 + $0x1a8] sm:$0xff]   ;;  %v8055_v17 = vld [vmem:[%s13207_s0 + $0x7f0] sm:$0xff]  ;;  %v10172_v20 = vld [vmem:[%s13206_s1 + $0x1c0] sm:$0xff]  }
 0x36b   :  { %6864 = vmatprep.mubr.bf16.mxu0 %v8622_v56  ;;  %4721 = vmatpush1.bf16.msra.mxu1 %v10166_v48  ;;  %v8043_v56 = vld [vmem:[%s13207_s0 + $0x790] sm:$0xff] }
 0x36c   :  { %7054 = vmatpush1.bf16.msra.mxu0 %v10166_v48  ;;  %4722 = vmatprep.subr.bf16.mxu1 %v13230_v0  ;;  %v8443_v48 = vld [vmem:[%s13207_s0 + $0xdd0] sm:$0xff] }
 0x36d   :  { %7055 = vmatprep.subr.bf16.mxu0 %v13230_v0 }
 0x36f   :  { %4723 = vmatpush1.bf16.msra.mxu1 %v10167_v13 }
 0x370   :  { %7056 = vmatpush1.bf16.msra.mxu0 %v10167_v13  ;;  %4724 = vmatprep.subr.bf16.mxu1 %v13230_v0  ;;  %v8051_v13 = vld [vmem:[%s13207_s0 + $0x7d0] sm:$0xff] }
 0x371   :  { %4532 = vmatmul.mubr.bf16.gmra.mrb[108].mxu1 %v8221_v28  ;;  %7057 = vmatprep.subr.bf16.mxu0 %v13230_v0  ;;  %v8637_v28 = vcombine.low %v8435_v52, %v8439_v26  ;;  %v8455_v52 = vld [vmem:[%s13207_s0 + $0xe30] sm:$0xff]  ;;  %v8245_v26 = vcombine.low %v8043_v56, %v8047_v2 }
 0x372   :  { %6865 = vmatmul.mubr.bf16.gmra.mrb[108].mxu0 %v8621_v1  ;;  %4539 = vmatprep.mubr.bf16.mxu1 %v8230_v7  ;;  %v8246_v1 = vcombine.high %v8043_v56, %v8047_v2  ;;  %v8646_v7 = vcombine.high %v8443_v48, %v8447_v32  ;;  %v8063_v56 = vld [vmem:[%s13207_s0 + $0x830] sm:$0xff] }
 0x373   :  { %6872 = vmatprep.mubr.bf16.mxu0 %v8630_v62  ;;  %4725 = vmatpush1.bf16.msra.mxu1 %v10168_v55  ;;  %v10171_v62 = vld [vmem:[%s13206_s1 + $0x1b8] sm:$0xff]   ;;  %v10174_v2 = vld [vmem:[%s13206_s1 + $0x1d0] sm:$0xff]  }
 0x374   :  { %7058 = vmatpush1.bf16.msra.mxu0 %v10168_v55  ;;  %4726 = vmatprep.subr.bf16.mxu1 %v13230_v0  ;;  %v8451_v55 = vld [vmem:[%s13207_s0 + $0xe10] sm:$0xff] }
 0x375   :  { %7059 = vmatprep.subr.bf16.mxu0 %v13230_v0 }
 0x377   :  { %4727 = vmatpush1.bf16.msra.mxu1 %v10169_v3 }
 0x378   :  { %7060 = vmatpush1.bf16.msra.mxu0 %v10169_v3  ;;  %4728 = vmatprep.subr.bf16.mxu1 %v13230_v0  ;;  %v8059_v3 = vld [vmem:[%s13207_s0 + $0x810] sm:$0xff] }
 0x379   :  { %4540 = vmatmul.mubr.bf16.gmra.mrb[112].mxu1 %v8229_v11  ;;  %7061 = vmatprep.subr.bf16.mxu0 %v13230_v0  ;;  %v8645_v11 = vcombine.low %v8443_v48, %v8447_v32  ;;  %v8463_v48 = vld [vmem:[%s13207_s0 + $0xe70] sm:$0xff]  ;;  %v8253_v32 = vcombine.low %v8051_v13, %v8055_v17 }
 0x37a   :  { %6873 = vmatmul.mubr.bf16.gmra.mrb[112].mxu0 %v8629_v35  ;;  %4547 = vmatprep.mubr.bf16.mxu1 %v8238_v30  ;;  %v8254_v35 = vcombine.high %v8051_v13, %v8055_v17  ;;  %v8654_v30 = vcombine.high %v8451_v55, %v8455_v52  ;;  %v8071_v13 = vld [vmem:[%s13207_s0 + $0x870] sm:$0xff]  ;;  %v10176_v17 = vld [vmem:[%s13206_s1 + $0x1e0] sm:$0xff]  }
 0x37b   :  { %6880 = vmatprep.mubr.bf16.mxu0 %v8638_v49  ;;  %4729 = vmatpush1.bf16.msra.mxu1 %v10170_v43  ;;  %v10173_v49 = vld [vmem:[%s13206_s1 + $0x1c8] sm:$0xff]  }
 0x37c   :  { %7062 = vmatpush1.bf16.msra.mxu0 %v10170_v43  ;;  %4730 = vmatprep.subr.bf16.mxu1 %v13230_v0  ;;  %v8459_v43 = vld [vmem:[%s13207_s0 + $0xe50] sm:$0xff] }
 0x37d   :  { %7063 = vmatprep.subr.bf16.mxu0 %v13230_v0 }
 0x37f   :  { %4731 = vmatpush1.bf16.msra.mxu1 %v10171_v62 }
 0x380   :  { %7064 = vmatpush1.bf16.msra.mxu0 %v10171_v62  ;;  %4732 = vmatprep.subr.bf16.mxu1 %v13230_v0  ;;  %v8067_v62 = vld [vmem:[%s13207_s0 + $0x850] sm:$0xff] }
 0x381   :  { %4548 = vmatmul.mubr.bf16.gmra.mrb[116].mxu1 %v8237_v37  ;;  %7065 = vmatprep.subr.bf16.mxu0 %v13230_v0  ;;  %v8653_v37 = vcombine.low %v8451_v55, %v8455_v52  ;;  %v8471_v55 = vld [vmem:[%s13207_s0 + $0xeb0] sm:$0xff]  ;;  %v8261_v52 = vcombine.low %v8059_v3, %v8063_v56 }
 0x382   :  { %6881 = vmatmul.mubr.bf16.gmra.mrb[116].mxu0 %v8637_v28  ;;  %4555 = vmatprep.mubr.bf16.mxu1 %v8246_v1  ;;  %v8262_v28 = vcombine.high %v8059_v3, %v8063_v56  ;;  %v8662_v1 = vcombine.high %v8459_v43, %v8463_v48  ;;  %v8079_v3 = vld [vmem:[%s13207_s0 + $0x8b0] sm:$0xff] }
 0x383   :  { %6888 = vmatprep.mubr.bf16.mxu0 %v8646_v7  ;;  %4733 = vmatpush1.bf16.msra.mxu1 %v10172_v20  ;;  %v10175_v7 = vld [vmem:[%s13206_s1 + $0x1d8] sm:$0xff]   ;;  %v10178_v56 = vld [vmem:[%s13206_s1 + $0x1f0] sm:$0xff]  }
 0x384   :  { %7066 = vmatpush1.bf16.msra.mxu0 %v10172_v20  ;;  %4734 = vmatprep.subr.bf16.mxu1 %v13230_v0  ;;  %v8467_v20 = vld [vmem:[%s13207_s0 + $0xe90] sm:$0xff] }
 0x385   :  { %7067 = vmatprep.subr.bf16.mxu0 %v13230_v0 }
 0x387   :  { %4735 = vmatpush1.bf16.msra.mxu1 %v10173_v49 }
 0x388   :  { %7068 = vmatpush1.bf16.msra.mxu0 %v10173_v49  ;;  %4736 = vmatprep.subr.bf16.mxu1 %v13230_v0  ;;  %v8075_v49 = vld [vmem:[%s13207_s0 + $0x890] sm:$0xff] }
 0x389   :  { %4556 = vmatmul.mubr.bf16.gmra.mrb[120].mxu1 %v8245_v26  ;;  %7069 = vmatprep.subr.bf16.mxu0 %v13230_v0  ;;  %v8661_v26 = vcombine.low %v8459_v43, %v8463_v48  ;;  %v8479_v43 = vld [vmem:[%s13207_s0 + $0xef0] sm:$0xff]  ;;  %v8269_v48 = vcombine.low %v8067_v62, %v8071_v13 }
 0x38a   :  { %6889 = vmatmul.mubr.bf16.gmra.mrb[120].mxu0 %v8645_v11  ;;  %4563 = vmatprep.mubr.bf16.mxu1 %v8254_v35  ;;  %v8270_v11 = vcombine.high %v8067_v62, %v8071_v13  ;;  %v8670_v35 = vcombine.high %v8467_v20, %v8471_v55  ;;  %v8483_v62 = vld [vmem:[%s13207_s0 + $0xf10] sm:$0xff] }
 0x38b   :  { %6896 = vmatprep.mubr.bf16.mxu0 %v8654_v30  ;;  %4737 = vmatpush1.bf16.msra.mxu1 %v10174_v2  ;;  %v10177_v30 = vld [vmem:[%s13206_s1 + $0x1e8] sm:$0xff]   ;;  %v8487_v13 = vld [vmem:[%s13207_s0 + $0xf30] sm:$0xff] }
 0x38c   :  { %7070 = vmatpush1.bf16.msra.mxu0 %v10174_v2  ;;  %4738 = vmatprep.subr.bf16.mxu1 %v13230_v0  ;;  %v8475_v2 = vld [vmem:[%s13207_s0 + $0xed0] sm:$0xff] }
 0x38d   :  { %7071 = vmatprep.subr.bf16.mxu0 %v13230_v0 }
 0x38f   :  { %4739 = vmatpush1.bf16.msra.mxu1 %v10175_v7 }
 0x390   :  { %7072 = vmatpush1.bf16.msra.mxu0 %v10175_v7  ;;  %4740 = vmatprep.subr.bf16.mxu1 %v13230_v0  ;;  %v8083_v7 = vld [vmem:[%s13207_s0 + $0x8d0] sm:$0xff] }
 0x391   :  { %4564 = vmatmul.mubr.bf16.gmra.mrb[124].mxu1 %v8253_v32  ;;  %7073 = vmatprep.subr.bf16.mxu0 %v13230_v0  ;;  %v8669_v32 = vcombine.low %v8467_v20, %v8471_v55  ;;  %v8677_v20 = vcombine.low %v8475_v2, %v8479_v43 }
 0x392   :  { %6897 = vmatmul.mubr.bf16.gmra.mrb[124].mxu0 %v8653_v37  ;;  %4571 = vmatprep.mubr.bf16.mxu1 %v8262_v28  ;;  %v8278_v37 = vcombine.high %v8075_v49, %v8079_v3  ;;  %v8678_v28 = vcombine.high %v8475_v2, %v8479_v43  ;;  %v8099_v43 = vld [vmem:[%s13207_s0 + $0x950] sm:$0xff] }
 0x393   :  { %6904 = vmatprep.mubr.bf16.mxu0 %v8662_v1  ;;  %4741 = vmatpush1.bf16.msra.mxu1 %v10176_v17  ;;  %v10179_v1 = vld [vmem:[%s13206_s1 + $0x1f8] sm:$0xff]  }
 0x394   :  { %7074 = vmatpush1.bf16.msra.mxu0 %v10176_v17  ;;  %4742 = vmatprep.subr.bf16.mxu1 %v13230_v0  ;;  %v8277_v17 = vcombine.low %v8075_v49, %v8079_v3  ;;  %v8685_v3 = vcombine.low %v8483_v62, %v8487_v13 }
 0x395   :  { %7075 = vmatprep.subr.bf16.mxu0 %v13230_v0 }
 0x397   :  { %4743 = vmatpush1.bf16.msra.mxu1 %v10177_v30 }
 0x398   :  { %7076 = vmatpush1.bf16.msra.mxu0 %v10177_v30  ;;  %4744 = vmatprep.subr.bf16.mxu1 %v13230_v0  ;;  %v8495_v30 = vld [vmem:[%s13207_s0 + $0xf70] sm:$0xff] }
 0x399   :  { %4572 = vmatmul.mubr.bf16.gmra.mrb[128].mxu1 %v8261_v52  ;;  %7077 = vmatprep.subr.bf16.mxu0 %v13230_v0  ;;  %v8686_v52 = vcombine.high %v8483_v62, %v8487_v13  ;;  %v8107_v62 = vld [vmem:[%s13207_s0 + $0x990] sm:$0xff] }
 0x39a   :  { %6905 = vmatmul.mubr.bf16.gmra.mrb[128].mxu0 %v8661_v26  ;;  %4579 = vmatprep.mubr.bf16.mxu1 %v8270_v11  ;;  %v8091_v26 = vld [vmem:[%s13207_s0 + $0x910] sm:$0xff] }
 0x39b   :  { %6912 = vmatprep.mubr.bf16.mxu0 %v8670_v35  ;;  %4745 = vmatpush1.bf16.msra.mxu1 %v10178_v56  ;;  %v8095_v11 = vld [vmem:[%s13207_s0 + $0x930] sm:$0xff] }
 0x39c   :  { %7078 = vmatpush1.bf16.msra.mxu0 %v10178_v56  ;;  %4746 = vmatprep.subr.bf16.mxu1 %v13230_v0  ;;  %v8491_v35 = vld [vmem:[%s13207_s0 + $0xf50] sm:$0xff]  ;;  %v8294_v56 = vcombine.high %v8091_v26, %v8095_v11 }
 0x39d   :  { %7079 = vmatprep.subr.bf16.mxu0 %v13230_v0  ;;  %v8087_v0 = vld [vmem:[%s13207_s0 + $0x8f0] sm:$0xff]  ;;  %v8694_v2 = vcombine.high %v8491_v35, %v8495_v30 }
 0x39e   :  { %v8286_v55 = vcombine.high %v8083_v7, %v8087_v0  ;;  %v8285_v49 = vcombine.low %v8083_v7, %v8087_v0  ;;  %v8111_v13 = vld [vmem:[%s13207_s0 + $0x9b0] sm:$0xff] }
 0x39f   :  { %4747 = vmatpush1.bf16.msra.mxu1 %v10179_v1 }
 0x3a0   :  { %7080 = vmatpush1.bf16.msra.mxu0 %v10179_v1  ;;  %v8693_v1 = vcombine.low %v8491_v35, %v8495_v30  ;;  %v8115_v35 = vld [vmem:[%s13207_s0 + $0x9d0] sm:$0xff] }
 0x3a1   :  { %4580 = vmatmul.mubr.bf16.gmra.mrb[132].mxu1 %v8269_v48  ;;  %v8103_v48 = vld [vmem:[%s13207_s0 + $0x970] sm:$0xff] }
 0x3a2   :  { %6913 = vmatmul.mubr.bf16.gmra.mrb[132].mxu0 %v8669_v32  ;;  %4587 = vmatprep.mubr.bf16.mxu1 %v8278_v37  ;;  %v8499_v32 = vld [vmem:[%s13207_s0 + $0xf90] sm:$0xff]  ;;  %v8302_v7 = vcombine.high %v8099_v43, %v8103_v48 }
 0x3a3   :  { %6920 = vmatprep.mubr.bf16.mxu0 %v8678_v28  ;;  %v8503_v37 = vld [vmem:[%s13207_s0 + $0xfb0] sm:$0xff]  ;;  %v8293_v28 = vcombine.low %v8091_v26, %v8095_v11  ;;  %v8310_v26 = vcombine.high %v8107_v62, %v8111_v13 }
 0x3a4   :  { %v8702_v0 = vcombine.high %v8499_v32, %v8503_v37  ;;  %v8119_v30 = vld [vmem:[%s13207_s0 + $0x9f0] sm:$0xff] }
 0x3a9   :  { %4588 = vmatmul.mubr.bf16.gmra.mrb[136].mxu1 %v8277_v17  ;;  %v8507_v17 = vld [vmem:[%s13207_s0 + $0xfd0] sm:$0xff] }
 0x3aa   :  { %6921 = vmatmul.mubr.bf16.gmra.mrb[136].mxu0 %v8677_v20  ;;  %4595 = vmatprep.mubr.bf16.mxu1 %v8286_v55  ;;  %v8511_v20 = vld [vmem:[%s13207_s0 + $0xff0] sm:$0xff]  ;;  %v8301_v55 = vcombine.low %v8099_v43, %v8103_v48  ;;  %v8318_v43 = vcombine.high %v8115_v35, %v8119_v30 }
 0x3ab   :  { %6928 = vmatprep.mubr.bf16.mxu0 %v8686_v52  ;;  %v8701_v52 = vcombine.low %v8499_v32, %v8503_v37  ;;  %v8710_v11 = vcombine.high %v8507_v17, %v8511_v20  ;;  %v8123_v32 = vld [vmem:[%s13207_s0 + $0xa10] sm:$0xff] }
 0x3ac   :  { %v8127_v37 = vld [vmem:[%s13207_s0 + $0xa30] sm:$0xff] }
 0x3b1   :  { %4596 = vmatmul.mubr.bf16.gmra.mrb[140].mxu1 %v8285_v49  ;;  %v8515_v49 = vld [vmem:[%s13207_s0 + $0x1010] sm:$0xff] }
 0x3b2   :  { %6929 = vmatmul.mubr.bf16.gmra.mrb[140].mxu0 %v8685_v3  ;;  %4603 = vmatprep.mubr.bf16.mxu1 %v8294_v56  ;;  %v8519_v3 = vld [vmem:[%s13207_s0 + $0x1030] sm:$0xff]  ;;  %v8309_v56 = vcombine.low %v8107_v62, %v8111_v13  ;;  %v8326_v62 = vcombine.high %v8123_v32, %v8127_v37 }
 0x3b3   :  { %6936 = vmatprep.mubr.bf16.mxu0 %v8694_v2  ;;  %v8709_v2 = vcombine.low %v8507_v17, %v8511_v20  ;;  %v8718_v48 = vcombine.high %v8515_v49, %v8519_v3  ;;  %v8131_v17 = vld [vmem:[%s13207_s0 + $0xa50] sm:$0xff] }
 0x3b4   :  { %v8135_v20 = vld [vmem:[%s13207_s0 + $0xa70] sm:$0xff] }
 0x3b9   :  { %4604 = vmatmul.mubr.bf16.gmra.mrb[144].mxu1 %v8293_v28  ;;  %v8523_v28 = vld [vmem:[%s13207_s0 + $0x1050] sm:$0xff] }
 0x3ba   :  { %6937 = vmatmul.mubr.bf16.gmra.mrb[144].mxu0 %v8693_v1  ;;  %4611 = vmatprep.mubr.bf16.mxu1 %v8302_v7  ;;  %v8527_v1 = vld [vmem:[%s13207_s0 + $0x1070] sm:$0xff]  ;;  %v8317_v7 = vcombine.low %v8115_v35, %v8119_v30  ;;  %v8334_v35 = vcombine.high %v8131_v17, %v8135_v20 }
 0x3bb   :  { %6944 = vmatprep.mubr.bf16.mxu0 %v8702_v0  ;;  %v8717_v0 = vcombine.low %v8515_v49, %v8519_v3  ;;  %v8726_v13 = vcombine.high %v8523_v28, %v8527_v1  ;;  %v8139_v49 = vld [vmem:[%s13207_s0 + $0xa90] sm:$0xff] }
 0x3bc   :  { %v8143_v3 = vld [vmem:[%s13207_s0 + $0xab0] sm:$0xff] }
 0x3c1   :  { %4612 = vmatmul.mubr.bf16.gmra.mrb[148].mxu1 %v8301_v55  ;;  %v8531_v55 = vld [vmem:[%s13207_s0 + $0x1090] sm:$0xff] }
 0x3c2   :  { %6945 = vmatmul.mubr.bf16.gmra.mrb[148].mxu0 %v8701_v52  ;;  %4619 = vmatprep.mubr.bf16.mxu1 %v8310_v26  ;;  %v8535_v52 = vld [vmem:[%s13207_s0 + $0x10b0] sm:$0xff]  ;;  %v8325_v26 = vcombine.low %v8123_v32, %v8127_v37  ;;  %v8342_v32 = vcombine.high %v8139_v49, %v8143_v3 }
 0x3c3   :  { %6952 = vmatprep.mubr.bf16.mxu0 %v8710_v11  ;;  %v8725_v11 = vcombine.low %v8523_v28, %v8527_v1  ;;  %v8734_v30 = vcombine.high %v8531_v55, %v8535_v52  ;;  %v8147_v28 = vld [vmem:[%s13207_s0 + $0xad0] sm:$0xff] }
 0x3c4   :  { %v8151_v1 = vld [vmem:[%s13207_s0 + $0xaf0] sm:$0xff] }
 0x3c9   :  { %4620 = vmatmul.mubr.bf16.gmra.mrb[152].mxu1 %v8309_v56  ;;  %v8539_v56 = vld [vmem:[%s13207_s0 + $0x10d0] sm:$0xff] }
 0x3ca   :  { %6953 = vmatmul.mubr.bf16.gmra.mrb[152].mxu0 %v8709_v2  ;;  %4627 = vmatprep.mubr.bf16.mxu1 %v8318_v43  ;;  %v8543_v2 = vld [vmem:[%s13207_s0 + $0x10f0] sm:$0xff]  ;;  %v8333_v43 = vcombine.low %v8131_v17, %v8135_v20  ;;  %v8350_v17 = vcombine.high %v8147_v28, %v8151_v1 }
 0x3cb   :  { %6960 = vmatprep.mubr.bf16.mxu0 %v8718_v48  ;;  %v8733_v48 = vcombine.low %v8531_v55, %v8535_v52  ;;  %v8742_v37 = vcombine.high %v8539_v56, %v8543_v2  ;;  %v8155_v55 = vld [vmem:[%s13207_s0 + $0xb10] sm:$0xff] }
 0x3cc   :  { %v8159_v52 = vld [vmem:[%s13207_s0 + $0xb30] sm:$0xff] }
 0x3d1   :  { %4628 = vmatmul.mubr.bf16.gmra.mrb[156].mxu1 %v8317_v7  ;;  %v8547_v7 = vld [vmem:[%s13207_s0 + $0x1110] sm:$0xff] }
 0x3d2   :  { %6961 = vmatmul.mubr.bf16.gmra.mrb[156].mxu0 %v8717_v0  ;;  %4635 = vmatprep.mubr.bf16.mxu1 %v8326_v62  ;;  %v8551_v0 = vld [vmem:[%s13207_s0 + $0x1130] sm:$0xff]  ;;  %v8341_v62 = vcombine.low %v8139_v49, %v8143_v3  ;;  %v8358_v49 = vcombine.high %v8155_v55, %v8159_v52 }
 0x3d3   :  { %6968 = vmatprep.mubr.bf16.mxu0 %v8726_v13  ;;  %v8741_v13 = vcombine.low %v8539_v56, %v8543_v2  ;;  %v8750_v20 = vcombine.high %v8547_v7, %v8551_v0  ;;  %v8163_v56 = vld [vmem:[%s13207_s0 + $0xb50] sm:$0xff] }
 0x3d4   :  { %v8167_v2 = vld [vmem:[%s13207_s0 + $0xb70] sm:$0xff] }
 0x3d9   :  { %4636 = vmatmul.mubr.bf16.gmra.mrb[160].mxu1 %v8325_v26  ;;  %v8555_v26 = vld [vmem:[%s13207_s0 + $0x1150] sm:$0xff] }
 0x3da   :  { %6969 = vmatmul.mubr.bf16.gmra.mrb[160].mxu0 %v8725_v11  ;;  %4643 = vmatprep.mubr.bf16.mxu1 %v8334_v35  ;;  %v8559_v11 = vld [vmem:[%s13207_s0 + $0x1170] sm:$0xff]  ;;  %v8349_v35 = vcombine.low %v8147_v28, %v8151_v1  ;;  %v8366_v28 = vcombine.high %v8163_v56, %v8167_v2 }
 0x3db   :  { %6976 = vmatprep.mubr.bf16.mxu0 %v8734_v30  ;;  %v8749_v30 = vcombine.low %v8547_v7, %v8551_v0  ;;  %v8758_v3 = vcombine.high %v8555_v26, %v8559_v11  ;;  %v8171_v7 = vld [vmem:[%s13207_s0 + $0xb90] sm:$0xff] }
 0x3dc   :  { %v8175_v0 = vld [vmem:[%s13207_s0 + $0xbb0] sm:$0xff] }
 0x3e1   :  { %4644 = vmatmul.mubr.bf16.gmra.mrb[164].mxu1 %v8333_v43  ;;  %v8563_v43 = vld [vmem:[%s13207_s0 + $0x1190] sm:$0xff] }
 0x3e2   :  { %6977 = vmatmul.mubr.bf16.gmra.mrb[164].mxu0 %v8733_v48  ;;  %4651 = vmatprep.mubr.bf16.mxu1 %v8342_v32  ;;  %v8567_v48 = vld [vmem:[%s13207_s0 + $0x11b0] sm:$0xff]  ;;  %v8357_v32 = vcombine.low %v8155_v55, %v8159_v52  ;;  %v8374_v55 = vcombine.high %v8171_v7, %v8175_v0 }
 0x3e3   :  { %6984 = vmatprep.mubr.bf16.mxu0 %v8742_v37  ;;  %v8757_v37 = vcombine.low %v8555_v26, %v8559_v11  ;;  %v8766_v1 = vcombine.high %v8563_v43, %v8567_v48  ;;  %v8179_v26 = vld [vmem:[%s13207_s0 + $0xbd0] sm:$0xff] }
 0x3e4   :  { %v8183_v11 = vld [vmem:[%s13207_s0 + $0xbf0] sm:$0xff] }
 0x3e9   :  { %4652 = vmatmul.mubr.bf16.gmra.mrb[168].mxu1 %v8341_v62  ;;  %v8571_v62 = vld [vmem:[%s13207_s0 + $0x11d0] sm:$0xff] }
 0x3ea   :  { %6985 = vmatmul.mubr.bf16.gmra.mrb[168].mxu0 %v8741_v13  ;;  %4659 = vmatprep.mubr.bf16.mxu1 %v8350_v17  ;;  %v8575_v13 = vld [vmem:[%s13207_s0 + $0x11f0] sm:$0xff]  ;;  %v8365_v17 = vcombine.low %v8163_v56, %v8167_v2  ;;  %v8382_v56 = vcombine.high %v8179_v26, %v8183_v11 }
 0x3eb   :  { %6992 = vmatprep.mubr.bf16.mxu0 %v8750_v20  ;;  %v8765_v20 = vcombine.low %v8563_v43, %v8567_v48  ;;  %v8774_v52 = vcombine.high %v8571_v62, %v8575_v13  ;;  %v8187_v43 = vld [vmem:[%s13207_s0 + $0xc10] sm:$0xff] }
 0x3ec   :  { %v8191_v48 = vld [vmem:[%s13207_s0 + $0xc30] sm:$0xff] }
 0x3f1   :  { %4660 = vmatmul.mubr.bf16.gmra.mrb[172].mxu1 %v8349_v35  ;;  %v8579_v35 = vld [vmem:[%s13207_s0 + $0x1210] sm:$0xff] }
 0x3f2   :  { %6993 = vmatmul.mubr.bf16.gmra.mrb[172].mxu0 %v8749_v30  ;;  %4667 = vmatprep.mubr.bf16.mxu1 %v8358_v49  ;;  %v8583_v30 = vld [vmem:[%s13207_s0 + $0x1230] sm:$0xff]  ;;  %v8373_v49 = vcombine.low %v8171_v7, %v8175_v0  ;;  %v8390_v7 = vcombine.high %v8187_v43, %v8191_v48 }
 0x3f3   :  { %7000 = vmatprep.mubr.bf16.mxu0 %v8758_v3  ;;  %v8773_v3 = vcombine.low %v8571_v62, %v8575_v13  ;;  %v8782_v2 = vcombine.high %v8579_v35, %v8583_v30  ;;  %v8195_v62 = vld [vmem:[%s13207_s0 + $0xc50] sm:$0xff] }
 0x3f4   :  { %v8199_v13 = vld [vmem:[%s13207_s0 + $0xc70] sm:$0xff] }
 0x3f9   :  { %4668 = vmatmul.mubr.bf16.gmra.mrb[176].mxu1 %v8357_v32  ;;  %v8587_v32 = vld [vmem:[%s13207_s0 + $0x1250] sm:$0xff] }
 0x3fa   :  { %7001 = vmatmul.mubr.bf16.gmra.mrb[176].mxu0 %v8757_v37  ;;  %4675 = vmatprep.mubr.bf16.mxu1 %v8366_v28  ;;  %v8591_v37 = vld [vmem:[%s13207_s0 + $0x1270] sm:$0xff]  ;;  %v8381_v28 = vcombine.low %v8179_v26, %v8183_v11  ;;  %v8398_v26 = vcombine.high %v8195_v62, %v8199_v13 }
 0x3fb   :  { %7008 = vmatprep.mubr.bf16.mxu0 %v8766_v1  ;;  %v8781_v1 = vcombine.low %v8579_v35, %v8583_v30  ;;  %v8790_v0 = vcombine.high %v8587_v32, %v8591_v37  ;;  %v8004_v35 = vld [vmem:[%s13207_s0 + $0x658] sm:$0xff] }
 0x3fc   :  { %v8008_v30 = vld [vmem:[%s13207_s0 + $0x678] sm:$0xff] }
 0x401   :  { %4676 = vmatmul.mubr.bf16.gmra.mrb[180].mxu1 %v8365_v17  ;;  %v8595_v17 = vld [vmem:[%s13207_s0 + $0x1290] sm:$0xff] }
 0x402   :  { %7009 = vmatmul.mubr.bf16.gmra.mrb[180].mxu0 %v8765_v20  ;;  %4683 = vmatprep.mubr.bf16.mxu1 %v8374_v55  ;;  %v8599_v20 = vld [vmem:[%s13207_s0 + $0x12b0] sm:$0xff]  ;;  %v8389_v55 = vcombine.low %v8187_v43, %v8191_v48  ;;  %v8208_v43 = vcombine.high %v8004_v35, %v8008_v30 }
 0x403   :  { %7016 = vmatprep.mubr.bf16.mxu0 %v8774_v52  ;;  %v8789_v52 = vcombine.low %v8587_v32, %v8591_v37  ;;  %v8798_v11 = vcombine.high %v8595_v17, %v8599_v20  ;;  %v8012_v32 = vld [vmem:[%s13207_s0 + $0x698] sm:$0xff] }
 0x404   :  { %v8016_v37 = vld [vmem:[%s13207_s0 + $0x6b8] sm:$0xff] }
 0x409   :  { %4684 = vmatmul.mubr.bf16.gmra.mrb[184].mxu1 %v8373_v49  ;;  %v8404_v49 = vld [vmem:[%s13207_s0 + $0xc98] sm:$0xff] }
 0x40a   :  { %7017 = vmatmul.mubr.bf16.gmra.mrb[184].mxu0 %v8773_v3  ;;  %4691 = vmatprep.mubr.bf16.mxu1 %v8382_v56  ;;  %v8408_v3 = vld [vmem:[%s13207_s0 + $0xcb8] sm:$0xff]  ;;  %v8397_v56 = vcombine.low %v8195_v62, %v8199_v13  ;;  %v8216_v62 = vcombine.high %v8012_v32, %v8016_v37 }
 0x40b   :  { %7024 = vmatprep.mubr.bf16.mxu0 %v8782_v2  ;;  %v8797_v2 = vcombine.low %v8595_v17, %v8599_v20  ;;  %v8608_v48 = vcombine.high %v8404_v49, %v8408_v3  ;;  %v8020_v17 = vld [vmem:[%s13207_s0 + $0x6d8] sm:$0xff] }
 0x40c   :  { %v8024_v20 = vld [vmem:[%s13207_s0 + $0x6f8] sm:$0xff] }
 0x411   :  { %4692 = vmatmul.mubr.bf16.gmra.mrb[188].mxu1 %v8381_v28  ;;  %v8412_v28 = vld [vmem:[%s13207_s0 + $0xcd8] sm:$0xff] }
 0x412   :  { %7025 = vmatmul.mubr.bf16.gmra.mrb[188].mxu0 %v8781_v1  ;;  %4699 = vmatprep.mubr.bf16.mxu1 %v8390_v7  ;;  %v8416_v1 = vld [vmem:[%s13207_s0 + $0xcf8] sm:$0xff]  ;;  %v8207_v7 = vcombine.low %v8004_v35, %v8008_v30  ;;  %v8224_v35 = vcombine.high %v8020_v17, %v8024_v20 }
 0x413   :  { %7032 = vmatprep.mubr.bf16.mxu0 %v8790_v0  ;;  %v8607_v0 = vcombine.low %v8404_v49, %v8408_v3  ;;  %v8616_v13 = vcombine.high %v8412_v28, %v8416_v1  ;;  %v8028_v49 = vld [vmem:[%s13207_s0 + $0x718] sm:$0xff] }
 0x414   :  { %v8032_v3 = vld [vmem:[%s13207_s0 + $0x738] sm:$0xff] }
 0x419   :  { %4700 = vmatmul.mubr.bf16.gmra.mrb[192].mxu1 %v8389_v55  ;;  %v8420_v55 = vld [vmem:[%s13207_s0 + $0xd18] sm:$0xff] }
 0x41a   :  { %7033 = vmatmul.mubr.bf16.gmra.mrb[192].mxu0 %v8789_v52  ;;  %4707 = vmatprep.mubr.bf16.mxu1 %v8398_v26  ;;  %v8424_v52 = vld [vmem:[%s13207_s0 + $0xd38] sm:$0xff]  ;;  %v8215_v26 = vcombine.low %v8012_v32, %v8016_v37  ;;  %v8232_v32 = vcombine.high %v8028_v49, %v8032_v3 }
 0x41b   :  { %7040 = vmatprep.mubr.bf16.mxu0 %v8798_v11  ;;  %v8615_v11 = vcombine.low %v8412_v28, %v8416_v1  ;;  %v8624_v30 = vcombine.high %v8420_v55, %v8424_v52  ;;  %v8036_v28 = vld [vmem:[%s13207_s0 + $0x758] sm:$0xff] }
 0x41c   :  { %v8040_v1 = vld [vmem:[%s13207_s0 + $0x778] sm:$0xff] }
 0x421   :  { %4708 = vmatmul.mubr.bf16.gmra.mrb[196].mxu1 %v8397_v56  ;;  %v8428_v56 = vld [vmem:[%s13207_s0 + $0xd58] sm:$0xff] }
 0x422   :  { %7041 = vmatmul.mubr.bf16.gmra.mrb[196].mxu0 %v8797_v2  ;;  %4748 = vmatprep.mubr.bf16.mxu1 %v8208_v43  ;;  %v8432_v2 = vld [vmem:[%s13207_s0 + $0xd78] sm:$0xff]  ;;  %v8223_v43 = vcombine.low %v8020_v17, %v8024_v20  ;;  %v8240_v17 = vcombine.high %v8036_v28, %v8040_v1 }
 0x423   :  { %7081 = vmatprep.mubr.bf16.mxu0 %v8608_v48  ;;  %v8623_v48 = vcombine.low %v8420_v55, %v8424_v52  ;;  %v8632_v37 = vcombine.high %v8428_v56, %v8432_v2  ;;  %v8044_v55 = vld [vmem:[%s13207_s0 + $0x798] sm:$0xff] }
 0x424   :  { %v8048_v52 = vld [vmem:[%s13207_s0 + $0x7b8] sm:$0xff] }
 0x429   :  { %4749 = vmatmul.mubr.bf16.vlgmr.msra.gmra.mrb[100].mxu1 %v8207_v7  ;;  %v8436_v7 = vld [vmem:[%s13207_s0 + $0xd98] sm:$0xff] }
 0x42a   :  { %7082 = vmatmul.mubr.bf16.vlgmr.msra.gmra.mrb[100].mxu0 %v8607_v0  ;;  %4756 = vmatprep.mubr.bf16.mxu1 %v8216_v62  ;;  %v8440_v0 = vld [vmem:[%s13207_s0 + $0xdb8] sm:$0xff]  ;;  %v8231_v62 = vcombine.low %v8028_v49, %v8032_v3  ;;  %v8248_v49 = vcombine.high %v8044_v55, %v8048_v52 }
 0x42b   :  { %7089 = vmatprep.mubr.bf16.mxu0 %v8616_v13  ;;  %v8631_v13 = vcombine.low %v8428_v56, %v8432_v2  ;;  %v8640_v20 = vcombine.high %v8436_v7, %v8440_v0  ;;  %v8052_v56 = vld [vmem:[%s13207_s0 + $0x7d8] sm:$0xff] }
 0x42c   :  { %v8056_v2 = vld [vmem:[%s13207_s0 + $0x7f8] sm:$0xff] }
 0x431   :  { %4757 = vmatmul.mubr.bf16.gmra.mrb[104].mxu1 %v8215_v26  ;;  %v8444_v26 = vld [vmem:[%s13207_s0 + $0xdd8] sm:$0xff] }
 0x432   :  { %7090 = vmatmul.mubr.bf16.gmra.mrb[104].mxu0 %v8615_v11  ;;  %4764 = vmatprep.mubr.bf16.mxu1 %v8224_v35  ;;  %v8448_v11 = vld [vmem:[%s13207_s0 + $0xdf8] sm:$0xff]  ;;  %v8239_v35 = vcombine.low %v8036_v28, %v8040_v1  ;;  %v8256_v28 = vcombine.high %v8052_v56, %v8056_v2 }
 0x433   :  { %7097 = vmatprep.mubr.bf16.mxu0 %v8624_v30  ;;  %v8639_v30 = vcombine.low %v8436_v7, %v8440_v0  ;;  %v8648_v3 = vcombine.high %v8444_v26, %v8448_v11  ;;  %v8060_v7 = vld [vmem:[%s13207_s0 + $0x818] sm:$0xff] }
 0x434   :  { %v8064_v0 = vld [vmem:[%s13207_s0 + $0x838] sm:$0xff] }
 0x439   :  { %4765 = vmatmul.mubr.bf16.gmra.mrb[108].mxu1 %v8223_v43  ;;  %v8452_v43 = vld [vmem:[%s13207_s0 + $0xe18] sm:$0xff] }
 0x43a   :  { %7098 = vmatmul.mubr.bf16.gmra.mrb[108].mxu0 %v8623_v48  ;;  %4772 = vmatprep.mubr.bf16.mxu1 %v8232_v32  ;;  %v8456_v48 = vld [vmem:[%s13207_s0 + $0xe38] sm:$0xff]  ;;  %v8247_v32 = vcombine.low %v8044_v55, %v8048_v52  ;;  %v8264_v55 = vcombine.high %v8060_v7, %v8064_v0 }
 0x43b   :  { %7105 = vmatprep.mubr.bf16.mxu0 %v8632_v37  ;;  %v8647_v37 = vcombine.low %v8444_v26, %v8448_v11  ;;  %v8656_v1 = vcombine.high %v8452_v43, %v8456_v48  ;;  %v8068_v26 = vld [vmem:[%s13207_s0 + $0x858] sm:$0xff] }
 0x43c   :  { %v8072_v11 = vld [vmem:[%s13207_s0 + $0x878] sm:$0xff] }
 0x441   :  { %4773 = vmatmul.mubr.bf16.gmra.mrb[112].mxu1 %v8231_v62  ;;  %v8460_v62 = vld [vmem:[%s13207_s0 + $0xe58] sm:$0xff] }
 0x442   :  { %7106 = vmatmul.mubr.bf16.gmra.mrb[112].mxu0 %v8631_v13  ;;  %4780 = vmatprep.mubr.bf16.mxu1 %v8240_v17  ;;  %v8464_v13 = vld [vmem:[%s13207_s0 + $0xe78] sm:$0xff]  ;;  %v8255_v17 = vcombine.low %v8052_v56, %v8056_v2  ;;  %v8272_v56 = vcombine.high %v8068_v26, %v8072_v11 }
 0x443   :  { %7113 = vmatprep.mubr.bf16.mxu0 %v8640_v20  ;;  %v8655_v20 = vcombine.low %v8452_v43, %v8456_v48  ;;  %v8664_v52 = vcombine.high %v8460_v62, %v8464_v13  ;;  %v8076_v43 = vld [vmem:[%s13207_s0 + $0x898] sm:$0xff] }
 0x444   :  { %v8080_v48 = vld [vmem:[%s13207_s0 + $0x8b8] sm:$0xff] }
 0x449   :  { %4781 = vmatmul.mubr.bf16.gmra.mrb[116].mxu1 %v8239_v35  ;;  %v8468_v35 = vld [vmem:[%s13207_s0 + $0xe98] sm:$0xff] }
 0x44a   :  { %7114 = vmatmul.mubr.bf16.gmra.mrb[116].mxu0 %v8639_v30  ;;  %4788 = vmatprep.mubr.bf16.mxu1 %v8248_v49  ;;  %v8472_v30 = vld [vmem:[%s13207_s0 + $0xeb8] sm:$0xff]  ;;  %v8263_v49 = vcombine.low %v8060_v7, %v8064_v0  ;;  %v8280_v7 = vcombine.high %v8076_v43, %v8080_v48 }
 0x44b   :  { %7121 = vmatprep.mubr.bf16.mxu0 %v8648_v3  ;;  %v8663_v3 = vcombine.low %v8460_v62, %v8464_v13  ;;  %v8672_v2 = vcombine.high %v8468_v35, %v8472_v30  ;;  %v8084_v62 = vld [vmem:[%s13207_s0 + $0x8d8] sm:$0xff] }
 0x44c   :  { %v8088_v13 = vld [vmem:[%s13207_s0 + $0x8f8] sm:$0xff] }
 0x451   :  { %4789 = vmatmul.mubr.bf16.gmra.mrb[120].mxu1 %v8247_v32  ;;  %v8476_v32 = vld [vmem:[%s13207_s0 + $0xed8] sm:$0xff] }
 0x452   :  { %7122 = vmatmul.mubr.bf16.gmra.mrb[120].mxu0 %v8647_v37  ;;  %4796 = vmatprep.mubr.bf16.mxu1 %v8256_v28  ;;  %v8480_v37 = vld [vmem:[%s13207_s0 + $0xef8] sm:$0xff]  ;;  %v8271_v28 = vcombine.low %v8068_v26, %v8072_v11  ;;  %v8288_v26 = vcombine.high %v8084_v62, %v8088_v13 }
 0x453   :  { %7129 = vmatprep.mubr.bf16.mxu0 %v8656_v1  ;;  %v8671_v1 = vcombine.low %v8468_v35, %v8472_v30  ;;  %v8680_v0 = vcombine.high %v8476_v32, %v8480_v37  ;;  %v8092_v35 = vld [vmem:[%s13207_s0 + $0x918] sm:$0xff] }
 0x454   :  { %v8096_v30 = vld [vmem:[%s13207_s0 + $0x938] sm:$0xff] }
 0x459   :  { %4797 = vmatmul.mubr.bf16.gmra.mrb[124].mxu1 %v8255_v17  ;;  %v8484_v17 = vld [vmem:[%s13207_s0 + $0xf18] sm:$0xff] }
 0x45a   :  { %7130 = vmatmul.mubr.bf16.gmra.mrb[124].mxu0 %v8655_v20  ;;  %4804 = vmatprep.mubr.bf16.mxu1 %v8264_v55  ;;  %v8488_v20 = vld [vmem:[%s13207_s0 + $0xf38] sm:$0xff]  ;;  %v8279_v55 = vcombine.low %v8076_v43, %v8080_v48  ;;  %v8296_v43 = vcombine.high %v8092_v35, %v8096_v30 }
 0x45b   :  { %7137 = vmatprep.mubr.bf16.mxu0 %v8664_v52  ;;  %v8679_v52 = vcombine.low %v8476_v32, %v8480_v37  ;;  %v8688_v11 = vcombine.high %v8484_v17, %v8488_v20  ;;  %v8100_v32 = vld [vmem:[%s13207_s0 + $0x958] sm:$0xff] }
 0x45c   :  { %v8104_v37 = vld [vmem:[%s13207_s0 + $0x978] sm:$0xff] }
 0x461   :  { %4805 = vmatmul.mubr.bf16.gmra.mrb[128].mxu1 %v8263_v49  ;;  %v8492_v49 = vld [vmem:[%s13207_s0 + $0xf58] sm:$0xff] }
 0x462   :  { %7138 = vmatmul.mubr.bf16.gmra.mrb[128].mxu0 %v8663_v3  ;;  %4812 = vmatprep.mubr.bf16.mxu1 %v8272_v56  ;;  %v8496_v3 = vld [vmem:[%s13207_s0 + $0xf78] sm:$0xff]  ;;  %v8287_v56 = vcombine.low %v8084_v62, %v8088_v13  ;;  %v8304_v62 = vcombine.high %v8100_v32, %v8104_v37 }
 0x463   :  { %7145 = vmatprep.mubr.bf16.mxu0 %v8672_v2  ;;  %v8687_v2 = vcombine.low %v8484_v17, %v8488_v20  ;;  %v8696_v48 = vcombine.high %v8492_v49, %v8496_v3  ;;  %v8108_v17 = vld [vmem:[%s13207_s0 + $0x998] sm:$0xff] }
 0x464   :  { %v8112_v20 = vld [vmem:[%s13207_s0 + $0x9b8] sm:$0xff] }
 0x469   :  { %4813 = vmatmul.mubr.bf16.gmra.mrb[132].mxu1 %v8271_v28  ;;  %v8500_v28 = vld [vmem:[%s13207_s0 + $0xf98] sm:$0xff] }
 0x46a   :  { %7146 = vmatmul.mubr.bf16.gmra.mrb[132].mxu0 %v8671_v1  ;;  %4820 = vmatprep.mubr.bf16.mxu1 %v8280_v7  ;;  %v8504_v1 = vld [vmem:[%s13207_s0 + $0xfb8] sm:$0xff]  ;;  %v8295_v7 = vcombine.low %v8092_v35, %v8096_v30  ;;  %v8312_v35 = vcombine.high %v8108_v17, %v8112_v20 }
 0x46b   :  { %7153 = vmatprep.mubr.bf16.mxu0 %v8680_v0  ;;  %v8695_v0 = vcombine.low %v8492_v49, %v8496_v3  ;;  %v8704_v13 = vcombine.high %v8500_v28, %v8504_v1  ;;  %v8116_v49 = vld [vmem:[%s13207_s0 + $0x9d8] sm:$0xff] }
 0x46c   :  { %v8120_v3 = vld [vmem:[%s13207_s0 + $0x9f8] sm:$0xff] }
 0x471   :  { %4821 = vmatmul.mubr.bf16.gmra.mrb[136].mxu1 %v8279_v55  ;;  %v8508_v55 = vld [vmem:[%s13207_s0 + $0xfd8] sm:$0xff] }
 0x472   :  { %7154 = vmatmul.mubr.bf16.gmra.mrb[136].mxu0 %v8679_v52  ;;  %4828 = vmatprep.mubr.bf16.mxu1 %v8288_v26  ;;  %v8512_v52 = vld [vmem:[%s13207_s0 + $0xff8] sm:$0xff]  ;;  %v8303_v26 = vcombine.low %v8100_v32, %v8104_v37  ;;  %v8320_v32 = vcombine.high %v8116_v49, %v8120_v3 }
 0x473   :  { %7161 = vmatprep.mubr.bf16.mxu0 %v8688_v11  ;;  %v8703_v11 = vcombine.low %v8500_v28, %v8504_v1  ;;  %v8712_v30 = vcombine.high %v8508_v55, %v8512_v52  ;;  %v8124_v28 = vld [vmem:[%s13207_s0 + $0xa18] sm:$0xff] }
 0x474   :  { %v8128_v1 = vld [vmem:[%s13207_s0 + $0xa38] sm:$0xff] }
 0x479   :  { %4829 = vmatmul.mubr.bf16.gmra.mrb[140].mxu1 %v8287_v56  ;;  %v8516_v56 = vld [vmem:[%s13207_s0 + $0x1018] sm:$0xff] }
 0x47a   :  { %7162 = vmatmul.mubr.bf16.gmra.mrb[140].mxu0 %v8687_v2  ;;  %4836 = vmatprep.mubr.bf16.mxu1 %v8296_v43  ;;  %v8520_v2 = vld [vmem:[%s13207_s0 + $0x1038] sm:$0xff]  ;;  %v8311_v43 = vcombine.low %v8108_v17, %v8112_v20  ;;  %v8328_v17 = vcombine.high %v8124_v28, %v8128_v1 }
 0x47b   :  { %7169 = vmatprep.mubr.bf16.mxu0 %v8696_v48  ;;  %v8711_v48 = vcombine.low %v8508_v55, %v8512_v52  ;;  %v8720_v37 = vcombine.high %v8516_v56, %v8520_v2  ;;  %v8132_v55 = vld [vmem:[%s13207_s0 + $0xa58] sm:$0xff] }
 0x47c   :  { %v8136_v52 = vld [vmem:[%s13207_s0 + $0xa78] sm:$0xff] }
 0x481   :  { %4837 = vmatmul.mubr.bf16.gmra.mrb[144].mxu1 %v8295_v7  ;;  %v8524_v7 = vld [vmem:[%s13207_s0 + $0x1058] sm:$0xff] }
 0x482   :  { %7170 = vmatmul.mubr.bf16.gmra.mrb[144].mxu0 %v8695_v0  ;;  %4844 = vmatprep.mubr.bf16.mxu1 %v8304_v62  ;;  %v8528_v0 = vld [vmem:[%s13207_s0 + $0x1078] sm:$0xff]  ;;  %v8319_v62 = vcombine.low %v8116_v49, %v8120_v3  ;;  %v8336_v49 = vcombine.high %v8132_v55, %v8136_v52 }
 0x483   :  { %7177 = vmatprep.mubr.bf16.mxu0 %v8704_v13  ;;  %v8719_v13 = vcombine.low %v8516_v56, %v8520_v2  ;;  %v8728_v20 = vcombine.high %v8524_v7, %v8528_v0  ;;  %v8140_v56 = vld [vmem:[%s13207_s0 + $0xa98] sm:$0xff] }
 0x484   :  { %v8144_v2 = vld [vmem:[%s13207_s0 + $0xab8] sm:$0xff] }
 0x489   :  { %4845 = vmatmul.mubr.bf16.gmra.mrb[148].mxu1 %v8303_v26  ;;  %v8532_v26 = vld [vmem:[%s13207_s0 + $0x1098] sm:$0xff] }
 0x48a   :  { %7178 = vmatmul.mubr.bf16.gmra.mrb[148].mxu0 %v8703_v11  ;;  %4852 = vmatprep.mubr.bf16.mxu1 %v8312_v35  ;;  %v8536_v11 = vld [vmem:[%s13207_s0 + $0x10b8] sm:$0xff]  ;;  %v8327_v35 = vcombine.low %v8124_v28, %v8128_v1  ;;  %v8344_v28 = vcombine.high %v8140_v56, %v8144_v2 }
 0x48b   :  { %7185 = vmatprep.mubr.bf16.mxu0 %v8712_v30  ;;  %v8727_v30 = vcombine.low %v8524_v7, %v8528_v0  ;;  %v8736_v3 = vcombine.high %v8532_v26, %v8536_v11  ;;  %v8148_v7 = vld [vmem:[%s13207_s0 + $0xad8] sm:$0xff] }
 0x48c   :  { %v8152_v0 = vld [vmem:[%s13207_s0 + $0xaf8] sm:$0xff] }
 0x491   :  { %4853 = vmatmul.mubr.bf16.gmra.mrb[152].mxu1 %v8311_v43  ;;  %v8540_v43 = vld [vmem:[%s13207_s0 + $0x10d8] sm:$0xff] }
 0x492   :  { %7186 = vmatmul.mubr.bf16.gmra.mrb[152].mxu0 %v8711_v48  ;;  %4860 = vmatprep.mubr.bf16.mxu1 %v8320_v32  ;;  %v8544_v48 = vld [vmem:[%s13207_s0 + $0x10f8] sm:$0xff]  ;;  %v8335_v32 = vcombine.low %v8132_v55, %v8136_v52  ;;  %v8352_v55 = vcombine.high %v8148_v7, %v8152_v0 }
 0x493   :  { %7193 = vmatprep.mubr.bf16.mxu0 %v8720_v37  ;;  %v8735_v37 = vcombine.low %v8532_v26, %v8536_v11  ;;  %v8744_v1 = vcombine.high %v8540_v43, %v8544_v48  ;;  %v8156_v26 = vld [vmem:[%s13207_s0 + $0xb18] sm:$0xff] }
 0x494   :  { %v8160_v11 = vld [vmem:[%s13207_s0 + $0xb38] sm:$0xff] }
 0x499   :  { %4861 = vmatmul.mubr.bf16.gmra.mrb[156].mxu1 %v8319_v62  ;;  %v8548_v62 = vld [vmem:[%s13207_s0 + $0x1118] sm:$0xff] }
 0x49a   :  { %7194 = vmatmul.mubr.bf16.gmra.mrb[156].mxu0 %v8719_v13  ;;  %4868 = vmatprep.mubr.bf16.mxu1 %v8328_v17  ;;  %v8552_v13 = vld [vmem:[%s13207_s0 + $0x1138] sm:$0xff]  ;;  %v8343_v17 = vcombine.low %v8140_v56, %v8144_v2  ;;  %v8360_v56 = vcombine.high %v8156_v26, %v8160_v11 }
 0x49b   :  { %7201 = vmatprep.mubr.bf16.mxu0 %v8728_v20  ;;  %v8743_v20 = vcombine.low %v8540_v43, %v8544_v48  ;;  %v8752_v52 = vcombine.high %v8548_v62, %v8552_v13  ;;  %v8164_v43 = vld [vmem:[%s13207_s0 + $0xb58] sm:$0xff] }
 0x49c   :  { %v8168_v48 = vld [vmem:[%s13207_s0 + $0xb78] sm:$0xff] }
 0x4a1   :  { %4869 = vmatmul.mubr.bf16.gmra.mrb[160].mxu1 %v8327_v35  ;;  %v8556_v35 = vld [vmem:[%s13207_s0 + $0x1158] sm:$0xff] }
 0x4a2   :  { %7202 = vmatmul.mubr.bf16.gmra.mrb[160].mxu0 %v8727_v30  ;;  %4876 = vmatprep.mubr.bf16.mxu1 %v8336_v49  ;;  %v8560_v30 = vld [vmem:[%s13207_s0 + $0x1178] sm:$0xff]  ;;  %v8351_v49 = vcombine.low %v8148_v7, %v8152_v0  ;;  %v8368_v7 = vcombine.high %v8164_v43, %v8168_v48 }
 0x4a3   :  { %7209 = vmatprep.mubr.bf16.mxu0 %v8736_v3  ;;  %v8751_v3 = vcombine.low %v8548_v62, %v8552_v13  ;;  %v8760_v2 = vcombine.high %v8556_v35, %v8560_v30  ;;  %v8172_v62 = vld [vmem:[%s13207_s0 + $0xb98] sm:$0xff] }
 0x4a4   :  { %v8176_v13 = vld [vmem:[%s13207_s0 + $0xbb8] sm:$0xff] }
 0x4a9   :  { %4877 = vmatmul.mubr.bf16.gmra.mrb[164].mxu1 %v8335_v32  ;;  %v8564_v32 = vld [vmem:[%s13207_s0 + $0x1198] sm:$0xff] }
 0x4aa   :  { %7210 = vmatmul.mubr.bf16.gmra.mrb[164].mxu0 %v8735_v37  ;;  %4884 = vmatprep.mubr.bf16.mxu1 %v8344_v28  ;;  %v8568_v37 = vld [vmem:[%s13207_s0 + $0x11b8] sm:$0xff]  ;;  %v8359_v28 = vcombine.low %v8156_v26, %v8160_v11  ;;  %v8376_v26 = vcombine.high %v8172_v62, %v8176_v13 }
 0x4ab   :  { %7217 = vmatprep.mubr.bf16.mxu0 %v8744_v1  ;;  %v8759_v1 = vcombine.low %v8556_v35, %v8560_v30  ;;  %v8768_v0 = vcombine.high %v8564_v32, %v8568_v37  ;;  %v8180_v35 = vld [vmem:[%s13207_s0 + $0xbd8] sm:$0xff] }
 0x4ac   :  { %v8184_v30 = vld [vmem:[%s13207_s0 + $0xbf8] sm:$0xff] }
 0x4b1   :  { %4885 = vmatmul.mubr.bf16.gmra.mrb[168].mxu1 %v8343_v17  ;;  %v8572_v17 = vld [vmem:[%s13207_s0 + $0x11d8] sm:$0xff] }
 0x4b2   :  { %7218 = vmatmul.mubr.bf16.gmra.mrb[168].mxu0 %v8743_v20  ;;  %4892 = vmatprep.mubr.bf16.mxu1 %v8352_v55  ;;  %v8576_v20 = vld [vmem:[%s13207_s0 + $0x11f8] sm:$0xff]  ;;  %v8367_v55 = vcombine.low %v8164_v43, %v8168_v48  ;;  %v8384_v43 = vcombine.high %v8180_v35, %v8184_v30 }
 0x4b3   :  { %7225 = vmatprep.mubr.bf16.mxu0 %v8752_v52  ;;  %v8767_v52 = vcombine.low %v8564_v32, %v8568_v37  ;;  %v8776_v11 = vcombine.high %v8572_v17, %v8576_v20  ;;  %v8188_v32 = vld [vmem:[%s13207_s0 + $0xc18] sm:$0xff] }
 0x4b4   :  { %v8192_v37 = vld [vmem:[%s13207_s0 + $0xc38] sm:$0xff] }
 0x4b9   :  { %4893 = vmatmul.mubr.bf16.gmra.mrb[172].mxu1 %v8351_v49  ;;  %v8580_v49 = vld [vmem:[%s13207_s0 + $0x1218] sm:$0xff] }
 0x4ba   :  { %7226 = vmatmul.mubr.bf16.gmra.mrb[172].mxu0 %v8751_v3  ;;  %4900 = vmatprep.mubr.bf16.mxu1 %v8360_v56  ;;  %v8584_v3 = vld [vmem:[%s13207_s0 + $0x1238] sm:$0xff]  ;;  %v8375_v56 = vcombine.low %v8172_v62, %v8176_v13  ;;  %v8392_v62 = vcombine.high %v8188_v32, %v8192_v37 }
 0x4bb   :  { %7233 = vmatprep.mubr.bf16.mxu0 %v8760_v2  ;;  %v8775_v2 = vcombine.low %v8572_v17, %v8576_v20  ;;  %v8784_v48 = vcombine.high %v8580_v49, %v8584_v3  ;;  %v8196_v17 = vld [vmem:[%s13207_s0 + $0xc58] sm:$0xff] }
 0x4bc   :  { %v8200_v20 = vld [vmem:[%s13207_s0 + $0xc78] sm:$0xff] }
 0x4c1   :  { %4901 = vmatmul.mubr.bf16.gmra.mrb[176].mxu1 %v8359_v28  ;;  %v8588_v28 = vld [vmem:[%s13207_s0 + $0x1258] sm:$0xff] }
 0x4c2   :  { %7234 = vmatmul.mubr.bf16.gmra.mrb[176].mxu0 %v8759_v1  ;;  %4908 = vmatprep.mubr.bf16.mxu1 %v8368_v7  ;;  %v8592_v1 = vld [vmem:[%s13207_s0 + $0x1278] sm:$0xff]  ;;  %v8383_v7 = vcombine.low %v8180_v35, %v8184_v30  ;;  %v8400_v35 = vcombine.high %v8196_v17, %v8200_v20 }
 0x4c3   :  { %7241 = vmatprep.mubr.bf16.mxu0 %v8768_v0  ;;  %v8783_v0 = vcombine.low %v8580_v49, %v8584_v3  ;;  %v8792_v13 = vcombine.high %v8588_v28, %v8592_v1  ;;  %v8399_v49 = vcombine.low %v8196_v17, %v8200_v20 }
 0x4c9   :  { %4909 = vmatmul.mubr.bf16.gmra.mrb[180].mxu1 %v8367_v55  ;;  %v8596_v55 = vld [vmem:[%s13207_s0 + $0x1298] sm:$0xff] }
 0x4ca   :  { %7242 = vmatmul.mubr.bf16.gmra.mrb[180].mxu0 %v8767_v52  ;;  %4916 = vmatprep.mubr.bf16.mxu1 %v8376_v26  ;;  %v8600_v52 = vld [vmem:[%s13207_s0 + $0x12b8] sm:$0xff]  ;;  %v8391_v26 = vcombine.low %v8188_v32, %v8192_v37 }
 0x4cb   :  { %7249 = vmatprep.mubr.bf16.mxu0 %v8776_v11  ;;  %v8791_v11 = vcombine.low %v8588_v28, %v8592_v1  ;;  %v8800_v30 = vcombine.high %v8596_v55, %v8600_v52  ;;  %v8799_v3 = vcombine.low %v8596_v55, %v8600_v52  ;;  %v2717_v28 = vmul.f32 0.01, %v11232_v23 }
 0x4d1   :  { %4917 = vmatmul.mubr.bf16.gmra.mrb[184].mxu1 %v8375_v56 }
 0x4d2   :  { %7250 = vmatmul.mubr.bf16.gmra.mrb[184].mxu0 %v8775_v2  ;;  %4924 = vmatprep.mubr.bf16.mxu1 %v8384_v43  ;;  %v2716_v2 = vmul.f32 0.01, %v11225_v16  ;;  %v12779_v43 = vld [vmem:[%s13208_s2] ss:$0 sm:$0xff] }
 0x4d3   :  { %7257 = vmatprep.mubr.bf16.mxu0 %v8784_v48 }
 0x4d9   :  { %4925 = vmatmul.mubr.bf16.gmra.mrb[188].mxu1 %v8383_v7 }
 0x4da   :  { %7258 = vmatmul.mubr.bf16.gmra.mrb[188].mxu0 %v8783_v0  ;;  %4932 = vmatprep.mubr.bf16.mxu1 %v8392_v62 }
 0x4db   :  { %7265 = vmatprep.mubr.bf16.mxu0 %v8792_v13 }
 0x4e1   :  { %4933 = vmatmul.mubr.bf16.gmra.mrb[192].mxu1 %v8391_v26 }
 0x4e2   :  { %7266 = vmatmul.mubr.bf16.gmra.mrb[192].mxu0 %v8791_v11  ;;  %4940 = vmatprep.mubr.bf16.mxu1 %v8400_v35  ;;  %v2766_v11 = vsel %vm2666_vm0, %v11225_v16, %v2716_v2  ;;  %v2719_v2 = vmul.f32 0.01, %v11264_v45 }
 0x4e3   :  { %7273 = vmatprep.mubr.bf16.mxu0 %v8800_v30 }
 0x4e9   :  { %4941 = vmatmul.mubr.bf16.gmra.mrb[196].mxu1 %v8399_v49 }
 0x4ea   :  { %7274 = vmatmul.mubr.bf16.gmra.mrb[196].mxu0 %v8799_v3 }
 0x4fc   :  { %v4750_v56 = vpop.f32.mrb[100].mxu1 }
 0x4fd   :  { %v9150_v48 = vadd.f32 %v12779_v43, %v4750_v56  ;;  %v7083_v32 = vpop.f32.mrb[100].mxu0  ;;  %v4752_v37 = vpop.f32.mrb[101].mxu1  ;;  %v2767_v56 = vsel %vm2667_vm2, %v11232_v23, %v2717_v28  ;;  %vm2672_vm2 = vcmp.ge.f32.partialorder %v11321_v21, 0.0 }
 0x4fe   :  { %v9200_v1 = vadd.f32 %v12779_v43, %v7083_v32  ;;  %v7085_v7 = vpop.f32.mrb[101].mxu0  ;;  %v4753_v0 = vpop.f32.mrb[102].mxu1 }
 0x4ff   :  { %vm4949_vm1 = vcmp.ge.f32.partialorder %v9150_v48, 0.0  ;;  %v4999_v62 = vmul.f32 0.01, %v9150_v48  ;;  %v9151_v13 = vadd.f32 %v12779_v43, %v4753_v0  ;;  %v7086_v17 = vpop.f32.mrb[102].mxu0  ;;  %v4755_v20 = vpop.f32.mrb[103].mxu1 }
 0x500   :  { %vm7282_vm3 = vcmp.ge.f32.partialorder %v9200_v1, 0.0  ;;  %v7332_v55 = vmul.f32 0.01, %v9200_v1  ;;  %v9201_v52 = vadd.f32 %v12779_v43, %v7086_v17  ;;  %v7088_v26 = vpop.f32.mrb[103].mxu0 }
 0x501   :  { %v5049_v35 = vsel %vm4949_vm1, %v9150_v48, %v4999_v62  ;;  %vm4950_vm4 = vcmp.ge.f32.partialorder %v9151_v13, 0.0  ;;  %v5000_v30 = vmul.f32 0.01, %v9151_v13 }
 0x502   :  { %v5099_v49 = vmax.f32 %v2766_v11, %v5049_v35  ;;  %vm7283_vm5 = vcmp.ge.f32.partialorder %v9201_v52, 0.0  ;;  %v7333_v3 = vmul.f32 0.01, %v9201_v52  ;;  %v7382_v32 = vsel %vm7282_vm3, %v9200_v1, %v7332_v55 }
 0x503   :  { %v5050_v37 = vsel %vm4950_vm4, %v9151_v13, %v5000_v30  ;;  %vm2673_vm3 = vcmp.ge.f32.partialorder %v11328_v29, 0.0 }
 0x504   :  { %v7432_v7 = vmax.f32 %v5099_v49, %v7382_v32  ;;  %v5100_v0 = vmax.f32 %v2767_v56, %v5050_v37  ;;  %v4758_v20 = vpop.f32.mrb[104].mxu1  ;;  %v7383_v41 = vsel %vm7283_vm5, %v9201_v52, %v7333_v3 }
 0x505   :  { %v9152_v17 = vadd.f32 %v12779_v43, %v4758_v20  ;;  %v7091_v26 = vpop.f32.mrb[104].mxu0  ;;  %v4760_v16 = vpop.f32.mrb[105].mxu1 }
 0x506   :  { %v7433_v48 = vmax.f32 %v5100_v0, %v7383_v41  ;;  %v9202_v62 = vadd.f32 %v12779_v43, %v7091_v26  ;;  %v7093_v23 = vpop.f32.mrb[105].mxu0  ;;  %v4761_v28 = vpop.f32.mrb[106].mxu1  ;;  %v2768_v41 = vsel %vm2668_vm6, %v11257_v38, %v2718_v27  ;;  %v2720_v38 = vmul.f32 0.01, %v11289_v60 }
 0x507   :  { %vm4951_vm8 = vcmp.ge.f32.partialorder %v9152_v17, 0.0  ;;  %v5001_v1 = vmul.f32 0.01, %v9152_v17  ;;  %v9153_v13 = vadd.f32 %v12779_v43, %v4761_v28  ;;  %v7094_v55 = vpop.f32.mrb[106].mxu0  ;;  %v4763_v52 = vpop.f32.mrb[107].mxu1 }
 0x508   :  { %v8904_v11 = vpack.c.bf16 %v7433_v48, %v7432_v7  ;;  %vm7284_vm9 = vcmp.ge.f32.partialorder %v9202_v62, 0.0  ;;  %v7334_v35 = vmul.f32 0.01, %v9202_v62  ;;  %v9203_v30 = vadd.f32 %v12779_v43, %v7094_v55  ;;  %v7096_v49 = vpop.f32.mrb[107].mxu0 }
 0x509   :  { %v5051_v3 = vsel %vm4951_vm8, %v9152_v17, %v5001_v1  ;;  %vm4952_vm10 = vcmp.ge.f32.partialorder %v9153_v13, 0.0  ;;  %v5002_v56 = vmul.f32 0.01, %v9153_v13  ;;  %v2769_v7 = vsel %vm2669_vm7, %v11264_v45, %v2719_v2 }
 0x50a   :  { %8905 = vst [vmem:[%s13209_s3] sm:$0xff] %v8904_v11   ;;  %v5101_v32 = vmax.f32 %v2768_v41, %v5051_v3  ;;  %vm7285_vm11 = vcmp.ge.f32.partialorder %v9203_v30, 0.0  ;;  %v7335_v37 = vmul.f32 0.01, %v9203_v30  ;;  %v7384_v0 = vsel %vm7284_vm9, %v9202_v62, %v7334_v35 }
 0x50b   :  { %v5052_v20 = vsel %vm4952_vm10, %v9153_v13, %v5002_v56  ;;  %v2721_v1 = vmul.f32 0.01, %v11296_v5  ;;  %v2770_v56 = vsel %vm2670_vm12, %v11289_v60, %v2720_v38  ;;  %v2722_v60 = vmul.f32 0.01, %v11321_v21 }
 0x50c   :  { %v7434_v26 = vmax.f32 %v5101_v32, %v7384_v0  ;;  %v5102_v16 = vmax.f32 %v2769_v7, %v5052_v20  ;;  %v4766_v48 = vpop.f32.mrb[108].mxu1  ;;  %v7385_v27 = vsel %vm7285_vm11, %v9203_v30, %v7335_v37  ;;  %vm2674_vm8 = vcmp.ge.f32.partialorder %v11353_v46, 0.0 }
 0x50d   :  { %v9154_v17 = vadd.f32 %v12779_v43, %v4766_v48  ;;  %v7099_v23 = vpop.f32.mrb[108].mxu0  ;;  %v4768_v28 = vpop.f32.mrb[109].mxu1  ;;  %v2771_v20 = vsel %vm2671_vm13, %v11296_v5, %v2721_v1  ;;  %vm2675_vm9 = vcmp.ge.f32.partialorder %v11360_v53, 0.0 }
 0x50e   :  { %v7435_v55 = vmax.f32 %v5102_v16, %v7385_v27  ;;  %v9204_v52 = vadd.f32 %v12779_v43, %v7099_v23  ;;  %v7101_v45 = vpop.f32.mrb[109].mxu0  ;;  %v4769_v2 = vpop.f32.mrb[110].mxu1 }
 0x50f   :  { %vm4953_vm14 = vcmp.ge.f32.partialorder %v9154_v17, 0.0  ;;  %v5003_v62 = vmul.f32 0.01, %v9154_v17  ;;  %v9155_v13 = vadd.f32 %v12779_v43, %v4769_v2  ;;  %v7102_v11 = vpop.f32.mrb[110].mxu0  ;;  %v4771_v35 = vpop.f32.mrb[111].mxu1 }
 0x510   :  { %v8909_v30 = vpack.c.bf16 %v7435_v55, %v7434_v26  ;;  %vm7286_vm15 = vcmp.ge.f32.partialorder %v9204_v52, 0.0  ;;  %v7336_v49 = vmul.f32 0.01, %v9204_v52  ;;  %v9205_v41 = vadd.f32 %v12779_v43, %v7102_v11  ;;  %v7104_v3 = vpop.f32.mrb[111].mxu0 }
 0x511   :  { %v5053_v32 = vsel %vm4953_vm14, %v9154_v17, %v5003_v62  ;;  %vm4954_vm0 = vcmp.ge.f32.partialorder %v9155_v13, 0.0  ;;  %v5004_v37 = vmul.f32 0.01, %v9155_v13  ;;  %v2723_v45 = vmul.f32 0.01, %v11328_v29 }
 0x512   :  { %9026 = vst [vmem:[%s13209_s3 + $0x8] sm:$0xff] %v8909_v30   ;;  %v5103_v7 = vmax.f32 %v2770_v56, %v5053_v32  ;;  %vm7287_vm1 = vcmp.ge.f32.partialorder %v9205_v41, 0.0  ;;  %v7337_v0 = vmul.f32 0.01, %v9205_v41  ;;  %v7386_v26 = vsel %vm7286_vm15, %v9204_v52, %v7336_v49 }
 0x513   :  { %v5054_v16 = vsel %vm4954_vm0, %v9155_v13, %v5004_v37  ;;  %v2772_v56 = vsel %vm2672_vm2, %v11321_v21, %v2722_v60  ;;  %v2724_v21 = vmul.f32 0.01, %v11353_v46  ;;  %vm2676_vm14 = vcmp.ge.f32.partialorder %v11385_v8, 0.0 }
 0x514   :  { %v7436_v48 = vmax.f32 %v5103_v7, %v7386_v26  ;;  %v5104_v27 = vmax.f32 %v2771_v20, %v5054_v16  ;;  %v4774_v23 = vpop.f32.mrb[112].mxu1  ;;  %v7387_v38 = vsel %vm7287_vm1, %v9205_v41, %v7337_v0  ;;  %v2773_v20 = vsel %vm2673_vm3, %v11328_v29, %v2723_v45 }
 0x515   :  { %v9156_v17 = vadd.f32 %v12779_v43, %v4774_v23  ;;  %v7107_v28 = vpop.f32.mrb[112].mxu0  ;;  %v4776_v55 = vpop.f32.mrb[113].mxu1  ;;  %vm2677_vm15 = vcmp.ge.f32.partialorder %v11392_v15, 0.0 }
 0x516   :  { %v7437_v2 = vmax.f32 %v5104_v27, %v7387_v38  ;;  %v9206_v62 = vadd.f32 %v12779_v43, %v7107_v28  ;;  %v7109_v5 = vpop.f32.mrb[113].mxu0  ;;  %v4777_v1 = vpop.f32.mrb[114].mxu1  ;;  %v2725_v55 = vmul.f32 0.01, %v11360_v53 }
 0x517   :  { %vm4955_vm4 = vcmp.ge.f32.partialorder %v9156_v17, 0.0  ;;  %v5005_v52 = vmul.f32 0.01, %v9156_v17  ;;  %v9157_v13 = vadd.f32 %v12779_v43, %v4777_v1  ;;  %v7110_v11 = vpop.f32.mrb[114].mxu0  ;;  %v4779_v35 = vpop.f32.mrb[115].mxu1 }
 0x518   :  { %v8914_v30 = vpack.c.bf16 %v7437_v2, %v7436_v48  ;;  %vm7288_vm5 = vcmp.ge.f32.partialorder %v9206_v62, 0.0  ;;  %v7338_v49 = vmul.f32 0.01, %v9206_v62  ;;  %v9207_v41 = vadd.f32 %v12779_v43, %v7110_v11  ;;  %v7112_v3 = vpop.f32.mrb[115].mxu0 }
 0x519   :  { %v5055_v32 = vsel %vm4955_vm4, %v9156_v17, %v5005_v52  ;;  %vm4956_vm6 = vcmp.ge.f32.partialorder %v9157_v13, 0.0  ;;  %v5006_v37 = vmul.f32 0.01, %v9157_v13  ;;  %vm2678_vm4 = vcmp.ge.f32.partialorder %v11414_v34, 0.0 }
 0x51a   :  { %9027 = vst [vmem:[%s13209_s3 + $0x10] sm:$0xff] %v8914_v30   ;;  %v5105_v7 = vmax.f32 %v2772_v56, %v5055_v32  ;;  %vm7289_vm7 = vcmp.ge.f32.partialorder %v9207_v41, 0.0  ;;  %v7339_v0 = vmul.f32 0.01, %v9207_v41  ;;  %v7388_v26 = vsel %vm7288_vm5, %v9206_v62, %v7338_v49 }
 0x51b   :  { %v5056_v16 = vsel %vm4956_vm6, %v9157_v13, %v5006_v37  ;;  %vm2679_vm5 = vcmp.ge.f32.partialorder %v11421_v42, 0.0 }
 0x51c   :  { %v7438_v48 = vmax.f32 %v5105_v7, %v7388_v26  ;;  %v5106_v27 = vmax.f32 %v2773_v20, %v5056_v16  ;;  %v4782_v23 = vpop.f32.mrb[116].mxu1  ;;  %v7389_v60 = vsel %vm7289_vm7, %v9207_v41, %v7339_v0  ;;  %v2774_v41 = vsel %vm2674_vm8, %v11353_v46, %v2724_v21 }
 0x51d   :  { %v9158_v38 = vadd.f32 %v12779_v43, %v4782_v23  ;;  %v7115_v17 = vpop.f32.mrb[116].mxu0  ;;  %v4784_v28 = vpop.f32.mrb[117].mxu1  ;;  %v2775_v7 = vsel %vm2675_vm9, %v11360_v53, %v2725_v55  ;;  %v2726_v46 = vmul.f32 0.01, %v11385_v8 }
 0x51e   :  { %v7439_v2 = vmax.f32 %v5106_v27, %v7389_v60  ;;  %v9208_v5 = vadd.f32 %v12779_v43, %v7115_v17  ;;  %v7117_v29 = vpop.f32.mrb[117].mxu0  ;;  %v4785_v45 = vpop.f32.mrb[118].mxu1 }
 0x51f   :  { %vm4957_vm10 = vcmp.ge.f32.partialorder %v9158_v38, 0.0  ;;  %v5007_v62 = vmul.f32 0.01, %v9158_v38  ;;  %v9159_v1 = vadd.f32 %v12779_v43, %v4785_v45  ;;  %v7118_v52 = vpop.f32.mrb[118].mxu0  ;;  %v4787_v13 = vpop.f32.mrb[119].mxu1 }
 0x520   :  { %v8919_v11 = vpack.c.bf16 %v7439_v2, %v7438_v48  ;;  %vm7290_vm11 = vcmp.ge.f32.partialorder %v9208_v5, 0.0  ;;  %v7340_v35 = vmul.f32 0.01, %v9208_v5  ;;  %v9209_v30 = vadd.f32 %v12779_v43, %v7118_v52  ;;  %v7120_v49 = vpop.f32.mrb[119].mxu0 }
 0x521   :  { %v5057_v3 = vsel %vm4957_vm10, %v9158_v38, %v5007_v62  ;;  %vm4958_vm12 = vcmp.ge.f32.partialorder %v9159_v1, 0.0  ;;  %v5008_v56 = vmul.f32 0.01, %v9159_v1  ;;  %v2727_v38 = vmul.f32 0.01, %v11392_v15 }
 0x522   :  { %9028 = vst [vmem:[%s13209_s3 + $0x18] sm:$0xff] %v8919_v11   ;;  %v5107_v32 = vmax.f32 %v2774_v41, %v5057_v3  ;;  %vm7291_vm13 = vcmp.ge.f32.partialorder %v9209_v30, 0.0  ;;  %v7341_v37 = vmul.f32 0.01, %v9209_v30  ;;  %v7390_v0 = vsel %vm7290_vm11, %v9208_v5, %v7340_v35 }
 0x523   :  { %v5058_v20 = vsel %vm4958_vm12, %v9159_v1, %v5008_v56  ;;  %v2776_v11 = vsel %vm2676_vm14, %v11385_v8, %v2726_v46  ;;  %v2777_v3 = vsel %vm2677_vm15, %v11392_v15, %v2727_v38  ;;  %v2728_v8 = vmul.f32 0.01, %v11414_v34 }
 0x524   :  { %v7440_v26 = vmax.f32 %v5107_v32, %v7390_v0  ;;  %v5108_v16 = vmax.f32 %v2775_v7, %v5058_v20  ;;  %v4790_v48 = vpop.f32.mrb[120].mxu1  ;;  %v7391_v27 = vsel %vm7291_vm13, %v9209_v30, %v7341_v37  ;;  %v2729_v46 = vmul.f32 0.01, %v11421_v42 }
 0x525   :  { %v9160_v23 = vadd.f32 %v12779_v43, %v4790_v48  ;;  %v7123_v21 = vpop.f32.mrb[120].mxu0  ;;  %v4792_v60 = vpop.f32.mrb[121].mxu1  ;;  %vm2680_vm10 = vcmp.ge.f32.partialorder %v11437_v59, 0.0  ;;  %vm2681_vm11 = vcmp.ge.f32.partialorder %v11440_v4, 0.0 }
 0x526   :  { %v7441_v17 = vmax.f32 %v5108_v16, %v7391_v27  ;;  %v9210_v28 = vadd.f32 %v12779_v43, %v7123_v21  ;;  %v7125_v53 = vpop.f32.mrb[121].mxu0  ;;  %v4793_v55 = vpop.f32.mrb[122].mxu1 }
 0x527   :  { %vm4959_vm0 = vcmp.ge.f32.partialorder %v9160_v23, 0.0  ;;  %v5009_v2 = vmul.f32 0.01, %v9160_v23  ;;  %v9161_v5 = vadd.f32 %v12779_v43, %v4793_v55  ;;  %v7126_v29 = vpop.f32.mrb[122].mxu0  ;;  %v4795_v45 = vpop.f32.mrb[123].mxu1 }
 0x528   :  { %v8924_v62 = vpack.c.bf16 %v7441_v17, %v7440_v26  ;;  %vm7292_vm1 = vcmp.ge.f32.partialorder %v9210_v28, 0.0  ;;  %v7342_v1 = vmul.f32 0.01, %v9210_v28  ;;  %v9211_v52 = vadd.f32 %v12779_v43, %v7126_v29  ;;  %v7128_v13 = vpop.f32.mrb[123].mxu0 }
 0x529   :  { %v5059_v35 = vsel %vm4959_vm0, %v9160_v23, %v5009_v2  ;;  %vm4960_vm2 = vcmp.ge.f32.partialorder %v9161_v5, 0.0  ;;  %v5010_v30 = vmul.f32 0.01, %v9161_v5  ;;  %v2778_v29 = vsel %vm2678_vm4, %v11414_v34, %v2728_v8 }
 0x52a   :  { %9029 = vst [vmem:[%s13209_s3 + $0x20] sm:$0xff] %v8924_v62   ;;  %v5109_v49 = vmax.f32 %v2776_v11, %v5059_v35  ;;  %vm7293_vm3 = vcmp.ge.f32.partialorder %v9211_v52, 0.0  ;;  %v7343_v41 = vmul.f32 0.01, %v9211_v52  ;;  %v7392_v56 = vsel %vm7292_vm1, %v9210_v28, %v7342_v1 }
 0x52b   :  { %v5060_v32 = vsel %vm4960_vm2, %v9161_v5, %v5010_v30  ;;  %v2779_v13 = vsel %vm2679_vm5, %v11421_v42, %v2729_v46  ;;  %v2730_v34 = vmul.f32 0.01, %v11437_v59  ;;  %vm2682_vm0 = vcmp.ge.f32.partialorder %v11455_v24, 0.0 }
 0x52c   :  { %v7442_v37 = vmax.f32 %v5109_v49, %v7392_v56  ;;  %v5110_v7 = vmax.f32 %v2777_v3, %v5060_v32  ;;  %v4798_v0 = vpop.f32.mrb[124].mxu1  ;;  %v7393_v20 = vsel %vm7293_vm3, %v9211_v52, %v7343_v41  ;;  %vm2683_vm1 = vcmp.ge.f32.partialorder %v11458_v31, 0.0 }
 0x52d   :  { %v9162_v26 = vadd.f32 %v12779_v43, %v4798_v0  ;;  %v7131_v16 = vpop.f32.mrb[124].mxu0  ;;  %v4800_v48 = vpop.f32.mrb[125].mxu1 }
 0x52e   :  { %v7443_v27 = vmax.f32 %v5110_v7, %v7393_v20  ;;  %v9212_v23 = vadd.f32 %v12779_v43, %v7131_v16  ;;  %v7133_v15 = vpop.f32.mrb[125].mxu0  ;;  %v4801_v21 = vpop.f32.mrb[126].mxu1  ;;  %v2731_v7 = vmul.f32 0.01, %v11440_v4 }
 0x52f   :  { %vm4961_vm6 = vcmp.ge.f32.partialorder %v9162_v26, 0.0  ;;  %v5011_v60 = vmul.f32 0.01, %v9162_v26  ;;  %v9163_v38 = vadd.f32 %v12779_v43, %v4801_v21  ;;  %v7134_v17 = vpop.f32.mrb[126].mxu0  ;;  %v4803_v28 = vpop.f32.mrb[127].mxu1 }
 0x530   :  { %v8929_v53 = vpack.c.bf16 %v7443_v27, %v7442_v37  ;;  %vm7294_vm7 = vcmp.ge.f32.partialorder %v9212_v23, 0.0  ;;  %v7344_v55 = vmul.f32 0.01, %v9212_v23  ;;  %v9213_v2 = vadd.f32 %v12779_v43, %v7134_v17  ;;  %v7136_v5 = vpop.f32.mrb[127].mxu0 }
 0x531   :  { %v5061_v45 = vsel %vm4961_vm6, %v9162_v26, %v5011_v60  ;;  %vm4962_vm8 = vcmp.ge.f32.partialorder %v9163_v38, 0.0  ;;  %v5012_v62 = vmul.f32 0.01, %v9163_v38  ;;  %v2780_v60 = vsel %vm2680_vm10, %v11437_v59, %v2730_v34 }
 0x532   :  { %9030 = vst [vmem:[%s13209_s3 + $0x28] sm:$0xff] %v8929_v53   ;;  %v5111_v1 = vmax.f32 %v2778_v29, %v5061_v45  ;;  %vm7295_vm9 = vcmp.ge.f32.partialorder %v9213_v2, 0.0  ;;  %v7345_v52 = vmul.f32 0.01, %v9213_v2  ;;  %v7394_v11 = vsel %vm7294_vm7, %v9212_v23, %v7344_v55 }
 0x533   :  { %v5062_v35 = vsel %vm4962_vm8, %v9163_v38, %v5012_v62  ;;  %v2781_v55 = vsel %vm2681_vm11, %v11440_v4, %v2731_v7  ;;  %v2732_v59 = vmul.f32 0.01, %v11455_v24  ;;  %vm2684_vm6 = vcmp.ge.f32.partialorder %v11473_v50, 0.0 }
 0x534   :  { %v7444_v30 = vmax.f32 %v5111_v1, %v7394_v11  ;;  %v5112_v49 = vmax.f32 %v2779_v13, %v5062_v35  ;;  %v4806_v41 = vpop.f32.mrb[128].mxu1  ;;  %v7395_v3 = vsel %vm7295_vm9, %v9213_v2, %v7345_v52  ;;  %v2733_v35 = vmul.f32 0.01, %v11458_v31 }
 0x535   :  { %v9164_v56 = vadd.f32 %v12779_v43, %v4806_v41  ;;  %v7139_v32 = vpop.f32.mrb[128].mxu0  ;;  %v4808_v37 = vpop.f32.mrb[129].mxu1  ;;  %vm2685_vm7 = vcmp.ge.f32.partialorder %v11476_v57, 0.0 }
 0x536   :  { %v7445_v0 = vmax.f32 %v5112_v49, %v7395_v3  ;;  %v9214_v8 = vadd.f32 %v12779_v43, %v7139_v32  ;;  %v7141_v42 = vpop.f32.mrb[129].mxu0  ;;  %v4809_v20 = vpop.f32.mrb[130].mxu1 }
 0x537   :  { %vm4963_vm12 = vcmp.ge.f32.partialorder %v9164_v56, 0.0  ;;  %v5013_v26 = vmul.f32 0.01, %v9164_v56  ;;  %v9165_v16 = vadd.f32 %v12779_v43, %v4809_v20  ;;  %v7142_v48 = vpop.f32.mrb[130].mxu0  ;;  %v4811_v46 = vpop.f32.mrb[131].mxu1  ;;  %v2782_v42 = vsel %vm2682_vm0, %v11455_v24, %v2732_v59 }
 0x538   :  { %v8934_v27 = vpack.c.bf16 %v7445_v0, %v7444_v30  ;;  %vm7296_vm13 = vcmp.ge.f32.partialorder %v9214_v8, 0.0  ;;  %v7346_v23 = vmul.f32 0.01, %v9214_v8  ;;  %v9215_v15 = vadd.f32 %v12779_v43, %v7142_v48  ;;  %v7144_v21 = vpop.f32.mrb[131].mxu0 }
 0x539   :  { %v5063_v38 = vsel %vm4963_vm12, %v9164_v56, %v5013_v26  ;;  %vm4964_vm14 = vcmp.ge.f32.partialorder %v9165_v16, 0.0  ;;  %v5014_v17 = vmul.f32 0.01, %v9165_v16  ;;  %v2783_v46 = vsel %vm2683_vm1, %v11458_v31, %v2733_v35 }
 0x53a   :  { %9031 = vst [vmem:[%s13209_s3 + $0x30] sm:$0xff] %v8934_v27   ;;  %v5113_v28 = vmax.f32 %v2780_v60, %v5063_v38  ;;  %vm7297_vm15 = vcmp.ge.f32.partialorder %v9215_v15, 0.0  ;;  %v7347_v53 = vmul.f32 0.01, %v9215_v15  ;;  %v7396_v2 = vsel %vm7296_vm13, %v9214_v8, %v7346_v23 }
 0x53b   :  { %v5064_v5 = vsel %vm4964_vm14, %v9165_v16, %v5014_v17  ;;  %v2734_v24 = vmul.f32 0.01, %v11473_v50  ;;  %vm2686_vm12 = vcmp.ge.f32.partialorder %v11491_v14, 0.0  ;;  %vm2687_vm13 = vcmp.ge.f32.partialorder %v11494_v25, 0.0 }
 0x53c   :  { %v7446_v29 = vmax.f32 %v5113_v28, %v7396_v2  ;;  %v5114_v45 = vmax.f32 %v2781_v55, %v5064_v5  ;;  %v4814_v62 = vpop.f32.mrb[132].mxu1  ;;  %v7397_v1 = vsel %vm7297_vm15, %v9215_v15, %v7347_v53  ;;  %v2735_v55 = vmul.f32 0.01, %v11476_v57 }
 0x53d   :  { %v9166_v52 = vadd.f32 %v12779_v43, %v4814_v62  ;;  %v7147_v13 = vpop.f32.mrb[132].mxu0  ;;  %v4816_v11 = vpop.f32.mrb[133].mxu1 }
 0x53e   :  { %v7447_v30 = vmax.f32 %v5114_v45, %v7397_v1  ;;  %v9216_v49 = vadd.f32 %v12779_v43, %v7147_v13  ;;  %v7149_v4 = vpop.f32.mrb[133].mxu0  ;;  %v4817_v41 = vpop.f32.mrb[134].mxu1 }
 0x53f   :  { %vm4965_vm2 = vcmp.ge.f32.partialorder %v9166_v52, 0.0  ;;  %v5015_v34 = vmul.f32 0.01, %v9166_v52  ;;  %v9167_v3 = vadd.f32 %v12779_v43, %v4817_v41  ;;  %v7150_v56 = vpop.f32.mrb[134].mxu0  ;;  %v4819_v32 = vpop.f32.mrb[135].mxu1 }
 0x540   :  { %v8939_v37 = vpack.c.bf16 %v7447_v30, %v7446_v29  ;;  %vm7298_vm3 = vcmp.ge.f32.partialorder %v9216_v49, 0.0  ;;  %v7348_v7 = vmul.f32 0.01, %v9216_v49  ;;  %v9217_v0 = vadd.f32 %v12779_v43, %v7150_v56  ;;  %v7152_v8 = vpop.f32.mrb[135].mxu0 }
 0x541   :  { %v5065_v20 = vsel %vm4965_vm2, %v9166_v52, %v5015_v34  ;;  %vm4966_vm4 = vcmp.ge.f32.partialorder %v9167_v3, 0.0  ;;  %v5016_v26 = vmul.f32 0.01, %v9167_v3  ;;  %v2784_v30 = vsel %vm2684_vm6, %v11473_v50, %v2734_v24 }
 0x542   :  { %9032 = vst [vmem:[%s13209_s3 + $0x38] sm:$0xff] %v8939_v37   ;;  %v5115_v16 = vmax.f32 %v2782_v42, %v5065_v20  ;;  %vm7299_vm5 = vcmp.ge.f32.partialorder %v9217_v0, 0.0  ;;  %v7349_v48 = vmul.f32 0.01, %v9217_v0  ;;  %v7398_v27 = vsel %vm7298_vm3, %v9216_v49, %v7348_v7 }
 0x543   :  { %v5066_v23 = vsel %vm4966_vm4, %v9167_v3, %v5016_v26  ;;  %v2785_v3 = vsel %vm2685_vm7, %v11476_v57, %v2735_v55  ;;  %v2736_v50 = vmul.f32 0.01, %v11491_v14  ;;  %vm2688_vm2 = vcmp.ge.f32.partialorder %v11509_v44, 0.0 }
 0x544   :  { %v7448_v15 = vmax.f32 %v5115_v16, %v7398_v27  ;;  %v5116_v21 = vmax.f32 %v2783_v46, %v5066_v23  ;;  %v4822_v60 = vpop.f32.mrb[136].mxu1  ;;  %v7399_v38 = vsel %vm7299_vm5, %v9217_v0, %v7349_v48  ;;  %v2737_v16 = vmul.f32 0.01, %v11494_v25 }
 0x545   :  { %v9168_v17 = vadd.f32 %v12779_v43, %v4822_v60  ;;  %v7155_v28 = vpop.f32.mrb[136].mxu0  ;;  %v4824_v53 = vpop.f32.mrb[137].mxu1  ;;  %vm2689_vm3 = vcmp.ge.f32.partialorder %v11512_v54, 0.0 }
 0x546   :  { %v7449_v2 = vmax.f32 %v5116_v21, %v7399_v38  ;;  %v9218_v5 = vadd.f32 %v12779_v43, %v7155_v28  ;;  %v7157_v31 = vpop.f32.mrb[137].mxu0  ;;  %v4825_v29 = vpop.f32.mrb[138].mxu1  ;;  %v2786_v53 = vsel %vm2686_vm12, %v11491_v14, %v2736_v50  ;;  %v2738_v14 = vmul.f32 0.01, %v11509_v44 }
 0x547   :  { %vm4967_vm8 = vcmp.ge.f32.partialorder %v9168_v17, 0.0  ;;  %v5017_v45 = vmul.f32 0.01, %v9168_v17  ;;  %v9169_v62 = vadd.f32 %v12779_v43, %v4825_v29  ;;  %v7158_v59 = vpop.f32.mrb[138].mxu0  ;;  %v4827_v1 = vpop.f32.mrb[139].mxu1  ;;  %v2787_v29 = vsel %vm2687_vm13, %v11494_v25, %v2737_v16 }
 0x548   :  { %v8944_v52 = vpack.c.bf16 %v7449_v2, %v7448_v15  ;;  %vm7300_vm9 = vcmp.ge.f32.partialorder %v9218_v5, 0.0  ;;  %v7350_v13 = vmul.f32 0.01, %v9218_v5  ;;  %v9219_v11 = vadd.f32 %v12779_v43, %v7158_v59  ;;  %v7160_v35 = vpop.f32.mrb[139].mxu0 }
 0x549   :  { %v5067_v49 = vsel %vm4967_vm8, %v9168_v17, %v5017_v45  ;;  %vm4968_vm10 = vcmp.ge.f32.partialorder %v9169_v62, 0.0  ;;  %v5018_v4 = vmul.f32 0.01, %v9169_v62  ;;  %vm2690_vm8 = vcmp.ge.f32.partialorder %v11527_v12, 0.0 }
 0x54a   :  { %9033 = vst [vmem:[%s13209_s3 + $0x40] sm:$0xff] %v8944_v52   ;;  %v5117_v41 = vmax.f32 %v2784_v30, %v5067_v49  ;;  %vm7301_vm11 = vcmp.ge.f32.partialorder %v9219_v11, 0.0  ;;  %v7351_v34 = vmul.f32 0.01, %v9219_v11  ;;  %v7400_v56 = vsel %vm7300_vm9, %v9218_v5, %v7350_v13 }
 0x54b   :  { %v5068_v32 = vsel %vm4968_vm10, %v9169_v62, %v5018_v4  ;;  %v2739_v49 = vmul.f32 0.01, %v11512_v54  ;;  %vm2691_vm9 = vcmp.ge.f32.partialorder %v11530_v22, 0.0 }
 0x54c   :  { %v7450_v37 = vmax.f32 %v5117_v41, %v7400_v56  ;;  %v5118_v7 = vmax.f32 %v2785_v3, %v5068_v32  ;;  %v4830_v0 = vpop.f32.mrb[140].mxu1  ;;  %v7401_v8 = vsel %vm7301_vm11, %v9219_v11, %v7351_v34 }
 0x54d   :  { %v9170_v42 = vadd.f32 %v12779_v43, %v4830_v0  ;;  %v7163_v20 = vpop.f32.mrb[140].mxu0  ;;  %v4832_v26 = vpop.f32.mrb[141].mxu1 }
 0x54e   :  { %v7451_v48 = vmax.f32 %v5118_v7, %v7401_v8  ;;  %v9220_v46 = vadd.f32 %v12779_v43, %v7163_v20  ;;  %v7165_v57 = vpop.f32.mrb[141].mxu0  ;;  %v4833_v27 = vpop.f32.mrb[142].mxu1 }
 0x54f   :  { %vm4969_vm14 = vcmp.ge.f32.partialorder %v9170_v42, 0.0  ;;  %v5019_v23 = vmul.f32 0.01, %v9170_v42  ;;  %v9171_v15 = vadd.f32 %v12779_v43, %v4833_v27  ;;  %v7166_v21 = vpop.f32.mrb[142].mxu0  ;;  %v4835_v60 = vpop.f32.mrb[143].mxu1 }
 0x550   :  { %v8949_v24 = vpack.c.bf16 %v7451_v48, %v7450_v37  ;;  %vm7302_vm15 = vcmp.ge.f32.partialorder %v9220_v46, 0.0  ;;  %v7352_v38 = vmul.f32 0.01, %v9220_v46  ;;  %v9221_v17 = vadd.f32 %v12779_v43, %v7166_v21  ;;  %v7168_v28 = vpop.f32.mrb[143].mxu0 }
 0x551   :  { %v5069_v55 = vsel %vm4969_vm14, %v9170_v42, %v5019_v23  ;;  %vm4970_vm0 = vcmp.ge.f32.partialorder %v9171_v15, 0.0  ;;  %v5020_v2 = vmul.f32 0.01, %v9171_v15  ;;  %v2788_v42 = vsel %vm2688_vm2, %v11509_v44, %v2738_v14 }
 0x552   :  { %9034 = vst [vmem:[%s13209_s3 + $0x48] sm:$0xff] %v8949_v24   ;;  %v5119_v5 = vmax.f32 %v2786_v53, %v5069_v55  ;;  %vm7303_vm1 = vcmp.ge.f32.partialorder %v9221_v17, 0.0  ;;  %v7353_v31 = vmul.f32 0.01, %v9221_v17  ;;  %v7402_v45 = vsel %vm7302_vm15, %v9220_v46, %v7352_v38 }
 0x553   :  { %v5070_v62 = vsel %vm4970_vm0, %v9171_v15, %v5020_v2  ;;  %v2789_v46 = vsel %vm2689_vm3, %v11512_v54, %v2739_v49  ;;  %v2740_v44 = vmul.f32 0.01, %v11527_v12  ;;  %v2741_v28 = vmul.f32 0.01, %v11530_v22 }
 0x554   :  { %v7452_v59 = vmax.f32 %v5119_v5, %v7402_v45  ;;  %v5120_v1 = vmax.f32 %v2787_v29, %v5070_v62  ;;  %v4838_v52 = vpop.f32.mrb[144].mxu1  ;;  %v7403_v13 = vsel %vm7303_vm1, %v9221_v17, %v7353_v31  ;;  %vm2692_vm14 = vcmp.ge.f32.partialorder %v11545_v47, 0.0 }
 0x555   :  { %v9172_v11 = vadd.f32 %v12779_v43, %v4838_v52  ;;  %v7171_v35 = vpop.f32.mrb[144].mxu0  ;;  %v4840_v30 = vpop.f32.mrb[145].mxu1  ;;  %v2790_v14 = vsel %vm2690_vm8, %v11527_v12, %v2740_v44  ;;  %v2791_v49 = vsel %vm2691_vm9, %v11530_v22, %v2741_v28  ;;  %v2742_v12 = vmul.f32 0.01, %v11545_v47 }
 0x556   :  { %v7453_v4 = vmax.f32 %v5120_v1, %v7403_v13  ;;  %v9222_v41 = vadd.f32 %v12779_v43, %v7171_v35  ;;  %v7173_v25 = vpop.f32.mrb[145].mxu0  ;;  %v4841_v34 = vpop.f32.mrb[146].mxu1  ;;  %vm2693_vm15 = vcmp.ge.f32.partialorder %v11548_v63, 0.0 }
 0x557   :  { %vm4971_vm4 = vcmp.ge.f32.partialorder %v9172_v11, 0.0  ;;  %v5021_v3 = vmul.f32 0.01, %v9172_v11  ;;  %v9173_v56 = vadd.f32 %v12779_v43, %v4841_v34  ;;  %v7174_v32 = vpop.f32.mrb[146].mxu0  ;;  %v4843_v37 = vpop.f32.mrb[147].mxu1 }
 0x558   :  { %v8954_v7 = vpack.c.bf16 %v7453_v4, %v7452_v59  ;;  %vm7304_vm5 = vcmp.ge.f32.partialorder %v9222_v41, 0.0  ;;  %v7354_v0 = vmul.f32 0.01, %v9222_v41  ;;  %v9223_v50 = vadd.f32 %v12779_v43, %v7174_v32  ;;  %v7176_v8 = vpop.f32.mrb[147].mxu0 }
 0x559   :  { %v5071_v20 = vsel %vm4971_vm4, %v9172_v11, %v5021_v3  ;;  %vm4972_vm6 = vcmp.ge.f32.partialorder %v9173_v56, 0.0  ;;  %v5022_v26 = vmul.f32 0.01, %v9173_v56  ;;  %vm2694_vm4 = vcmp.ge.f32.partialorder %v11563_v18, 0.0 }
 0x55a   :  { %9035 = vst [vmem:[%s13209_s3 + $0x50] sm:$0xff] %v8954_v7   ;;  %v5121_v16 = vmax.f32 %v2788_v42, %v5071_v20  ;;  %vm7305_vm7 = vcmp.ge.f32.partialorder %v9223_v50, 0.0  ;;  %v7355_v48 = vmul.f32 0.01, %v9223_v50  ;;  %v7404_v57 = vsel %vm7304_vm5, %v9222_v41, %v7354_v0 }
 0x55b   :  { %v5072_v27 = vsel %vm4972_vm6, %v9173_v56, %v5022_v26  ;;  %v2743_v0 = vmul.f32 0.01, %v11548_v63  ;;  %vm2695_vm5 = vcmp.ge.f32.partialorder %v11566_v36, 0.0 }
 0x55c   :  { %v7454_v23 = vmax.f32 %v5121_v16, %v7404_v57  ;;  %v5122_v15 = vmax.f32 %v2789_v46, %v5072_v27  ;;  %v4846_v21 = vpop.f32.mrb[148].mxu1  ;;  %v7405_v60 = vsel %vm7305_vm7, %v9223_v50, %v7355_v48 }
 0x55d   :  { %v9174_v24 = vadd.f32 %v12779_v43, %v4846_v21  ;;  %v7179_v38 = vpop.f32.mrb[148].mxu0  ;;  %v4848_v17 = vpop.f32.mrb[149].mxu1 }
 0x55e   :  { %v7455_v53 = vmax.f32 %v5122_v15, %v7405_v60  ;;  %v9224_v55 = vadd.f32 %v12779_v43, %v7179_v38  ;;  %v7181_v54 = vpop.f32.mrb[149].mxu0  ;;  %v4849_v2 = vpop.f32.mrb[150].mxu1  ;;  %v2792_v15 = vsel %vm2692_vm14, %v11545_v47, %v2742_v12  ;;  %v2793_v38 = vsel %vm2693_vm15, %v11548_v63, %v2743_v0 }
 0x55f   :  { %vm4973_vm10 = vcmp.ge.f32.partialorder %v9174_v24, 0.0  ;;  %v5023_v5 = vmul.f32 0.01, %v9174_v24  ;;  %v9175_v31 = vadd.f32 %v12779_v43, %v4849_v2  ;;  %v7182_v29 = vpop.f32.mrb[150].mxu0  ;;  %v4851_v45 = vpop.f32.mrb[151].mxu1 }
 0x560   :  { %v8959_v62 = vpack.c.bf16 %v7455_v53, %v7454_v23  ;;  %vm7306_vm11 = vcmp.ge.f32.partialorder %v9224_v55, 0.0  ;;  %v7356_v59 = vmul.f32 0.01, %v9224_v55  ;;  %v9225_v1 = vadd.f32 %v12779_v43, %v7182_v29  ;;  %v7184_v52 = vpop.f32.mrb[151].mxu0 }
 0x561   :  { %v5073_v13 = vsel %vm4973_vm10, %v9174_v24, %v5023_v5  ;;  %vm4974_vm12 = vcmp.ge.f32.partialorder %v9175_v31, 0.0  ;;  %v5024_v11 = vmul.f32 0.01, %v9175_v31  ;;  %v2744_v47 = vmul.f32 0.01, %v11563_v18 }
 0x562   :  { %9036 = vst [vmem:[%s13209_s3 + $0x58] sm:$0xff] %v8959_v62   ;;  %v5123_v35 = vmax.f32 %v2790_v14, %v5073_v13  ;;  %vm7307_vm13 = vcmp.ge.f32.partialorder %v9225_v1, 0.0  ;;  %v7357_v30 = vmul.f32 0.01, %v9225_v1  ;;  %v7406_v4 = vsel %vm7306_vm11, %v9224_v55, %v7356_v59  ;;  %v13020_v14 = vld [vmem:[%s13208_s2] ss:$0 sm:$0xff] }
 0x563   :  { %v5074_v41 = vsel %vm4974_vm12, %v9175_v31, %v5024_v11  ;;  %v2745_v45 = vmul.f32 0.01, %v11566_v36  ;;  %vm2696_vm10 = vcmp.ge.f32.partialorder %v11581_v58, 0.0  ;;  %vm2697_vm11 = vcmp.ge.f32.partialorder %v11584_v10, 0.0 }
 0x564   :  { %v7456_v25 = vmax.f32 %v5123_v35, %v7406_v4  ;;  %v5124_v34 = vmax.f32 %v2791_v49, %v5074_v41  ;;  %v4854_v3 = vpop.f32.mrb[152].mxu1  ;;  %v7407_v56 = vsel %vm7307_vm13, %v9225_v1, %v7357_v30  ;;  %v2794_v41 = vsel %vm2694_vm4, %v11563_v18, %v2744_v47 }
 0x565   :  { %v9176_v32 = vadd.f32 %v12779_v43, %v4854_v3  ;;  %v7187_v37 = vpop.f32.mrb[152].mxu0  ;;  %v4856_v7 = vpop.f32.mrb[153].mxu1  ;;  %v2746_v18 = vmul.f32 0.01, %v11581_v58 }
 0x566   :  { %v7457_v50 = vmax.f32 %v5124_v34, %v7407_v56  ;;  %v9226_v8 = vadd.f32 %v12779_v43, %v7187_v37  ;;  %v7189_v22 = vpop.f32.mrb[153].mxu0  ;;  %v4857_v42 = vpop.f32.mrb[154].mxu1  ;;  %v2795_v56 = vsel %vm2695_vm5, %v11566_v36, %v2745_v45 }
 0x567   :  { %vm4975_vm0 = vcmp.ge.f32.partialorder %v9176_v32, 0.0  ;;  %v5025_v20 = vmul.f32 0.01, %v9176_v32  ;;  %v9177_v26 = vadd.f32 %v12779_v43, %v4857_v42  ;;  %v7190_v16 = vpop.f32.mrb[154].mxu0  ;;  %v4859_v48 = vpop.f32.mrb[155].mxu1 }
 0x568   :  { %v8964_v46 = vpack.c.bf16 %v7457_v50, %v7456_v25  ;;  %vm7308_vm1 = vcmp.ge.f32.partialorder %v9226_v8, 0.0  ;;  %v7358_v57 = vmul.f32 0.01, %v9226_v8  ;;  %v9227_v27 = vadd.f32 %v12779_v43, %v7190_v16  ;;  %v7192_v23 = vpop.f32.mrb[155].mxu0 }
 0x569   :  { %v5075_v21 = vsel %vm4975_vm0, %v9176_v32, %v5025_v20  ;;  %vm4976_vm2 = vcmp.ge.f32.partialorder %v9177_v26, 0.0  ;;  %v5026_v44 = vmul.f32 0.01, %v9177_v26  ;;  %vm2698_vm0 = vcmp.ge.f32.partialorder %v11599_v39, 0.0 }
 0x56a   :  { %9037 = vst [vmem:[%s13209_s3 + $0x60] sm:$0xff] %v8964_v46   ;;  %v5125_v60 = vmax.f32 %v2792_v15, %v5075_v21  ;;  %vm7309_vm3 = vcmp.ge.f32.partialorder %v9227_v27, 0.0  ;;  %v7359_v24 = vmul.f32 0.01, %v9227_v27  ;;  %v7408_v17 = vsel %vm7308_vm1, %v9226_v8, %v7358_v57 }
 0x56b   :  { %v5076_v28 = vsel %vm4976_vm2, %v9177_v26, %v5026_v44  ;;  %v2747_v26 = vmul.f32 0.01, %v11584_v10  ;;  %vm2699_vm1 = vcmp.ge.f32.partialorder %v11602_v51, 0.0 }
 0x56c   :  { %v7458_v53 = vmax.f32 %v5125_v60, %v7408_v17  ;;  %v5126_v55 = vmax.f32 %v2793_v38, %v5076_v28  ;;  %v4862_v54 = vpop.f32.mrb[156].mxu1  ;;  %v7409_v2 = vsel %vm7309_vm3, %v9227_v27, %v7359_v24  ;;  %v2796_v38 = vsel %vm2696_vm10, %v11581_v58, %v2746_v18 }
 0x56d   :  { %v9178_v5 = vadd.f32 %v12779_v43, %v4862_v54  ;;  %v7195_v31 = vpop.f32.mrb[156].mxu0  ;;  %v4864_v29 = vpop.f32.mrb[157].mxu1  ;;  %v2797_v54 = vsel %vm2697_vm11, %v11584_v10, %v2747_v26  ;;  %v2748_v58 = vmul.f32 0.01, %v11599_v39 }
 0x56e   :  { %v7459_v62 = vmax.f32 %v5126_v55, %v7409_v2  ;;  %v9228_v59 = vadd.f32 %v12779_v43, %v7195_v31  ;;  %v7197_v63 = vpop.f32.mrb[157].mxu0  ;;  %v4865_v1 = vpop.f32.mrb[158].mxu1 }
 0x56f   :  { %vm4977_vm6 = vcmp.ge.f32.partialorder %v9178_v5, 0.0  ;;  %v5027_v52 = vmul.f32 0.01, %v9178_v5  ;;  %v9179_v13 = vadd.f32 %v13020_v14, %v4865_v1  ;;  %v7198_v11 = vpop.f32.mrb[158].mxu0  ;;  %v4867_v35 = vpop.f32.mrb[159].mxu1 }
 0x570   :  { %v8969_v30 = vpack.c.bf16 %v7459_v62, %v7458_v53  ;;  %vm7310_vm7 = vcmp.ge.f32.partialorder %v9228_v59, 0.0  ;;  %v7360_v49 = vmul.f32 0.01, %v9228_v59  ;;  %v9229_v43 = vadd.f32 %v13020_v14, %v7198_v11  ;;  %v7200_v4 = vpop.f32.mrb[159].mxu0 }
 0x571   :  { %v5077_v25 = vsel %vm4977_vm6, %v9178_v5, %v5027_v52  ;;  %vm4978_vm8 = vcmp.ge.f32.partialorder %v9179_v13, 0.0  ;;  %v5028_v34 = vmul.f32 0.01, %v9179_v13  ;;  %v2749_v1 = vmul.f32 0.01, %v11602_v51 }
 0x572   :  { %9038 = vst [vmem:[%s13209_s3 + $0x68] sm:$0xff] %v8969_v30   ;;  %v5127_v3 = vmax.f32 %v2794_v41, %v5077_v25  ;;  %vm7311_vm9 = vcmp.ge.f32.partialorder %v9229_v43, 0.0  ;;  %v7361_v12 = vmul.f32 0.01, %v9229_v43  ;;  %v7410_v32 = vsel %vm7310_vm7, %v9228_v59, %v7360_v49 }
 0x573   :  { %v5078_v37 = vsel %vm4978_vm8, %v9179_v13, %v5028_v34  ;;  %vm2700_vm6 = vcmp.ge.f32.partialorder %v11617_v19, 0.0  ;;  %vm2701_vm7 = vcmp.ge.f32.partialorder %v11620_v40, 0.0 }
 0x574   :  { %v7460_v7 = vmax.f32 %v5127_v3, %v7410_v32  ;;  %v5128_v0 = vmax.f32 %v2795_v56, %v5078_v37  ;;  %v4870_v50 = vpop.f32.mrb[160].mxu1  ;;  %v7411_v8 = vsel %vm7311_vm9, %v9229_v43, %v7361_v12  ;;  %v2798_v3 = vsel %vm2698_vm0, %v11599_v39, %v2748_v58 }
 0x575   :  { %v9180_v22 = vadd.f32 %v13020_v14, %v4870_v50  ;;  %v7203_v42 = vpop.f32.mrb[160].mxu0  ;;  %v4872_v20 = vpop.f32.mrb[161].mxu1  ;;  %v2750_v39 = vmul.f32 0.01, %v11617_v19 }
 0x576   :  { %v7461_v16 = vmax.f32 %v5128_v0, %v7411_v8  ;;  %v9230_v48 = vadd.f32 %v13020_v14, %v7203_v42  ;;  %v7205_v36 = vpop.f32.mrb[161].mxu0  ;;  %v4873_v46 = vpop.f32.mrb[162].mxu1 }
 0x577   :  { %vm4979_vm12 = vcmp.ge.f32.partialorder %v9180_v22, 0.0  ;;  %v5029_v57 = vmul.f32 0.01, %v9180_v22  ;;  %v9181_v27 = vadd.f32 %v13020_v14, %v4873_v46  ;;  %v7206_v23 = vpop.f32.mrb[162].mxu0  ;;  %v4875_v15 = vpop.f32.mrb[163].mxu1 }
 0x578   :  { %v8974_v21 = vpack.c.bf16 %v7461_v16, %v7460_v7  ;;  %vm7312_vm13 = vcmp.ge.f32.partialorder %v9230_v48, 0.0  ;;  %v7362_v44 = vmul.f32 0.01, %v9230_v48  ;;  %v9231_v60 = vadd.f32 %v13020_v14, %v7206_v23  ;;  %v7208_v24 = vpop.f32.mrb[163].mxu0 }
 0x579   :  { %v5079_v17 = vsel %vm4979_vm12, %v9180_v22, %v5029_v57  ;;  %vm4980_vm14 = vcmp.ge.f32.partialorder %v9181_v27, 0.0  ;;  %v5030_v28 = vmul.f32 0.01, %v9181_v27  ;;  %v2799_v7 = vsel %vm2699_vm1, %v11602_v51, %v2749_v1 }
 0x57a   :  { %9039 = vst [vmem:[%s13209_s3 + $0x70] sm:$0xff] %v8974_v21   ;;  %v5129_v53 = vmax.f32 %v2796_v38, %v5079_v17  ;;  %vm7313_vm15 = vcmp.ge.f32.partialorder %v9231_v60, 0.0  ;;  %v7363_v55 = vmul.f32 0.01, %v9231_v60  ;;  %v7412_v47 = vsel %vm7312_vm13, %v9230_v48, %v7362_v44 }
 0x57b   :  { %v5080_v2 = vsel %vm4980_vm14, %v9181_v27, %v5030_v28  ;;  %v2751_v48 = vmul.f32 0.01, %v11620_v40  ;;  %v2800_v17 = vsel %vm2700_vm6, %v11617_v19, %v2750_v39  ;;  %v2752_v19 = vmul.f32 0.01, %v11635_v9 }
 0x57c   :  { %v7462_v5 = vmax.f32 %v5129_v53, %v7412_v47  ;;  %v5130_v31 = vmax.f32 %v2797_v54, %v5080_v2  ;;  %v4878_v29 = vpop.f32.mrb[164].mxu1  ;;  %v7413_v45 = vsel %vm7313_vm15, %v9231_v60, %v7363_v55  ;;  %vm2702_vm12 = vcmp.ge.f32.partialorder %v11635_v9, 0.0 }
 0x57d   :  { %v9182_v62 = vadd.f32 %v13020_v14, %v4878_v29  ;;  %v7211_v59 = vpop.f32.mrb[164].mxu0  ;;  %v4880_v63 = vpop.f32.mrb[165].mxu1  ;;  %v2801_v47 = vsel %vm2701_vm7, %v11620_v40, %v2751_v48  ;;  %v2753_v1 = vmul.f32 0.01, %v11638_v33  ;;  %vm2703_vm13 = vcmp.ge.f32.partialorder %v11638_v33, 0.0 }
 0x57e   :  { %v7463_v52 = vmax.f32 %v5130_v31, %v7413_v45  ;;  %v9232_v13 = vadd.f32 %v13020_v14, %v7211_v59  ;;  %v7213_v10 = vpop.f32.mrb[165].mxu0  ;;  %v4881_v11 = vpop.f32.mrb[166].mxu1 }
 0x57f   :  { %vm4981_vm2 = vcmp.ge.f32.partialorder %v9182_v62, 0.0  ;;  %v5031_v35 = vmul.f32 0.01, %v9182_v62  ;;  %v9183_v30 = vadd.f32 %v13020_v14, %v4881_v11  ;;  %v7214_v49 = vpop.f32.mrb[166].mxu0  ;;  %v4883_v43 = vpop.f32.mrb[167].mxu1 }
 0x580   :  { %v8979_v4 = vpack.c.bf16 %v7463_v52, %v7462_v5  ;;  %vm7314_vm3 = vcmp.ge.f32.partialorder %v9232_v13, 0.0  ;;  %v7364_v41 = vmul.f32 0.01, %v9232_v13  ;;  %v9233_v25 = vadd.f32 %v13020_v14, %v7214_v49  ;;  %v7216_v34 = vpop.f32.mrb[167].mxu0 }
 0x581   :  { %v5081_v12 = vsel %vm4981_vm2, %v9182_v62, %v5031_v35  ;;  %vm4982_vm4 = vcmp.ge.f32.partialorder %v9183_v30, 0.0  ;;  %v5032_v56 = vmul.f32 0.01, %v9183_v30  ;;  %v2802_v34 = vsel %vm2702_vm12, %v11635_v9, %v2752_v19 }
 0x582   :  { %9040 = vst [vmem:[%s13209_s3 + $0x78] sm:$0xff] %v8979_v4   ;;  %v5131_v32 = vmax.f32 %v2798_v3, %v5081_v12  ;;  %vm7315_vm5 = vcmp.ge.f32.partialorder %v9233_v25, 0.0  ;;  %v7365_v37 = vmul.f32 0.01, %v9233_v25  ;;  %v7414_v0 = vsel %vm7314_vm3, %v9232_v13, %v7364_v41 }
 0x583   :  { %v5082_v50 = vsel %vm4982_vm4, %v9183_v30, %v5032_v56  ;;  %v2754_v9 = vmul.f32 0.01, %v11658_v6  ;;  %vm2704_vm2 = vcmp.ge.f32.partialorder %v11658_v6, 0.0 }
 0x584   :  { %v7464_v18 = vmax.f32 %v5131_v32, %v7414_v0  ;;  %v5132_v8 = vmax.f32 %v2799_v7, %v5082_v50  ;;  %v4886_v22 = vpop.f32.mrb[168].mxu1  ;;  %v7415_v42 = vsel %vm7315_vm5, %v9233_v25, %v7365_v37  ;;  %v2803_v37 = vsel %vm2703_vm13, %v11638_v33, %v2753_v1 }
 0x585   :  { %v9184_v20 = vadd.f32 %v13020_v14, %v4886_v22  ;;  %v7219_v26 = vpop.f32.mrb[168].mxu0  ;;  %v4888_v16 = vpop.f32.mrb[169].mxu1 }
 0x586   :  { %v7465_v36 = vmax.f32 %v5132_v8, %v7415_v42  ;;  %v9234_v46 = vadd.f32 %v13020_v14, %v7219_v26  ;;  %v7221_v51 = vpop.f32.mrb[169].mxu0  ;;  %v4889_v57 = vpop.f32.mrb[170].mxu1  ;;  %v13233_v26 = vld [vmem:[#allocation2_spill] sm:$0xff] }
 0x587   :  { %vm4983_vm8 = vcmp.ge.f32.partialorder %v9184_v20, 0.0  ;;  %v5033_v27 = vmul.f32 0.01, %v9184_v20  ;;  %v9185_v23 = vadd.f32 %v13020_v14, %v4889_v57  ;;  %v7222_v15 = vpop.f32.mrb[170].mxu0  ;;  %v4891_v21 = vpop.f32.mrb[171].mxu1  ;;  %vm2705_vm3 = vcmp.ge.f32.partialorder %v13233_v26, 0.0 }
 0x588   :  { %v8984_v44 = vpack.c.bf16 %v7465_v36, %v7464_v18  ;;  %vm7316_vm9 = vcmp.ge.f32.partialorder %v9234_v46, 0.0  ;;  %v7366_v60 = vmul.f32 0.01, %v9234_v46  ;;  %v9235_v24 = vadd.f32 %v13020_v14, %v7222_v15  ;;  %v7224_v38 = vpop.f32.mrb[171].mxu0 }
 0x589   :  { %v5083_v28 = vsel %vm4983_vm8, %v9184_v20, %v5033_v27  ;;  %vm4984_vm10 = vcmp.ge.f32.partialorder %v9185_v23, 0.0  ;;  %v5034_v53 = vmul.f32 0.01, %v9185_v23  ;;  %v2755_v16 = vmul.f32 0.01, %v13233_v26 }
 0x58a   :  { %9041 = vst [vmem:[%s13209_s3 + $0x80] sm:$0xff] %v8984_v44   ;;  %v5133_v55 = vmax.f32 %v2800_v17, %v5083_v28  ;;  %vm7317_vm11 = vcmp.ge.f32.partialorder %v9235_v24, 0.0  ;;  %v7367_v54 = vmul.f32 0.01, %v9235_v24  ;;  %v7416_v2 = vsel %vm7316_vm9, %v9234_v46, %v7366_v60 }
 0x58b   :  { %v5084_v5 = vsel %vm4984_vm10, %v9185_v23, %v5034_v53 }
 0x58c   :  { %v7466_v31 = vmax.f32 %v5133_v55, %v7416_v2  ;;  %v5134_v29 = vmax.f32 %v2801_v47, %v5084_v5  ;;  %v4894_v58 = vpop.f32.mrb[172].mxu1  ;;  %v7417_v45 = vsel %vm7317_vm11, %v9235_v24, %v7367_v54  ;;  %v2804_v24 = vsel %vm2704_vm2, %v11658_v6, %v2754_v9  ;;  %v13234_v6 = vld [vmem:[#allocation3_spill] sm:$0xff] }
 0x58d   :  { %v9186_v62 = vadd.f32 %v13020_v14, %v4894_v58  ;;  %v7227_v59 = vpop.f32.mrb[172].mxu0  ;;  %v4896_v63 = vpop.f32.mrb[173].mxu1  ;;  %v2805_v55 = vsel %vm2705_vm3, %v13233_v26, %v2755_v16  ;;  %vm2706_vm8 = vcmp.ge.f32.partialorder %v13234_v6, 0.0  ;;  %v13237_v26 = vld [vmem:[#allocation6_spill] sm:$0xff] }
 0x58e   :  { %v7467_v52 = vmax.f32 %v5134_v29, %v7417_v45  ;;  %v9236_v13 = vadd.f32 %v13020_v14, %v7227_v59  ;;  %v7229_v40 = vpop.f32.mrb[173].mxu0  ;;  %v4897_v10 = vpop.f32.mrb[174].mxu1  ;;  %v2756_v29 = vmul.f32 0.01, %v13234_v6  ;;  %v13235_v59 = vld [vmem:[#allocation4_spill] sm:$0xff] }
 0x58f   :  { %vm4985_vm14 = vcmp.ge.f32.partialorder %v9186_v62, 0.0  ;;  %v5035_v11 = vmul.f32 0.01, %v9186_v62  ;;  %v9187_v35 = vadd.f32 %v13020_v14, %v4897_v10  ;;  %v7230_v30 = vpop.f32.mrb[174].mxu0  ;;  %v4899_v49 = vpop.f32.mrb[175].mxu1  ;;  %vm2707_vm9 = vcmp.ge.f32.partialorder %v13235_v59, 0.0 }
 0x590   :  { %v8989_v43 = vpack.c.bf16 %v7467_v52, %v7466_v31  ;;  %vm7318_vm15 = vcmp.ge.f32.partialorder %v9236_v13, 0.0  ;;  %v7368_v4 = vmul.f32 0.01, %v9236_v13  ;;  %v9237_v41 = vadd.f32 %v13020_v14, %v7230_v30  ;;  %v7232_v25 = vpop.f32.mrb[175].mxu0 }
 0x591   :  { %v5085_v3 = vsel %vm4985_vm14, %v9186_v62, %v5035_v11  ;;  %vm4986_vm0 = vcmp.ge.f32.partialorder %v9187_v35, 0.0  ;;  %v5036_v12 = vmul.f32 0.01, %v9187_v35  ;;  %v2757_v63 = vmul.f32 0.01, %v13235_v59 }
 0x592   :  { %9042 = vst [vmem:[%s13209_s3 + $0x88] sm:$0xff] %v8989_v43   ;;  %v5135_v56 = vmax.f32 %v2802_v34, %v5085_v3  ;;  %vm7319_vm1 = vcmp.ge.f32.partialorder %v9237_v41, 0.0  ;;  %v7369_v32 = vmul.f32 0.01, %v9237_v41  ;;  %v7418_v7 = vsel %vm7318_vm15, %v9236_v13, %v7368_v4 }
 0x593   :  { %v5086_v0 = vsel %vm4986_vm0, %v9187_v35, %v5036_v12  ;;  %v2806_v25 = vsel %vm2706_vm8, %v13234_v6, %v2756_v29  ;;  %v2759_v16 = vmul.f32 0.01, %v13237_v26  ;;  %vm2709_vm15 = vcmp.ge.f32.partialorder %v13237_v26, 0.0 }
 0x594   :  { %v7468_v50 = vmax.f32 %v5135_v56, %v7418_v7  ;;  %v5136_v18 = vmax.f32 %v2803_v37, %v5086_v0  ;;  %v4902_v8 = vpop.f32.mrb[176].mxu1  ;;  %v7419_v22 = vsel %vm7319_vm1, %v9237_v41, %v7369_v32  ;;  %v2807_v32 = vsel %vm2707_vm9, %v13235_v59, %v2757_v63 }
 0x595   :  { %v9188_v39 = vadd.f32 %v13020_v14, %v4902_v8  ;;  %v7235_v42 = vpop.f32.mrb[176].mxu0  ;;  %v4904_v20 = vpop.f32.mrb[177].mxu1  ;;  %v13236_v8 = vld [vmem:[#allocation5_spill] sm:$0xff]  ;;  %v2760_v6 = vmul.f32 0.01, %v11712_v61 }
 0x596   :  { %v7469_v48 = vmax.f32 %v5136_v18, %v7419_v22  ;;  %v9238_v36 = vadd.f32 %v13020_v14, %v7235_v42  ;;  %v7237_v33 = vpop.f32.mrb[177].mxu0  ;;  %v4905_v46 = vpop.f32.mrb[178].mxu1  ;;  %v2758_v9 = vmul.f32 0.01, %v13236_v8  ;;  %vm2708_vm14 = vcmp.ge.f32.partialorder %v13236_v8, 0.0 }
 0x597   :  { %vm4987_vm4 = vcmp.ge.f32.partialorder %v9188_v39, 0.0  ;;  %v5037_v51 = vmul.f32 0.01, %v9188_v39  ;;  %v9189_v57 = vadd.f32 %v13020_v14, %v4905_v46  ;;  %v7238_v27 = vpop.f32.mrb[178].mxu0  ;;  %v4907_v23 = vpop.f32.mrb[179].mxu1 }
 0x598   :  { %v8994_v15 = vpack.c.bf16 %v7469_v48, %v7468_v50  ;;  %vm7320_vm5 = vcmp.ge.f32.partialorder %v9238_v36, 0.0  ;;  %v7370_v21 = vmul.f32 0.01, %v9238_v36  ;;  %v9239_v44 = vadd.f32 %v13020_v14, %v7238_v27  ;;  %v7240_v60 = vpop.f32.mrb[179].mxu0 }
 0x599   :  { %v5087_v38 = vsel %vm4987_vm4, %v9188_v39, %v5037_v51  ;;  %vm4988_vm6 = vcmp.ge.f32.partialorder %v9189_v57, 0.0  ;;  %v5038_v17 = vmul.f32 0.01, %v9189_v57  ;;  %vm2710_vm4 = vcmp.ge.f32.partialorder %v11712_v61, 0.0 }
 0x59a   :  { %9043 = vst [vmem:[%s13209_s3 + $0x90] sm:$0xff] %v8994_v15   ;;  %v5137_v28 = vmax.f32 %v2804_v24, %v5087_v38  ;;  %vm7321_vm7 = vcmp.ge.f32.partialorder %v9239_v44, 0.0  ;;  %v7371_v53 = vmul.f32 0.01, %v9239_v44  ;;  %v7420_v54 = vsel %vm7320_vm5, %v9238_v36, %v7370_v21 }
 0x59b   :  { %v5088_v47 = vsel %vm4988_vm6, %v9189_v57, %v5038_v17  ;;  %v2808_v24 = vsel %vm2708_vm14, %v13236_v8, %v2758_v9 }
 0x59c   :  { %v7470_v2 = vmax.f32 %v5137_v28, %v7420_v54  ;;  %v5138_v5 = vmax.f32 %v2805_v55, %v5088_v47  ;;  %v4910_v31 = vpop.f32.mrb[180].mxu1  ;;  %v7421_v58 = vsel %vm7321_vm7, %v9239_v44, %v7371_v53  ;;  %v2809_v55 = vsel %vm2709_vm15, %v13237_v26, %v2759_v16 }
 0x59d   :  { %v9190_v19 = vadd.f32 %v13020_v14, %v4910_v31  ;;  %v7243_v45 = vpop.f32.mrb[180].mxu0  ;;  %v4912_v62 = vpop.f32.mrb[181].mxu1 }
 0x59e   :  { %v7471_v1 = vmax.f32 %v5138_v5, %v7421_v58  ;;  %v9240_v52 = vadd.f32 %v13020_v14, %v7243_v45  ;;  %v7245_v13 = vpop.f32.mrb[181].mxu0  ;;  %v4913_v40 = vpop.f32.mrb[182].mxu1  ;;  %v13238_v62 = vld [vmem:[#allocation7_spill] sm:$0xff] }
 0x59f   :  { %vm4989_vm10 = vcmp.ge.f32.partialorder %v9190_v19, 0.0  ;;  %v5039_v10 = vmul.f32 0.01, %v9190_v19  ;;  %v9191_v11 = vadd.f32 %v13020_v14, %v4913_v40  ;;  %v7246_v35 = vpop.f32.mrb[182].mxu0  ;;  %v4915_v30 = vpop.f32.mrb[183].mxu1  ;;  %vm2711_vm5 = vcmp.ge.f32.partialorder %v13238_v62, 0.0 }
 0x5a0   :  { %v8999_v49 = vpack.c.bf16 %v7471_v1, %v7470_v2  ;;  %vm7322_vm11 = vcmp.ge.f32.partialorder %v9240_v52, 0.0  ;;  %v7372_v43 = vmul.f32 0.01, %v9240_v52  ;;  %v9241_v4 = vadd.f32 %v13020_v14, %v7246_v35  ;;  %v7248_v41 = vpop.f32.mrb[183].mxu0 }
 0x5a1   :  { %v5089_v34 = vsel %vm4989_vm10, %v9190_v19, %v5039_v10  ;;  %vm4990_vm12 = vcmp.ge.f32.partialorder %v9191_v11, 0.0  ;;  %v5040_v3 = vmul.f32 0.01, %v9191_v11  ;;  %v2761_v59 = vmul.f32 0.01, %v13238_v62 }
 0x5a2   :  { %9044 = vst [vmem:[%s13209_s3 + $0x98] sm:$0xff] %v8999_v49   ;;  %v5139_v12 = vmax.f32 %v2806_v25, %v5089_v34  ;;  %vm7323_vm13 = vcmp.ge.f32.partialorder %v9241_v4, 0.0  ;;  %v7373_v56 = vmul.f32 0.01, %v9241_v4  ;;  %v7422_v37 = vsel %vm7322_vm11, %v9240_v52, %v7372_v43 }
 0x5a3   :  { %v5090_v7 = vsel %vm4990_vm12, %v9191_v11, %v5040_v3  ;;  %v2810_v41 = vsel %vm2710_vm4, %v11712_v61, %v2760_v6  ;;  %v13239_v61 = vld [vmem:[#allocation8_spill] sm:$0xff] }
 0x5a4   :  { %v7472_v0 = vmax.f32 %v5139_v12, %v7422_v37  ;;  %v5140_v50 = vmax.f32 %v2807_v32, %v5090_v7  ;;  %v4918_v18 = vpop.f32.mrb[184].mxu1  ;;  %v7423_v22 = vsel %vm7323_vm13, %v9241_v4, %v7373_v56  ;;  %v2811_v56 = vsel %vm2711_vm5, %v13238_v62, %v2761_v59 }
 0x5a5   :  { %v9192_v39 = vadd.f32 %v13020_v14, %v4918_v18  ;;  %v7251_v42 = vpop.f32.mrb[184].mxu0  ;;  %v4920_v20 = vpop.f32.mrb[185].mxu1  ;;  %v2762_v18 = vmul.f32 0.01, %v13239_v61  ;;  %vm2712_vm10 = vcmp.ge.f32.partialorder %v13239_v61, 0.0 }
 0x5a6   :  { %v7473_v48 = vmax.f32 %v5140_v50, %v7423_v22  ;;  %v9242_v36 = vadd.f32 %v13020_v14, %v7251_v42  ;;  %v7253_v33 = vpop.f32.mrb[185].mxu0  ;;  %v4921_v46 = vpop.f32.mrb[186].mxu1  ;;  %v13240_v42 = vld [vmem:[#allocation9_spill] sm:$0xff] }
 0x5a7   :  { %vm4991_vm0 = vcmp.ge.f32.partialorder %v9192_v39, 0.0  ;;  %v5041_v51 = vmul.f32 0.01, %v9192_v39  ;;  %v9193_v57 = vadd.f32 %v13020_v14, %v4921_v46  ;;  %v7254_v27 = vpop.f32.mrb[186].mxu0  ;;  %v4923_v23 = vpop.f32.mrb[187].mxu1  ;;  %vm2713_vm11 = vcmp.ge.f32.partialorder %v13240_v42, 0.0 }
 0x5a8   :  { %v9004_v15 = vpack.c.bf16 %v7473_v48, %v7472_v0  ;;  %vm7324_vm1 = vcmp.ge.f32.partialorder %v9242_v36, 0.0  ;;  %v7374_v21 = vmul.f32 0.01, %v9242_v36  ;;  %v9243_v44 = vadd.f32 %v13020_v14, %v7254_v27  ;;  %v7256_v60 = vpop.f32.mrb[187].mxu0 }
 0x5a9   :  { %v5091_v38 = vsel %vm4991_vm0, %v9192_v39, %v5041_v51  ;;  %vm4992_vm2 = vcmp.ge.f32.partialorder %v9193_v57, 0.0  ;;  %v5042_v17 = vmul.f32 0.01, %v9193_v57  ;;  %v2763_v20 = vmul.f32 0.01, %v13240_v42 }
 0x5aa   :  { %9045 = vst [vmem:[%s13209_s3 + $0xa0] sm:$0xff] %v9004_v15   ;;  %v5141_v28 = vmax.f32 %v2808_v24, %v5091_v38  ;;  %vm7325_vm3 = vcmp.ge.f32.partialorder %v9243_v44, 0.0  ;;  %v7375_v53 = vmul.f32 0.01, %v9243_v44  ;;  %v7424_v54 = vsel %vm7324_vm1, %v9242_v36, %v7374_v21 }
 0x5ab   :  { %v5092_v47 = vsel %vm4992_vm2, %v9193_v57, %v5042_v17 }
 0x5ac   :  { %v7474_v2 = vmax.f32 %v5141_v28, %v7424_v54  ;;  %v5142_v5 = vmax.f32 %v2809_v55, %v5092_v47  ;;  %v4926_v31 = vpop.f32.mrb[188].mxu1  ;;  %v7425_v29 = vsel %vm7325_vm3, %v9243_v44, %v7375_v53  ;;  %v2812_v44 = vsel %vm2712_vm10, %v13239_v61, %v2762_v18 }
 0x5ad   :  { %v9194_v58 = vadd.f32 %v13020_v14, %v4926_v31  ;;  %v7259_v19 = vpop.f32.mrb[188].mxu0  ;;  %v4928_v45 = vpop.f32.mrb[189].mxu1  ;;  %v2813_v28 = vsel %vm2713_vm11, %v13240_v42, %v2763_v20 }
 0x5ae   :  { %v7475_v63 = vmax.f32 %v5142_v5, %v7425_v29  ;;  %v9244_v1 = vadd.f32 %v13020_v14, %v7259_v19  ;;  %v7261_v52 = vpop.f32.mrb[189].mxu0  ;;  %v4929_v13 = vpop.f32.mrb[190].mxu1  ;;  %v13241_v5 = vld [vmem:[#allocation10_spill] sm:$0xff]  ;;  %v13242_v45 = vld [vmem:[#allocation11_spill] sm:$0xff] }
 0x5af   :  { %vm4993_vm6 = vcmp.ge.f32.partialorder %v9194_v58, 0.0  ;;  %v5043_v40 = vmul.f32 0.01, %v9194_v58  ;;  %v9195_v10 = vadd.f32 %v13020_v14, %v4929_v13  ;;  %v7262_v11 = vpop.f32.mrb[190].mxu0  ;;  %v4931_v35 = vpop.f32.mrb[191].mxu1  ;;  %vm2714_vm0 = vcmp.ge.f32.partialorder %v13241_v5, 0.0 }
 0x5b0   :  { %v9009_v30 = vpack.c.bf16 %v7475_v63, %v7474_v2  ;;  %vm7326_vm7 = vcmp.ge.f32.partialorder %v9244_v1, 0.0  ;;  %v7376_v49 = vmul.f32 0.01, %v9244_v1  ;;  %v9245_v43 = vadd.f32 %v13020_v14, %v7262_v11  ;;  %v7264_v4 = vpop.f32.mrb[191].mxu0 }
 0x5b1   :  { %v5093_v25 = vsel %vm4993_vm6, %v9194_v58, %v5043_v40  ;;  %vm4994_vm8 = vcmp.ge.f32.partialorder %v9195_v10, 0.0  ;;  %v5044_v34 = vmul.f32 0.01, %v9195_v10  ;;  %v2764_v31 = vmul.f32 0.01, %v13241_v5 }
 0x5b2   :  { %9046 = vst [vmem:[%s13209_s3 + $0xa8] sm:$0xff] %v9009_v30   ;;  %v5143_v3 = vmax.f32 %v2810_v41, %v5093_v25  ;;  %vm7327_vm9 = vcmp.ge.f32.partialorder %v9245_v43, 0.0  ;;  %v7377_v12 = vmul.f32 0.01, %v9245_v43  ;;  %v7426_v32 = vsel %vm7326_vm7, %v9244_v1, %v7376_v49 }
 0x5b3   :  { %v5094_v37 = vsel %vm4994_vm8, %v9195_v10, %v5044_v34  ;;  %v2765_v62 = vmul.f32 0.01, %v13242_v45  ;;  %vm2715_vm1 = vcmp.ge.f32.partialorder %v13242_v45, 0.0  ;;  %v2814_v4 = vsel %vm2714_vm0, %v13241_v5, %v2764_v31 }
 0x5b4   :  { %v7476_v7 = vmax.f32 %v5143_v3, %v7426_v32  ;;  %v5144_v0 = vmax.f32 %v2811_v56, %v5094_v37  ;;  %v4934_v50 = vpop.f32.mrb[192].mxu1  ;;  %v7427_v8 = vsel %vm7327_vm9, %v9245_v43, %v7377_v12 }
 0x5b5   :  { %v9196_v9 = vadd.f32 %v13020_v14, %v4934_v50  ;;  %v7267_v22 = vpop.f32.mrb[192].mxu0  ;;  %v4936_v39 = vpop.f32.mrb[193].mxu1  ;;  %v2815_v12 = vsel %vm2715_vm1, %v13242_v45, %v2765_v62 }
 0x5b6   :  { %v7477_v26 = vmax.f32 %v5144_v0, %v7427_v8  ;;  %v9246_v16 = vadd.f32 %v13020_v14, %v7267_v22  ;;  %v7269_v48 = vpop.f32.mrb[193].mxu0  ;;  %v4937_v36 = vpop.f32.mrb[194].mxu1 }
 0x5b7   :  { %vm4995_vm12 = vcmp.ge.f32.partialorder %v9196_v9, 0.0  ;;  %v5045_v33 = vmul.f32 0.01, %v9196_v9  ;;  %v9197_v46 = vadd.f32 %v13020_v14, %v4937_v36  ;;  %v7270_v51 = vpop.f32.mrb[194].mxu0  ;;  %v4939_v57 = vpop.f32.mrb[195].mxu1 }
 0x5b8   :  { %v9014_v27 = vpack.c.bf16 %v7477_v26, %v7476_v7  ;;  %vm7328_vm13 = vcmp.ge.f32.partialorder %v9246_v16, 0.0  ;;  %v7378_v23 = vmul.f32 0.01, %v9246_v16  ;;  %v9247_v15 = vadd.f32 %v13020_v14, %v7270_v51  ;;  %v7272_v21 = vpop.f32.mrb[195].mxu0 }
 0x5b9   :  { %v5095_v60 = vsel %vm4995_vm12, %v9196_v9, %v5045_v33  ;;  %vm4996_vm14 = vcmp.ge.f32.partialorder %v9197_v46, 0.0  ;;  %v5046_v24 = vmul.f32 0.01, %v9197_v46 }
 0x5ba   :  { %9047 = vst [vmem:[%s13209_s3 + $0xb0] sm:$0xff] %v9014_v27   ;;  %v5145_v38 = vmax.f32 %v2812_v44, %v5095_v60  ;;  %vm7329_vm15 = vcmp.ge.f32.partialorder %v9247_v15, 0.0  ;;  %v7379_v17 = vmul.f32 0.01, %v9247_v15  ;;  %v7428_v53 = vsel %vm7328_vm13, %v9246_v16, %v7378_v23 }
 0x5bb   :  { %v5096_v55 = vsel %vm4996_vm14, %v9197_v46, %v5046_v24 }
 0x5bc   :  { %v7478_v54 = vmax.f32 %v5145_v38, %v7428_v53  ;;  %v5146_v47 = vmax.f32 %v2813_v28, %v5096_v55  ;;  %v4942_v2 = vpop.f32.mrb[196].mxu1  ;;  %v7429_v6 = vsel %vm7329_vm15, %v9247_v15, %v7379_v17 }
 0x5bd   :  { %v9198_v29 = vadd.f32 %v13020_v14, %v4942_v2  ;;  %v7275_v58 = vpop.f32.mrb[196].mxu0  ;;  %v4944_v19 = vpop.f32.mrb[197].mxu1 }
 0x5be   :  { %v7479_v59 = vmax.f32 %v5146_v47, %v7429_v6  ;;  %v9248_v63 = vadd.f32 %v13020_v14, %v7275_v58  ;;  %v7277_v1 = vpop.f32.mrb[197].mxu0  ;;  %v4945_v52 = vpop.f32.mrb[198].mxu1 }
 0x5bf   :  { %vm4997_vm2 = vcmp.ge.f32.partialorder %v9198_v29, 0.0  ;;  %v5047_v13 = vmul.f32 0.01, %v9198_v29  ;;  %v9199_v40 = vadd.f32 %v13020_v14, %v4945_v52  ;;  %v7278_v10 = vpop.f32.mrb[198].mxu0  ;;  %v4947_v11 = vpop.f32.mrb[199].mxu1 }
 0x5c0   :  { %v9019_v35 = vpack.c.bf16 %v7479_v59, %v7478_v54  ;;  %vm7330_vm3 = vcmp.ge.f32.partialorder %v9248_v63, 0.0  ;;  %v7380_v30 = vmul.f32 0.01, %v9248_v63  ;;  %v9249_v49 = vadd.f32 %v13020_v14, %v7278_v10  ;;  %v7280_v43 = vpop.f32.mrb[199].mxu0 }
 0x5c1   :  { %v5097_v41 = vsel %vm4997_vm2, %v9198_v29, %v5047_v13  ;;  %vm4998_vm4 = vcmp.ge.f32.partialorder %v9199_v40, 0.0  ;;  %v5048_v25 = vmul.f32 0.01, %v9199_v40 }
 0x5c2   :  { %9048 = vst [vmem:[%s13209_s3 + $0xb8] sm:$0xff] %v9019_v35   ;;  %v5147_v34 = vmax.f32 %v2814_v4, %v5097_v41  ;;  %vm7331_vm5 = vcmp.ge.f32.partialorder %v9249_v49, 0.0  ;;  %v7381_v3 = vmul.f32 0.01, %v9249_v49  ;;  %v7430_v14 = vsel %vm7330_vm3, %v9248_v63, %v7380_v30 }
 0x5c3   :  { %v5098_v56 = vsel %vm4998_vm4, %v9199_v40, %v5048_v25 }
 0x5c4   :  { %v7480_v32 = vmax.f32 %v5147_v34, %v7430_v14  ;;  %v5148_v37 = vmax.f32 %v2815_v12, %v5098_v56  ;;  %v7431_v7 = vsel %vm7331_vm5, %v9249_v49, %v7381_v3 }
 0x5c6   :  { %v7481_v0 = vmax.f32 %v5148_v37, %v7431_v7 }
 0x5c8   :  { %v9024_v50 = vpack.c.bf16 %v7481_v0, %v7480_v32 }
 0x5ca   :  { %9049 = vst [vmem:[%s13209_s3 + $0xc0] sm:$0xff] %v9024_v50  }

// kernel: encoder_net_forward.7
= control target key start
LH: loop header
LB: loop body
LE: loop exit
PB: predicated region body
PF: predicated region fallthrough
CT: control target
= control target key end

     0   :  { %s1254_s1 = inlined_call_operand.vmem [shape: bf16[128,128], index: 1, kind: input, shape index: {}]   ;;  %s1255_s0 = inlined_call_operand.vmem [shape: bf16[3,96,128], index: 0, kind: input, shape index: {}]   ;;  %s1256_s2 = inlined_call_operand.vmem [shape: f32[1,128], index: 2, kind: input, shape index: {}]   ;;  %s1257_s3 = inlined_call_operand.vmem [shape: bf16[96,128], index: 3, kind: output, shape index: {}]  }
   0x1   :  { %v923_v0 = vld [vmem:[%s1254_s1] sm:$0xff]   ;;  %v924_v1 = vld [vmem:[%s1254_s1 + $0x8] sm:$0xff]   ;;  %v925_v2 = vld [vmem:[%s1254_s1 + $0x10] sm:$0xff]  }
   0x2   :  { %823 = vmatprep.subr.bf16.mxu0 %v923_v0  ;;  %851 = vmatprep.subr.bf16.mxu1 %v923_v0  ;;  %v981_v3 = vld [vmem:[%s1254_s1 + $0x18] sm:$0xff]   ;;  %v931_v4 = vld [vmem:[%s1255_s0] sm:$0xff]   ;;  %v932_v5 = vld [vmem:[%s1255_s0 + $0x30] sm:$0xff]  }
   0x3   :  { %824 = vmatpush3.bf16.msra.mxu0 %v923_v0  ;;  %852 = vmatpush3.bf16.msra.mxu1 %v923_v0  ;;  %v994_v6 = vld [vmem:[%s1254_s1 + $0x20] sm:$0xff]   ;;  %v1003_v7 = vld [vmem:[%s1254_s1 + $0x28] sm:$0xff]   ;;  %v929_v8 = vld [vmem:[%s1254_s1 + $0x30] sm:$0xff]  }
   0x4   :  { %825 = vmatprep.subr.bf16.mxu0 %v924_v1  ;;  %853 = vmatprep.subr.bf16.mxu1 %v924_v1  ;;  %v1017_v9 = vld [vmem:[%s1254_s1 + $0x38] sm:$0xff]   ;;  %v933_v10 = vld [vmem:[%s1255_s0 + $0x8] sm:$0xff]   ;;  %v935_v12 = vld [vmem:[%s1255_s0 + $0x10] sm:$0xff]  }
   0x5   :  { %839 = vmatprep.mubr.bf16.mxu0 %v931_v4  ;;  %867 = vmatprep.mubr.bf16.mxu1 %v932_v5  ;;  %v934_v11 = vld [vmem:[%s1255_s0 + $0x38] sm:$0xff]   ;;  %v936_v13 = vld [vmem:[%s1255_s0 + $0x40] sm:$0xff]   ;;  %v938_v15 = vld [vmem:[%s1255_s0 + $0x48] sm:$0xff]  }
   0x6   :  { %v937_v14 = vld [vmem:[%s1255_s0 + $0x18] sm:$0xff]   ;;  %v939_v16 = vld [vmem:[%s1255_s0 + $0x20] sm:$0xff]   ;;  %v940_v17 = vld [vmem:[%s1255_s0 + $0x50] sm:$0xff]  }
   0x7   :  { %826 = vmatpush3.bf16.msra.mxu0 %v924_v1  ;;  %854 = vmatpush3.bf16.msra.mxu1 %v924_v1  ;;  %v941_v18 = vld [vmem:[%s1255_s0 + $0x28] sm:$0xff]   ;;  %v942_v19 = vld [vmem:[%s1255_s0 + $0x58] sm:$0xff]   ;;  %v943_v20 = vld [vmem:[%s1255_s0 + $0x60] sm:$0xff]  }
   0x8   :  { %827 = vmatprep.subr.bf16.mxu0 %v925_v2  ;;  %855 = vmatprep.subr.bf16.mxu1 %v925_v2  ;;  %v944_v21 = vld [vmem:[%s1255_s0 + $0x70] sm:$0xff]   ;;  %v945_v22 = vld [vmem:[%s1255_s0 + $0x68] sm:$0xff]   ;;  %v946_v23 = vld [vmem:[%s1255_s0 + $0x78] sm:$0xff]  }
   0x9   :  { %v947_v24 = vld [vmem:[%s1255_s0 + $0x80] sm:$0xff]   ;;  %v948_v25 = vld [vmem:[%s1255_s0 + $0x88] sm:$0xff]  }
   0xa   :  { %v1090_v26 = vld [vmem:[%s1256_s2] ss:$0 sm:$0xff] }
   0xb   :  { %828 = vmatpush3.bf16.msra.mxu0 %v925_v2  ;;  %856 = vmatpush3.bf16.msra.mxu1 %v925_v2 }
   0xc   :  { %829 = vmatprep.subr.bf16.mxu0 %v981_v3  ;;  %857 = vmatprep.subr.bf16.mxu1 %v981_v3 }
   0xf   :  { %830 = vmatpush3.bf16.msra.mxu0 %v981_v3  ;;  %858 = vmatpush3.bf16.msra.mxu1 %v981_v3 }
  0x10   :  { %831 = vmatprep.subr.bf16.mxu0 %v994_v6  ;;  %859 = vmatprep.subr.bf16.mxu1 %v994_v6 }
  0x13   :  { %832 = vmatpush3.bf16.msra.mxu0 %v994_v6  ;;  %860 = vmatpush3.bf16.msra.mxu1 %v994_v6 }
  0x14   :  { %833 = vmatprep.subr.bf16.mxu0 %v1003_v7  ;;  %861 = vmatprep.subr.bf16.mxu1 %v1003_v7 }
  0x17   :  { %834 = vmatpush3.bf16.msra.mxu0 %v1003_v7  ;;  %862 = vmatpush3.bf16.msra.mxu1 %v1003_v7 }
  0x18   :  { %835 = vmatprep.subr.bf16.mxu0 %v929_v8  ;;  %863 = vmatprep.subr.bf16.mxu1 %v929_v8 }
  0x1b   :  { %836 = vmatpush3.bf16.msra.mxu0 %v929_v8  ;;  %864 = vmatpush3.bf16.msra.mxu1 %v929_v8 }
  0x1c   :  { %837 = vmatprep.subr.bf16.mxu0 %v1017_v9  ;;  %865 = vmatprep.subr.bf16.mxu1 %v1017_v9 }
  0x1f   :  { %838 = vmatpush3.bf16.msra.mxu0 %v1017_v9  ;;  %866 = vmatpush3.bf16.msra.mxu1 %v1017_v9 }
  0x20   :  { %879 = vmatprep.subr.bf16.mxu0 %v923_v0  ;;  %907 = vmatprep.subr.bf16.mxu1 %v923_v0 }
  0x22   :  { %840 = vmatmul.mubr.bf16.vlgmr.msra.gmra.mrb[0].mxu0 %v933_v10  ;;  %868 = vmatmul.mubr.bf16.vlgmr.msra.gmra.mrb[0].mxu1 %v934_v11 }
  0x23   :  { %880 = vmatpush3.bf16.msra.mxu0 %v923_v0  ;;  %915 = vmatpush3.bf16.msra.mxu1 %v923_v0 }
  0x24   :  { %881 = vmatprep.subr.bf16.mxu0 %v924_v1  ;;  %908 = vmatprep.subr.bf16.mxu1 %v924_v1 }
  0x25   :  { %843 = vmatprep.mubr.bf16.mxu0 %v935_v12  ;;  %871 = vmatprep.mubr.bf16.mxu1 %v936_v13 }
  0x27   :  { %882 = vmatpush3.bf16.msra.mxu0 %v924_v1  ;;  %916 = vmatpush3.bf16.msra.mxu1 %v924_v1 }
  0x28   :  { %883 = vmatprep.subr.bf16.mxu0 %v925_v2  ;;  %909 = vmatprep.subr.bf16.mxu1 %v925_v2 }
  0x2a   :  { %844 = vmatmul.mubr.bf16.gmra.mrb[4].mxu0 %v937_v14  ;;  %872 = vmatmul.mubr.bf16.gmra.mrb[4].mxu1 %v938_v15 }
  0x2b   :  { %884 = vmatpush3.bf16.msra.mxu0 %v925_v2  ;;  %917 = vmatpush3.bf16.msra.mxu1 %v925_v2 }
  0x2c   :  { %885 = vmatprep.subr.bf16.mxu0 %v981_v3  ;;  %910 = vmatprep.subr.bf16.mxu1 %v981_v3 }
  0x2d   :  { %847 = vmatprep.mubr.bf16.mxu0 %v939_v16  ;;  %875 = vmatprep.mubr.bf16.mxu1 %v940_v17 }
  0x2f   :  { %886 = vmatpush3.bf16.msra.mxu0 %v981_v3  ;;  %918 = vmatpush3.bf16.msra.mxu1 %v981_v3 }
  0x30   :  { %887 = vmatprep.subr.bf16.mxu0 %v994_v6  ;;  %911 = vmatprep.subr.bf16.mxu1 %v994_v6 }
  0x32   :  { %848 = vmatmul.mubr.bf16.gmra.mrb[8].mxu0 %v941_v18  ;;  %876 = vmatmul.mubr.bf16.gmra.mrb[8].mxu1 %v942_v19 }
  0x33   :  { %888 = vmatpush3.bf16.msra.mxu0 %v994_v6  ;;  %919 = vmatpush3.bf16.msra.mxu1 %v994_v6 }
  0x34   :  { %889 = vmatprep.subr.bf16.mxu0 %v1003_v7  ;;  %912 = vmatprep.subr.bf16.mxu1 %v1003_v7 }
  0x35   :  { %895 = vmatprep.mubr.bf16.mxu0 %v943_v20  ;;  %899 = vmatprep.mubr.bf16.mxu1 %v944_v21 }
  0x37   :  { %890 = vmatpush3.bf16.msra.mxu0 %v1003_v7  ;;  %920 = vmatpush3.bf16.msra.mxu1 %v1003_v7 }
  0x38   :  { %891 = vmatprep.subr.bf16.mxu0 %v929_v8  ;;  %913 = vmatprep.subr.bf16.mxu1 %v929_v8 }
  0x3b   :  { %892 = vmatpush3.bf16.msra.mxu0 %v929_v8  ;;  %921 = vmatpush3.bf16.msra.mxu1 %v929_v8 }
  0x3c   :  { %893 = vmatprep.subr.bf16.mxu0 %v1017_v9  ;;  %914 = vmatprep.subr.bf16.mxu1 %v1017_v9 }
  0x3f   :  { %894 = vmatpush3.bf16.msra.mxu0 %v1017_v9  ;;  %922 = vmatpush3.bf16.msra.mxu1 %v1017_v9 }
  0x42   :  { %896 = vmatmul.mubr.bf16.vlgmr.msra.gmra.mrb[12].mxu0 %v945_v22  ;;  %900 = vmatmul.mubr.bf16.vlgmr.msra.gmra.mrb[12].mxu1 %v946_v23 }
  0x43   :  { %903 = vmatprep.mubr.bf16.mxu1 %v947_v24 }
  0x4a   :  { %904 = vmatmul.mubr.bf16.gmra.mrb[16].mxu1 %v948_v25 }
  0xf5   :  { %v841_v27 = vpop.f32.mrb[0].mxu0  ;;  %v869_v28 = vpop.f32.mrb[0].mxu1 }
  0xf6   :  { %v177_v29 = vadd.f32 %v841_v27, %v1090_v26  ;;  %v343_v30 = vadd.f32 %v869_v28, %v1090_v26  ;;  %v168_v31 = vpop.f32.mrb[1].mxu0  ;;  %v334_v32 = vpop.f32.mrb[1].mxu1 }
  0xf7   :  { %v169_v33 = vadd.f32 %v1090_v26, %v168_v31  ;;  %v335_v34 = vadd.f32 %v1090_v26, %v334_v32  ;;  %v842_v35 = vpop.f32.mrb[2].mxu0  ;;  %v870_v36 = vpop.f32.mrb[2].mxu1 }
  0xf8   :  { %vm217_vm0 = vcmp.ge.f32.partialorder %v177_v29, 0.0  ;;  %v229_v37 = vmul.f32 0.01, %v177_v29  ;;  %vm383_vm1 = vcmp.ge.f32.partialorder %v343_v30, 0.0  ;;  %v395_v38 = vmul.f32 0.01, %v343_v30 }
  0xf9   :  { %vm215_vm2 = vcmp.ge.f32.partialorder %v169_v33, 0.0  ;;  %v227_v39 = vmul.f32 0.01, %v169_v33  ;;  %vm381_vm3 = vcmp.ge.f32.partialorder %v335_v34, 0.0  ;;  %v393_v40 = vmul.f32 0.01, %v335_v34 }
  0xfa   :  { %v1096_v41 = vsel %vm217_vm0, %v177_v29, %v229_v37  ;;  %v1098_v42 = vsel %vm383_vm1, %v343_v30, %v395_v38  ;;  %v180_v43 = vadd.f32 %v842_v35, %v1090_v26  ;;  %v346_v44 = vadd.f32 %v870_v36, %v1090_v26  ;;  %v171_v45 = vpop.f32.mrb[3].mxu0  ;;  %v337_v46 = vpop.f32.mrb[3].mxu1 }
  0xfb   :  { %v419_v47 = vmax.f32 %v1096_v41, %v1098_v42  ;;  %v1104_v48 = vsel %vm215_vm2, %v169_v33, %v227_v39  ;;  %v1106_v49 = vsel %vm381_vm3, %v335_v34, %v393_v40  ;;  %v172_v50 = vadd.f32 %v1090_v26, %v171_v45 }
  0xfc   :  { %v417_v51 = vmax.f32 %v1104_v48, %v1106_v49  ;;  %vm218_vm4 = vcmp.ge.f32.partialorder %v180_v43, 0.0  ;;  %v230_v52 = vmul.f32 0.01, %v180_v43  ;;  %vm384_vm5 = vcmp.ge.f32.partialorder %v346_v44, 0.0 }
  0xfd   :  { %v396_v53 = vmul.f32 0.01, %v346_v44  ;;  %vm216_vm6 = vcmp.ge.f32.partialorder %v172_v50, 0.0  ;;  %v228_v54 = vmul.f32 0.01, %v172_v50  ;;  %v338_v55 = vadd.f32 %v1090_v26, %v337_v46  ;;  %v845_v56 = vpop.f32.mrb[4].mxu0 }
  0xfe   :  { %v1112_v57 = vsel %vm218_vm4, %v180_v43, %v230_v52  ;;  %v193_v58 = vadd.f32 %v845_v56, %v1090_v26  ;;  %v873_v59 = vpop.f32.mrb[4].mxu1  ;;  %v184_v60 = vpop.f32.mrb[5].mxu0 }
  0xff   :  { %v1115_v61 = vsel %vm384_vm5, %v346_v44, %v396_v53  ;;  %v1117_v62 = vsel %vm216_vm6, %v172_v50, %v228_v54  ;;  %vm382_vm7 = vcmp.ge.f32.partialorder %v338_v55, 0.0  ;;  %v394_v63 = vmul.f32 0.01, %v338_v55  ;;  %v350_v0 = vpop.f32.mrb[5].mxu1  ;;  %v846_v1 = vpop.f32.mrb[6].mxu0 }
 0x100   :  { %v420_v2 = vmax.f32 %v1112_v57, %v1115_v61  ;;  %vm221_vm8 = vcmp.ge.f32.partialorder %v193_v58, 0.0  ;;  %v233_v3 = vmul.f32 0.01, %v193_v58  ;;  %v359_v4 = vadd.f32 %v873_v59, %v1090_v26  ;;  %v874_v5 = vpop.f32.mrb[6].mxu1  ;;  %v187_v6 = vpop.f32.mrb[7].mxu0 }
 0x101   :  { %v1122_v7 = vsel %vm382_vm7, %v338_v55, %v394_v63  ;;  %v185_v8 = vadd.f32 %v1090_v26, %v184_v60  ;;  %v351_v9 = vadd.f32 %v1090_v26, %v350_v0  ;;  %v196_v10 = vadd.f32 %v846_v1, %v1090_v26  ;;  %v353_v11 = vpop.f32.mrb[7].mxu1 }
 0x102   :  { %v418_v12 = vmax.f32 %v1117_v62, %v1122_v7  ;;  %v1129_v13 = vsel %vm221_vm8, %v193_v58, %v233_v3  ;;  %vm387_vm9 = vcmp.ge.f32.partialorder %v359_v4, 0.0  ;;  %v399_v14 = vmul.f32 0.01, %v359_v4 }
 0x103   :  { %vm219_vm10 = vcmp.ge.f32.partialorder %v185_v8, 0.0  ;;  %v231_v15 = vmul.f32 0.01, %v185_v8  ;;  %vm385_vm11 = vcmp.ge.f32.partialorder %v351_v9, 0.0  ;;  %v397_v16 = vmul.f32 0.01, %v351_v9 }
 0x104   :  { %v1131_v17 = vsel %vm387_vm9, %v359_v4, %v399_v14  ;;  %vm222_vm12 = vcmp.ge.f32.partialorder %v196_v10, 0.0  ;;  %v234_v18 = vmul.f32 0.01, %v196_v10  ;;  %v362_v19 = vadd.f32 %v874_v5, %v1090_v26 }
 0x105   :  { %v423_v20 = vmax.f32 %v1129_v13, %v1131_v17  ;;  %v1136_v21 = vsel %vm219_vm10, %v185_v8, %v231_v15  ;;  %v1138_v22 = vsel %vm385_vm11, %v351_v9, %v397_v16  ;;  %v188_v23 = vadd.f32 %v1090_v26, %v187_v6  ;;  %v849_v24 = vpop.f32.mrb[8].mxu0  ;;  %v877_v25 = vpop.f32.mrb[8].mxu1 }
 0x106   :  { %v421_v27 = vmax.f32 %v1136_v21, %v1138_v22  ;;  %v1143_v28 = vsel %vm222_vm12, %v196_v10, %v234_v18  ;;  %vm388_vm13 = vcmp.ge.f32.partialorder %v362_v19, 0.0  ;;  %v400_v29 = vmul.f32 0.01, %v362_v19  ;;  %v200_v30 = vpop.f32.mrb[9].mxu0  ;;  %v366_v31 = vpop.f32.mrb[9].mxu1 }
 0x107   :  { %vm220_vm14 = vcmp.ge.f32.partialorder %v188_v23, 0.0  ;;  %v232_v32 = vmul.f32 0.01, %v188_v23  ;;  %v354_v33 = vadd.f32 %v1090_v26, %v353_v11  ;;  %v209_v34 = vadd.f32 %v849_v24, %v1090_v26  ;;  %v850_v35 = vpop.f32.mrb[10].mxu0  ;;  %v878_v36 = vpop.f32.mrb[10].mxu1 }
 0x108   :  { %v1147_v37 = vsel %vm388_vm13, %v362_v19, %v400_v29  ;;  %v375_v38 = vadd.f32 %v877_v25, %v1090_v26  ;;  %v201_v39 = vadd.f32 %v1090_v26, %v200_v30  ;;  %v367_v40 = vadd.f32 %v1090_v26, %v366_v31  ;;  %v203_v43 = vpop.f32.mrb[11].mxu0  ;;  %v369_v44 = vpop.f32.mrb[11].mxu1 }
 0x109   :  { %v424_v45 = vmax.f32 %v1143_v28, %v1147_v37  ;;  %v1154_v46 = vsel %vm220_vm14, %v188_v23, %v232_v32  ;;  %vm386_vm15 = vcmp.ge.f32.partialorder %v354_v33, 0.0  ;;  %v398_v50 = vmul.f32 0.01, %v354_v33 }
 0x10a   :  { %vm225_vm0 = vcmp.ge.f32.partialorder %v209_v34, 0.0  ;;  %v237_v52 = vmul.f32 0.01, %v209_v34  ;;  %vm391_vm1 = vcmp.ge.f32.partialorder %v375_v38, 0.0  ;;  %v403_v53 = vmul.f32 0.01, %v375_v38 }
 0x10b   :  { %v1156_v54 = vsel %vm386_vm15, %v354_v33, %v398_v50  ;;  %vm223_vm2 = vcmp.ge.f32.partialorder %v201_v39, 0.0  ;;  %v235_v55 = vmul.f32 0.01, %v201_v39  ;;  %vm389_vm3 = vcmp.ge.f32.partialorder %v367_v40, 0.0 }
 0x10c   :  { %v422_v56 = vmax.f32 %v1154_v46, %v1156_v54  ;;  %v1160_v58 = vsel %vm225_vm0, %v209_v34, %v237_v52  ;;  %v1162_v59 = vsel %vm391_vm1, %v375_v38, %v403_v53  ;;  %v401_v60 = vmul.f32 0.01, %v367_v40 }
 0x10d   :  { %v427_v63 = vmax.f32 %v1160_v58, %v1162_v59  ;;  %v1166_v0 = vsel %vm223_vm2, %v201_v39, %v235_v55  ;;  %v212_v1 = vadd.f32 %v850_v35, %v1090_v26  ;;  %v378_v3 = vadd.f32 %v878_v36, %v1090_v26 }
 0x10e   :  { %v1170_v4 = vsel %vm389_vm3, %v367_v40, %v401_v60  ;;  %v204_v5 = vadd.f32 %v1090_v26, %v203_v43  ;;  %v370_v6 = vadd.f32 %v1090_v26, %v369_v44 }
 0x10f   :  { %v425_v8 = vmax.f32 %v1166_v0, %v1170_v4  ;;  %vm226_vm4 = vcmp.ge.f32.partialorder %v212_v1, 0.0  ;;  %v238_v9 = vmul.f32 0.01, %v212_v1  ;;  %vm392_vm5 = vcmp.ge.f32.partialorder %v378_v3, 0.0 }
 0x110   :  { %v404_v10 = vmul.f32 0.01, %v378_v3  ;;  %vm224_vm6 = vcmp.ge.f32.partialorder %v204_v5, 0.0  ;;  %v236_v11 = vmul.f32 0.01, %v204_v5  ;;  %vm390_vm7 = vcmp.ge.f32.partialorder %v370_v6, 0.0 }
 0x111   :  { %v1176_v14 = vsel %vm226_vm4, %v212_v1, %v238_v9  ;;  %v402_v15 = vmul.f32 0.01, %v370_v6 }
 0x112   :  { %v1178_v16 = vsel %vm392_vm5, %v378_v3, %v404_v10  ;;  %v1180_v18 = vsel %vm224_vm6, %v204_v5, %v236_v11 }
 0x113   :  { %v428_v19 = vmax.f32 %v1176_v14, %v1178_v16  ;;  %v1184_v23 = vsel %vm390_vm7, %v370_v6, %v402_v15 }
 0x114   :  { %v426_v24 = vmax.f32 %v1180_v18, %v1184_v23 }
 0x115   :  { %v897_v25 = vpop.f32.mrb[12].mxu0  ;;  %v901_v29 = vpop.f32.mrb[12].mxu1 }
 0x116   :  { %v521_v30 = vadd.f32 %v897_v25, %v1090_v26  ;;  %v537_v31 = vadd.f32 %v901_v29, %v1090_v26  ;;  %v512_v32 = vpop.f32.mrb[13].mxu0  ;;  %v528_v33 = vpop.f32.mrb[13].mxu1 }
 0x117   :  { %v513_v34 = vadd.f32 %v1090_v26, %v512_v32  ;;  %v529_v35 = vadd.f32 %v1090_v26, %v528_v33  ;;  %v898_v36 = vpop.f32.mrb[14].mxu0  ;;  %v902_v38 = vpop.f32.mrb[14].mxu1 }
 0x118   :  { %vm561_vm8 = vcmp.ge.f32.partialorder %v521_v30, 0.0  ;;  %v573_v39 = vmul.f32 0.01, %v521_v30  ;;  %vm565_vm9 = vcmp.ge.f32.partialorder %v537_v31, 0.0  ;;  %v577_v40 = vmul.f32 0.01, %v537_v31 }
 0x119   :  { %vm559_vm10 = vcmp.ge.f32.partialorder %v513_v34, 0.0  ;;  %v571_v43 = vmul.f32 0.01, %v513_v34  ;;  %vm563_vm11 = vcmp.ge.f32.partialorder %v529_v35, 0.0  ;;  %v575_v44 = vmul.f32 0.01, %v529_v35 }
 0x11a   :  { %v585_v50 = vsel %vm561_vm8, %v521_v30, %v573_v39  ;;  %v589_v52 = vsel %vm565_vm9, %v537_v31, %v577_v40  ;;  %v524_v53 = vadd.f32 %v898_v36, %v1090_v26  ;;  %v540_v55 = vadd.f32 %v902_v38, %v1090_v26  ;;  %v515_v60 = vpop.f32.mrb[15].mxu0  ;;  %v531_v1 = vpop.f32.mrb[15].mxu1 }
 0x11b   :  { %v597_v3 = vmax.f32 %v419_v47, %v585_v50  ;;  %v601_v5 = vmax.f32 %v423_v20, %v589_v52  ;;  %v583_v6 = vsel %vm559_vm10, %v513_v34, %v571_v43  ;;  %v587_v9 = vsel %vm563_vm11, %v529_v35, %v575_v44 }
 0x11c   :  { %v595_v10 = vmax.f32 %v417_v51, %v583_v6  ;;  %v599_v11 = vmax.f32 %v421_v27, %v587_v9  ;;  %vm562_vm12 = vcmp.ge.f32.partialorder %v524_v53, 0.0  ;;  %v574_v15 = vmul.f32 0.01, %v524_v53 }
 0x11d   :  { %vm566_vm13 = vcmp.ge.f32.partialorder %v540_v55, 0.0  ;;  %v578_v25 = vmul.f32 0.01, %v540_v55  ;;  %v516_v41 = vadd.f32 %v1090_v26, %v515_v60  ;;  %v532_v42 = vadd.f32 %v1090_v26, %v531_v1  ;;  %v905_v47 = vpop.f32.mrb[16].mxu1 }
 0x11e   :  { %v586_v13 = vsel %vm562_vm12, %v524_v53, %v574_v15  ;;  %v553_v17 = vadd.f32 %v905_v47, %v1090_v26  ;;  %v544_v20 = vpop.f32.mrb[17].mxu1 }
 0x11f   :  { %v598_v48 = vmax.f32 %v420_v2, %v586_v13  ;;  %v590_v49 = vsel %vm566_vm13, %v540_v55, %v578_v25  ;;  %vm560_vm14 = vcmp.ge.f32.partialorder %v516_v41, 0.0  ;;  %v572_v51 = vmul.f32 0.01, %v516_v41  ;;  %v906_v21 = vpop.f32.mrb[18].mxu1 }
 0x120   :  { %v602_v22 = vmax.f32 %v424_v45, %v590_v49  ;;  %vm564_vm15 = vcmp.ge.f32.partialorder %v532_v42, 0.0  ;;  %v576_v27 = vmul.f32 0.01, %v532_v42  ;;  %vm569_vm0 = vcmp.ge.f32.partialorder %v553_v17, 0.0  ;;  %v547_v29 = vpop.f32.mrb[19].mxu1 }
 0x121   :  { %v754_v30 = vpack.c.bf16 %v598_v48, %v597_v3  ;;  %v584_v31 = vsel %vm560_vm14, %v516_v41, %v572_v51  ;;  %v581_v32 = vmul.f32 0.01, %v553_v17  ;;  %v545_v33 = vadd.f32 %v1090_v26, %v544_v20 }
 0x122   :  { %v764_v34 = vpack.c.bf16 %v602_v22, %v601_v5  ;;  %v596_v57 = vmax.f32 %v418_v12, %v584_v31  ;;  %v588_v61 = vsel %vm564_vm15, %v532_v42, %v576_v27  ;;  %v556_v2 = vadd.f32 %v906_v21, %v1090_v26 }
 0x123   :  { %776 = vst [vmem:[%s1257_s3 + $0x8] sm:$0xff] %v754_v30   ;;  %v600_v28 = vmax.f32 %v422_v56, %v588_v61  ;;  %v593_v37 = vsel %vm569_vm0, %v553_v17, %v581_v32  ;;  %vm567_vm1 = vcmp.ge.f32.partialorder %v545_v33, 0.0  ;;  %v579_v45 = vmul.f32 0.01, %v545_v33 }
 0x124   :  { %778 = vst [vmem:[%s1257_s3 + $0x18] sm:$0xff] %v764_v34   ;;  %v749_v62 = vpack.c.bf16 %v596_v57, %v595_v10  ;;  %v605_v7 = vmax.f32 %v427_v63, %v593_v37  ;;  %vm570_vm2 = vcmp.ge.f32.partialorder %v556_v2, 0.0  ;;  %v582_v12 = vmul.f32 0.01, %v556_v2 }
 0x125   :  { %v759_v35 = vpack.c.bf16 %v600_v28, %v599_v11  ;;  %v591_v36 = vsel %vm567_vm1, %v545_v33, %v579_v45  ;;  %v548_v38 = vadd.f32 %v1090_v26, %v547_v29 }
 0x126   :  { %750 = vst [vmem:[%s1257_s3] sm:$0xff] %v749_v62   ;;  %v603_v46 = vmax.f32 %v425_v8, %v591_v36  ;;  %v594_v54 = vsel %vm570_vm2, %v556_v2, %v582_v12 }
 0x127   :  { %777 = vst [vmem:[%s1257_s3 + $0x10] sm:$0xff] %v759_v35   ;;  %v606_v56 = vmax.f32 %v428_v19, %v594_v54  ;;  %vm568_vm3 = vcmp.ge.f32.partialorder %v548_v38, 0.0  ;;  %v580_v58 = vmul.f32 0.01, %v548_v38 }
 0x129   :  { %v774_v26 = vpack.c.bf16 %v606_v56, %v605_v7  ;;  %v592_v59 = vsel %vm568_vm3, %v548_v38, %v580_v58 }
 0x12a   :  { %v604_v63 = vmax.f32 %v426_v24, %v592_v59 }
 0x12b   :  { %780 = vst [vmem:[%s1257_s3 + $0x28] sm:$0xff] %v774_v26  }
 0x12c   :  { %v769_v0 = vpack.c.bf16 %v604_v63, %v603_v46 }
 0x12e   :  { %779 = vst [vmem:[%s1257_s3 + $0x20] sm:$0xff] %v769_v0  }

// kernel: encoder_net_forward.9
= control target key start
LH: loop header
LB: loop body
LE: loop exit
PB: predicated region body
PF: predicated region fallthrough
CT: control target
= control target key end

     0   :  { %s70_s0 = inlined_call_operand.vmem [shape: f32[24,128], index: 0, kind: input, shape index: {}]   ;;  %s71_s1 = inlined_call_operand.vmem [shape: f32[24,128], index: 1, kind: output, shape index: {}]  }
   0x1   :  { %v8_v0 = vld [vmem:[%s70_s0] sm:$0xff]  ;;  %v10_v1 = vld [vmem:[%s70_s0 + $0x10] sm:$0xff]  ;;  %v9_v2 = vld [vmem:[%s70_s0 + $0x8] sm:$0xff] }
   0x2   :  { %11 = vadd.xlane.f32.xlu0 %v8_v0  ;;  %15 = vadd.xlane.f32.xlu1 %v10_v1 }
   0x6   :  { %13 = vadd.xlane.f32.xlu0 %v9_v2 }
  0x8f   :  { %v12_v3 = vpop.xlane.xlu0 %11  ;;  %v16_v4 = vpop.xlane.xlu1 %15 }
  0x90   :  { %vm17_vm0 = vcmp.eq.f32.partialorder %v12_v3, 0.0  ;;  %vm19_vm1 = vcmp.eq.f32.partialorder %v16_v4, 0.0 }
  0x91   :  { %v20_v5 = vsel %vm17_vm0, 1.0, %v12_v3  ;;  %v22_v6 = vsel %vm19_vm1, 1.0, %v16_v4 }
  0x92   :  { %36 = vrcp.f32 %v20_v5 }
  0x93   :  { %38 = vrcp.f32 %v22_v6  ;;  %v14_v7 = vpop.xlane.xlu0 %13 }
  0x94   :  { %vm18_vm2 = vcmp.eq.f32.partialorder %v14_v7, 0.0 }
  0x95   :  { %v21_v8 = vsel %vm18_vm2, 1.0, %v14_v7 }
  0x96   :  { %40 = vrcp.f32 %v21_v8 }
  0x9c   :  { %v37_v9 = vpop.eup %36 }
  0x9d   :  { %v39_v10 = vpop.eup %38  ;;  %v24_v11 = vmul.f32 %v37_v9, %v8_v0 }
  0x9e   :  { %v28_v12 = vmul.f32 %v39_v10, %v10_v1 }
  0x9f   :  { %29 = vst [vmem:[%s71_s1] sm:$0xff] %v24_v11 }
  0xa0   :  { %v41_v13 = vpop.eup %40  ;;  %31 = vst [vmem:[%s71_s1 + $0x10] sm:$0xff] %v28_v12 }
  0xa1   :  { %v26_v14 = vmul.f32 %v41_v13, %v9_v2 }
  0xa3   :  { %30 = vst [vmem:[%s71_s1 + $0x8] sm:$0xff] %v26_v14 }

// kernel: encoder_net_forward.8
= control target key start
LH: loop header
LB: loop body
LE: loop exit
PB: predicated region body
PF: predicated region fallthrough
CT: control target
= control target key end

     0   :  { %s287_s1 = inlined_call_operand.vmem [shape: bf16[128,128], index: 1, kind: input, shape index: {}]   ;;  %s288_s0 = inlined_call_operand.vmem [shape: bf16[32,128], index: 0, kind: input, shape index: {}]   ;;  %s289_s2 = inlined_call_operand.vmem [shape: f32[1,128], index: 2, kind: input, shape index: {}]   ;;  %s290_s3 = inlined_call_operand.vmem [shape: f32[32,128], index: 3, kind: output, shape index: {}]  }
   0x1   :  { %v212_v0 = vld [vmem:[%s287_s1] sm:$0xff]   ;;  %v213_v1 = vld [vmem:[%s287_s1 + $0x8] sm:$0xff]   ;;  %v214_v2 = vld [vmem:[%s287_s1 + $0x10] sm:$0xff]  }
   0x2   :  { %192 = vmatprep.subr.bf16.mxu0 %v212_v0  ;;  %v215_v3 = vld [vmem:[%s287_s1 + $0x18] sm:$0xff]   ;;  %v220_v4 = vld [vmem:[%s288_s0] sm:$0xff]   ;;  %v217_v6 = vld [vmem:[%s287_s1 + $0x28] sm:$0xff]  }
   0x3   :  { %193 = vmatpush3.bf16.msra.mxu0 %v212_v0  ;;  %208 = vmatprep.mubr.bf16.mxu0 %v220_v4  ;;  %v216_v5 = vld [vmem:[%s287_s1 + $0x20] sm:$0xff]   ;;  %v218_v7 = vld [vmem:[%s287_s1 + $0x30] sm:$0xff]   ;;  %v219_v8 = vld [vmem:[%s287_s1 + $0x38] sm:$0xff]  }
   0x4   :  { %194 = vmatprep.subr.bf16.mxu0 %v213_v1  ;;  %v221_v9 = vld [vmem:[%s288_s0 + $0x8] sm:$0xff]   ;;  %v171_v10 = vld [vmem:[%s289_s2] ss:$0 sm:$0xff] }
   0x7   :  { %195 = vmatpush3.bf16.msra.mxu0 %v213_v1 }
   0x8   :  { %196 = vmatprep.subr.bf16.mxu0 %v214_v2 }
   0xb   :  { %197 = vmatpush3.bf16.msra.mxu0 %v214_v2 }
   0xc   :  { %198 = vmatprep.subr.bf16.mxu0 %v215_v3 }
   0xf   :  { %199 = vmatpush3.bf16.msra.mxu0 %v215_v3 }
  0x10   :  { %200 = vmatprep.subr.bf16.mxu0 %v216_v5 }
  0x13   :  { %201 = vmatpush3.bf16.msra.mxu0 %v216_v5 }
  0x14   :  { %202 = vmatprep.subr.bf16.mxu0 %v217_v6 }
  0x17   :  { %203 = vmatpush3.bf16.msra.mxu0 %v217_v6 }
  0x18   :  { %204 = vmatprep.subr.bf16.mxu0 %v218_v7 }
  0x1b   :  { %205 = vmatpush3.bf16.msra.mxu0 %v218_v7 }
  0x1c   :  { %206 = vmatprep.subr.bf16.mxu0 %v219_v8 }
  0x1f   :  { %207 = vmatpush3.bf16.msra.mxu0 %v219_v8 }
  0x22   :  { %209 = vmatmul.mubr.bf16.vlgmr.msra.gmra.mrb[0].mxu0 %v221_v9 }
  0xf5   :  { %v210_v11 = vpop.f32.mrb[0].mxu0 }
  0xf6   :  { %v145_v12 = vadd.f32 %v210_v11, %v171_v10  ;;  %v136_v13 = vpop.f32.mrb[1].mxu0 }
  0xf7   :  { %v137_v14 = vadd.f32 %v171_v10, %v136_v13  ;;  %v211_v15 = vpop.f32.mrb[2].mxu0 }
  0xf8   :  { %vm153_vm0 = vcmp.ge.f32.partialorder %v145_v12, 0.0  ;;  %v157_v16 = vmul.f32 0.01, %v145_v12  ;;  %v148_v17 = vadd.f32 %v211_v15, %v171_v10  ;;  %v139_v18 = vpop.f32.mrb[3].mxu0 }
  0xf9   :  { %vm151_vm1 = vcmp.ge.f32.partialorder %v137_v14, 0.0  ;;  %v155_v19 = vmul.f32 0.01, %v137_v14  ;;  %v140_v20 = vadd.f32 %v171_v10, %v139_v18 }
  0xfa   :  { %v161_v21 = vsel %vm153_vm0, %v145_v12, %v157_v16  ;;  %vm154_vm2 = vcmp.ge.f32.partialorder %v148_v17, 0.0  ;;  %v158_v22 = vmul.f32 0.01, %v148_v17 }
  0xfb   :  { %165 = vst [vmem:[%s290_s3 + $0x10] sm:$0xff] %v161_v21  ;;  %v159_v23 = vsel %vm151_vm1, %v137_v14, %v155_v19  ;;  %vm152_vm3 = vcmp.ge.f32.partialorder %v140_v20, 0.0  ;;  %v156_v24 = vmul.f32 0.01, %v140_v20 }
  0xfc   :  { %163 = vst [vmem:[%s290_s3] sm:$0xff] %v159_v23  ;;  %v162_v25 = vsel %vm154_vm2, %v148_v17, %v158_v22 }
  0xfd   :  { %166 = vst [vmem:[%s290_s3 + $0x18] sm:$0xff] %v162_v25  ;;  %v160_v26 = vsel %vm152_vm3, %v140_v20, %v156_v24 }
  0xfe   :  { %164 = vst [vmem:[%s290_s3 + $0x8] sm:$0xff] %v160_v26 }

</bundles_post_ra>
